<compile_context>
chip_gen: v7x
topology: tpu7x:2x2x1
jax: 0.10.0
libtpu: 0.0.40
codegen_flags: <defaults>
</compile_context>

<pallas_src>
import functools

import jax
import jax.numpy as jnp
from jax.experimental import pallas as pl
from jax.experimental.pallas import tpu as pltpu

HIDDEN = 5000
HIDDEN_PAD = 5120            # next multiple of 256 -> clean K/N tiling
OC = 80                      # conv out-channels (real)
OC_PAD = 128                 # padded to one full lane tile
CONV1_K = 2 * 57 * 6         # 684
CONV1_K_PAD = 768            # padded to a multiple of 128
CONV2_K = OC * 1 * 3         # 240 real rows
CONV2_K_PAD = OC_PAD * 3     # 384 (input channels padded upstream)
FC1_K = OC * 3               # 240 real flatten features
FC1_K_PAD = OC_PAD * 3       # 384 (flatten of channel-padded pool2 output)
NUM_CLASSES = 10
NUM_CLASSES_PAD = 128

_VMEM_LIMIT = 32 * 1024 * 1024


# --------------------------------------------------------------------------
# Pallas kernels
# --------------------------------------------------------------------------
def _matmul_bias_kernel(x_ref, w_ref, b_ref, o_ref, *, relu):
    """Grid (n, k): accumulate x @ w into the resident f32 output block over
    the K axis; bias (+ReLU) epilogue on the last K step."""
    k = pl.program_id(1)

    @pl.when(k == 0)
    def _():
        o_ref[...] = jnp.zeros_like(o_ref)

    o_ref[...] += jnp.dot(x_ref[...].astype(w_ref.dtype), w_ref[...],
                          preferred_element_type=jnp.float32)

    @pl.when(k == pl.num_programs(1) - 1)
    def _():
        y = o_ref[...] + b_ref[...]
        if relu:
            y = jnp.maximum(y, 0.0)
        o_ref[...] = y


def pallas_linear(x, w, b, *, relu, tn=None, tk=None):
    """y = x @ w + b (optionally ReLU).  x:(M,K) f32, w:(K,N) f32/bf16, b:(N,) f32.

    Grid = (N//tn, K//tk); N axis is "parallel" (megacore), K axis is the
    reduction ("arbitrary", last).  Output block stays VMEM-resident over K.
    """
    M, K = x.shape
    K2, N = w.shape
    assert K == K2 and b.shape == (N,)
    if tn is None:
        tn = N
    if tk is None:
        tk = K
    assert N % tn == 0 and K % tk == 0
    grid = (N // tn, K // tk)
    kernel = functools.partial(_matmul_bias_kernel, relu=relu)
    return pl.pallas_call(
        kernel,
        out_shape=jax.ShapeDtypeStruct((M, N), jnp.float32),
        grid_spec=pltpu.PrefetchScalarGridSpec(
            num_scalar_prefetch=0,
            grid=grid,
            in_specs=[
                pl.BlockSpec((M, tk), lambda n, k: (0, k)),
                pl.BlockSpec((tk, tn), lambda n, k: (k, n)),
                pl.BlockSpec((1, tn), lambda n, k: (0, n)),
            ],
            out_specs=pl.BlockSpec((M, tn), lambda n, k: (0, n)),
        ),
        compiler_params=pltpu.CompilerParams(
            dimension_semantics=("parallel", "arbitrary"),
            vmem_limit_bytes=_VMEM_LIMIT),
    )(x, w, b.reshape(1, N))


def _window_max_kernel(x_ref, o_ref):
    """Elementwise max over the (small, static) leading window axis."""
    acc = x_ref[0]
    for i in range(1, x_ref.shape[0]):
        acc = jnp.maximum(acc, x_ref[i])
    o_ref[...] = acc


def pallas_window_max(xw):
    """xw: (W, R, C) -> (R, C), max over axis 0.  C is lane-dense (128)."""
    W, R, C = xw.shape
    return pl.pallas_call(
        _window_max_kernel,
        out_shape=jax.ShapeDtypeStruct((R, C), xw.dtype),
        grid=(1,),
        in_specs=[pl.BlockSpec((W, R, C), lambda i: (0, 0, 0))],
        out_specs=pl.BlockSpec((R, C), lambda i: (0, 0)),
    )(xw)


# --------------------------------------------------------------------------
# Glue: patches / conv / pool wrappers (layout only; compute is in Pallas)
# --------------------------------------------------------------------------
def im2col(x, kh, kw):
    """NCHW -> (B*oh*ow, C*kh*kw); feature order (c, i, j) like torch."""
    B, C, H, W = x.shape
    oh, ow = H - kh + 1, W - kw + 1
    patches = jax.lax.conv_general_dilated_patches(
        x, filter_shape=(kh, kw), window_strides=(1, 1), padding="VALID")
    # patches: (B, C*kh*kw, oh, ow), channel index = c*kh*kw + i*kw + j
    p = jnp.transpose(patches, (0, 2, 3, 1))          # (B, oh, ow, C*kh*kw)
    return p.reshape(B * oh * ow, C * kh * kw), oh, ow


def conv2d_padded(x, wmat, b, kh, kw, k_pad):
    """Conv as patches + Pallas matmul.  wmat:(k_pad, OC_PAD) pre-prepared.
    Returns NCHW with OC_PAD channels (channels >= 80 are exactly zero)."""
    B = x.shape[0]
    cols, oh, ow = im2col(x, kh, kw)                  # (B*oh*ow, K_real)
    if cols.shape[1] != k_pad:
        cols = jnp.pad(cols, ((0, 0), (0, k_pad - cols.shape[1])))
    y = pallas_linear(cols, wmat, b, relu=True)       # (B*oh*ow, OC_PAD)
    y = y.reshape(B, oh, ow, OC_PAD)
    return jnp.transpose(y, (0, 3, 1, 2))             # NCHW


def maxpool2d(x, kernel, stride):
    """NCHW max-pool; window extraction is glue, the max runs in Pallas."""
    B, C, H, W = x.shape
    kh, kw = kernel
    sh, sw = stride
    oh = (H - kh) // sh + 1
    ow = (W - kw) // sw + 1
    wins = [x[:, :, i:i + sh * oh:sh, j:j + sw * ow:sw]
            for i in range(kh) for j in range(kw)]
    xw = jnp.stack(wins, axis=0).reshape(kh * kw, -1)  # (W, B*C*oh*ow)
    total = B * C * oh * ow
    if total % 128 == 0:
        xw = xw.reshape(kh * kw, total // 128, 128)    # lane-dense
    else:
        xw = xw.reshape(kh * kw, 1, total)
    y = pallas_window_max(xw)
    return y.reshape(B, C, oh, ow)


# --------------------------------------------------------------------------
# Parameters: PyTorch-layout init, then one-time kernel-layout preparation
# --------------------------------------------------------------------------
def init_params(key):
    ks = jax.random.split(key, 10)

    def u(k, shape, fan_in):
        bound = 1.0 / float(fan_in) ** 0.5
        return jax.random.uniform(k, shape, jnp.float32, -bound, bound)

    return {
        "conv1_w": u(ks[0], (80, 2, 57, 6), 2 * 57 * 6),
        "conv1_b": u(ks[1], (80,), 2 * 57 * 6),
        "conv2_w": u(ks[2], (80, 80, 1, 3), 80 * 1 * 3),
        "conv2_b": u(ks[3], (80,), 80 * 1 * 3),
        "fc1_w": u(ks[4], (5000, 240), 240),   # PyTorch Linear stores (out, in)
        "fc1_b": u(ks[5], (5000,), 240),
        "fc2_w": u(ks[6], (5000, 5000), 5000),
        "fc2_b": u(ks[7], (5000,), 5000),
        "fc3_w": u(ks[8], (10, 5000), 5000),
        "fc3_b": u(ks[9], (10,), 5000),
    }


def prepare_params(p):
    """One-time: transpose / zero-pad / cast weights into kernel layout so the
    jitted forward streams them straight from HBM with no per-call reshuffle."""
    ocp = OC_PAD - OC
    hp = HIDDEN_PAD - HIDDEN

    w1 = p["conv1_w"].reshape(OC, CONV1_K).T                        # (684, 80)
    w1 = jnp.pad(w1, ((0, CONV1_K_PAD - CONV1_K), (0, ocp)))        # (768, 128)
    b1 = jnp.pad(p["conv1_b"], (0, ocp))

    w2 = p["conv2_w"].reshape(OC, CONV2_K).T                        # (240, 80)
    w2 = jnp.pad(w2, ((0, CONV2_K_PAD - CONV2_K), (0, ocp)))        # (384, 128)
    b2 = jnp.pad(p["conv2_b"], (0, ocp))

    f1 = jnp.pad(p["fc1_w"].T, ((0, FC1_K_PAD - FC1_K), (0, hp)))   # (384, 5120)
    f1 = f1.astype(jnp.bfloat16)
    fb1 = jnp.pad(p["fc1_b"], (0, hp))

    f2 = jnp.pad(p["fc2_w"].T, ((0, hp), (0, hp)))                  # (5120, 5120)
    f2 = f2.astype(jnp.bfloat16)
    fb2 = jnp.pad(p["fc2_b"], (0, hp))

    f3 = jnp.pad(p["fc3_w"].T, ((0, hp), (0, NUM_CLASSES_PAD - NUM_CLASSES)))
    fb3 = jnp.pad(p["fc3_b"], (0, NUM_CLASSES_PAD - NUM_CLASSES))   # (5120,128)

    return {
        "conv1_w": w1, "conv1_b": b1,
        "conv2_w": w2, "conv2_b": b2,
        "fc1_w": f1, "fc1_b": fb1,
        "fc2_w": f2, "fc2_b": fb2,
        "fc3_w": f3, "fc3_b": fb3,
    }


# --------------------------------------------------------------------------
# Forward pass (mirrors PiczakCNN.forward, inference mode)
# --------------------------------------------------------------------------
def piczak_forward(params, x):
    # x: (B, 2, 60, 41)
    B = x.shape[0]

    # conv1 + ReLU -> (B, 128, 4, 36)   [channels 80..127 are zeros]
    x = conv2d_padded(x, params["conv1_w"], params["conv1_b"], 57, 6, CONV1_K_PAD)
    # pool1 (4,3)/(1,3) -> (B, 128, 1, 12)
    x = maxpool2d(x, (4, 3), (1, 3))
    # conv2 + ReLU -> (B, 128, 1, 10)  (zero input channels hit zero weight rows)
    x = conv2d_padded(x, params["conv2_w"], params["conv2_b"], 1, 3, CONV2_K_PAD)
    # pool2 (1,3)/(1,3) -> (B, 128, 1, 3)
    x = maxpool2d(x, (1, 3), (1, 3))

    # flatten: first 240 features match torch .view order on the 80 real chans
    x = x.reshape(B, -1)                                             # (B, 384)

    # fc1 + ReLU (bf16 weight stream, f32 accumulate)
    x = pallas_linear(x, params["fc1_w"], params["fc1_b"], relu=True, tn=2560)
    # TODO(synk): nn.Dropout(0.5) treated as inference-mode identity (no RNG mask).

    # fc2 + ReLU: bf16 weights, K tiled at 512, N split in two "parallel" tiles
    x = pallas_linear(x, params["fc2_w"], params["fc2_b"], relu=True,
                      tn=2560, tk=512)
    # dropout: identity at inference

    # fc3 logits (N padded 10 -> 128 for lane-dense stores, slice back)
    x = pallas_linear(x, params["fc3_w"], params["fc3_b"], relu=False,
                      tn=NUM_CLASSES_PAD, tk=512)
    return x[:, :NUM_CLASSES]


if __name__ == "__main__":
    key = jax.random.PRNGKey(0)
    pkey, xkey = jax.random.split(key)
    params = prepare_params(init_params(pkey))   # one-time weight preparation

    # Piczak ESC input: batch=2, 2 channels (log-mel + delta), 60 bands, 41 frames.
    x = jax.random.normal(xkey, (2, 2, 60, 41), jnp.float32)

    fwd = jax.jit(piczak_forward)
    out = jax.block_until_ready(fwd(params, x))

    assert out.shape == (2, 10), out.shape
    assert bool(jnp.all(jnp.isfinite(out)))
    print("KERNEL_OK")
</pallas_src>

<mosaic_0001>
module attributes {stable_mosaic.version = 11 : i64} {
  func.func @_matmul_bias_kernel(%arg0: i32, %arg1: i32, %arg2: memref<288x768xf32, #tpu.memory_space<vmem>>, %arg3: memref<768x128xf32, #tpu.memory_space<vmem>>, %arg4: memref<1x128xf32, #tpu.memory_space<vmem>>, %arg5: memref<288x128xf32, #tpu.memory_space<vmem>>) attributes {dimension_semantics = [#tpu.dimension_semantics<parallel>, #tpu.dimension_semantics<arbitrary>], iteration_bounds = array<i64: 1, 1>, scalar_prefetch = 0 : i64, scratch_operands = 0 : i64, tpu.core_type = #tpu.core_type<tc>, window_params = [{transform_indices = @transform_0, window_bounds = array<i64: 288, 768>}, {transform_indices = @transform_1, window_bounds = array<i64: 768, 128>}, {transform_indices = @transform_2, window_bounds = array<i64: 1, 128>}, {transform_indices = @transform_3, window_bounds = array<i64: 288, 128>}]} {
    %c0_i32 = arith.constant 0 : i32
    %0 = arith.cmpi eq, %arg1, %c0_i32 : i32
    %1 = arith.extui %0 : i1 to i32
    %c0_i32_0 = arith.constant 0 : i32
    %2 = arith.cmpi ne, %1, %c0_i32_0 : i32
    scf.if %2 {
      %cst_10 = arith.constant 0.000000e+00 : f32
      %12 = vector.broadcast %cst_10 : f32 to vector<288x128xf32>
      %c0_11 = arith.constant 0 : index
      %c0_12 = arith.constant 0 : index
      %13 = vector.load %arg5[%c0_11, %c0_12] : memref<288x128xf32, #tpu.memory_space<vmem>>, vector<288x128xf32>
      tpu.vector_store %arg5[%c0_11, %c0_12], %12 {strides = array<i32>} : memref<288x128xf32, #tpu.memory_space<vmem>>, vector<288x128xf32>,
    } else {
    }
    %c0 = arith.constant 0 : index
    %c0_1 = arith.constant 0 : index
    %3 = vector.load %arg5[%c0, %c0_1] : memref<288x128xf32, #tpu.memory_space<vmem>>, vector<288x128xf32>
    %c0_2 = arith.constant 0 : index
    %c0_3 = arith.constant 0 : index
    %4 = vector.load %arg2[%c0_2, %c0_3] : memref<288x768xf32, #tpu.memory_space<vmem>>, vector<288x768xf32>
    %c0_4 = arith.constant 0 : index
    %c0_5 = arith.constant 0 : index
    %5 = vector.load %arg3[%c0_4, %c0_5] : memref<768x128xf32, #tpu.memory_space<vmem>>, vector<768x128xf32>
    %cst = arith.constant dense<0.000000e+00> : vector<288x128xf32>
    %6 = tpu.matmul %4, %5, %cst {dimension_numbers = #tpu.dot_dimension_numbers<[1], [0], [0], [1], [0, 0, 1, 1], [], []>} : vector<288x768xf32>, vector<768x128xf32>, vector<288x128xf32> -> vector<288x128xf32>
    %7 = arith.addf %3, %6 : vector<288x128xf32>
    %c0_6 = arith.constant 0 : index
    %c0_7 = arith.constant 0 : index
    %8 = vector.load %arg5[%c0_6, %c0_7] : memref<288x128xf32, #tpu.memory_space<vmem>>, vector<288x128xf32>
    tpu.vector_store %arg5[%c0_6, %c0_7], %7 {strides = array<i32>} : memref<288x128xf32, #tpu.memory_space<vmem>>, vector<288x128xf32>,
    %c0_i32_8 = arith.constant 0 : i32
    %9 = arith.cmpi eq, %arg1, %c0_i32_8 : i32
    %10 = arith.extui %9 : i1 to i32
    %c0_i32_9 = arith.constant 0 : i32
    %11 = arith.cmpi ne, %10, %c0_i32_9 : i32
    scf.if %11 {
      %c0_10 = arith.constant 0 : index
      %c0_11 = arith.constant 0 : index
      %12 = vector.load %arg5[%c0_10, %c0_11] : memref<288x128xf32, #tpu.memory_space<vmem>>, vector<288x128xf32>
      %c0_12 = arith.constant 0 : index
      %c0_13 = arith.constant 0 : index
      %13 = vector.load %arg4[%c0_12, %c0_13] : memref<1x128xf32, #tpu.memory_space<vmem>>, vector<1x128xf32>
      %14 = vector.broadcast %13 : vector<1x128xf32> to vector<288x128xf32>
      %15 = arith.addf %12, %14 : vector<288x128xf32>
      %cst_14 = arith.constant 0.000000e+00 : f32
      %16 = vector.broadcast %cst_14 : f32 to vector<288x128xf32>
      %17 = arith.maximumf %15, %16 : vector<288x128xf32>
      %c0_15 = arith.constant 0 : index
      %c0_16 = arith.constant 0 : index
      %18 = vector.load %arg5[%c0_15, %c0_16] : memref<288x128xf32, #tpu.memory_space<vmem>>, vector<288x128xf32>
      tpu.vector_store %arg5[%c0_15, %c0_16], %17 {strides = array<i32>} : memref<288x128xf32, #tpu.memory_space<vmem>>, vector<288x128xf32>,
    } else {
    }
    return
  }
  func.func @transform_0(%arg0: i32, %arg1: i32) -> (i32, i32) {
    %c0_i32 = arith.constant 0 : i32
    %c0_i32_0 = arith.constant 0 : i32
    return %c0_i32, %arg1 : i32, i32
  }
  func.func @transform_1(%arg0: i32, %arg1: i32) -> (i32, i32) {
    %c0_i32 = arith.constant 0 : i32
    return %arg1, %arg0 : i32, i32
  }
  func.func @transform_2(%arg0: i32, %arg1: i32) -> (i32, i32) {
    %c0_i32 = arith.constant 0 : i32
    %c0_i32_0 = arith.constant 0 : i32
    return %c0_i32, %arg0 : i32, i32
  }
  func.func @transform_3(%arg0: i32, %arg1: i32) -> (i32, i32) {
    %c0_i32 = arith.constant 0 : i32
    %c0_i32_0 = arith.constant 0 : i32
    return %c0_i32, %arg0 : i32, i32
  }
}

module attributes {stable_mosaic.version = 11 : i64} {
  func.func @_window_max_kernel(%arg0: i32, %arg1: memref<12x24x128xf32, #tpu.memory_space<vmem>>, %arg2: memref<24x128xf32, #tpu.memory_space<vmem>>) attributes {dimension_semantics = [#tpu.dimension_semantics<arbitrary>], iteration_bounds = array<i64: 1>, scalar_prefetch = 0 : i64, scratch_operands = 0 : i64, tpu.core_type = #tpu.core_type<tc>, window_params = [{pipeline_mode = #tpu.pipeline_mode<synchronous>, transform_indices = @transform_0, window_bounds = array<i64: 12, 24, 128>}, {pipeline_mode = #tpu.pipeline_mode<synchronous>, transform_indices = @transform_1, window_bounds = array<i64: 24, 128>}]} {
    %c0 = arith.constant 0 : index
    %c0_0 = arith.constant 0 : index
    %c0_1 = arith.constant 0 : index
    %0 = vector.load %arg1[%c0, %c0_0, %c0_1] : memref<12x24x128xf32, #tpu.memory_space<vmem>>, vector<1x24x128xf32>
    %1 = vector.shape_cast %0 : vector<1x24x128xf32> to vector<24x128xf32>
    %c1 = arith.constant 1 : index
    %c0_2 = arith.constant 0 : index
    %c0_3 = arith.constant 0 : index
    %2 = vector.load %arg1[%c1, %c0_2, %c0_3] : memref<12x24x128xf32, #tpu.memory_space<vmem>>, vector<1x24x128xf32>
    %3 = vector.shape_cast %2 : vector<1x24x128xf32> to vector<24x128xf32>
    %4 = arith.maximumf %1, %3 : vector<24x128xf32>
    %c2 = arith.constant 2 : index
    %c0_4 = arith.constant 0 : index
    %c0_5 = arith.constant 0 : index
    %5 = vector.load %arg1[%c2, %c0_4, %c0_5] : memref<12x24x128xf32, #tpu.memory_space<vmem>>, vector<1x24x128xf32>
    %6 = vector.shape_cast %5 : vector<1x24x128xf32> to vector<24x128xf32>
    %7 = arith.maximumf %4, %6 : vector<24x128xf32>
    %c3 = arith.constant 3 : index
    %c0_6 = arith.constant 0 : index
    %c0_7 = arith.constant 0 : index
    %8 = vector.load %arg1[%c3, %c0_6, %c0_7] : memref<12x24x128xf32, #tpu.memory_space<vmem>>, vector<1x24x128xf32>
    %9 = vector.shape_cast %8 : vector<1x24x128xf32> to vector<24x128xf32>
    %10 = arith.maximumf %7, %9 : vector<24x128xf32>
    %c4 = arith.constant 4 : index
    %c0_8 = arith.constant 0 : index
    %c0_9 = arith.constant 0 : index
    %11 = vector.load %arg1[%c4, %c0_8, %c0_9] : memref<12x24x128xf32, #tpu.memory_space<vmem>>, vector<1x24x128xf32>
    %12 = vector.shape_cast %11 : vector<1x24x128xf32> to vector<24x128xf32>
    %13 = arith.maximumf %10, %12 : vector<24x128xf32>
    %c5 = arith.constant 5 : index
    %c0_10 = arith.constant 0 : index
    %c0_11 = arith.constant 0 : index
    %14 = vector.load %arg1[%c5, %c0_10, %c0_11] : memref<12x24x128xf32, #tpu.memory_space<vmem>>, vector<1x24x128xf32>
    %15 = vector.shape_cast %14 : vector<1x24x128xf32> to vector<24x128xf32>
    %16 = arith.maximumf %13, %15 : vector<24x128xf32>
    %c6 = arith.constant 6 : index
    %c0_12 = arith.constant 0 : index
    %c0_13 = arith.constant 0 : index
    %17 = vector.load %arg1[%c6, %c0_12, %c0_13] : memref<12x24x128xf32, #tpu.memory_space<vmem>>, vector<1x24x128xf32>
    %18 = vector.shape_cast %17 : vector<1x24x128xf32> to vector<24x128xf32>
    %19 = arith.maximumf %16, %18 : vector<24x128xf32>
    %c7 = arith.constant 7 : index
    %c0_14 = arith.constant 0 : index
    %c0_15 = arith.constant 0 : index
    %20 = vector.load %arg1[%c7, %c0_14, %c0_15] : memref<12x24x128xf32, #tpu.memory_space<vmem>>, vector<1x24x128xf32>
    %21 = vector.shape_cast %20 : vector<1x24x128xf32> to vector<24x128xf32>
    %22 = arith.maximumf %19, %21 : vector<24x128xf32>
    %c8 = arith.constant 8 : index
    %c0_16 = arith.constant 0 : index
    %c0_17 = arith.constant 0 : index
    %23 = vector.load %arg1[%c8, %c0_16, %c0_17] : memref<12x24x128xf32, #tpu.memory_space<vmem>>, vector<1x24x128xf32>
    %24 = vector.shape_cast %23 : vector<1x24x128xf32> to vector<24x128xf32>
    %25 = arith.maximumf %22, %24 : vector<24x128xf32>
    %c9 = arith.constant 9 : index
    %c0_18 = arith.constant 0 : index
    %c0_19 = arith.constant 0 : index
    %26 = vector.load %arg1[%c9, %c0_18, %c0_19] : memref<12x24x128xf32, #tpu.memory_space<vmem>>, vector<1x24x128xf32>
    %27 = vector.shape_cast %26 : vector<1x24x128xf32> to vector<24x128xf32>
    %28 = arith.maximumf %25, %27 : vector<24x128xf32>
    %c10 = arith.constant 10 : index
    %c0_20 = arith.constant 0 : index
    %c0_21 = arith.constant 0 : index
    %29 = vector.load %arg1[%c10, %c0_20, %c0_21] : memref<12x24x128xf32, #tpu.memory_space<vmem>>, vector<1x24x128xf32>
    %30 = vector.shape_cast %29 : vector<1x24x128xf32> to vector<24x128xf32>
    %31 = arith.maximumf %28, %30 : vector<24x128xf32>
    %c11 = arith.constant 11 : index
    %c0_22 = arith.constant 0 : index
    %c0_23 = arith.constant 0 : index
    %32 = vector.load %arg1[%c11, %c0_22, %c0_23] : memref<12x24x128xf32, #tpu.memory_space<vmem>>, vector<1x24x128xf32>
    %33 = vector.shape_cast %32 : vector<1x24x128xf32> to vector<24x128xf32>
    %34 = arith.maximumf %31, %33 : vector<24x128xf32>
    %c0_24 = arith.constant 0 : index
    %c0_25 = arith.constant 0 : index
    %35 = vector.load %arg2[%c0_24, %c0_25] : memref<24x128xf32, #tpu.memory_space<vmem>>, vector<24x128xf32>
    tpu.vector_store %arg2[%c0_24, %c0_25], %34 {strides = array<i32>} : memref<24x128xf32, #tpu.memory_space<vmem>>, vector<24x128xf32>,
    return
  }
  func.func @transform_0(%arg0: i32) -> (i32, i32, i32) {
    %c0_i32 = arith.constant 0 : i32
    %c0_i32_0 = arith.constant 0 : i32
    %c0_i32_1 = arith.constant 0 : i32
    %c0_i32_2 = arith.constant 0 : i32
    return %c0_i32, %c0_i32_0, %c0_i32_1 : i32, i32, i32
  }
  func.func @transform_1(%arg0: i32) -> (i32, i32) {
    %c0_i32 = arith.constant 0 : i32
    %c0_i32_0 = arith.constant 0 : i32
    %c0_i32_1 = arith.constant 0 : i32
    return %c0_i32, %c0_i32_0 : i32, i32
  }
}

module attributes {stable_mosaic.version = 11 : i64} {
  func.func @_matmul_bias_kernel(%arg0: i32, %arg1: i32, %arg2: memref<20x384xf32, #tpu.memory_space<vmem>>, %arg3: memref<384x128xf32, #tpu.memory_space<vmem>>, %arg4: memref<1x128xf32, #tpu.memory_space<vmem>>, %arg5: memref<20x128xf32, #tpu.memory_space<vmem>>) attributes {dimension_semantics = [#tpu.dimension_semantics<parallel>, #tpu.dimension_semantics<arbitrary>], iteration_bounds = array<i64: 1, 1>, scalar_prefetch = 0 : i64, scratch_operands = 0 : i64, tpu.core_type = #tpu.core_type<tc>, window_params = [{transform_indices = @transform_0, window_bounds = array<i64: 20, 384>}, {transform_indices = @transform_1, window_bounds = array<i64: 384, 128>}, {transform_indices = @transform_2, window_bounds = array<i64: 1, 128>}, {transform_indices = @transform_3, window_bounds = array<i64: 20, 128>}]} {
    %c0_i32 = arith.constant 0 : i32
    %0 = arith.cmpi eq, %arg1, %c0_i32 : i32
    %1 = arith.extui %0 : i1 to i32
    %c0_i32_0 = arith.constant 0 : i32
    %2 = arith.cmpi ne, %1, %c0_i32_0 : i32
    scf.if %2 {
      %cst_10 = arith.constant 0.000000e+00 : f32
      %12 = vector.broadcast %cst_10 : f32 to vector<20x128xf32>
      %c0_11 = arith.constant 0 : index
      %c0_12 = arith.constant 0 : index
      %13 = vector.load %arg5[%c0_11, %c0_12] : memref<20x128xf32, #tpu.memory_space<vmem>>, vector<20x128xf32>
      tpu.vector_store %arg5[%c0_11, %c0_12], %12 {strides = array<i32>} : memref<20x128xf32, #tpu.memory_space<vmem>>, vector<20x128xf32>,
    } else {
    }
    %c0 = arith.constant 0 : index
    %c0_1 = arith.constant 0 : index
    %3 = vector.load %arg5[%c0, %c0_1] : memref<20x128xf32, #tpu.memory_space<vmem>>, vector<20x128xf32>
    %c0_2 = arith.constant 0 : index
    %c0_3 = arith.constant 0 : index
    %4 = vector.load %arg2[%c0_2, %c0_3] : memref<20x384xf32, #tpu.memory_space<vmem>>, vector<20x384xf32>
    %c0_4 = arith.constant 0 : index
    %c0_5 = arith.constant 0 : index
    %5 = vector.load %arg3[%c0_4, %c0_5] : memref<384x128xf32, #tpu.memory_space<vmem>>, vector<384x128xf32>
    %cst = arith.constant dense<0.000000e+00> : vector<20x128xf32>
    %6 = tpu.matmul %4, %5, %cst {dimension_numbers = #tpu.dot_dimension_numbers<[1], [0], [0], [1], [0, 0, 1, 1], [], []>} : vector<20x384xf32>, vector<384x128xf32>, vector<20x128xf32> -> vector<20x128xf32>
    %7 = arith.addf %3, %6 : vector<20x128xf32>
    %c0_6 = arith.constant 0 : index
    %c0_7 = arith.constant 0 : index
    %8 = vector.load %arg5[%c0_6, %c0_7] : memref<20x128xf32, #tpu.memory_space<vmem>>, vector<20x128xf32>
    tpu.vector_store %arg5[%c0_6, %c0_7], %7 {strides = array<i32>} : memref<20x128xf32, #tpu.memory_space<vmem>>, vector<20x128xf32>,
    %c0_i32_8 = arith.constant 0 : i32
    %9 = arith.cmpi eq, %arg1, %c0_i32_8 : i32
    %10 = arith.extui %9 : i1 to i32
    %c0_i32_9 = arith.constant 0 : i32
    %11 = arith.cmpi ne, %10, %c0_i32_9 : i32
    scf.if %11 {
      %c0_10 = arith.constant 0 : index
      %c0_11 = arith.constant 0 : index
      %12 = vector.load %arg5[%c0_10, %c0_11] : memref<20x128xf32, #tpu.memory_space<vmem>>, vector<20x128xf32>
      %c0_12 = arith.constant 0 : index
      %c0_13 = arith.constant 0 : index
      %13 = vector.load %arg4[%c0_12, %c0_13] : memref<1x128xf32, #tpu.memory_space<vmem>>, vector<1x128xf32>
      %14 = vector.broadcast %13 : vector<1x128xf32> to vector<20x128xf32>
      %15 = arith.addf %12, %14 : vector<20x128xf32>
      %cst_14 = arith.constant 0.000000e+00 : f32
      %16 = vector.broadcast %cst_14 : f32 to vector<20x128xf32>
      %17 = arith.maximumf %15, %16 : vector<20x128xf32>
      %c0_15 = arith.constant 0 : index
      %c0_16 = arith.constant 0 : index
      %18 = vector.load %arg5[%c0_15, %c0_16] : memref<20x128xf32, #tpu.memory_space<vmem>>, vector<20x128xf32>
      tpu.vector_store %arg5[%c0_15, %c0_16], %17 {strides = array<i32>} : memref<20x128xf32, #tpu.memory_space<vmem>>, vector<20x128xf32>,
    } else {
    }
    return
  }
  func.func @transform_0(%arg0: i32, %arg1: i32) -> (i32, i32) {
    %c0_i32 = arith.constant 0 : i32
    %c0_i32_0 = arith.constant 0 : i32
    return %c0_i32, %arg1 : i32, i32
  }
  func.func @transform_1(%arg0: i32, %arg1: i32) -> (i32, i32) {
    %c0_i32 = arith.constant 0 : i32
    return %arg1, %arg0 : i32, i32
  }
  func.func @transform_2(%arg0: i32, %arg1: i32) -> (i32, i32) {
    %c0_i32 = arith.constant 0 : i32
    %c0_i32_0 = arith.constant 0 : i32
    return %c0_i32, %arg0 : i32, i32
  }
  func.func @transform_3(%arg0: i32, %arg1: i32) -> (i32, i32) {
    %c0_i32 = arith.constant 0 : i32
    %c0_i32_0 = arith.constant 0 : i32
    return %c0_i32, %arg0 : i32, i32
  }
}

module attributes {stable_mosaic.version = 11 : i64} {
  func.func @_window_max_kernel(%arg0: i32, %arg1: memref<3x6x128xf32, #tpu.memory_space<vmem>>, %arg2: memref<6x128xf32, #tpu.memory_space<vmem>>) attributes {dimension_semantics = [#tpu.dimension_semantics<arbitrary>], iteration_bounds = array<i64: 1>, scalar_prefetch = 0 : i64, scratch_operands = 0 : i64, tpu.core_type = #tpu.core_type<tc>, window_params = [{pipeline_mode = #tpu.pipeline_mode<synchronous>, transform_indices = @transform_0, window_bounds = array<i64: 3, 6, 128>}, {pipeline_mode = #tpu.pipeline_mode<synchronous>, transform_indices = @transform_1, window_bounds = array<i64: 6, 128>}]} {
    %c0 = arith.constant 0 : index
    %c0_0 = arith.constant 0 : index
    %c0_1 = arith.constant 0 : index
    %0 = vector.load %arg1[%c0, %c0_0, %c0_1] : memref<3x6x128xf32, #tpu.memory_space<vmem>>, vector<1x6x128xf32>
    %1 = vector.shape_cast %0 : vector<1x6x128xf32> to vector<6x128xf32>
    %c1 = arith.constant 1 : index
    %c0_2 = arith.constant 0 : index
    %c0_3 = arith.constant 0 : index
    %2 = vector.load %arg1[%c1, %c0_2, %c0_3] : memref<3x6x128xf32, #tpu.memory_space<vmem>>, vector<1x6x128xf32>
    %3 = vector.shape_cast %2 : vector<1x6x128xf32> to vector<6x128xf32>
    %4 = arith.maximumf %1, %3 : vector<6x128xf32>
    %c2 = arith.constant 2 : index
    %c0_4 = arith.constant 0 : index
    %c0_5 = arith.constant 0 : index
    %5 = vector.load %arg1[%c2, %c0_4, %c0_5] : memref<3x6x128xf32, #tpu.memory_space<vmem>>, vector<1x6x128xf32>
    %6 = vector.shape_cast %5 : vector<1x6x128xf32> to vector<6x128xf32>
    %7 = arith.maximumf %4, %6 : vector<6x128xf32>
    %c0_6 = arith.constant 0 : index
    %c0_7 = arith.constant 0 : index
    %8 = vector.load %arg2[%c0_6, %c0_7] : memref<6x128xf32, #tpu.memory_space<vmem>>, vector<6x128xf32>
    tpu.vector_store %arg2[%c0_6, %c0_7], %7 {strides = array<i32>} : memref<6x128xf32, #tpu.memory_space<vmem>>, vector<6x128xf32>,
    return
  }
  func.func @transform_0(%arg0: i32) -> (i32, i32, i32) {
    %c0_i32 = arith.constant 0 : i32
    %c0_i32_0 = arith.constant 0 : i32
    %c0_i32_1 = arith.constant 0 : i32
    %c0_i32_2 = arith.constant 0 : i32
    return %c0_i32, %c0_i32_0, %c0_i32_1 : i32, i32, i32
  }
  func.func @transform_1(%arg0: i32) -> (i32, i32) {
    %c0_i32 = arith.constant 0 : i32
    %c0_i32_0 = arith.constant 0 : i32
    %c0_i32_1 = arith.constant 0 : i32
    return %c0_i32, %c0_i32_0 : i32, i32
  }
}

module attributes {stable_mosaic.version = 11 : i64} {
  func.func @_matmul_bias_kernel(%arg0: i32, %arg1: i32, %arg2: memref<2x384xf32, #tpu.memory_space<vmem>>, %arg3: memref<384x2560xbf16, #tpu.memory_space<vmem>>, %arg4: memref<1x2560xf32, #tpu.memory_space<vmem>>, %arg5: memref<2x2560xf32, #tpu.memory_space<vmem>>) attributes {dimension_semantics = [#tpu.dimension_semantics<parallel>, #tpu.dimension_semantics<arbitrary>], iteration_bounds = array<i64: 2, 1>, scalar_prefetch = 0 : i64, scratch_operands = 0 : i64, tpu.core_type = #tpu.core_type<tc>, window_params = [{transform_indices = @transform_0, window_bounds = array<i64: 2, 384>}, {transform_indices = @transform_1, window_bounds = array<i64: 384, 2560>}, {transform_indices = @transform_2, window_bounds = array<i64: 1, 2560>}, {transform_indices = @transform_3, window_bounds = array<i64: 2, 2560>}]} {
    %c0_i32 = arith.constant 0 : i32
    %0 = arith.cmpi eq, %arg1, %c0_i32 : i32
    %1 = arith.extui %0 : i1 to i32
    %c0_i32_0 = arith.constant 0 : i32
    %2 = arith.cmpi ne, %1, %c0_i32_0 : i32
    scf.if %2 {
      %cst_10 = arith.constant 0.000000e+00 : f32
      %13 = vector.broadcast %cst_10 : f32 to vector<2x2560xf32>
      %c0_11 = arith.constant 0 : index
      %c0_12 = arith.constant 0 : index
      %14 = vector.load %arg5[%c0_11, %c0_12] : memref<2x2560xf32, #tpu.memory_space<vmem>>, vector<2x2560xf32>
      tpu.vector_store %arg5[%c0_11, %c0_12], %13 {strides = array<i32>} : memref<2x2560xf32, #tpu.memory_space<vmem>>, vector<2x2560xf32>,
    } else {
    }
    %c0 = arith.constant 0 : index
    %c0_1 = arith.constant 0 : index
    %3 = vector.load %arg5[%c0, %c0_1] : memref<2x2560xf32, #tpu.memory_space<vmem>>, vector<2x2560xf32>
    %c0_2 = arith.constant 0 : index
    %c0_3 = arith.constant 0 : index
    %4 = vector.load %arg2[%c0_2, %c0_3] : memref<2x384xf32, #tpu.memory_space<vmem>>, vector<2x384xf32>
    %5 = arith.truncf %4 : vector<2x384xf32> to vector<2x384xbf16>
    %c0_4 = arith.constant 0 : index
    %c0_5 = arith.constant 0 : index
    %6 = vector.load %arg3[%c0_4, %c0_5] : memref<384x2560xbf16, #tpu.memory_space<vmem>>, vector<384x2560xbf16>
    %cst = arith.constant dense<0.000000e+00> : vector<2x2560xf32>
    %7 = tpu.matmul %5, %6, %cst {dimension_numbers = #tpu.dot_dimension_numbers<[1], [0], [0], [1], [0, 0, 1, 1], [], []>} : vector<2x384xbf16>, vector<384x2560xbf16>, vector<2x2560xf32> -> vector<2x2560xf32>
    %8 = arith.addf %3, %7 : vector<2x2560xf32>
    %c0_6 = arith.constant 0 : index
    %c0_7 = arith.constant 0 : index
    %9 = vector.load %arg5[%c0_6, %c0_7] : memref<2x2560xf32, #tpu.memory_space<vmem>>, vector<2x2560xf32>
    tpu.vector_store %arg5[%c0_6, %c0_7], %8 {strides = array<i32>} : memref<2x2560xf32, #tpu.memory_space<vmem>>, vector<2x2560xf32>,
    %c0_i32_8 = arith.constant 0 : i32
    %10 = arith.cmpi eq, %arg1, %c0_i32_8 : i32
    %11 = arith.extui %10 : i1 to i32
    %c0_i32_9 = arith.constant 0 : i32
    %12 = arith.cmpi ne, %11, %c0_i32_9 : i32
    scf.if %12 {
      %c0_10 = arith.constant 0 : index
      %c0_11 = arith.constant 0 : index
      %13 = vector.load %arg5[%c0_10, %c0_11] : memref<2x2560xf32, #tpu.memory_space<vmem>>, vector<2x2560xf32>
      %c0_12 = arith.constant 0 : index
      %c0_13 = arith.constant 0 : index
      %14 = vector.load %arg4[%c0_12, %c0_13] : memref<1x2560xf32, #tpu.memory_space<vmem>>, vector<1x2560xf32>
      %15 = vector.broadcast %14 : vector<1x2560xf32> to vector<2x2560xf32>
      %16 = arith.addf %13, %15 : vector<2x2560xf32>
      %cst_14 = arith.constant 0.000000e+00 : f32
      %17 = vector.broadcast %cst_14 : f32 to vector<2x2560xf32>
      %18 = arith.maximumf %16, %17 : vector<2x2560xf32>
      %c0_15 = arith.constant 0 : index
      %c0_16 = arith.constant 0 : index
      %19 = vector.load %arg5[%c0_15, %c0_16] : memref<2x2560xf32, #tpu.memory_space<vmem>>, vector<2x2560xf32>
      tpu.vector_store %arg5[%c0_15, %c0_16], %18 {strides = array<i32>} : memref<2x2560xf32, #tpu.memory_space<vmem>>, vector<2x2560xf32>,
    } else {
    }
    return
  }
  func.func @transform_0(%arg0: i32, %arg1: i32) -> (i32, i32) {
    %c0_i32 = arith.constant 0 : i32
    %c0_i32_0 = arith.constant 0 : i32
    return %c0_i32, %arg1 : i32, i32
  }
  func.func @transform_1(%arg0: i32, %arg1: i32) -> (i32, i32) {
    %c0_i32 = arith.constant 0 : i32
    return %arg1, %arg0 : i32, i32
  }
  func.func @transform_2(%arg0: i32, %arg1: i32) -> (i32, i32) {
    %c0_i32 = arith.constant 0 : i32
    %c0_i32_0 = arith.constant 0 : i32
    return %c0_i32, %arg0 : i32, i32
  }
  func.func @transform_3(%arg0: i32, %arg1: i32) -> (i32, i32) {
    %c0_i32 = arith.constant 0 : i32
    %c0_i32_0 = arith.constant 0 : i32
    return %c0_i32, %arg0 : i32, i32
  }
}

module attributes {stable_mosaic.version = 11 : i64} {
  func.func @_matmul_bias_kernel(%arg0: i32, %arg1: i32, %arg2: memref<2x512xf32, #tpu.memory_space<vmem>>, %arg3: memref<512x2560xbf16, #tpu.memory_space<vmem>>, %arg4: memref<1x2560xf32, #tpu.memory_space<vmem>>, %arg5: memref<2x2560xf32, #tpu.memory_space<vmem>>) attributes {dimension_semantics = [#tpu.dimension_semantics<parallel>, #tpu.dimension_semantics<arbitrary>], iteration_bounds = array<i64: 2, 10>, scalar_prefetch = 0 : i64, scratch_operands = 0 : i64, tpu.core_type = #tpu.core_type<tc>, window_params = [{transform_indices = @transform_0, window_bounds = array<i64: 2, 512>}, {transform_indices = @transform_1, window_bounds = array<i64: 512, 2560>}, {transform_indices = @transform_2, window_bounds = array<i64: 1, 2560>}, {transform_indices = @transform_3, window_bounds = array<i64: 2, 2560>}]} {
    %c0_i32 = arith.constant 0 : i32
    %0 = arith.cmpi eq, %arg1, %c0_i32 : i32
    %1 = arith.extui %0 : i1 to i32
    %c0_i32_0 = arith.constant 0 : i32
    %2 = arith.cmpi ne, %1, %c0_i32_0 : i32
    scf.if %2 {
      %cst_9 = arith.constant 0.000000e+00 : f32
      %13 = vector.broadcast %cst_9 : f32 to vector<2x2560xf32>
      %c0_10 = arith.constant 0 : index
      %c0_11 = arith.constant 0 : index
      %14 = vector.load %arg5[%c0_10, %c0_11] : memref<2x2560xf32, #tpu.memory_space<vmem>>, vector<2x2560xf32>
      tpu.vector_store %arg5[%c0_10, %c0_11], %13 {strides = array<i32>} : memref<2x2560xf32, #tpu.memory_space<vmem>>, vector<2x2560xf32>,
    } else {
    }
    %c0 = arith.constant 0 : index
    %c0_1 = arith.constant 0 : index
    %3 = vector.load %arg5[%c0, %c0_1] : memref<2x2560xf32, #tpu.memory_space<vmem>>, vector<2x2560xf32>
    %c0_2 = arith.constant 0 : index
    %c0_3 = arith.constant 0 : index
    %4 = vector.load %arg2[%c0_2, %c0_3] : memref<2x512xf32, #tpu.memory_space<vmem>>, vector<2x512xf32>
    %5 = arith.truncf %4 : vector<2x512xf32> to vector<2x512xbf16>
    %c0_4 = arith.constant 0 : index
    %c0_5 = arith.constant 0 : index
    %6 = vector.load %arg3[%c0_4, %c0_5] : memref<512x2560xbf16, #tpu.memory_space<vmem>>, vector<512x2560xbf16>
    %cst = arith.constant dense<0.000000e+00> : vector<2x2560xf32>
    %7 = tpu.matmul %5, %6, %cst {dimension_numbers = #tpu.dot_dimension_numbers<[1], [0], [0], [1], [0, 0, 1, 1], [], []>} : vector<2x512xbf16>, vector<512x2560xbf16>, vector<2x2560xf32> -> vector<2x2560xf32>
    %8 = arith.addf %3, %7 : vector<2x2560xf32>
    %c0_6 = arith.constant 0 : index
    %c0_7 = arith.constant 0 : index
    %9 = vector.load %arg5[%c0_6, %c0_7] : memref<2x2560xf32, #tpu.memory_space<vmem>>, vector<2x2560xf32>
    tpu.vector_store %arg5[%c0_6, %c0_7], %8 {strides = array<i32>} : memref<2x2560xf32, #tpu.memory_space<vmem>>, vector<2x2560xf32>,
    %c9_i32 = arith.constant 9 : i32
    %10 = arith.cmpi eq, %arg1, %c9_i32 : i32
    %11 = arith.extui %10 : i1 to i32
    %c0_i32_8 = arith.constant 0 : i32
    %12 = arith.cmpi ne, %11, %c0_i32_8 : i32
    scf.if %12 {
      %c0_9 = arith.constant 0 : index
      %c0_10 = arith.constant 0 : index
      %13 = vector.load %arg5[%c0_9, %c0_10] : memref<2x2560xf32, #tpu.memory_space<vmem>>, vector<2x2560xf32>
      %c0_11 = arith.constant 0 : index
      %c0_12 = arith.constant 0 : index
      %14 = vector.load %arg4[%c0_11, %c0_12] : memref<1x2560xf32, #tpu.memory_space<vmem>>, vector<1x2560xf32>
      %15 = vector.broadcast %14 : vector<1x2560xf32> to vector<2x2560xf32>
      %16 = arith.addf %13, %15 : vector<2x2560xf32>
      %cst_13 = arith.constant 0.000000e+00 : f32
      %17 = vector.broadcast %cst_13 : f32 to vector<2x2560xf32>
      %18 = arith.maximumf %16, %17 : vector<2x2560xf32>
      %c0_14 = arith.constant 0 : index
      %c0_15 = arith.constant 0 : index
      %19 = vector.load %arg5[%c0_14, %c0_15] : memref<2x2560xf32, #tpu.memory_space<vmem>>, vector<2x2560xf32>
      tpu.vector_store %arg5[%c0_14, %c0_15], %18 {strides = array<i32>} : memref<2x2560xf32, #tpu.memory_space<vmem>>, vector<2x2560xf32>,
    } else {
    }
    return
  }
  func.func @transform_0(%arg0: i32, %arg1: i32) -> (i32, i32) {
    %c0_i32 = arith.constant 0 : i32
    %c0_i32_0 = arith.constant 0 : i32
    return %c0_i32, %arg1 : i32, i32
  }
  func.func @transform_1(%arg0: i32, %arg1: i32) -> (i32, i32) {
    %c0_i32 = arith.constant 0 : i32
    return %arg1, %arg0 : i32, i32
  }
  func.func @transform_2(%arg0: i32, %arg1: i32) -> (i32, i32) {
    %c0_i32 = arith.constant 0 : i32
    %c0_i32_0 = arith.constant 0 : i32
    return %c0_i32, %arg0 : i32, i32
  }
  func.func @transform_3(%arg0: i32, %arg1: i32) -> (i32, i32) {
    %c0_i32 = arith.constant 0 : i32
    %c0_i32_0 = arith.constant 0 : i32
    return %c0_i32, %arg0 : i32, i32
  }
}

module attributes {stable_mosaic.version = 11 : i64} {
  func.func @_matmul_bias_kernel(%arg0: i32, %arg1: i32, %arg2: memref<2x512xf32, #tpu.memory_space<vmem>>, %arg3: memref<512x128xf32, #tpu.memory_space<vmem>>, %arg4: memref<1x128xf32, #tpu.memory_space<vmem>>, %arg5: memref<2x128xf32, #tpu.memory_space<vmem>>) attributes {dimension_semantics = [#tpu.dimension_semantics<parallel>, #tpu.dimension_semantics<arbitrary>], iteration_bounds = array<i64: 1, 10>, scalar_prefetch = 0 : i64, scratch_operands = 0 : i64, tpu.core_type = #tpu.core_type<tc>, window_params = [{transform_indices = @transform_0, window_bounds = array<i64: 2, 512>}, {transform_indices = @transform_1, window_bounds = array<i64: 512, 128>}, {transform_indices = @transform_2, window_bounds = array<i64: 1, 128>}, {transform_indices = @transform_3, window_bounds = array<i64: 2, 128>}]} {
    %c0_i32 = arith.constant 0 : i32
    %0 = arith.cmpi eq, %arg1, %c0_i32 : i32
    %1 = arith.extui %0 : i1 to i32
    %c0_i32_0 = arith.constant 0 : i32
    %2 = arith.cmpi ne, %1, %c0_i32_0 : i32
    scf.if %2 {
      %cst_9 = arith.constant 0.000000e+00 : f32
      %12 = vector.broadcast %cst_9 : f32 to vector<2x128xf32>
      %c0_10 = arith.constant 0 : index
      %c0_11 = arith.constant 0 : index
      %13 = vector.load %arg5[%c0_10, %c0_11] : memref<2x128xf32, #tpu.memory_space<vmem>>, vector<2x128xf32>
      tpu.vector_store %arg5[%c0_10, %c0_11], %12 {strides = array<i32>} : memref<2x128xf32, #tpu.memory_space<vmem>>, vector<2x128xf32>,
    } else {
    }
    %c0 = arith.constant 0 : index
    %c0_1 = arith.constant 0 : index
    %3 = vector.load %arg5[%c0, %c0_1] : memref<2x128xf32, #tpu.memory_space<vmem>>, vector<2x128xf32>
    %c0_2 = arith.constant 0 : index
    %c0_3 = arith.constant 0 : index
    %4 = vector.load %arg2[%c0_2, %c0_3] : memref<2x512xf32, #tpu.memory_space<vmem>>, vector<2x512xf32>
    %c0_4 = arith.constant 0 : index
    %c0_5 = arith.constant 0 : index
    %5 = vector.load %arg3[%c0_4, %c0_5] : memref<512x128xf32, #tpu.memory_space<vmem>>, vector<512x128xf32>
    %cst = arith.constant dense<0.000000e+00> : vector<2x128xf32>
    %6 = tpu.matmul %4, %5, %cst {dimension_numbers = #tpu.dot_dimension_numbers<[1], [0], [0], [1], [0, 0, 1, 1], [], []>} : vector<2x512xf32>, vector<512x128xf32>, vector<2x128xf32> -> vector<2x128xf32>
    %7 = arith.addf %3, %6 : vector<2x128xf32>
    %c0_6 = arith.constant 0 : index
    %c0_7 = arith.constant 0 : index
    %8 = vector.load %arg5[%c0_6, %c0_7] : memref<2x128xf32, #tpu.memory_space<vmem>>, vector<2x128xf32>
    tpu.vector_store %arg5[%c0_6, %c0_7], %7 {strides = array<i32>} : memref<2x128xf32, #tpu.memory_space<vmem>>, vector<2x128xf32>,
    %c9_i32 = arith.constant 9 : i32
    %9 = arith.cmpi eq, %arg1, %c9_i32 : i32
    %10 = arith.extui %9 : i1 to i32
    %c0_i32_8 = arith.constant 0 : i32
    %11 = arith.cmpi ne, %10, %c0_i32_8 : i32
    scf.if %11 {
      %c0_9 = arith.constant 0 : index
      %c0_10 = arith.constant 0 : index
      %12 = vector.load %arg5[%c0_9, %c0_10] : memref<2x128xf32, #tpu.memory_space<vmem>>, vector<2x128xf32>
      %c0_11 = arith.constant 0 : index
      %c0_12 = arith.constant 0 : index
      %13 = vector.load %arg4[%c0_11, %c0_12] : memref<1x128xf32, #tpu.memory_space<vmem>>, vector<1x128xf32>
      %14 = vector.broadcast %13 : vector<1x128xf32> to vector<2x128xf32>
      %15 = arith.addf %12, %14 : vector<2x128xf32>
      %c0_13 = arith.constant 0 : index
      %c0_14 = arith.constant 0 : index
      %16 = vector.load %arg5[%c0_13, %c0_14] : memref<2x128xf32, #tpu.memory_space<vmem>>, vector<2x128xf32>
      tpu.vector_store %arg5[%c0_13, %c0_14], %15 {strides = array<i32>} : memref<2x128xf32, #tpu.memory_space<vmem>>, vector<2x128xf32>,
    } else {
    }
    return
  }
  func.func @transform_0(%arg0: i32, %arg1: i32) -> (i32, i32) {
    %c0_i32 = arith.constant 0 : i32
    %c0_i32_0 = arith.constant 0 : i32
    return %c0_i32, %arg1 : i32, i32
  }
  func.func @transform_1(%arg0: i32, %arg1: i32) -> (i32, i32) {
    %c0_i32 = arith.constant 0 : i32
    return %arg1, %arg0 : i32, i32
  }
  func.func @transform_2(%arg0: i32, %arg1: i32) -> (i32, i32) {
    %c0_i32 = arith.constant 0 : i32
    %c0_i32_0 = arith.constant 0 : i32
    return %c0_i32, %arg0 : i32, i32
  }
  func.func @transform_3(%arg0: i32, %arg1: i32) -> (i32, i32) {
    %c0_i32 = arith.constant 0 : i32
    %c0_i32_0 = arith.constant 0 : i32
    return %c0_i32, %arg0 : i32, i32
  }
}

</mosaic_0001>

<bundles_post_ra>
// kernel: piczak_forward.7
= control target key start
LH: loop header
LB: loop body
LE: loop exit
PB: predicated region body
PF: predicated region fallthrough
CT: control target
= control target key end

     0   :  { %v1546_v0 = vmov 0.0|0.0   ;;  %s2824_s1 = inlined_call_operand.vmem [shape: f32[768,128], index: 1, kind: input, shape index: {}]   ;;  %s2825_s0 = inlined_call_operand.vmem [shape: f32[288,768], index: 0, kind: input, shape index: {}]   ;;  %s2826_s2 = inlined_call_operand.vmem [shape: f32[1,128], index: 2, kind: input, shape index: {}]   ;;  %s2827_s3 = inlined_call_operand.vmem [shape: f32[288,128], index: 3, kind: output, shape index: {}]  }
   0x1   :  { %1512 = vmatprep.subr.bf16.mxu1 %v1546_v0  ;;  %v306_v1 = vld [vmem:[%s2824_s1] sm:$0xff]  ;;  %v307_v2 = vld [vmem:[%s2824_s1 + $0x8] sm:$0xff]  ;;  %1368 = vmatprep.subr.bf16.mxu0 %v1546_v0  ;;  %v308_v3 = vld [vmem:[%s2824_s1 + $0x10] sm:$0xff] }
   0x2   :  { %v1369_v4 = vpack.c.bf16 %v307_v2, %v306_v1  ;;  %v309_v5 = vld [vmem:[%s2824_s1 + $0x18] sm:$0xff]  ;;  %v310_v7 = vld [vmem:[%s2824_s1 + $0x20] sm:$0xff]  ;;  %v311_v8 = vld [vmem:[%s2824_s1 + $0x28] sm:$0xff] }
   0x3   :  { %v1372_v6 = vpack.c.bf16 %v309_v5, %v308_v3  ;;  %v1375_v9 = vpack.c.bf16 %v311_v8, %v310_v7  ;;  %v312_v10 = vld [vmem:[%s2824_s1 + $0x30] sm:$0xff]  ;;  %v313_v11 = vld [vmem:[%s2824_s1 + $0x38] sm:$0xff]  ;;  %v199_v12 = vld [vmem:[%s2825_s0 + $0x368] sm:$0xff] }
   0x4   :  { %1528 = vmatpush1.bf16.msra.mxu1 %v1369_v4  ;;  %1370 = vmatpush1.bf16.msra.mxu0 %v1369_v4  ;;  %v1378_v13 = vpack.c.bf16 %v313_v11, %v312_v10  ;;  %v91_v14 = vld [vmem:[%s2825_s0 + $0x8] sm:$0xff]  ;;  %v314_v15 = vld [vmem:[%s2824_s1 + $0x40] sm:$0xff]  ;;  %v316_v18 = vld [vmem:[%s2824_s1 + $0x50] sm:$0xff] }
   0x5   :  { %1513 = vmatprep.subr.bf16.mxu1 %v1546_v0  ;;  %1371 = vmatprep.subr.bf16.mxu0 %v1546_v0  ;;  %v315_v16 = vld [vmem:[%s2824_s1 + $0x48] sm:$0xff]  ;;  %v317_v19 = vld [vmem:[%s2824_s1 + $0x58] sm:$0xff]  ;;  %v318_v21 = vld [vmem:[%s2824_s1 + $0x60] sm:$0xff] }
   0x6   :  { %556 = vmatprep.mubr.f32.mxu1 %v199_v12  ;;  %466 = vmatprep.mubr.f32.mxu0 %v91_v14  ;;  %v1381_v17 = vpack.c.bf16 %v315_v16, %v314_v15  ;;  %v1384_v20 = vpack.c.bf16 %v317_v19, %v316_v18  ;;  %v319_v22 = vld [vmem:[%s2824_s1 + $0x68] sm:$0xff]  ;;  %v320_v24 = vld [vmem:[%s2824_s1 + $0x70] sm:$0xff]  ;;  %v321_v25 = vld [vmem:[%s2824_s1 + $0x78] sm:$0xff] }
   0x7   :  { %v1387_v23 = vpack.c.bf16 %v319_v22, %v318_v21  ;;  %v1390_v26 = vpack.c.bf16 %v321_v25, %v320_v24  ;;  %v322_v27 = vld [vmem:[%s2824_s1 + $0x80] sm:$0xff]  ;;  %v323_v28 = vld [vmem:[%s2824_s1 + $0x88] sm:$0xff]  ;;  %v324_v30 = vld [vmem:[%s2824_s1 + $0x90] sm:$0xff] }
   0x8   :  { %1529 = vmatpush1.bf16.msra.mxu1 %v1372_v6  ;;  %1373 = vmatpush1.bf16.msra.mxu0 %v1372_v6  ;;  %v1393_v29 = vpack.c.bf16 %v323_v28, %v322_v27  ;;  %v325_v31 = vld [vmem:[%s2824_s1 + $0x98] sm:$0xff]  ;;  %v326_v33 = vld [vmem:[%s2824_s1 + $0xa0] sm:$0xff]  ;;  %v327_v34 = vld [vmem:[%s2824_s1 + $0xa8] sm:$0xff] }
   0x9   :  { %1514 = vmatprep.subr.bf16.mxu1 %v1546_v0  ;;  %1374 = vmatprep.subr.bf16.mxu0 %v1546_v0  ;;  %v1396_v32 = vpack.c.bf16 %v325_v31, %v324_v30  ;;  %v1399_v35 = vpack.c.bf16 %v327_v34, %v326_v33  ;;  %v328_v36 = vld [vmem:[%s2824_s1 + $0xb0] sm:$0xff]  ;;  %v329_v37 = vld [vmem:[%s2824_s1 + $0xb8] sm:$0xff]  ;;  %v330_v39 = vld [vmem:[%s2824_s1 + $0xc0] sm:$0xff] }
   0xa   :  { %v1402_v38 = vpack.c.bf16 %v329_v37, %v328_v36  ;;  %v331_v40 = vld [vmem:[%s2824_s1 + $0xc8] sm:$0xff]  ;;  %v332_v42 = vld [vmem:[%s2824_s1 + $0xd0] sm:$0xff]  ;;  %v333_v43 = vld [vmem:[%s2824_s1 + $0xd8] sm:$0xff] }
   0xb   :  { %v1405_v41 = vpack.c.bf16 %v331_v40, %v330_v39  ;;  %v1408_v44 = vpack.c.bf16 %v333_v43, %v332_v42  ;;  %v334_v45 = vld [vmem:[%s2824_s1 + $0xe0] sm:$0xff]  ;;  %v335_v46 = vld [vmem:[%s2824_s1 + $0xe8] sm:$0xff]  ;;  %v336_v48 = vld [vmem:[%s2824_s1 + $0xf0] sm:$0xff] }
   0xc   :  { %1530 = vmatpush1.bf16.msra.mxu1 %v1375_v9  ;;  %1376 = vmatpush1.bf16.msra.mxu0 %v1375_v9  ;;  %v1411_v47 = vpack.c.bf16 %v335_v46, %v334_v45  ;;  %v337_v49 = vld [vmem:[%s2824_s1 + $0xf8] sm:$0xff]  ;;  %v338_v51 = vld [vmem:[%s2824_s1 + $0x100] sm:$0xff]  ;;  %v339_v52 = vld [vmem:[%s2824_s1 + $0x108] sm:$0xff] }
   0xd   :  { %1515 = vmatprep.subr.bf16.mxu1 %v1546_v0  ;;  %1377 = vmatprep.subr.bf16.mxu0 %v1546_v0  ;;  %v1414_v50 = vpack.c.bf16 %v337_v49, %v336_v48  ;;  %v370_v53 = vld [vmem:[%s2824_s1 + $0x200] sm:$0xff]  ;;  %v371_v54 = vld [vmem:[%s2824_s1 + $0x208] sm:$0xff]  ;;  %v1417_v56 = vpack.c.bf16 %v339_v52, %v338_v51  ;;  %v205_v58 = vld [vmem:[%s2825_s0 + $0x398] sm:$0xff] }
   0xe   :  { %v198_v55 = vld [vmem:[%s2825_s0 + $0x360] sm:$0xff]  ;;  %v1465_v59 = vpack.c.bf16 %v371_v54, %v370_v53  ;;  %v340_v60 = vld [vmem:[%s2824_s1 + $0x110] sm:$0xff]  ;;  %v341_v61 = vld [vmem:[%s2824_s1 + $0x118] sm:$0xff] }
   0xf   :  { %v90_v57 = vld [vmem:[%s2825_s0] sm:$0xff]  ;;  %v97_v62 = vld [vmem:[%s2825_s0 + $0x38] sm:$0xff]  ;;  %v372_v63 = vld [vmem:[%s2824_s1 + $0x210] sm:$0xff]  ;;  %v1420_v4 = vpack.c.bf16 %v341_v61, %v340_v60 }
  0x10   :  { %1531 = vmatpush1.bf16.msra.mxu1 %v1378_v13  ;;  %1379 = vmatpush1.bf16.msra.mxu0 %v1378_v13  ;;  %v373_v1 = vld [vmem:[%s2824_s1 + $0x218] sm:$0xff]  ;;  %v204_v2 = vld [vmem:[%s2825_s0 + $0x390] sm:$0xff]  ;;  %v211_v5 = vld [vmem:[%s2825_s0 + $0x3c8] sm:$0xff] }
  0x11   :  { %1516 = vmatprep.subr.bf16.mxu1 %v1546_v0  ;;  %1380 = vmatprep.subr.bf16.mxu0 %v1546_v0  ;;  %v96_v3 = vld [vmem:[%s2825_s0 + $0x30] sm:$0xff]  ;;  %v1468_v6 = vpack.c.bf16 %v373_v1, %v372_v63  ;;  %v342_v7 = vld [vmem:[%s2824_s1 + $0x120] sm:$0xff]  ;;  %v343_v8 = vld [vmem:[%s2824_s1 + $0x128] sm:$0xff] }
  0x12   :  { %v103_v9 = vld [vmem:[%s2825_s0 + $0x68] sm:$0xff]  ;;  %v374_v10 = vld [vmem:[%s2824_s1 + $0x220] sm:$0xff]  ;;  %v1423_v14 = vpack.c.bf16 %v343_v8, %v342_v7  ;;  %v217_v15 = vld [vmem:[%s2825_s0 + $0x3f8] sm:$0xff] }
  0x13   :  { %v375_v11 = vld [vmem:[%s2824_s1 + $0x228] sm:$0xff]  ;;  %v210_v12 = vld [vmem:[%s2825_s0 + $0x3c0] sm:$0xff]  ;;  %v345_v18 = vld [vmem:[%s2824_s1 + $0x138] sm:$0xff] }
  0x14   :  { %1532 = vmatpush1.bf16.msra.mxu1 %v1381_v17  ;;  %1382 = vmatpush1.bf16.msra.mxu0 %v1381_v17  ;;  %v102_v13 = vld [vmem:[%s2825_s0 + $0x60] sm:$0xff]  ;;  %v1471_v16 = vpack.c.bf16 %v375_v11, %v374_v10  ;;  %v344_v17 = vld [vmem:[%s2824_s1 + $0x130] sm:$0xff]  ;;  %v109_v19 = vld [vmem:[%s2825_s0 + $0x98] sm:$0xff] }
  0x15   :  { %1517 = vmatprep.subr.bf16.mxu1 %v1546_v0  ;;  %1383 = vmatprep.subr.bf16.mxu0 %v1546_v0  ;;  %v377_v21 = vld [vmem:[%s2824_s1 + $0x238] sm:$0xff]  ;;  %v216_v22 = vld [vmem:[%s2825_s0 + $0x3f0] sm:$0xff]  ;;  %v1426_v24 = vpack.c.bf16 %v345_v18, %v344_v17  ;;  %v223_v25 = vld [vmem:[%s2825_s0 + $0x428] sm:$0xff] }
  0x16   :  { %v346_v27 = vld [vmem:[%s2824_s1 + $0x140] sm:$0xff]  ;;  %v347_v28 = vld [vmem:[%s2824_s1 + $0x148] sm:$0xff]  ;;  %v348_v37 = vld [vmem:[%s2824_s1 + $0x150] sm:$0xff] }
  0x17   :  { %v378_v30 = vld [vmem:[%s2824_s1 + $0x240] sm:$0xff]  ;;  %v379_v31 = vld [vmem:[%s2824_s1 + $0x248] sm:$0xff]  ;;  %v1429_v34 = vpack.c.bf16 %v347_v28, %v346_v27  ;;  %v121_v39 = vld [vmem:[%s2825_s0 + $0xf8] sm:$0xff] }
  0x18   :  { %1533 = vmatpush1.bf16.msra.mxu1 %v1384_v20  ;;  %1385 = vmatpush1.bf16.msra.mxu0 %v1384_v20  ;;  %v376_v20 = vld [vmem:[%s2824_s1 + $0x230] sm:$0xff]  ;;  %v114_v33 = vld [vmem:[%s2825_s0 + $0xc0] sm:$0xff]  ;;  %v1477_v36 = vpack.c.bf16 %v379_v31, %v378_v30  ;;  %v235_v45 = vld [vmem:[%s2825_s0 + $0x488] sm:$0xff] }
  0x19   :  { %1518 = vmatprep.subr.bf16.mxu1 %v1546_v0  ;;  %1386 = vmatprep.subr.bf16.mxu0 %v1546_v0  ;;  %v380_v40 = vld [vmem:[%s2824_s1 + $0x250] sm:$0xff]  ;;  %v351_v48 = vld [vmem:[%s2824_s1 + $0x168] sm:$0xff]  ;;  %v234_v52 = vld [vmem:[%s2825_s0 + $0x480] sm:$0xff] }
  0x1a   :  { %v228_v42 = vld [vmem:[%s2825_s0 + $0x450] sm:$0xff]  ;;  %v127_v49 = vld [vmem:[%s2825_s0 + $0x128] sm:$0xff]  ;;  %v126_v53 = vld [vmem:[%s2825_s0 + $0x120] sm:$0xff] }
  0x1b   :  { %v120_v43 = vld [vmem:[%s2825_s0 + $0xf0] sm:$0xff]  ;;  %v383_v51 = vld [vmem:[%s2824_s1 + $0x268] sm:$0xff]  ;;  %v385_v61 = vld [vmem:[%s2824_s1 + $0x278] sm:$0xff] }
  0x1c   :  { %1534 = vmatpush1.bf16.msra.mxu1 %v1387_v23  ;;  %1388 = vmatpush1.bf16.msra.mxu0 %v1387_v23  ;;  %v108_v23 = vld [vmem:[%s2825_s0 + $0x90] sm:$0xff]  ;;  %v247_v1 = vld [vmem:[%s2825_s0 + $0x4e8] sm:$0xff]  ;;  %v386_v7 = vld [vmem:[%s2824_s1 + $0x280] sm:$0xff] }
  0x1d   :  { %1519 = vmatprep.subr.bf16.mxu1 %v1546_v0  ;;  %1389 = vmatprep.subr.bf16.mxu0 %v1546_v0  ;;  %v384_v60 = vld [vmem:[%s2824_s1 + $0x270] sm:$0xff]  ;;  %v387_v8 = vld [vmem:[%s2824_s1 + $0x288] sm:$0xff]  ;;  %v138_v10 = vld [vmem:[%s2825_s0 + $0x180] sm:$0xff] }
  0x1e   :  { %v132_v63 = vld [vmem:[%s2825_s0 + $0x150] sm:$0xff]  ;;  %v253_v11 = vld [vmem:[%s2825_s0 + $0x518] sm:$0xff]  ;;  %v390_v27 = vld [vmem:[%s2824_s1 + $0x2a0] sm:$0xff] }
  0x1f   :  { %v388_v17 = vld [vmem:[%s2824_s1 + $0x290] sm:$0xff]  ;;  %v389_v18 = vld [vmem:[%s2824_s1 + $0x298] sm:$0xff]  ;;  %v391_v28 = vld [vmem:[%s2824_s1 + $0x2a8] sm:$0xff] }
  0x20   :  { %1535 = vmatpush1.bf16.msra.mxu1 %v1390_v26  ;;  %1391 = vmatpush1.bf16.msra.mxu0 %v1390_v26  ;;  %v1474_v26 = vpack.c.bf16 %v377_v21, %v376_v20  ;;  %v144_v20 = vld [vmem:[%s2825_s0 + $0x1b0] sm:$0xff]  ;;  %v259_v21 = vld [vmem:[%s2825_s0 + $0x548] sm:$0xff]  ;;  %v150_v30 = vld [vmem:[%s2825_s0 + $0x1e0] sm:$0xff] }
  0x21   :  { %1520 = vmatprep.subr.bf16.mxu1 %v1546_v0  ;;  %1392 = vmatprep.subr.bf16.mxu0 %v1546_v0  ;;  %v265_v31 = vld [vmem:[%s2825_s0 + $0x578] sm:$0xff] }
  0x24   :  { %1536 = vmatpush1.bf16.msra.mxu1 %v1393_v29  ;;  %1394 = vmatpush1.bf16.msra.mxu0 %v1393_v29  ;;  %v115_v29 = vld [vmem:[%s2825_s0 + $0xc8] sm:$0xff] }
  0x25   :  { %1521 = vmatprep.subr.bf16.mxu1 %v1546_v0  ;;  %1395 = vmatprep.subr.bf16.mxu0 %v1546_v0 }
  0x28   :  { %1537 = vmatpush1.bf16.msra.mxu1 %v1396_v32  ;;  %1397 = vmatpush1.bf16.msra.mxu0 %v1396_v32  ;;  %v222_v32 = vld [vmem:[%s2825_s0 + $0x420] sm:$0xff] }
  0x29   :  { %1522 = vmatprep.subr.bf16.mxu1 %v1546_v0  ;;  %1398 = vmatprep.subr.bf16.mxu0 %v1546_v0 }
  0x2c   :  { %1538 = vmatpush1.bf16.msra.mxu1 %v1399_v35  ;;  %1400 = vmatpush1.bf16.msra.mxu0 %v1399_v35  ;;  %v229_v35 = vld [vmem:[%s2825_s0 + $0x458] sm:$0xff] }
  0x2d   :  { %1523 = vmatprep.subr.bf16.mxu1 %v1546_v0  ;;  %1401 = vmatprep.subr.bf16.mxu0 %v1546_v0 }
  0x30   :  { %1539 = vmatpush1.bf16.msra.mxu1 %v1402_v38  ;;  %1403 = vmatpush1.bf16.msra.mxu0 %v1402_v38  ;;  %v349_v38 = vld [vmem:[%s2824_s1 + $0x158] sm:$0xff] }
  0x31   :  { %1524 = vmatprep.subr.bf16.mxu1 %v1546_v0  ;;  %1404 = vmatprep.subr.bf16.mxu0 %v1546_v0 }
  0x34   :  { %1540 = vmatpush1.bf16.msra.mxu1 %v1405_v41  ;;  %1406 = vmatpush1.bf16.msra.mxu0 %v1405_v41  ;;  %v381_v41 = vld [vmem:[%s2824_s1 + $0x258] sm:$0xff] }
  0x35   :  { %1525 = vmatprep.subr.bf16.mxu1 %v1546_v0  ;;  %1407 = vmatprep.subr.bf16.mxu0 %v1546_v0  ;;  %v1480_v46 = vpack.c.bf16 %v381_v41, %v380_v40  ;;  %v156_v40 = vld [vmem:[%s2825_s0 + $0x210] sm:$0xff]  ;;  %v271_v41 = vld [vmem:[%s2825_s0 + $0x5a8] sm:$0xff] }
  0x38   :  { %1541 = vmatpush1.bf16.msra.mxu1 %v1408_v44  ;;  %1409 = vmatpush1.bf16.msra.mxu0 %v1408_v44  ;;  %v1432_v44 = vpack.c.bf16 %v349_v38, %v348_v37  ;;  %v392_v37 = vld [vmem:[%s2824_s1 + $0x2b0] sm:$0xff]  ;;  %v393_v38 = vld [vmem:[%s2824_s1 + $0x2b8] sm:$0xff] }
  0x39   :  { %1526 = vmatprep.subr.bf16.mxu1 %v1546_v0  ;;  %1410 = vmatprep.subr.bf16.mxu0 %v1546_v0 }
  0x3c   :  { %1542 = vmatpush1.bf16.msra.mxu1 %v1411_v47  ;;  %1412 = vmatpush1.bf16.msra.mxu0 %v1411_v47  ;;  %v350_v47 = vld [vmem:[%s2824_s1 + $0x160] sm:$0xff] }
  0x3d   :  { %1527 = vmatprep.subr.bf16.mxu1 %v1546_v0  ;;  %1413 = vmatprep.subr.bf16.mxu0 %v1546_v0  ;;  %v1435_v54 = vpack.c.bf16 %v351_v48, %v350_v47  ;;  %v394_v47 = vld [vmem:[%s2824_s1 + $0x2c0] sm:$0xff]  ;;  %v395_v48 = vld [vmem:[%s2824_s1 + $0x2c8] sm:$0xff] }
  0x40   :  { %1543 = vmatpush1.bf16.msra.mxu1 %v1414_v50  ;;  %1415 = vmatpush1.bf16.msra.mxu0 %v1414_v50  ;;  %v382_v50 = vld [vmem:[%s2824_s1 + $0x260] sm:$0xff] }
  0x41   :  { %1416 = vmatprep.subr.bf16.mxu1 %v1546_v0  ;;  %1464 = vmatprep.subr.bf16.mxu0 %v1546_v0 }
  0x43   :  { %557 = vmatmul.mubr.f32.vlgmr.msra.gmra.mrb[0].mxu1 %v198_v55  ;;  %467 = vmatmul.mubr.f32.vlgmr.msra.gmra.mrb[0].mxu0 %v90_v57  ;;  %v241_v55 = vld [vmem:[%s2825_s0 + $0x4b8] sm:$0xff]  ;;  %v1483_v57 = vpack.c.bf16 %v383_v51, %v382_v50  ;;  %v162_v50 = vld [vmem:[%s2825_s0 + $0x240] sm:$0xff] }
  0x44   :  { %1418 = vmatpush1.bf16.msra.mxu1 %v1417_v56  ;;  %561 = vmatprep.mubr.f32.mxu1 %v205_v58  ;;  %v133_v56 = vld [vmem:[%s2825_s0 + $0x158] sm:$0xff]  ;;  %v352_v58 = vld [vmem:[%s2824_s1 + $0x170] sm:$0xff] }
  0x45   :  { %1466 = vmatpush1.bf16.msra.mxu0 %v1465_v59  ;;  %471 = vmatprep.mubr.f32.mxu0 %v97_v62  ;;  %v353_v59 = vld [vmem:[%s2824_s1 + $0x178] sm:$0xff]  ;;  %v240_v62 = vld [vmem:[%s2825_s0 + $0x4b0] sm:$0xff] }
  0x46   :  { %1419 = vmatprep.subr.bf16.mxu1 %v1546_v0  ;;  %1467 = vmatprep.subr.bf16.mxu0 %v1546_v0  ;;  %v277_v51 = vld [vmem:[%s2825_s0 + $0x5d8] sm:$0xff] }
  0x47   :  { %562 = vmatmul.mubr.f32.gmra.mrb[2].mxu1 %v204_v2  ;;  %472 = vmatmul.mubr.f32.gmra.mrb[2].mxu0 %v96_v3  ;;  %v139_v2 = vld [vmem:[%s2825_s0 + $0x188] sm:$0xff]  ;;  %v1438_v3 = vpack.c.bf16 %v353_v59, %v352_v58  ;;  %v397_v58 = vld [vmem:[%s2824_s1 + $0x2d8] sm:$0xff]  ;;  %v276_v59 = vld [vmem:[%s2825_s0 + $0x5d0] sm:$0xff] }
  0x48   :  { %1421 = vmatpush1.bf16.msra.mxu1 %v1420_v4  ;;  %566 = vmatprep.mubr.f32.mxu1 %v211_v5  ;;  %v1486_v4 = vpack.c.bf16 %v385_v61, %v384_v60  ;;  %v354_v5 = vld [vmem:[%s2824_s1 + $0x180] sm:$0xff]  ;;  %v168_v60 = vld [vmem:[%s2825_s0 + $0x270] sm:$0xff]  ;;  %v283_v61 = vld [vmem:[%s2825_s0 + $0x608] sm:$0xff] }
  0x49   :  { %1469 = vmatpush1.bf16.msra.mxu0 %v1468_v6  ;;  %476 = vmatprep.mubr.f32.mxu0 %v103_v9  ;;  %v355_v6 = vld [vmem:[%s2824_s1 + $0x188] sm:$0xff]  ;;  %v246_v9 = vld [vmem:[%s2825_s0 + $0x4e0] sm:$0xff] }
  0x4a   :  { %1422 = vmatprep.subr.bf16.mxu1 %v1546_v0  ;;  %1470 = vmatprep.subr.bf16.mxu0 %v1546_v0 }
  0x4b   :  { %567 = vmatmul.mubr.f32.gmra.mrb[4].mxu1 %v210_v12  ;;  %477 = vmatmul.mubr.f32.gmra.mrb[4].mxu0 %v102_v13  ;;  %v145_v12 = vld [vmem:[%s2825_s0 + $0x1b8] sm:$0xff]  ;;  %v1441_v13 = vpack.c.bf16 %v355_v6, %v354_v5  ;;  %v399_v5 = vld [vmem:[%s2824_s1 + $0x2e8] sm:$0xff]  ;;  %v282_v6 = vld [vmem:[%s2825_s0 + $0x600] sm:$0xff] }
  0x4c   :  { %1424 = vmatpush1.bf16.msra.mxu1 %v1423_v14  ;;  %571 = vmatprep.mubr.f32.mxu1 %v217_v15  ;;  %v1489_v14 = vpack.c.bf16 %v387_v8, %v386_v7  ;;  %v356_v15 = vld [vmem:[%s2824_s1 + $0x190] sm:$0xff]  ;;  %v174_v7 = vld [vmem:[%s2825_s0 + $0x2a0] sm:$0xff]  ;;  %v289_v8 = vld [vmem:[%s2825_s0 + $0x638] sm:$0xff] }
  0x4d   :  { %1472 = vmatpush1.bf16.msra.mxu0 %v1471_v16  ;;  %481 = vmatprep.mubr.f32.mxu0 %v109_v19  ;;  %v357_v16 = vld [vmem:[%s2824_s1 + $0x198] sm:$0xff]  ;;  %v252_v19 = vld [vmem:[%s2825_s0 + $0x510] sm:$0xff] }
  0x4e   :  { %1425 = vmatprep.subr.bf16.mxu1 %v1546_v0  ;;  %1473 = vmatprep.subr.bf16.mxu0 %v1546_v0 }
  0x4f   :  { %572 = vmatmul.mubr.f32.gmra.mrb[6].mxu1 %v216_v22  ;;  %482 = vmatmul.mubr.f32.gmra.mrb[6].mxu0 %v108_v23  ;;  %v151_v22 = vld [vmem:[%s2825_s0 + $0x1e8] sm:$0xff]  ;;  %v1444_v23 = vpack.c.bf16 %v357_v16, %v356_v15  ;;  %v401_v15 = vld [vmem:[%s2824_s1 + $0x2f8] sm:$0xff]  ;;  %v288_v16 = vld [vmem:[%s2825_s0 + $0x630] sm:$0xff] }
  0x50   :  { %576 = vmatprep.mubr.f32.mxu1 %v223_v25  ;;  %1427 = vmatpush1.bf16.msra.mxu1 %v1426_v24  ;;  %v1492_v24 = vpack.c.bf16 %v389_v18, %v388_v17  ;;  %v358_v25 = vld [vmem:[%s2824_s1 + $0x1a0] sm:$0xff]  ;;  %v180_v17 = vld [vmem:[%s2825_s0 + $0x2d0] sm:$0xff]  ;;  %v295_v18 = vld [vmem:[%s2825_s0 + $0x668] sm:$0xff] }
  0x51   :  { %486 = vmatprep.mubr.f32.mxu0 %v115_v29  ;;  %1475 = vmatpush1.bf16.msra.mxu0 %v1474_v26  ;;  %v359_v26 = vld [vmem:[%s2824_s1 + $0x1a8] sm:$0xff]  ;;  %v258_v29 = vld [vmem:[%s2825_s0 + $0x540] sm:$0xff] }
  0x52   :  { %1428 = vmatprep.subr.bf16.mxu1 %v1546_v0  ;;  %1476 = vmatprep.subr.bf16.mxu0 %v1546_v0 }
  0x53   :  { %577 = vmatmul.mubr.f32.gmra.mrb[8].mxu1 %v222_v32  ;;  %487 = vmatmul.mubr.f32.gmra.mrb[8].mxu0 %v114_v33  ;;  %v157_v32 = vld [vmem:[%s2825_s0 + $0x218] sm:$0xff]  ;;  %v1447_v33 = vpack.c.bf16 %v359_v26, %v358_v25  ;;  %v300_v25 = vld [vmem:[%s2825_s0 + $0x690] sm:$0xff] }
  0x54   :  { %581 = vmatprep.mubr.f32.mxu1 %v229_v35  ;;  %1430 = vmatpush1.bf16.msra.mxu1 %v1429_v34  ;;  %v1495_v34 = vpack.c.bf16 %v391_v28, %v390_v27  ;;  %v360_v35 = vld [vmem:[%s2824_s1 + $0x1b0] sm:$0xff]  ;;  %v93_v27 = vld [vmem:[%s2825_s0 + $0x18] sm:$0xff]  ;;  %v95_v28 = vld [vmem:[%s2825_s0 + $0x28] sm:$0xff] }
  0x55   :  { %491 = vmatprep.mubr.f32.mxu0 %v121_v39  ;;  %1478 = vmatpush1.bf16.msra.mxu0 %v1477_v36  ;;  %v361_v36 = vld [vmem:[%s2824_s1 + $0x1b8] sm:$0xff]  ;;  %v264_v39 = vld [vmem:[%s2825_s0 + $0x570] sm:$0xff] }
  0x56   :  { %1431 = vmatprep.subr.bf16.mxu1 %v1546_v0  ;;  %1479 = vmatprep.subr.bf16.mxu0 %v1546_v0  ;;  %v192_v26 = vld [vmem:[%s2825_s0 + $0x330] sm:$0xff] }
  0x57   :  { %582 = vmatmul.mubr.f32.gmra.mrb[10].mxu1 %v228_v42  ;;  %492 = vmatmul.mubr.f32.gmra.mrb[10].mxu0 %v120_v43  ;;  %v163_v42 = vld [vmem:[%s2825_s0 + $0x248] sm:$0xff]  ;;  %v1450_v43 = vpack.c.bf16 %v361_v36, %v360_v35  ;;  %v105_v35 = vld [vmem:[%s2825_s0 + $0x78] sm:$0xff] }
  0x58   :  { %586 = vmatprep.mubr.f32.mxu1 %v235_v45  ;;  %1433 = vmatpush1.bf16.msra.mxu1 %v1432_v44  ;;  %v1498_v44 = vpack.c.bf16 %v393_v38, %v392_v37  ;;  %v362_v45 = vld [vmem:[%s2824_s1 + $0x1c0] sm:$0xff]  ;;  %v107_v36 = vld [vmem:[%s2825_s0 + $0x88] sm:$0xff]  ;;  %v104_v37 = vld [vmem:[%s2825_s0 + $0x70] sm:$0xff] }
  0x59   :  { %496 = vmatprep.mubr.f32.mxu0 %v127_v49  ;;  %1481 = vmatpush1.bf16.msra.mxu0 %v1480_v46  ;;  %v363_v46 = vld [vmem:[%s2824_s1 + $0x1c8] sm:$0xff]  ;;  %v270_v49 = vld [vmem:[%s2825_s0 + $0x5a0] sm:$0xff] }
  0x5a   :  { %1434 = vmatprep.subr.bf16.mxu1 %v1546_v0  ;;  %1482 = vmatprep.subr.bf16.mxu0 %v1546_v0  ;;  %v106_v38 = vld [vmem:[%s2825_s0 + $0x80] sm:$0xff] }
  0x5b   :  { %587 = vmatmul.mubr.f32.gmra.mrb[12].mxu1 %v234_v52  ;;  %497 = vmatmul.mubr.f32.gmra.mrb[12].mxu0 %v126_v53  ;;  %v169_v52 = vld [vmem:[%s2825_s0 + $0x278] sm:$0xff]  ;;  %v1453_v53 = vpack.c.bf16 %v363_v46, %v362_v45  ;;  %v116_v45 = vld [vmem:[%s2825_s0 + $0xd0] sm:$0xff]  ;;  %v118_v46 = vld [vmem:[%s2825_s0 + $0xe0] sm:$0xff] }
  0x5c   :  { %591 = vmatprep.mubr.f32.mxu1 %v241_v55  ;;  %1436 = vmatpush1.bf16.msra.mxu1 %v1435_v54  ;;  %v1501_v54 = vpack.c.bf16 %v395_v48, %v394_v47  ;;  %v364_v55 = vld [vmem:[%s2824_s1 + $0x1d0] sm:$0xff]  ;;  %v123_v47 = vld [vmem:[%s2825_s0 + $0x108] sm:$0xff]  ;;  %v125_v48 = vld [vmem:[%s2825_s0 + $0x118] sm:$0xff] }
  0x5d   :  { %501 = vmatprep.mubr.f32.mxu0 %v133_v56  ;;  %1484 = vmatpush1.bf16.msra.mxu0 %v1483_v57  ;;  %v365_v56 = vld [vmem:[%s2824_s1 + $0x1d8] sm:$0xff]  ;;  %v396_v57 = vld [vmem:[%s2824_s1 + $0x2d0] sm:$0xff] }
  0x5e   :  { %1437 = vmatprep.subr.bf16.mxu1 %v1546_v0  ;;  %1485 = vmatprep.subr.bf16.mxu0 %v1546_v0 }
  0x5f   :  { %592 = vmatmul.mubr.f32.gmra.mrb[14].mxu1 %v240_v62  ;;  %502 = vmatmul.mubr.f32.gmra.mrb[14].mxu0 %v132_v63  ;;  %v175_v62 = vld [vmem:[%s2825_s0 + $0x2a8] sm:$0xff]  ;;  %v1456_v63 = vpack.c.bf16 %v365_v56, %v364_v55  ;;  %v137_v56 = vld [vmem:[%s2825_s0 + $0x178] sm:$0xff] }
  0x60   :  { %596 = vmatprep.mubr.f32.mxu1 %v247_v1  ;;  %506 = vmatprep.mubr.f32.mxu0 %v139_v2  ;;  %v1504_v1 = vpack.c.bf16 %v397_v58, %v396_v57  ;;  %v366_v2 = vld [vmem:[%s2824_s1 + $0x1e0] sm:$0xff]  ;;  %v135_v55 = vld [vmem:[%s2825_s0 + $0x168] sm:$0xff]  ;;  %v136_v58 = vld [vmem:[%s2825_s0 + $0x170] sm:$0xff] }
  0x61   :  { %1439 = vmatpush1.bf16.msra.mxu1 %v1438_v3  ;;  %1487 = vmatpush1.bf16.msra.mxu0 %v1486_v4  ;;  %v367_v3 = vld [vmem:[%s2824_s1 + $0x1e8] sm:$0xff]  ;;  %v398_v4 = vld [vmem:[%s2824_s1 + $0x2e0] sm:$0xff] }
  0x62   :  { %1440 = vmatprep.subr.bf16.mxu1 %v1546_v0  ;;  %1488 = vmatprep.subr.bf16.mxu0 %v1546_v0  ;;  %v134_v57 = vld [vmem:[%s2825_s0 + $0x160] sm:$0xff] }
  0x63   :  { %597 = vmatmul.mubr.f32.gmra.mrb[16].mxu1 %v246_v9  ;;  %507 = vmatmul.mubr.f32.gmra.mrb[16].mxu0 %v138_v10  ;;  %v181_v9 = vld [vmem:[%s2825_s0 + $0x2d8] sm:$0xff]  ;;  %v1459_v10 = vpack.c.bf16 %v367_v3, %v366_v2  ;;  %v146_v2 = vld [vmem:[%s2825_s0 + $0x1c0] sm:$0xff]  ;;  %v148_v3 = vld [vmem:[%s2825_s0 + $0x1d0] sm:$0xff] }
  0x64   :  { %601 = vmatprep.mubr.f32.mxu1 %v253_v11  ;;  %511 = vmatprep.mubr.f32.mxu0 %v145_v12  ;;  %v1507_v11 = vpack.c.bf16 %v399_v5, %v398_v4  ;;  %v368_v12 = vld [vmem:[%s2824_s1 + $0x1f0] sm:$0xff]  ;;  %v153_v4 = vld [vmem:[%s2825_s0 + $0x1f8] sm:$0xff]  ;;  %v155_v5 = vld [vmem:[%s2825_s0 + $0x208] sm:$0xff] }
  0x65   :  { %1442 = vmatpush1.bf16.msra.mxu1 %v1441_v13  ;;  %1490 = vmatpush1.bf16.msra.mxu0 %v1489_v14  ;;  %v369_v13 = vld [vmem:[%s2824_s1 + $0x1f8] sm:$0xff]  ;;  %v400_v14 = vld [vmem:[%s2824_s1 + $0x2f0] sm:$0xff] }
  0x66   :  { %1443 = vmatprep.subr.bf16.mxu1 %v1546_v0  ;;  %1491 = vmatprep.subr.bf16.mxu0 %v1546_v0 }
  0x67   :  { %602 = vmatmul.mubr.f32.gmra.mrb[18].mxu1 %v252_v19  ;;  %512 = vmatmul.mubr.f32.gmra.mrb[18].mxu0 %v144_v20  ;;  %v187_v19 = vld [vmem:[%s2825_s0 + $0x308] sm:$0xff]  ;;  %v1462_v20 = vpack.c.bf16 %v369_v13, %v368_v12  ;;  %v165_v12 = vld [vmem:[%s2825_s0 + $0x258] sm:$0xff] }
  0x68   :  { %606 = vmatprep.mubr.f32.mxu1 %v259_v21  ;;  %516 = vmatprep.mubr.f32.mxu0 %v151_v22  ;;  %v1510_v21 = vpack.c.bf16 %v401_v15, %v400_v14  ;;  %v294_v22 = vld [vmem:[%s2825_s0 + $0x660] sm:$0xff]  ;;  %v167_v13 = vld [vmem:[%s2825_s0 + $0x268] sm:$0xff]  ;;  %v164_v14 = vld [vmem:[%s2825_s0 + $0x250] sm:$0xff] }
  0x69   :  { %1445 = vmatpush1.bf16.msra.mxu1 %v1444_v23  ;;  %1493 = vmatpush1.bf16.msra.mxu0 %v1492_v24  ;;  %v186_v23 = vld [vmem:[%s2825_s0 + $0x300] sm:$0xff]  ;;  %v301_v24 = vld [vmem:[%s2825_s0 + $0x698] sm:$0xff] }
  0x6a   :  { %1446 = vmatprep.subr.bf16.mxu1 %v1546_v0  ;;  %1494 = vmatprep.subr.bf16.mxu0 %v1546_v0  ;;  %v166_v15 = vld [vmem:[%s2825_s0 + $0x260] sm:$0xff] }
  0x6b   :  { %607 = vmatmul.mubr.f32.gmra.mrb[20].mxu1 %v258_v29  ;;  %517 = vmatmul.mubr.f32.gmra.mrb[20].mxu0 %v150_v30  ;;  %v92_v29 = vld [vmem:[%s2825_s0 + $0x10] sm:$0xff]  ;;  %v94_v30 = vld [vmem:[%s2825_s0 + $0x20] sm:$0xff] }
  0x6c   :  { %611 = vmatprep.mubr.f32.mxu1 %v265_v31  ;;  %521 = vmatprep.mubr.f32.mxu0 %v157_v32  ;;  %v99_v31 = vld [vmem:[%s2825_s0 + $0x48] sm:$0xff]  ;;  %v101_v32 = vld [vmem:[%s2825_s0 + $0x58] sm:$0xff] }
  0x6d   :  { %1448 = vmatpush1.bf16.msra.mxu1 %v1447_v33  ;;  %1496 = vmatpush1.bf16.msra.mxu0 %v1495_v34  ;;  %v98_v33 = vld [vmem:[%s2825_s0 + $0x40] sm:$0xff]  ;;  %v100_v34 = vld [vmem:[%s2825_s0 + $0x50] sm:$0xff] }
  0x6e   :  { %1449 = vmatprep.subr.bf16.mxu1 %v1546_v0  ;;  %1497 = vmatprep.subr.bf16.mxu0 %v1546_v0 }
  0x6f   :  { %612 = vmatmul.mubr.f32.gmra.mrb[22].mxu1 %v264_v39  ;;  %522 = vmatmul.mubr.f32.gmra.mrb[22].mxu0 %v156_v40  ;;  %v111_v39 = vld [vmem:[%s2825_s0 + $0xa8] sm:$0xff]  ;;  %v113_v40 = vld [vmem:[%s2825_s0 + $0xb8] sm:$0xff] }
  0x70   :  { %616 = vmatprep.mubr.f32.mxu1 %v271_v41  ;;  %526 = vmatprep.mubr.f32.mxu0 %v163_v42  ;;  %v110_v41 = vld [vmem:[%s2825_s0 + $0xa0] sm:$0xff]  ;;  %v112_v42 = vld [vmem:[%s2825_s0 + $0xb0] sm:$0xff] }
  0x71   :  { %1451 = vmatpush1.bf16.msra.mxu1 %v1450_v43  ;;  %1499 = vmatpush1.bf16.msra.mxu0 %v1498_v44  ;;  %v117_v43 = vld [vmem:[%s2825_s0 + $0xd8] sm:$0xff]  ;;  %v119_v44 = vld [vmem:[%s2825_s0 + $0xe8] sm:$0xff] }
  0x72   :  { %1452 = vmatprep.subr.bf16.mxu1 %v1546_v0  ;;  %1500 = vmatprep.subr.bf16.mxu0 %v1546_v0 }
  0x73   :  { %617 = vmatmul.mubr.f32.gmra.mrb[24].mxu1 %v270_v49  ;;  %527 = vmatmul.mubr.f32.gmra.mrb[24].mxu0 %v162_v50  ;;  %v122_v49 = vld [vmem:[%s2825_s0 + $0x100] sm:$0xff]  ;;  %v124_v50 = vld [vmem:[%s2825_s0 + $0x110] sm:$0xff] }
  0x74   :  { %621 = vmatprep.mubr.f32.mxu1 %v277_v51  ;;  %531 = vmatprep.mubr.f32.mxu0 %v169_v52  ;;  %v129_v51 = vld [vmem:[%s2825_s0 + $0x138] sm:$0xff]  ;;  %v131_v52 = vld [vmem:[%s2825_s0 + $0x148] sm:$0xff] }
  0x75   :  { %1454 = vmatpush1.bf16.msra.mxu1 %v1453_v53  ;;  %1502 = vmatpush1.bf16.msra.mxu0 %v1501_v54  ;;  %v128_v53 = vld [vmem:[%s2825_s0 + $0x130] sm:$0xff]  ;;  %v130_v54 = vld [vmem:[%s2825_s0 + $0x140] sm:$0xff] }
  0x76   :  { %1455 = vmatprep.subr.bf16.mxu1 %v1546_v0  ;;  %1503 = vmatprep.subr.bf16.mxu0 %v1546_v0 }
  0x77   :  { %622 = vmatmul.mubr.f32.gmra.mrb[26].mxu1 %v276_v59  ;;  %532 = vmatmul.mubr.f32.gmra.mrb[26].mxu0 %v168_v60  ;;  %v141_v59 = vld [vmem:[%s2825_s0 + $0x198] sm:$0xff]  ;;  %v143_v60 = vld [vmem:[%s2825_s0 + $0x1a8] sm:$0xff] }
  0x78   :  { %626 = vmatprep.mubr.f32.mxu1 %v283_v61  ;;  %536 = vmatprep.mubr.f32.mxu0 %v175_v62  ;;  %v140_v61 = vld [vmem:[%s2825_s0 + $0x190] sm:$0xff]  ;;  %v142_v62 = vld [vmem:[%s2825_s0 + $0x1a0] sm:$0xff] }
  0x79   :  { %1457 = vmatpush1.bf16.msra.mxu1 %v1456_v63  ;;  %1505 = vmatpush1.bf16.msra.mxu0 %v1504_v1  ;;  %v147_v63 = vld [vmem:[%s2825_s0 + $0x1c8] sm:$0xff]  ;;  %v149_v1 = vld [vmem:[%s2825_s0 + $0x1d8] sm:$0xff] }
  0x7a   :  { %1458 = vmatprep.subr.bf16.mxu1 %v1546_v0  ;;  %1506 = vmatprep.subr.bf16.mxu0 %v1546_v0 }
  0x7b   :  { %627 = vmatmul.mubr.f32.gmra.mrb[28].mxu1 %v282_v6  ;;  %537 = vmatmul.mubr.f32.gmra.mrb[28].mxu0 %v174_v7  ;;  %v152_v6 = vld [vmem:[%s2825_s0 + $0x1f0] sm:$0xff]  ;;  %v154_v7 = vld [vmem:[%s2825_s0 + $0x200] sm:$0xff] }
  0x7c   :  { %631 = vmatprep.mubr.f32.mxu1 %v289_v8  ;;  %541 = vmatprep.mubr.f32.mxu0 %v181_v9  ;;  %v159_v8 = vld [vmem:[%s2825_s0 + $0x228] sm:$0xff]  ;;  %v161_v9 = vld [vmem:[%s2825_s0 + $0x238] sm:$0xff] }
  0x7d   :  { %1460 = vmatpush1.bf16.msra.mxu1 %v1459_v10  ;;  %1508 = vmatpush1.bf16.msra.mxu0 %v1507_v11  ;;  %v158_v10 = vld [vmem:[%s2825_s0 + $0x220] sm:$0xff]  ;;  %v160_v11 = vld [vmem:[%s2825_s0 + $0x230] sm:$0xff] }
  0x7e   :  { %1461 = vmatprep.subr.bf16.mxu1 %v1546_v0  ;;  %1509 = vmatprep.subr.bf16.mxu0 %v1546_v0  ;;  %v193_v0 = vld [vmem:[%s2825_s0 + $0x338] sm:$0xff] }
  0x7f   :  { %632 = vmatmul.mubr.f32.gmra.mrb[30].mxu1 %v288_v16  ;;  %542 = vmatmul.mubr.f32.gmra.mrb[30].mxu0 %v180_v17  ;;  %v171_v16 = vld [vmem:[%s2825_s0 + $0x288] sm:$0xff]  ;;  %v173_v17 = vld [vmem:[%s2825_s0 + $0x298] sm:$0xff] }
  0x80   :  { %636 = vmatprep.mubr.f32.mxu1 %v295_v18  ;;  %546 = vmatprep.mubr.f32.mxu0 %v187_v19  ;;  %v170_v18 = vld [vmem:[%s2825_s0 + $0x280] sm:$0xff]  ;;  %v172_v19 = vld [vmem:[%s2825_s0 + $0x290] sm:$0xff] }
  0x81   :  { %1463 = vmatpush1.bf16.msra.mxu1 %v1462_v20  ;;  %1511 = vmatpush1.bf16.msra.mxu0 %v1510_v21  ;;  %v177_v20 = vld [vmem:[%s2825_s0 + $0x2b8] sm:$0xff]  ;;  %v179_v21 = vld [vmem:[%s2825_s0 + $0x2c8] sm:$0xff] }
  0x83   :  { %637 = vmatmul.mubr.f32.gmra.mrb[32].mxu1 %v294_v22  ;;  %547 = vmatmul.mubr.f32.gmra.mrb[32].mxu0 %v186_v23  ;;  %v176_v22 = vld [vmem:[%s2825_s0 + $0x2b0] sm:$0xff]  ;;  %v178_v23 = vld [vmem:[%s2825_s0 + $0x2c0] sm:$0xff] }
  0x84   :  { %641 = vmatprep.mubr.f32.mxu1 %v301_v24  ;;  %551 = vmatprep.mubr.f32.mxu0 %v193_v0  ;;  %v183_v24 = vld [vmem:[%s2825_s0 + $0x2e8] sm:$0xff]  ;;  %v185_v0 = vld [vmem:[%s2825_s0 + $0x2f8] sm:$0xff] }
  0x87   :  { %642 = vmatmul.mubr.f32.gmra.mrb[34].mxu1 %v300_v25  ;;  %552 = vmatmul.mubr.f32.gmra.mrb[34].mxu0 %v192_v26  ;;  %v182_v25 = vld [vmem:[%s2825_s0 + $0x2e0] sm:$0xff]  ;;  %v184_v26 = vld [vmem:[%s2825_s0 + $0x2f0] sm:$0xff] }
  0x88   :  { %711 = vmatprep.mubr.f32.mxu1 %v93_v27  ;;  %956 = vmatprep.mubr.f32.mxu0 %v95_v28  ;;  %v189_v27 = vld [vmem:[%s2825_s0 + $0x318] sm:$0xff]  ;;  %v191_v28 = vld [vmem:[%s2825_s0 + $0x328] sm:$0xff] }
  0x8b   :  { %712 = vmatmul.mubr.f32.vlgmr.msra.gmra.mrb[36].mxu1 %v92_v29  ;;  %957 = vmatmul.mubr.f32.vlgmr.msra.gmra.mrb[36].mxu0 %v94_v30  ;;  %v188_v29 = vld [vmem:[%s2825_s0 + $0x310] sm:$0xff]  ;;  %v190_v30 = vld [vmem:[%s2825_s0 + $0x320] sm:$0xff] }
  0x8c   :  { %716 = vmatprep.mubr.f32.mxu1 %v99_v31  ;;  %961 = vmatprep.mubr.f32.mxu0 %v101_v32  ;;  %v195_v31 = vld [vmem:[%s2825_s0 + $0x348] sm:$0xff]  ;;  %v197_v32 = vld [vmem:[%s2825_s0 + $0x358] sm:$0xff] }
  0x8f   :  { %717 = vmatmul.mubr.f32.gmra.mrb[38].mxu1 %v98_v33  ;;  %962 = vmatmul.mubr.f32.gmra.mrb[38].mxu0 %v100_v34  ;;  %v194_v33 = vld [vmem:[%s2825_s0 + $0x340] sm:$0xff]  ;;  %v196_v34 = vld [vmem:[%s2825_s0 + $0x350] sm:$0xff] }
  0x90   :  { %721 = vmatprep.mubr.f32.mxu1 %v105_v35  ;;  %966 = vmatprep.mubr.f32.mxu0 %v107_v36  ;;  %v201_v35 = vld [vmem:[%s2825_s0 + $0x378] sm:$0xff]  ;;  %v203_v36 = vld [vmem:[%s2825_s0 + $0x388] sm:$0xff] }
  0x93   :  { %722 = vmatmul.mubr.f32.gmra.mrb[40].mxu1 %v104_v37  ;;  %967 = vmatmul.mubr.f32.gmra.mrb[40].mxu0 %v106_v38  ;;  %v200_v37 = vld [vmem:[%s2825_s0 + $0x370] sm:$0xff]  ;;  %v202_v38 = vld [vmem:[%s2825_s0 + $0x380] sm:$0xff] }
  0x94   :  { %726 = vmatprep.mubr.f32.mxu1 %v111_v39  ;;  %971 = vmatprep.mubr.f32.mxu0 %v113_v40  ;;  %v207_v39 = vld [vmem:[%s2825_s0 + $0x3a8] sm:$0xff]  ;;  %v209_v40 = vld [vmem:[%s2825_s0 + $0x3b8] sm:$0xff] }
  0x97   :  { %727 = vmatmul.mubr.f32.gmra.mrb[42].mxu1 %v110_v41  ;;  %972 = vmatmul.mubr.f32.gmra.mrb[42].mxu0 %v112_v42  ;;  %v206_v41 = vld [vmem:[%s2825_s0 + $0x3a0] sm:$0xff]  ;;  %v208_v42 = vld [vmem:[%s2825_s0 + $0x3b0] sm:$0xff] }
  0x98   :  { %731 = vmatprep.mubr.f32.mxu1 %v117_v43  ;;  %976 = vmatprep.mubr.f32.mxu0 %v119_v44  ;;  %v213_v43 = vld [vmem:[%s2825_s0 + $0x3d8] sm:$0xff]  ;;  %v215_v44 = vld [vmem:[%s2825_s0 + $0x3e8] sm:$0xff] }
  0x9b   :  { %732 = vmatmul.mubr.f32.gmra.mrb[44].mxu1 %v116_v45  ;;  %977 = vmatmul.mubr.f32.gmra.mrb[44].mxu0 %v118_v46  ;;  %v212_v45 = vld [vmem:[%s2825_s0 + $0x3d0] sm:$0xff]  ;;  %v214_v46 = vld [vmem:[%s2825_s0 + $0x3e0] sm:$0xff] }
  0x9c   :  { %736 = vmatprep.mubr.f32.mxu1 %v123_v47  ;;  %981 = vmatprep.mubr.f32.mxu0 %v125_v48  ;;  %v219_v47 = vld [vmem:[%s2825_s0 + $0x408] sm:$0xff]  ;;  %v221_v48 = vld [vmem:[%s2825_s0 + $0x418] sm:$0xff] }
  0x9f   :  { %737 = vmatmul.mubr.f32.gmra.mrb[46].mxu1 %v122_v49  ;;  %982 = vmatmul.mubr.f32.gmra.mrb[46].mxu0 %v124_v50  ;;  %v218_v49 = vld [vmem:[%s2825_s0 + $0x400] sm:$0xff]  ;;  %v220_v50 = vld [vmem:[%s2825_s0 + $0x410] sm:$0xff] }
  0xa0   :  { %741 = vmatprep.mubr.f32.mxu1 %v129_v51  ;;  %986 = vmatprep.mubr.f32.mxu0 %v131_v52  ;;  %v225_v51 = vld [vmem:[%s2825_s0 + $0x438] sm:$0xff]  ;;  %v227_v52 = vld [vmem:[%s2825_s0 + $0x448] sm:$0xff] }
  0xa3   :  { %742 = vmatmul.mubr.f32.gmra.mrb[48].mxu1 %v128_v53  ;;  %987 = vmatmul.mubr.f32.gmra.mrb[48].mxu0 %v130_v54  ;;  %v224_v53 = vld [vmem:[%s2825_s0 + $0x430] sm:$0xff]  ;;  %v226_v54 = vld [vmem:[%s2825_s0 + $0x440] sm:$0xff] }
  0xa4   :  { %746 = vmatprep.mubr.f32.mxu1 %v135_v55  ;;  %991 = vmatprep.mubr.f32.mxu0 %v137_v56  ;;  %v231_v55 = vld [vmem:[%s2825_s0 + $0x468] sm:$0xff]  ;;  %v233_v56 = vld [vmem:[%s2825_s0 + $0x478] sm:$0xff] }
  0xa7   :  { %747 = vmatmul.mubr.f32.gmra.mrb[50].mxu1 %v134_v57  ;;  %992 = vmatmul.mubr.f32.gmra.mrb[50].mxu0 %v136_v58  ;;  %v230_v57 = vld [vmem:[%s2825_s0 + $0x460] sm:$0xff]  ;;  %v232_v58 = vld [vmem:[%s2825_s0 + $0x470] sm:$0xff] }
  0xa8   :  { %751 = vmatprep.mubr.f32.mxu1 %v141_v59  ;;  %996 = vmatprep.mubr.f32.mxu0 %v143_v60  ;;  %v237_v59 = vld [vmem:[%s2825_s0 + $0x498] sm:$0xff]  ;;  %v239_v60 = vld [vmem:[%s2825_s0 + $0x4a8] sm:$0xff] }
  0xab   :  { %752 = vmatmul.mubr.f32.gmra.mrb[52].mxu1 %v140_v61  ;;  %997 = vmatmul.mubr.f32.gmra.mrb[52].mxu0 %v142_v62  ;;  %v236_v61 = vld [vmem:[%s2825_s0 + $0x490] sm:$0xff]  ;;  %v238_v62 = vld [vmem:[%s2825_s0 + $0x4a0] sm:$0xff] }
  0xac   :  { %756 = vmatprep.mubr.f32.mxu1 %v147_v63  ;;  %1001 = vmatprep.mubr.f32.mxu0 %v149_v1  ;;  %v243_v63 = vld [vmem:[%s2825_s0 + $0x4c8] sm:$0xff]  ;;  %v245_v1 = vld [vmem:[%s2825_s0 + $0x4d8] sm:$0xff] }
  0xaf   :  { %757 = vmatmul.mubr.f32.gmra.mrb[54].mxu1 %v146_v2  ;;  %1002 = vmatmul.mubr.f32.gmra.mrb[54].mxu0 %v148_v3  ;;  %v242_v2 = vld [vmem:[%s2825_s0 + $0x4c0] sm:$0xff]  ;;  %v244_v3 = vld [vmem:[%s2825_s0 + $0x4d0] sm:$0xff] }
  0xb0   :  { %761 = vmatprep.mubr.f32.mxu1 %v153_v4  ;;  %1006 = vmatprep.mubr.f32.mxu0 %v155_v5  ;;  %v249_v4 = vld [vmem:[%s2825_s0 + $0x4f8] sm:$0xff]  ;;  %v251_v5 = vld [vmem:[%s2825_s0 + $0x508] sm:$0xff] }
  0xb3   :  { %762 = vmatmul.mubr.f32.gmra.mrb[56].mxu1 %v152_v6  ;;  %1007 = vmatmul.mubr.f32.gmra.mrb[56].mxu0 %v154_v7  ;;  %v248_v6 = vld [vmem:[%s2825_s0 + $0x4f0] sm:$0xff]  ;;  %v250_v7 = vld [vmem:[%s2825_s0 + $0x500] sm:$0xff] }
  0xb4   :  { %766 = vmatprep.mubr.f32.mxu1 %v159_v8  ;;  %1011 = vmatprep.mubr.f32.mxu0 %v161_v9  ;;  %v255_v8 = vld [vmem:[%s2825_s0 + $0x528] sm:$0xff]  ;;  %v257_v9 = vld [vmem:[%s2825_s0 + $0x538] sm:$0xff] }
  0xb7   :  { %767 = vmatmul.mubr.f32.gmra.mrb[58].mxu1 %v158_v10  ;;  %1012 = vmatmul.mubr.f32.gmra.mrb[58].mxu0 %v160_v11  ;;  %v254_v10 = vld [vmem:[%s2825_s0 + $0x520] sm:$0xff]  ;;  %v256_v11 = vld [vmem:[%s2825_s0 + $0x530] sm:$0xff] }
  0xb8   :  { %771 = vmatprep.mubr.f32.mxu1 %v165_v12  ;;  %1016 = vmatprep.mubr.f32.mxu0 %v167_v13  ;;  %v261_v12 = vld [vmem:[%s2825_s0 + $0x558] sm:$0xff]  ;;  %v263_v13 = vld [vmem:[%s2825_s0 + $0x568] sm:$0xff] }
  0xbb   :  { %772 = vmatmul.mubr.f32.gmra.mrb[60].mxu1 %v164_v14  ;;  %1017 = vmatmul.mubr.f32.gmra.mrb[60].mxu0 %v166_v15  ;;  %v260_v14 = vld [vmem:[%s2825_s0 + $0x550] sm:$0xff]  ;;  %v262_v15 = vld [vmem:[%s2825_s0 + $0x560] sm:$0xff] }
  0xbc   :  { %776 = vmatprep.mubr.f32.mxu1 %v171_v16  ;;  %1021 = vmatprep.mubr.f32.mxu0 %v173_v17  ;;  %v267_v16 = vld [vmem:[%s2825_s0 + $0x588] sm:$0xff]  ;;  %v269_v17 = vld [vmem:[%s2825_s0 + $0x598] sm:$0xff] }
  0xbf   :  { %777 = vmatmul.mubr.f32.gmra.mrb[62].mxu1 %v170_v18  ;;  %1022 = vmatmul.mubr.f32.gmra.mrb[62].mxu0 %v172_v19  ;;  %v266_v18 = vld [vmem:[%s2825_s0 + $0x580] sm:$0xff]  ;;  %v268_v19 = vld [vmem:[%s2825_s0 + $0x590] sm:$0xff] }
  0xc0   :  { %781 = vmatprep.mubr.f32.mxu1 %v177_v20  ;;  %1026 = vmatprep.mubr.f32.mxu0 %v179_v21  ;;  %v273_v20 = vld [vmem:[%s2825_s0 + $0x5b8] sm:$0xff]  ;;  %v275_v21 = vld [vmem:[%s2825_s0 + $0x5c8] sm:$0xff] }
  0xc3   :  { %782 = vmatmul.mubr.f32.gmra.mrb[64].mxu1 %v176_v22  ;;  %1027 = vmatmul.mubr.f32.gmra.mrb[64].mxu0 %v178_v23  ;;  %v272_v22 = vld [vmem:[%s2825_s0 + $0x5b0] sm:$0xff]  ;;  %v274_v23 = vld [vmem:[%s2825_s0 + $0x5c0] sm:$0xff] }
  0xc4   :  { %786 = vmatprep.mubr.f32.mxu1 %v183_v24  ;;  %1031 = vmatprep.mubr.f32.mxu0 %v185_v0  ;;  %v279_v24 = vld [vmem:[%s2825_s0 + $0x5e8] sm:$0xff]  ;;  %v281_v0 = vld [vmem:[%s2825_s0 + $0x5f8] sm:$0xff] }
  0xc7   :  { %787 = vmatmul.mubr.f32.gmra.mrb[66].mxu1 %v182_v25  ;;  %1032 = vmatmul.mubr.f32.gmra.mrb[66].mxu0 %v184_v26  ;;  %v278_v25 = vld [vmem:[%s2825_s0 + $0x5e0] sm:$0xff]  ;;  %v280_v26 = vld [vmem:[%s2825_s0 + $0x5f0] sm:$0xff] }
  0xc8   :  { %791 = vmatprep.mubr.f32.mxu1 %v189_v27  ;;  %1036 = vmatprep.mubr.f32.mxu0 %v191_v28  ;;  %v285_v27 = vld [vmem:[%s2825_s0 + $0x618] sm:$0xff]  ;;  %v287_v28 = vld [vmem:[%s2825_s0 + $0x628] sm:$0xff] }
  0xcb   :  { %792 = vmatmul.mubr.f32.gmra.mrb[68].mxu1 %v188_v29  ;;  %1037 = vmatmul.mubr.f32.gmra.mrb[68].mxu0 %v190_v30  ;;  %v284_v29 = vld [vmem:[%s2825_s0 + $0x610] sm:$0xff]  ;;  %v286_v30 = vld [vmem:[%s2825_s0 + $0x620] sm:$0xff] }
  0xcc   :  { %796 = vmatprep.mubr.f32.mxu1 %v195_v31  ;;  %1041 = vmatprep.mubr.f32.mxu0 %v197_v32  ;;  %v291_v31 = vld [vmem:[%s2825_s0 + $0x648] sm:$0xff]  ;;  %v293_v32 = vld [vmem:[%s2825_s0 + $0x658] sm:$0xff] }
  0xcf   :  { %797 = vmatmul.mubr.f32.gmra.mrb[70].mxu1 %v194_v33  ;;  %1042 = vmatmul.mubr.f32.gmra.mrb[70].mxu0 %v196_v34  ;;  %v290_v33 = vld [vmem:[%s2825_s0 + $0x640] sm:$0xff]  ;;  %v292_v34 = vld [vmem:[%s2825_s0 + $0x650] sm:$0xff] }
  0xd0   :  { %801 = vmatprep.mubr.f32.mxu1 %v201_v35  ;;  %1046 = vmatprep.mubr.f32.mxu0 %v203_v36  ;;  %v297_v35 = vld [vmem:[%s2825_s0 + $0x678] sm:$0xff]  ;;  %v299_v36 = vld [vmem:[%s2825_s0 + $0x688] sm:$0xff] }
  0xd3   :  { %802 = vmatmul.mubr.f32.gmra.mrb[72].mxu1 %v200_v37  ;;  %1047 = vmatmul.mubr.f32.gmra.mrb[72].mxu0 %v202_v38  ;;  %v296_v37 = vld [vmem:[%s2825_s0 + $0x670] sm:$0xff]  ;;  %v298_v38 = vld [vmem:[%s2825_s0 + $0x680] sm:$0xff] }
  0xd4   :  { %806 = vmatprep.mubr.f32.mxu1 %v207_v39  ;;  %1051 = vmatprep.mubr.f32.mxu0 %v209_v40  ;;  %v303_v39 = vld [vmem:[%s2825_s0 + $0x6a8] sm:$0xff]  ;;  %v305_v40 = vld [vmem:[%s2825_s0 + $0x6b8] sm:$0xff] }
  0xd7   :  { %807 = vmatmul.mubr.f32.gmra.mrb[74].mxu1 %v206_v41  ;;  %1052 = vmatmul.mubr.f32.gmra.mrb[74].mxu0 %v208_v42  ;;  %v302_v41 = vld [vmem:[%s2825_s0 + $0x6a0] sm:$0xff]  ;;  %v304_v42 = vld [vmem:[%s2825_s0 + $0x6b0] sm:$0xff] }
  0xd8   :  { %811 = vmatprep.mubr.f32.mxu1 %v213_v43  ;;  %1056 = vmatprep.mubr.f32.mxu0 %v215_v44 }
  0xdb   :  { %812 = vmatmul.mubr.f32.gmra.mrb[76].mxu1 %v212_v45  ;;  %1057 = vmatmul.mubr.f32.gmra.mrb[76].mxu0 %v214_v46 }
  0xdc   :  { %816 = vmatprep.mubr.f32.mxu1 %v219_v47  ;;  %1061 = vmatprep.mubr.f32.mxu0 %v221_v48 }
  0xdf   :  { %817 = vmatmul.mubr.f32.gmra.mrb[78].mxu1 %v218_v49  ;;  %1062 = vmatmul.mubr.f32.gmra.mrb[78].mxu0 %v220_v50 }
  0xe0   :  { %821 = vmatprep.mubr.f32.mxu1 %v225_v51  ;;  %1066 = vmatprep.mubr.f32.mxu0 %v227_v52 }
  0xe3   :  { %822 = vmatmul.mubr.f32.gmra.mrb[80].mxu1 %v224_v53  ;;  %1067 = vmatmul.mubr.f32.gmra.mrb[80].mxu0 %v226_v54 }
  0xe4   :  { %826 = vmatprep.mubr.f32.mxu1 %v231_v55  ;;  %1071 = vmatprep.mubr.f32.mxu0 %v233_v56 }
  0xe7   :  { %827 = vmatmul.mubr.f32.gmra.mrb[82].mxu1 %v230_v57  ;;  %1072 = vmatmul.mubr.f32.gmra.mrb[82].mxu0 %v232_v58 }
  0xe8   :  { %831 = vmatprep.mubr.f32.mxu1 %v237_v59  ;;  %1076 = vmatprep.mubr.f32.mxu0 %v239_v60 }
  0xeb   :  { %832 = vmatmul.mubr.f32.gmra.mrb[84].mxu1 %v236_v61  ;;  %1077 = vmatmul.mubr.f32.gmra.mrb[84].mxu0 %v238_v62 }
  0xec   :  { %836 = vmatprep.mubr.f32.mxu1 %v243_v63  ;;  %1081 = vmatprep.mubr.f32.mxu0 %v245_v1 }
  0xef   :  { %837 = vmatmul.mubr.f32.gmra.mrb[86].mxu1 %v242_v2  ;;  %1082 = vmatmul.mubr.f32.gmra.mrb[86].mxu0 %v244_v3 }
  0xf0   :  { %841 = vmatprep.mubr.f32.mxu1 %v249_v4  ;;  %1086 = vmatprep.mubr.f32.mxu0 %v251_v5 }
  0xf3   :  { %842 = vmatmul.mubr.f32.gmra.mrb[88].mxu1 %v248_v6  ;;  %1087 = vmatmul.mubr.f32.gmra.mrb[88].mxu0 %v250_v7 }
  0xf4   :  { %846 = vmatprep.mubr.f32.mxu1 %v255_v8  ;;  %1091 = vmatprep.mubr.f32.mxu0 %v257_v9 }
  0xf7   :  { %847 = vmatmul.mubr.f32.gmra.mrb[90].mxu1 %v254_v10  ;;  %1092 = vmatmul.mubr.f32.gmra.mrb[90].mxu0 %v256_v11 }
  0xf8   :  { %851 = vmatprep.mubr.f32.mxu1 %v261_v12  ;;  %1096 = vmatprep.mubr.f32.mxu0 %v263_v13 }
  0xfb   :  { %852 = vmatmul.mubr.f32.gmra.mrb[92].mxu1 %v260_v14  ;;  %1097 = vmatmul.mubr.f32.gmra.mrb[92].mxu0 %v262_v15 }
  0xfc   :  { %856 = vmatprep.mubr.f32.mxu1 %v267_v16  ;;  %1101 = vmatprep.mubr.f32.mxu0 %v269_v17 }
  0xff   :  { %857 = vmatmul.mubr.f32.gmra.mrb[94].mxu1 %v266_v18  ;;  %1102 = vmatmul.mubr.f32.gmra.mrb[94].mxu0 %v268_v19 }
 0x100   :  { %861 = vmatprep.mubr.f32.mxu1 %v273_v20  ;;  %1106 = vmatprep.mubr.f32.mxu0 %v275_v21 }
 0x103   :  { %862 = vmatmul.mubr.f32.gmra.mrb[96].mxu1 %v272_v22  ;;  %1107 = vmatmul.mubr.f32.gmra.mrb[96].mxu0 %v274_v23 }
 0x104   :  { %866 = vmatprep.mubr.f32.mxu1 %v279_v24  ;;  %1111 = vmatprep.mubr.f32.mxu0 %v281_v0 }
 0x107   :  { %867 = vmatmul.mubr.f32.gmra.mrb[98].mxu1 %v278_v25  ;;  %1112 = vmatmul.mubr.f32.gmra.mrb[98].mxu0 %v280_v26 }
 0x108   :  { %871 = vmatprep.mubr.f32.mxu1 %v285_v27  ;;  %1116 = vmatprep.mubr.f32.mxu0 %v287_v28 }
 0x10b   :  { %872 = vmatmul.mubr.f32.gmra.mrb[100].mxu1 %v284_v29  ;;  %1117 = vmatmul.mubr.f32.gmra.mrb[100].mxu0 %v286_v30 }
 0x10c   :  { %876 = vmatprep.mubr.f32.mxu1 %v291_v31  ;;  %1121 = vmatprep.mubr.f32.mxu0 %v293_v32 }
 0x10f   :  { %877 = vmatmul.mubr.f32.gmra.mrb[102].mxu1 %v290_v33  ;;  %1122 = vmatmul.mubr.f32.gmra.mrb[102].mxu0 %v292_v34 }
 0x110   :  { %881 = vmatprep.mubr.f32.mxu1 %v297_v35  ;;  %1126 = vmatprep.mubr.f32.mxu0 %v299_v36 }
 0x113   :  { %882 = vmatmul.mubr.f32.gmra.mrb[104].mxu1 %v296_v37  ;;  %1127 = vmatmul.mubr.f32.gmra.mrb[104].mxu0 %v298_v38 }
 0x114   :  { %886 = vmatprep.mubr.f32.mxu1 %v303_v39  ;;  %1131 = vmatprep.mubr.f32.mxu0 %v305_v40 }
 0x116   :  { %v2567_v43 = vpop.f32.mrb[0].mxu1  ;;  %v2569_v44 = vpop.f32.mrb[0].mxu0 }
 0x117   :  { %v560_v45 = vpop.f32.mrb[1].mxu1  ;;  %887 = vmatmul.mubr.f32.gmra.mrb[106].mxu1 %v302_v41  ;;  %v470_v46 = vpop.f32.mrb[1].mxu0  ;;  %1132 = vmatmul.mubr.f32.gmra.mrb[106].mxu0 %v304_v42 }
 0x11a   :  { %v2571_v47 = vpop.f32.mrb[2].mxu1  ;;  %v2573_v48 = vpop.f32.mrb[2].mxu0 }
 0x11b   :  { %v565_v49 = vpop.f32.mrb[3].mxu1  ;;  %v475_v50 = vpop.f32.mrb[3].mxu0 }
 0x11e   :  { %v2575_v51 = vpop.f32.mrb[4].mxu1  ;;  %v2577_v52 = vpop.f32.mrb[4].mxu0 }
 0x11f   :  { %v570_v53 = vpop.f32.mrb[5].mxu1  ;;  %v480_v54 = vpop.f32.mrb[5].mxu0 }
 0x122   :  { %v2579_v55 = vpop.f32.mrb[6].mxu1  ;;  %v2581_v56 = vpop.f32.mrb[6].mxu0 }
 0x123   :  { %v575_v57 = vpop.f32.mrb[7].mxu1  ;;  %v485_v58 = vpop.f32.mrb[7].mxu0 }
 0x126   :  { %v2583_v59 = vpop.f32.mrb[8].mxu1  ;;  %v2585_v60 = vpop.f32.mrb[8].mxu0 }
 0x127   :  { %v580_v61 = vpop.f32.mrb[9].mxu1  ;;  %v490_v62 = vpop.f32.mrb[9].mxu0 }
 0x12a   :  { %v2587_v63 = vpop.f32.mrb[10].mxu1  ;;  %v2589_v1 = vpop.f32.mrb[10].mxu0 }
 0x12b   :  { %v585_v2 = vpop.f32.mrb[11].mxu1  ;;  %v495_v3 = vpop.f32.mrb[11].mxu0 }
 0x12e   :  { %v2591_v4 = vpop.f32.mrb[12].mxu1  ;;  %v2593_v5 = vpop.f32.mrb[12].mxu0 }
 0x12f   :  { %v590_v6 = vpop.f32.mrb[13].mxu1  ;;  %v500_v7 = vpop.f32.mrb[13].mxu0 }
 0x132   :  { %v2595_v8 = vpop.f32.mrb[14].mxu1  ;;  %v2597_v9 = vpop.f32.mrb[14].mxu0 }
 0x133   :  { %v595_v10 = vpop.f32.mrb[15].mxu1  ;;  %v505_v11 = vpop.f32.mrb[15].mxu0 }
 0x134   :  { %v2643_v10 = vld [vmem:[%s2826_s2] ss:$0 sm:$0xff] }
 0x136   :  { %v2599_v12 = vpop.f32.mrb[16].mxu1  ;;  %v2601_v13 = vpop.f32.mrb[16].mxu0 }
 0x137   :  { %v600_v14 = vpop.f32.mrb[17].mxu1  ;;  %v510_v15 = vpop.f32.mrb[17].mxu0 }
 0x13a   :  { %v2603_v16 = vpop.f32.mrb[18].mxu1  ;;  %v2605_v17 = vpop.f32.mrb[18].mxu0 }
 0x13b   :  { %v605_v18 = vpop.f32.mrb[19].mxu1  ;;  %v515_v19 = vpop.f32.mrb[19].mxu0 }
 0x13e   :  { %v2607_v20 = vpop.f32.mrb[20].mxu1  ;;  %v2609_v21 = vpop.f32.mrb[20].mxu0 }
 0x13f   :  { %v610_v22 = vpop.f32.mrb[21].mxu1  ;;  %v520_v23 = vpop.f32.mrb[21].mxu0 }
 0x142   :  { %v2611_v24 = vpop.f32.mrb[22].mxu1  ;;  %v2613_v0 = vpop.f32.mrb[22].mxu0 }
 0x143   :  { %v615_v25 = vpop.f32.mrb[23].mxu1  ;;  %v525_v26 = vpop.f32.mrb[23].mxu0 }
 0x146   :  { %v2615_v27 = vpop.f32.mrb[24].mxu1  ;;  %v2617_v28 = vpop.f32.mrb[24].mxu0 }
 0x147   :  { %v620_v29 = vpop.f32.mrb[25].mxu1  ;;  %v530_v30 = vpop.f32.mrb[25].mxu0 }
 0x14a   :  { %v2619_v31 = vpop.f32.mrb[26].mxu1  ;;  %v2621_v32 = vpop.f32.mrb[26].mxu0 }
 0x14b   :  { %v625_v33 = vpop.f32.mrb[27].mxu1  ;;  %v535_v34 = vpop.f32.mrb[27].mxu0 }
 0x14e   :  { %v2623_v35 = vpop.f32.mrb[28].mxu1  ;;  %v2625_v36 = vpop.f32.mrb[28].mxu0 }
 0x14f   :  { %v630_v37 = vpop.f32.mrb[29].mxu1  ;;  %v540_v38 = vpop.f32.mrb[29].mxu0 }
 0x152   :  { %v2627_v39 = vpop.f32.mrb[30].mxu1  ;;  %v2629_v40 = vpop.f32.mrb[30].mxu0 }
 0x153   :  { %v635_v41 = vpop.f32.mrb[31].mxu1  ;;  %v545_v42 = vpop.f32.mrb[31].mxu0 }
 0x156   :  { %v2631_v45 = vpop.f32.mrb[32].mxu1  ;;  %v2633_v46 = vpop.f32.mrb[32].mxu0 }
 0x157   :  { %v640_v49 = vpop.f32.mrb[33].mxu1  ;;  %v550_v50 = vpop.f32.mrb[33].mxu0 }
 0x15a   :  { %v2635_v53 = vpop.f32.mrb[34].mxu1  ;;  %v2637_v54 = vpop.f32.mrb[34].mxu0 }
 0x15b   :  { %v645_v57 = vpop.f32.mrb[35].mxu1  ;;  %v555_v58 = vpop.f32.mrb[35].mxu0 }
 0x15e   :  { %v713_v61 = vpop.f32.mrb[36].mxu1  ;;  %v958_v62 = vpop.f32.mrb[36].mxu0 }
 0x15f   :  { %v714_v2 = vadd.f32 %v713_v61, %v2569_v44  ;;  %v715_v3 = vpop.f32.mrb[37].mxu1  ;;  %v960_v6 = vpop.f32.mrb[37].mxu0 }
 0x161   :  { %v959_v7 = vadd.f32 %v958_v62, %v714_v2 }
 0x162   :  { %v718_v11 = vpop.f32.mrb[38].mxu1  ;;  %v963_v14 = vpop.f32.mrb[38].mxu0 }
 0x163   :  { %v719_v15 = vadd.f32 %v718_v11, %v2573_v48  ;;  %v720_v18 = vpop.f32.mrb[39].mxu1  ;;  %v965_v19 = vpop.f32.mrb[39].mxu0  ;;  %v1255_v22 = vadd.f32 %v2643_v10, %v959_v7 }
 0x165   :  { %v964_v23 = vadd.f32 %v963_v14, %v719_v15  ;;  %v1291_v44 = vmax.f32 %v1255_v22, 0.0 }
 0x166   :  { %v723_v25 = vpop.f32.mrb[40].mxu1  ;;  %v968_v26 = vpop.f32.mrb[40].mxu0 }
 0x167   :  { %v724_v29 = vadd.f32 %v723_v25, %v2577_v52  ;;  %v725_v30 = vpop.f32.mrb[41].mxu1  ;;  %v970_v33 = vpop.f32.mrb[41].mxu0  ;;  %1327 = vst [vmem:[%s2827_s3] sm:$0xff] %v1291_v44  ;;  %v1256_v34 = vadd.f32 %v2643_v10, %v964_v23 }
 0x169   :  { %v969_v37 = vadd.f32 %v968_v26, %v724_v29  ;;  %v1292_v41 = vmax.f32 %v1256_v34, 0.0 }
 0x16a   :  { %v728_v48 = vpop.f32.mrb[42].mxu1  ;;  %v973_v38 = vpop.f32.mrb[42].mxu0 }
 0x16b   :  { %v729_v42 = vadd.f32 %v728_v48, %v2581_v56  ;;  %v730_v49 = vpop.f32.mrb[43].mxu1  ;;  %v975_v50 = vpop.f32.mrb[43].mxu0  ;;  %1328 = vst [vmem:[%s2827_s3 + $0x8] sm:$0xff] %v1292_v41  ;;  %v1257_v52 = vadd.f32 %v2643_v10, %v969_v37 }
 0x16d   :  { %v974_v57 = vadd.f32 %v973_v38, %v729_v42  ;;  %v1293_v62 = vmax.f32 %v1257_v52, 0.0 }
 0x16e   :  { %v733_v58 = vpop.f32.mrb[44].mxu1  ;;  %v978_v61 = vpop.f32.mrb[44].mxu0 }
 0x16f   :  { %v734_v2 = vadd.f32 %v733_v58, %v2585_v60  ;;  %v735_v3 = vpop.f32.mrb[45].mxu1  ;;  %v980_v6 = vpop.f32.mrb[45].mxu0  ;;  %1329 = vst [vmem:[%s2827_s3 + $0x10] sm:$0xff] %v1293_v62  ;;  %v1258_v56 = vadd.f32 %v2643_v10, %v974_v57 }
 0x171   :  { %v979_v7 = vadd.f32 %v978_v61, %v734_v2  ;;  %v1294_v15 = vmax.f32 %v1258_v56, 0.0 }
 0x172   :  { %v738_v11 = vpop.f32.mrb[46].mxu1  ;;  %v983_v14 = vpop.f32.mrb[46].mxu0 }
 0x173   :  { %v739_v18 = vadd.f32 %v738_v11, %v2589_v1  ;;  %v740_v19 = vpop.f32.mrb[47].mxu1  ;;  %v985_v22 = vpop.f32.mrb[47].mxu0  ;;  %1330 = vst [vmem:[%s2827_s3 + $0x18] sm:$0xff] %v1294_v15  ;;  %v1259_v60 = vadd.f32 %v2643_v10, %v979_v7 }
 0x175   :  { %v984_v23 = vadd.f32 %v983_v14, %v739_v18  ;;  %v1295_v44 = vmax.f32 %v1259_v60, 0.0 }
 0x176   :  { %v743_v25 = vpop.f32.mrb[48].mxu1  ;;  %v988_v26 = vpop.f32.mrb[48].mxu0 }
 0x177   :  { %v744_v29 = vadd.f32 %v743_v25, %v2593_v5  ;;  %v745_v30 = vpop.f32.mrb[49].mxu1  ;;  %v990_v33 = vpop.f32.mrb[49].mxu0  ;;  %1331 = vst [vmem:[%s2827_s3 + $0x20] sm:$0xff] %v1295_v44  ;;  %v1260_v1 = vadd.f32 %v2643_v10, %v984_v23 }
 0x179   :  { %v989_v34 = vadd.f32 %v988_v26, %v744_v29  ;;  %v1296_v38 = vmax.f32 %v1260_v1, 0.0 }
 0x17a   :  { %v748_v37 = vpop.f32.mrb[50].mxu1  ;;  %v993_v48 = vpop.f32.mrb[50].mxu0 }
 0x17b   :  { %v749_v41 = vadd.f32 %v748_v37, %v2597_v9  ;;  %v750_v42 = vpop.f32.mrb[51].mxu1  ;;  %v995_v49 = vpop.f32.mrb[51].mxu0  ;;  %1332 = vst [vmem:[%s2827_s3 + $0x28] sm:$0xff] %v1296_v38  ;;  %v1261_v5 = vadd.f32 %v2643_v10, %v989_v34 }
 0x17d   :  { %v994_v50 = vadd.f32 %v993_v48, %v749_v41  ;;  %v1297_v58 = vmax.f32 %v1261_v5, 0.0 }
 0x17e   :  { %v753_v52 = vpop.f32.mrb[52].mxu1  ;;  %v998_v57 = vpop.f32.mrb[52].mxu0 }
 0x17f   :  { %v754_v61 = vadd.f32 %v753_v52, %v2601_v13  ;;  %v755_v62 = vpop.f32.mrb[53].mxu1  ;;  %v1000_v2 = vpop.f32.mrb[53].mxu0  ;;  %1333 = vst [vmem:[%s2827_s3 + $0x30] sm:$0xff] %v1297_v58  ;;  %v1262_v9 = vadd.f32 %v2643_v10, %v994_v50 }
 0x181   :  { %v999_v3 = vadd.f32 %v998_v57, %v754_v61  ;;  %v1298_v7 = vmax.f32 %v1262_v9, 0.0 }
 0x182   :  { %v758_v6 = vpop.f32.mrb[54].mxu1  ;;  %v1003_v56 = vpop.f32.mrb[54].mxu0 }
 0x183   :  { %v759_v11 = vadd.f32 %v758_v6, %v2605_v17  ;;  %v760_v14 = vpop.f32.mrb[55].mxu1  ;;  %v1005_v15 = vpop.f32.mrb[55].mxu0  ;;  %1334 = vst [vmem:[%s2827_s3 + $0x38] sm:$0xff] %v1298_v7  ;;  %v1263_v13 = vadd.f32 %v2643_v10, %v999_v3 }
 0x185   :  { %v1004_v18 = vadd.f32 %v1003_v56, %v759_v11  ;;  %v1299_v60 = vmax.f32 %v1263_v13, 0.0 }
 0x186   :  { %v763_v19 = vpop.f32.mrb[56].mxu1  ;;  %v1008_v22 = vpop.f32.mrb[56].mxu0 }
 0x187   :  { %v764_v23 = vadd.f32 %v763_v19, %v2609_v21  ;;  %v765_v25 = vpop.f32.mrb[57].mxu1  ;;  %v1010_v26 = vpop.f32.mrb[57].mxu0  ;;  %1335 = vst [vmem:[%s2827_s3 + $0x40] sm:$0xff] %v1299_v60  ;;  %v1264_v17 = vadd.f32 %v2643_v10, %v1004_v18 }
 0x189   :  { %v1009_v44 = vadd.f32 %v1008_v22, %v764_v23  ;;  %v1300_v33 = vmax.f32 %v1264_v17, 0.0 }
 0x18a   :  { %v768_v29 = vpop.f32.mrb[58].mxu1  ;;  %v1013_v30 = vpop.f32.mrb[58].mxu0 }
 0x18b   :  { %v769_v1 = vadd.f32 %v768_v29, %v2613_v0  ;;  %v770_v34 = vpop.f32.mrb[59].mxu1  ;;  %v1015_v37 = vpop.f32.mrb[59].mxu0  ;;  %1336 = vst [vmem:[%s2827_s3 + $0x48] sm:$0xff] %v1300_v33  ;;  %v1265_v21 = vadd.f32 %v2643_v10, %v1009_v44 }
 0x18d   :  { %v1014_v48 = vadd.f32 %v1013_v30, %v769_v1  ;;  %v1301_v42 = vmax.f32 %v1265_v21, 0.0 }
 0x18e   :  { %v773_v38 = vpop.f32.mrb[60].mxu1  ;;  %v1018_v41 = vpop.f32.mrb[60].mxu0 }
 0x18f   :  { %v774_v49 = vadd.f32 %v773_v38, %v2617_v28  ;;  %v775_v5 = vpop.f32.mrb[61].mxu1  ;;  %v1020_v50 = vpop.f32.mrb[61].mxu0  ;;  %1337 = vst [vmem:[%s2827_s3 + $0x50] sm:$0xff] %v1301_v42  ;;  %v1266_v0 = vadd.f32 %v2643_v10, %v1014_v48 }
 0x191   :  { %v1019_v52 = vadd.f32 %v1018_v41, %v774_v49  ;;  %v1302_v61 = vmax.f32 %v1266_v0, 0.0 }
 0x192   :  { %v778_v57 = vpop.f32.mrb[62].mxu1  ;;  %v1023_v58 = vpop.f32.mrb[62].mxu0 }
 0x193   :  { %v779_v62 = vadd.f32 %v778_v57, %v2621_v32  ;;  %v780_v2 = vpop.f32.mrb[63].mxu1  ;;  %v1025_v9 = vpop.f32.mrb[63].mxu0  ;;  %1338 = vst [vmem:[%s2827_s3 + $0x58] sm:$0xff] %v1302_v61  ;;  %v1267_v28 = vadd.f32 %v2643_v10, %v1019_v52 }
 0x195   :  { %v1024_v3 = vadd.f32 %v1023_v58, %v779_v62  ;;  %v1303_v7 = vmax.f32 %v1267_v28, 0.0 }
 0x196   :  { %v783_v6 = vpop.f32.mrb[64].mxu1  ;;  %v1028_v56 = vpop.f32.mrb[64].mxu0 }
 0x197   :  { %v784_v11 = vadd.f32 %v783_v6, %v2625_v36  ;;  %v785_v14 = vpop.f32.mrb[65].mxu1  ;;  %v1030_v15 = vpop.f32.mrb[65].mxu0  ;;  %1339 = vst [vmem:[%s2827_s3 + $0x60] sm:$0xff] %v1303_v7  ;;  %v1268_v32 = vadd.f32 %v2643_v10, %v1024_v3 }
 0x199   :  { %v1029_v13 = vadd.f32 %v1028_v56, %v784_v11  ;;  %v1304_v22 = vmax.f32 %v1268_v32, 0.0 }
 0x19a   :  { %v788_v18 = vpop.f32.mrb[66].mxu1  ;;  %v1033_v19 = vpop.f32.mrb[66].mxu0 }
 0x19b   :  { %v789_v60 = vadd.f32 %v788_v18, %v2629_v40  ;;  %v790_v23 = vpop.f32.mrb[67].mxu1  ;;  %v1035_v25 = vpop.f32.mrb[67].mxu0  ;;  %1340 = vst [vmem:[%s2827_s3 + $0x68] sm:$0xff] %v1304_v22  ;;  %v1269_v36 = vadd.f32 %v2643_v10, %v1029_v13 }
 0x19d   :  { %v1034_v26 = vadd.f32 %v1033_v19, %v789_v60  ;;  %v1305_v29 = vmax.f32 %v1269_v36, 0.0 }
 0x19e   :  { %v793_v17 = vpop.f32.mrb[68].mxu1  ;;  %v1038_v44 = vpop.f32.mrb[68].mxu0 }
 0x19f   :  { %v794_v30 = vadd.f32 %v793_v17, %v2633_v46  ;;  %v795_v33 = vpop.f32.mrb[69].mxu1  ;;  %v1040_v1 = vpop.f32.mrb[69].mxu0  ;;  %1341 = vst [vmem:[%s2827_s3 + $0x70] sm:$0xff] %v1305_v29  ;;  %v1270_v40 = vadd.f32 %v2643_v10, %v1034_v26 }
 0x1a1   :  { %v1039_v34 = vadd.f32 %v1038_v44, %v794_v30  ;;  %v1306_v48 = vmax.f32 %v1270_v40, 0.0 }
 0x1a2   :  { %v798_v37 = vpop.f32.mrb[70].mxu1  ;;  %v1043_v21 = vpop.f32.mrb[70].mxu0 }
 0x1a3   :  { %v799_v38 = vadd.f32 %v798_v37, %v2637_v54  ;;  %v800_v41 = vpop.f32.mrb[71].mxu1  ;;  %v1045_v42 = vpop.f32.mrb[71].mxu0  ;;  %1342 = vst [vmem:[%s2827_s3 + $0x78] sm:$0xff] %v1306_v48  ;;  %v1271_v46 = vadd.f32 %v2643_v10, %v1039_v34 }
 0x1a5   :  { %v1044_v49 = vadd.f32 %v1043_v21, %v799_v38  ;;  %v1307_v0 = vmax.f32 %v1271_v46, 0.0 }
 0x1a6   :  { %v803_v5 = vpop.f32.mrb[72].mxu1  ;;  %v1048_v50 = vpop.f32.mrb[72].mxu0 }
 0x1a7   :  { %v804_v52 = vadd.f32 %v803_v5, %v2567_v43  ;;  %v805_v57 = vpop.f32.mrb[73].mxu1  ;;  %v1050_v58 = vpop.f32.mrb[73].mxu0  ;;  %1343 = vst [vmem:[%s2827_s3 + $0x80] sm:$0xff] %v1307_v0  ;;  %v1272_v54 = vadd.f32 %v2643_v10, %v1044_v49 }
 0x1a9   :  { %v1049_v61 = vadd.f32 %v1048_v50, %v804_v52  ;;  %v1308_v9 = vmax.f32 %v1272_v54, 0.0 }
 0x1aa   :  { %v808_v62 = vpop.f32.mrb[74].mxu1  ;;  %v1053_v2 = vpop.f32.mrb[74].mxu0 }
 0x1ab   :  { %v809_v28 = vadd.f32 %v808_v62, %v2571_v47  ;;  %v810_v3 = vpop.f32.mrb[75].mxu1  ;;  %v1055_v6 = vpop.f32.mrb[75].mxu0  ;;  %1344 = vst [vmem:[%s2827_s3 + $0x88] sm:$0xff] %v1308_v9  ;;  %v1273_v43 = vadd.f32 %v2643_v10, %v1049_v61 }
 0x1ad   :  { %v1054_v56 = vadd.f32 %v1053_v2, %v809_v28  ;;  %v1309_v14 = vmax.f32 %v1273_v43, 0.0 }
 0x1ae   :  { %v813_v7 = vpop.f32.mrb[76].mxu1  ;;  %v1058_v11 = vpop.f32.mrb[76].mxu0 }
 0x1af   :  { %v814_v15 = vadd.f32 %v813_v7, %v2575_v51  ;;  %v815_v32 = vpop.f32.mrb[77].mxu1  ;;  %v1060_v13 = vpop.f32.mrb[77].mxu0  ;;  %1345 = vst [vmem:[%s2827_s3 + $0x90] sm:$0xff] %v1309_v14  ;;  %v1274_v47 = vadd.f32 %v2643_v10, %v1054_v56 }
 0x1b1   :  { %v1059_v18 = vadd.f32 %v1058_v11, %v814_v15  ;;  %v1310_v60 = vmax.f32 %v1274_v47, 0.0 }
 0x1b2   :  { %v818_v19 = vpop.f32.mrb[78].mxu1  ;;  %v1063_v22 = vpop.f32.mrb[78].mxu0 }
 0x1b3   :  { %v819_v23 = vadd.f32 %v818_v19, %v2579_v55  ;;  %v820_v25 = vpop.f32.mrb[79].mxu1  ;;  %v1065_v36 = vpop.f32.mrb[79].mxu0  ;;  %1346 = vst [vmem:[%s2827_s3 + $0x98] sm:$0xff] %v1310_v60  ;;  %v1275_v51 = vadd.f32 %v2643_v10, %v1059_v18 }
 0x1b5   :  { %v1064_v26 = vadd.f32 %v1063_v22, %v819_v23  ;;  %v1311_v29 = vmax.f32 %v1275_v51, 0.0 }
 0x1b6   :  { %v823_v17 = vpop.f32.mrb[80].mxu1  ;;  %v1068_v44 = vpop.f32.mrb[80].mxu0 }
 0x1b7   :  { %v824_v30 = vadd.f32 %v823_v17, %v2583_v59  ;;  %v825_v33 = vpop.f32.mrb[81].mxu1  ;;  %v1070_v1 = vpop.f32.mrb[81].mxu0  ;;  %1347 = vst [vmem:[%s2827_s3 + $0xa0] sm:$0xff] %v1311_v29  ;;  %v1276_v55 = vadd.f32 %v2643_v10, %v1064_v26 }
 0x1b9   :  { %v1069_v40 = vadd.f32 %v1068_v44, %v824_v30  ;;  %v1312_v21 = vmax.f32 %v1276_v55, 0.0 }
 0x1ba   :  { %v828_v34 = vpop.f32.mrb[82].mxu1  ;;  %v1073_v37 = vpop.f32.mrb[82].mxu0 }
 0x1bb   :  { %v829_v48 = vadd.f32 %v828_v34, %v2587_v63  ;;  %v830_v38 = vpop.f32.mrb[83].mxu1  ;;  %v1075_v41 = vpop.f32.mrb[83].mxu0  ;;  %1348 = vst [vmem:[%s2827_s3 + $0xa8] sm:$0xff] %v1312_v21  ;;  %v1277_v59 = vadd.f32 %v2643_v10, %v1069_v40 }
 0x1bd   :  { %v1074_v42 = vadd.f32 %v1073_v37, %v829_v48  ;;  %v1313_v5 = vmax.f32 %v1277_v59, 0.0 }
 0x1be   :  { %v833_v46 = vpop.f32.mrb[84].mxu1  ;;  %v1078_v49 = vpop.f32.mrb[84].mxu0 }
 0x1bf   :  { %v834_v50 = vadd.f32 %v833_v46, %v2591_v4  ;;  %v835_v0 = vpop.f32.mrb[85].mxu1  ;;  %v1080_v52 = vpop.f32.mrb[85].mxu0  ;;  %1349 = vst [vmem:[%s2827_s3 + $0xb0] sm:$0xff] %v1313_v5  ;;  %v1278_v63 = vadd.f32 %v2643_v10, %v1074_v42 }
 0x1c1   :  { %v1079_v57 = vadd.f32 %v1078_v49, %v834_v50  ;;  %v1314_v61 = vmax.f32 %v1278_v63, 0.0 }
 0x1c2   :  { %v838_v58 = vpop.f32.mrb[86].mxu1  ;;  %v1083_v54 = vpop.f32.mrb[86].mxu0 }
 0x1c3   :  { %v839_v62 = vadd.f32 %v838_v58, %v2595_v8  ;;  %v840_v2 = vpop.f32.mrb[87].mxu1  ;;  %v1085_v9 = vpop.f32.mrb[87].mxu0  ;;  %1350 = vst [vmem:[%s2827_s3 + $0xb8] sm:$0xff] %v1314_v61  ;;  %v1279_v4 = vadd.f32 %v2643_v10, %v1079_v57 }
 0x1c5   :  { %v1084_v28 = vadd.f32 %v1083_v54, %v839_v62  ;;  %v1315_v43 = vmax.f32 %v1279_v4, 0.0 }
 0x1c6   :  { %v843_v3 = vpop.f32.mrb[88].mxu1  ;;  %v1088_v6 = vpop.f32.mrb[88].mxu0 }
 0x1c7   :  { %v844_v56 = vadd.f32 %v843_v3, %v2599_v12  ;;  %v845_v7 = vpop.f32.mrb[89].mxu1  ;;  %v1090_v11 = vpop.f32.mrb[89].mxu0  ;;  %1351 = vst [vmem:[%s2827_s3 + $0xc0] sm:$0xff] %v1315_v43  ;;  %v1280_v8 = vadd.f32 %v2643_v10, %v1084_v28 }
 0x1c9   :  { %v1089_v14 = vadd.f32 %v1088_v6, %v844_v56  ;;  %v1316_v13 = vmax.f32 %v1280_v8, 0.0 }
 0x1ca   :  { %v848_v15 = vpop.f32.mrb[90].mxu1  ;;  %v1093_v32 = vpop.f32.mrb[90].mxu0 }
 0x1cb   :  { %v849_v47 = vadd.f32 %v848_v15, %v2603_v16  ;;  %v850_v18 = vpop.f32.mrb[91].mxu1  ;;  %v1095_v19 = vpop.f32.mrb[91].mxu0  ;;  %1352 = vst [vmem:[%s2827_s3 + $0xc8] sm:$0xff] %v1316_v13  ;;  %v1281_v12 = vadd.f32 %v2643_v10, %v1089_v14 }
 0x1cd   :  { %v1094_v22 = vadd.f32 %v1093_v32, %v849_v47  ;;  %v1317_v25 = vmax.f32 %v1281_v12, 0.0 }
 0x1ce   :  { %v853_v60 = vpop.f32.mrb[92].mxu1  ;;  %v1098_v23 = vpop.f32.mrb[92].mxu0 }
 0x1cf   :  { %v854_v36 = vadd.f32 %v853_v60, %v2607_v20  ;;  %v855_v51 = vpop.f32.mrb[93].mxu1  ;;  %v1100_v26 = vpop.f32.mrb[93].mxu0  ;;  %1353 = vst [vmem:[%s2827_s3 + $0xd0] sm:$0xff] %v1317_v25  ;;  %v1282_v16 = vadd.f32 %v2643_v10, %v1094_v22 }
 0x1d1   :  { %v1099_v17 = vadd.f32 %v1098_v23, %v854_v36  ;;  %v1318_v30 = vmax.f32 %v1282_v16, 0.0 }
 0x1d2   :  { %v858_v44 = vpop.f32.mrb[94].mxu1  ;;  %v1103_v29 = vpop.f32.mrb[94].mxu0 }
 0x1d3   :  { %v859_v33 = vadd.f32 %v858_v44, %v2611_v24  ;;  %v860_v1 = vpop.f32.mrb[95].mxu1  ;;  %v1105_v55 = vpop.f32.mrb[95].mxu0  ;;  %1354 = vst [vmem:[%s2827_s3 + $0xd8] sm:$0xff] %v1318_v30  ;;  %v1283_v20 = vadd.f32 %v2643_v10, %v1099_v17 }
 0x1d5   :  { %v1104_v40 = vadd.f32 %v1103_v29, %v859_v33  ;;  %v1319_v21 = vmax.f32 %v1283_v20, 0.0 }
 0x1d6   :  { %v863_v34 = vpop.f32.mrb[96].mxu1  ;;  %v1108_v37 = vpop.f32.mrb[96].mxu0 }
 0x1d7   :  { %v864_v48 = vadd.f32 %v863_v34, %v2615_v27  ;;  %v865_v38 = vpop.f32.mrb[97].mxu1  ;;  %v1110_v41 = vpop.f32.mrb[97].mxu0  ;;  %1355 = vst [vmem:[%s2827_s3 + $0xe0] sm:$0xff] %v1319_v21  ;;  %v1284_v24 = vadd.f32 %v2643_v10, %v1104_v40 }
 0x1d9   :  { %v1109_v59 = vadd.f32 %v1108_v37, %v864_v48  ;;  %v1320_v49 = vmax.f32 %v1284_v24, 0.0 }
 0x1da   :  { %v868_v42 = vpop.f32.mrb[98].mxu1  ;;  %v1113_v46 = vpop.f32.mrb[98].mxu0 }
 0x1db   :  { %v869_v5 = vadd.f32 %v868_v42, %v2619_v31  ;;  %v870_v50 = vpop.f32.mrb[99].mxu1  ;;  %v1115_v0 = vpop.f32.mrb[99].mxu0  ;;  %1356 = vst [vmem:[%s2827_s3 + $0xe8] sm:$0xff] %v1320_v49  ;;  %v1285_v27 = vadd.f32 %v2643_v10, %v1109_v59 }
 0x1dd   :  { %v1114_v52 = vadd.f32 %v1113_v46, %v869_v5  ;;  %v1321_v58 = vmax.f32 %v1285_v27, 0.0 }
 0x1de   :  { %v873_v63 = vpop.f32.mrb[100].mxu1  ;;  %v1118_v57 = vpop.f32.mrb[100].mxu0 }
 0x1df   :  { %v874_v54 = vadd.f32 %v873_v63, %v2623_v35  ;;  %v875_v61 = vpop.f32.mrb[101].mxu1  ;;  %v1120_v62 = vpop.f32.mrb[101].mxu0  ;;  %1357 = vst [vmem:[%s2827_s3 + $0xf0] sm:$0xff] %v1321_v58  ;;  %v1286_v31 = vadd.f32 %v2643_v10, %v1114_v52 }
 0x1e1   :  { %v1119_v2 = vadd.f32 %v1118_v57, %v874_v54  ;;  %v1322_v28 = vmax.f32 %v1286_v31, 0.0 }
 0x1e2   :  { %v878_v9 = vpop.f32.mrb[102].mxu1  ;;  %v1123_v4 = vpop.f32.mrb[102].mxu0 }
 0x1e3   :  { %v879_v3 = vadd.f32 %v878_v9, %v2627_v39  ;;  %v880_v6 = vpop.f32.mrb[103].mxu1  ;;  %v1125_v43 = vpop.f32.mrb[103].mxu0  ;;  %1358 = vst [vmem:[%s2827_s3 + $0xf8] sm:$0xff] %v1322_v28  ;;  %v1287_v35 = vadd.f32 %v2643_v10, %v1119_v2 }
 0x1e5   :  { %v1124_v56 = vadd.f32 %v1123_v4, %v879_v3  ;;  %v1323_v8 = vmax.f32 %v1287_v35, 0.0 }
 0x1e6   :  { %v883_v7 = vpop.f32.mrb[104].mxu1  ;;  %v1128_v11 = vpop.f32.mrb[104].mxu0 }
 0x1e7   :  { %v884_v14 = vadd.f32 %v883_v7, %v2631_v45  ;;  %v885_v15 = vpop.f32.mrb[105].mxu1  ;;  %v1130_v32 = vpop.f32.mrb[105].mxu0  ;;  %1359 = vst [vmem:[%s2827_s3 + $0x100] sm:$0xff] %v1323_v8  ;;  %v1288_v39 = vadd.f32 %v2643_v10, %v1124_v56 }
 0x1e9   :  { %v1129_v13 = vadd.f32 %v1128_v11, %v884_v14  ;;  %v1324_v19 = vmax.f32 %v1288_v39, 0.0 }
 0x1ea   :  { %v888_v47 = vpop.f32.mrb[106].mxu1  ;;  %v1133_v18 = vpop.f32.mrb[106].mxu0 }
 0x1eb   :  { %v889_v12 = vadd.f32 %v888_v47, %v2635_v53  ;;  %v890_v22 = vpop.f32.mrb[107].mxu1  ;;  %v1135_v60 = vpop.f32.mrb[107].mxu0  ;;  %1360 = vst [vmem:[%s2827_s3 + $0x108] sm:$0xff] %v1324_v19  ;;  %v1289_v45 = vadd.f32 %v2643_v10, %v1129_v13 }
 0x1ed   :  { %v1134_v23 = vadd.f32 %v1133_v18, %v889_v12  ;;  %v1325_v25 = vmax.f32 %v1289_v45, 0.0 }
 0x1ef   :  { %1361 = vst [vmem:[%s2827_s3 + $0x110] sm:$0xff] %v1325_v25  ;;  %v1290_v36 = vadd.f32 %v2643_v10, %v1134_v23 }
 0x1f1   :  { %v1326_v51 = vmax.f32 %v1290_v36, 0.0 }
 0x1f3   :  { %1362 = vst [vmem:[%s2827_s3 + $0x118] sm:$0xff] %v1326_v51 }

// kernel: piczak_forward.8
= control target key start
LH: loop header
LB: loop body
LE: loop exit
PB: predicated region body
PF: predicated region fallthrough
CT: control target
= control target key end

     0   :  { %s255_s0 = inlined_call_operand.vmem [shape: f32[12,24,128], index: 0, kind: input, shape index: {}]   ;;  %s256_s1 = inlined_call_operand.vmem [shape: f32[24,128], index: 1, kind: output, shape index: {}]  }
   0x1   :  { %v8_v0 = vld [vmem:[%s255_s0] sm:$0xff]  ;;  %v95_v1 = vld [vmem:[%s255_s0 + $0x18] sm:$0xff]  ;;  %v98_v2 = vld [vmem:[%s255_s0 + $0x30] sm:$0xff] }
   0x2   :  { %v15_v3 = vmax.f32 %v8_v0, %v95_v1  ;;  %v101_v4 = vld [vmem:[%s255_s0 + $0x48] sm:$0xff]  ;;  %v104_v6 = vld [vmem:[%s255_s0 + $0x60] sm:$0xff]  ;;  %v99_v9 = vld [vmem:[%s255_s0 + $0x38] sm:$0xff] }
   0x3   :  { %v9_v7 = vld [vmem:[%s255_s0 + $0x8] sm:$0xff]  ;;  %v96_v8 = vld [vmem:[%s255_s0 + $0x20] sm:$0xff]  ;;  %v107_v12 = vld [vmem:[%s255_s0 + $0x78] sm:$0xff] }
   0x4   :  { %v22_v5 = vmax.f32 %v15_v3, %v98_v2  ;;  %v16_v11 = vmax.f32 %v9_v7, %v96_v8  ;;  %v102_v13 = vld [vmem:[%s255_s0 + $0x50] sm:$0xff]  ;;  %v105_v17 = vld [vmem:[%s255_s0 + $0x68] sm:$0xff]  ;;  %v100_v20 = vld [vmem:[%s255_s0 + $0x40] sm:$0xff] }
   0x5   :  { %v110_v15 = vld [vmem:[%s255_s0 + $0x90] sm:$0xff]  ;;  %v97_v19 = vld [vmem:[%s255_s0 + $0x28] sm:$0xff]  ;;  %v108_v25 = vld [vmem:[%s255_s0 + $0x80] sm:$0xff] }
   0x6   :  { %v29_v10 = vmax.f32 %v22_v5, %v101_v4  ;;  %v23_v16 = vmax.f32 %v16_v11, %v99_v9  ;;  %v10_v18 = vld [vmem:[%s255_s0 + $0x10] sm:$0xff]  ;;  %v113_v24 = vld [vmem:[%s255_s0 + $0xa8] sm:$0xff]  ;;  %v103_v26 = vld [vmem:[%s255_s0 + $0x58] sm:$0xff] }
   0x7   :  { %v17_v23 = vmax.f32 %v10_v18, %v97_v19  ;;  %v116_v30 = vld [vmem:[%s255_s0 + $0xc0] sm:$0xff]  ;;  %v111_v31 = vld [vmem:[%s255_s0 + $0x98] sm:$0xff]  ;;  %v106_v32 = vld [vmem:[%s255_s0 + $0x70] sm:$0xff] }
   0x8   :  { %v36_v14 = vmax.f32 %v29_v10, %v104_v6  ;;  %v30_v22 = vmax.f32 %v23_v16, %v102_v13  ;;  %v119_v36 = vld [vmem:[%s255_s0 + $0xd8] sm:$0xff]  ;;  %v114_v37 = vld [vmem:[%s255_s0 + $0xb0] sm:$0xff]  ;;  %v109_v38 = vld [vmem:[%s255_s0 + $0x88] sm:$0xff] }
   0x9   :  { %v24_v29 = vmax.f32 %v17_v23, %v100_v20  ;;  %v122_v42 = vld [vmem:[%s255_s0 + $0xf0] sm:$0xff]  ;;  %v117_v43 = vld [vmem:[%s255_s0 + $0xc8] sm:$0xff]  ;;  %v112_v44 = vld [vmem:[%s255_s0 + $0xa0] sm:$0xff] }
   0xa   :  { %v43_v21 = vmax.f32 %v36_v14, %v107_v12  ;;  %v37_v28 = vmax.f32 %v30_v22, %v105_v17  ;;  %v125_v48 = vld [vmem:[%s255_s0 + $0x108] sm:$0xff]  ;;  %v120_v49 = vld [vmem:[%s255_s0 + $0xe0] sm:$0xff]  ;;  %v115_v50 = vld [vmem:[%s255_s0 + $0xb8] sm:$0xff] }
   0xb   :  { %v31_v35 = vmax.f32 %v24_v29, %v103_v26  ;;  %v123_v54 = vld [vmem:[%s255_s0 + $0xf8] sm:$0xff]  ;;  %v118_v55 = vld [vmem:[%s255_s0 + $0xd0] sm:$0xff]  ;;  %v121_v60 = vld [vmem:[%s255_s0 + $0xe8] sm:$0xff] }
   0xc   :  { %v50_v27 = vmax.f32 %v43_v21, %v110_v15  ;;  %v44_v34 = vmax.f32 %v37_v28, %v108_v25  ;;  %v126_v59 = vld [vmem:[%s255_s0 + $0x110] sm:$0xff]  ;;  %v124_v63 = vld [vmem:[%s255_s0 + $0x100] sm:$0xff]  ;;  %v127_v2 = vld [vmem:[%s255_s0 + $0x118] sm:$0xff] }
   0xd   :  { %v38_v41 = vmax.f32 %v31_v35, %v106_v32 }
   0xe   :  { %v57_v33 = vmax.f32 %v50_v27, %v113_v24  ;;  %v51_v40 = vmax.f32 %v44_v34, %v111_v31 }
   0xf   :  { %v45_v47 = vmax.f32 %v38_v41, %v109_v38 }
  0x10   :  { %v64_v39 = vmax.f32 %v57_v33, %v116_v30  ;;  %v58_v46 = vmax.f32 %v51_v40, %v114_v37 }
  0x11   :  { %v52_v53 = vmax.f32 %v45_v47, %v112_v44 }
  0x12   :  { %v71_v45 = vmax.f32 %v64_v39, %v119_v36  ;;  %v65_v52 = vmax.f32 %v58_v46, %v117_v43 }
  0x13   :  { %v59_v58 = vmax.f32 %v52_v53, %v115_v50 }
  0x14   :  { %v78_v51 = vmax.f32 %v71_v45, %v122_v42  ;;  %v72_v57 = vmax.f32 %v65_v52, %v120_v49 }
  0x15   :  { %v66_v62 = vmax.f32 %v59_v58, %v118_v55 }
  0x16   :  { %v85_v56 = vmax.f32 %v78_v51, %v125_v48  ;;  %v79_v61 = vmax.f32 %v72_v57, %v123_v54 }
  0x17   :  { %v73_v1 = vmax.f32 %v66_v62, %v121_v60 }
  0x18   :  { %88 = vst [vmem:[%s256_s1] sm:$0xff] %v85_v56  ;;  %v86_v0 = vmax.f32 %v79_v61, %v126_v59 }
  0x19   :  { %v80_v3 = vmax.f32 %v73_v1, %v124_v63 }
  0x1a   :  { %89 = vst [vmem:[%s256_s1 + $0x8] sm:$0xff] %v86_v0 }
  0x1b   :  { %v87_v4 = vmax.f32 %v80_v3, %v127_v2 }
  0x1d   :  { %90 = vst [vmem:[%s256_s1 + $0x10] sm:$0xff] %v87_v4 }

// kernel: piczak_forward.9
= control target key start
LH: loop header
LB: loop body
LE: loop exit
PB: predicated region body
PF: predicated region fallthrough
CT: control target
= control target key end

     0   :  { %v434_v3 = vmov 0.0|0.0   ;;  %vm435_vm0 = vmmov 0   ;;  %v436_v4 = vmov 0.0   ;;  %s667_s1 = inlined_call_operand.vmem [shape: f32[384,128], index: 1, kind: input, shape index: {}]   ;;  %s668_s0 = inlined_call_operand.vmem [shape: f32[20,384], index: 0, kind: input, shape index: {}]   ;;  %s669_s3 = inlined_call_operand.vmem [shape: f32[20,128], index: 3, kind: output, shape index: {}]   ;;  %s670_s2 = inlined_call_operand.vmem [shape: f32[1,128], index: 2, kind: input, shape index: {}]  }
   0x1   :  { %v49_v0 = vld [vmem:[%s667_s1 + $0x80] sm:$0xff]  ;;  %v50_v1 = vld [vmem:[%s667_s1 + $0x88] sm:$0xff]  ;;  %407 = vmatprep.subr.bf16.mxu1 %v434_v3  ;;  %366 = vmatprep.mubr.msk.f32.mxu1 %vm435_vm0, %v436_v4  ;;  %v51_v11 = vld [vmem:[%s667_s1 + $0x90] sm:$0xff]  ;;  %20 = vst [vmem:[%s669_s3 + $0x10] sm:$0xf] %v436_v4 }
   0x2   :  { %v33_v2 = vld [vmem:[%s667_s1] sm:$0xff]  ;;  %v375_v5 = vpack.c.bf16 %v50_v1, %v49_v0  ;;  %v34_v6 = vld [vmem:[%s667_s1 + $0x8] sm:$0xff]  ;;  %v52_v12 = vld [vmem:[%s667_s1 + $0x98] sm:$0xff] }
   0x3   :  { %v65_v7 = vld [vmem:[%s667_s1 + $0x100] sm:$0xff]  ;;  %v66_v8 = vld [vmem:[%s667_s1 + $0x108] sm:$0xff]  ;;  %v377_v9 = vpack.c.bf16 %v34_v6, %v33_v2  ;;  %v35_v13 = vld [vmem:[%s667_s1 + $0x10] sm:$0xff]  ;;  %v379_v14 = vpack.c.bf16 %v52_v12, %v51_v11 }
   0x4   :  { %v408_v10 = vpack.c.bf16 %v66_v8, %v65_v7  ;;  %376 = vmatprep.subr.bf16.mxu0 %v375_v5  ;;  %v36_v15 = vld [vmem:[%s667_s1 + $0x18] sm:$0xff]  ;;  %v67_v16 = vld [vmem:[%s667_s1 + $0x110] sm:$0xff]  ;;  %v53_v20 = vld [vmem:[%s667_s1 + $0xa0] sm:$0xff] }
   0x5   :  { %v68_v17 = vld [vmem:[%s667_s1 + $0x118] sm:$0xff]  ;;  %378 = vmatpush3.bf16.msra.mxu0 %v377_v9  ;;  %v381_v18 = vpack.c.bf16 %v36_v15, %v35_v13  ;;  %v54_v21 = vld [vmem:[%s667_s1 + $0xa8] sm:$0xff]  ;;  %v37_v22 = vld [vmem:[%s667_s1 + $0x20] sm:$0xff] }
   0x6   :  { %409 = vmatpush3.bf16.msra.mxu1 %v408_v10  ;;  %v411_v19 = vpack.c.bf16 %v68_v17, %v67_v16  ;;  %380 = vmatprep.subr.bf16.mxu0 %v379_v14  ;;  %v383_v23 = vpack.c.bf16 %v54_v21, %v53_v20  ;;  %v38_v24 = vld [vmem:[%s667_s1 + $0x28] sm:$0xff]  ;;  %v69_v25 = vld [vmem:[%s667_s1 + $0x120] sm:$0xff]  ;;  %v55_v27 = vld [vmem:[%s667_s1 + $0xb0] sm:$0xff] }
   0x7   :  { %410 = vmatprep.subr.bf16.mxu1 %v434_v3  ;;  %v70_v26 = vld [vmem:[%s667_s1 + $0x128] sm:$0xff]  ;;  %v56_v28 = vld [vmem:[%s667_s1 + $0xb8] sm:$0xff]  ;;  %v385_v29 = vpack.c.bf16 %v38_v24, %v37_v22  ;;  %v39_v31 = vld [vmem:[%s667_s1 + $0x30] sm:$0xff] }
   0x8   :  { %v414_v30 = vpack.c.bf16 %v70_v26, %v69_v25  ;;  %v387_v32 = vpack.c.bf16 %v56_v28, %v55_v27  ;;  %v40_v33 = vld [vmem:[%s667_s1 + $0x38] sm:$0xff]  ;;  %v71_v34 = vld [vmem:[%s667_s1 + $0x130] sm:$0xff]  ;;  %v57_v36 = vld [vmem:[%s667_s1 + $0xc0] sm:$0xff] }
   0x9   :  { %382 = vmatpush3.bf16.msra.mxu0 %v381_v18  ;;  %v72_v35 = vld [vmem:[%s667_s1 + $0x138] sm:$0xff]  ;;  %v58_v37 = vld [vmem:[%s667_s1 + $0xc8] sm:$0xff]  ;;  %v389_v38 = vpack.c.bf16 %v40_v33, %v39_v31  ;;  %v41_v40 = vld [vmem:[%s667_s1 + $0x40] sm:$0xff] }
   0xa   :  { %412 = vmatpush3.bf16.msra.mxu1 %v411_v19  ;;  %384 = vmatprep.subr.bf16.mxu0 %v383_v23  ;;  %v417_v39 = vpack.c.bf16 %v72_v35, %v71_v34  ;;  %v391_v41 = vpack.c.bf16 %v58_v37, %v57_v36  ;;  %v42_v42 = vld [vmem:[%s667_s1 + $0x48] sm:$0xff]  ;;  %v73_v43 = vld [vmem:[%s667_s1 + $0x140] sm:$0xff]  ;;  %v59_v45 = vld [vmem:[%s667_s1 + $0xd0] sm:$0xff] }
   0xb   :  { %413 = vmatprep.subr.bf16.mxu1 %v434_v3  ;;  %v74_v44 = vld [vmem:[%s667_s1 + $0x148] sm:$0xff]  ;;  %v60_v46 = vld [vmem:[%s667_s1 + $0xd8] sm:$0xff]  ;;  %v393_v48 = vpack.c.bf16 %v42_v42, %v41_v40  ;;  %v43_v50 = vld [vmem:[%s667_s1 + $0x50] sm:$0xff] }
   0xc   :  { %v25_v47 = vld [vmem:[%s668_s0 + $0x8] sm:$0xff]  ;;  %v420_v49 = vpack.c.bf16 %v74_v44, %v73_v43  ;;  %v395_v51 = vpack.c.bf16 %v60_v46, %v59_v45  ;;  %v44_v52 = vld [vmem:[%s667_s1 + $0x58] sm:$0xff]  ;;  %v75_v53 = vld [vmem:[%s667_s1 + $0x150] sm:$0xff] }
   0xd   :  { %386 = vmatpush3.bf16.msra.mxu0 %v385_v29  ;;  %v76_v54 = vld [vmem:[%s667_s1 + $0x158] sm:$0xff]  ;;  %v61_v55 = vld [vmem:[%s667_s1 + $0xe0] sm:$0xff]  ;;  %v62_v56 = vld [vmem:[%s667_s1 + $0xe8] sm:$0xff]  ;;  %145 = vmatprep.mubr.f32.mxu0 %v25_v47  ;;  %v397_v57 = vpack.c.bf16 %v44_v52, %v43_v50 }
   0xe   :  { %415 = vmatpush3.bf16.msra.mxu1 %v414_v30  ;;  %388 = vmatprep.subr.bf16.mxu0 %v387_v32  ;;  %v423_v58 = vpack.c.bf16 %v76_v54, %v75_v53  ;;  %v45_v59 = vld [vmem:[%s667_s1 + $0x60] sm:$0xff]  ;;  %v399_v60 = vpack.c.bf16 %v62_v56, %v61_v55  ;;  %v46_v61 = vld [vmem:[%s667_s1 + $0x68] sm:$0xff]  ;;  %v63_v0 = vld [vmem:[%s667_s1 + $0xf0] sm:$0xff] }
   0xf   :  { %416 = vmatprep.subr.bf16.mxu1 %v434_v3  ;;  %v77_v62 = vld [vmem:[%s667_s1 + $0x160] sm:$0xff]  ;;  %v78_v63 = vld [vmem:[%s667_s1 + $0x168] sm:$0xff]  ;;  %v64_v1 = vld [vmem:[%s667_s1 + $0xf8] sm:$0xff]  ;;  %v401_v2 = vpack.c.bf16 %v46_v61, %v45_v59 }
  0x10   :  { %v426_v5 = vpack.c.bf16 %v78_v63, %v77_v62  ;;  %v47_v6 = vld [vmem:[%s667_s1 + $0x70] sm:$0xff]  ;;  %v403_v7 = vpack.c.bf16 %v64_v1, %v63_v0  ;;  %v48_v8 = vld [vmem:[%s667_s1 + $0x78] sm:$0xff]  ;;  %v24_v13 = vld [vmem:[%s668_s0] sm:$0xff] }
  0x11   :  { %390 = vmatpush3.bf16.msra.mxu0 %v389_v38  ;;  %v79_v9 = vld [vmem:[%s667_s1 + $0x170] sm:$0xff]  ;;  %v80_v10 = vld [vmem:[%s667_s1 + $0x178] sm:$0xff]  ;;  %v405_v11 = vpack.c.bf16 %v48_v8, %v47_v6  ;;  %v28_v15 = vld [vmem:[%s668_s0 + $0x20] sm:$0xff] }
  0x12   :  { %418 = vmatpush3.bf16.msra.mxu1 %v417_v39  ;;  %392 = vmatprep.subr.bf16.mxu0 %v391_v41  ;;  %v429_v12 = vpack.c.bf16 %v80_v10, %v79_v9  ;;  %v26_v14 = vld [vmem:[%s668_s0 + $0x10] sm:$0xff]  ;;  %v29_v16 = vld [vmem:[%s668_s0 + $0x28] sm:$0xff]  ;;  %v31_v17 = vld [vmem:[%s668_s0 + $0x38] sm:$0xf] }
  0x13   :  { %419 = vmatprep.subr.bf16.mxu1 %v434_v3  ;;  %v30_v18 = vld [vmem:[%s668_s0 + $0x30] sm:$0xf]  ;;  %v32_v19 = vld [vmem:[%s668_s0 + $0x40] sm:$0xf] }
  0x14   :  { %v273_v28 = vld [vmem:[%s670_s2] ss:$0 sm:$0xff]  ;;  %v23_v39 = vld [vmem:[%s669_s3 + $0x10] sm:$0xf] }
  0x15   :  { %394 = vmatpush3.bf16.msra.mxu0 %v393_v48 }
  0x16   :  { %421 = vmatpush3.bf16.msra.mxu1 %v420_v49  ;;  %396 = vmatprep.subr.bf16.mxu0 %v395_v51 }
  0x17   :  { %422 = vmatprep.subr.bf16.mxu1 %v434_v3 }
  0x19   :  { %398 = vmatpush3.bf16.msra.mxu0 %v397_v57 }
  0x1a   :  { %424 = vmatpush3.bf16.msra.mxu1 %v423_v58  ;;  %400 = vmatprep.subr.bf16.mxu0 %v399_v60 }
  0x1b   :  { %425 = vmatprep.subr.bf16.mxu1 %v434_v3 }
  0x1d   :  { %402 = vmatpush3.bf16.msra.mxu0 %v401_v2 }
  0x1e   :  { %427 = vmatpush3.bf16.msra.mxu1 %v426_v5  ;;  %404 = vmatprep.subr.bf16.mxu0 %v403_v7 }
  0x1f   :  { %428 = vmatprep.subr.bf16.mxu1 %v434_v3  ;;  %v27_v3 = vld [vmem:[%s668_s0 + $0x18] sm:$0xff] }
  0x21   :  { %406 = vmatpush3.bf16.msra.mxu0 %v405_v11 }
  0x22   :  { %430 = vmatpush3.bf16.msra.mxu1 %v429_v12 }
  0x24   :  { %146 = vmatmul.mubr.f32.vlgmr.msra.gmra.mrb[0].mxu0 %v24_v13 }
  0x25   :  { %367 = vmatmul.mubr.f32.vlgmr.msra.gmra.mrb[0].mxu1 %v26_v14  ;;  %150 = vmatprep.mubr.f32.mxu0 %v28_v15 }
  0x26   :  { %369 = vmatprep.mubr.msk.f32.mxu1 %vm435_vm0, %v436_v4 }
  0x28   :  { %151 = vmatmul.mubr.f32.gmra.mrb[2].mxu0 %v27_v3 }
  0x29   :  { %370 = vmatmul.mubr.f32.gmra.mrb[2].mxu1 %v29_v16  ;;  %155 = vmatprep.mubr.f32.mxu0 %v31_v17 }
  0x2a   :  { %372 = vmatprep.mubr.msk.f32.mxu1 %vm435_vm0, %v436_v4 }
  0x2c   :  { %156 = vmatmul.mubr.f32.gmra.mrb[4].mxu0 %v30_v18 }
  0x2d   :  { %373 = vmatmul.mubr.f32.gmra.mrb[4].mxu1 %v32_v19 }
  0xf7   :  { %v306_v20 = vpop.f32.mrb[0].mxu0 }
  0xf8   :  { %v227_v21 = vpop.f32.mrb[0].mxu1  ;;  %v307_v22 = vpop.f32.mrb[1].mxu0 }
  0xf9   :  { %v368_v23 = vpop.f32.mrb[1].mxu1  ;;  %v308_v24 = vadd.f32 %v307_v22, %v306_v20 }
  0xfb   :  { %v228_v25 = vadd.f32 %v308_v24, %v227_v21  ;;  %v309_v26 = vpop.f32.mrb[2].mxu0 }
  0xfc   :  { %v232_v27 = vpop.f32.mrb[2].mxu1  ;;  %v310_v29 = vpop.f32.mrb[3].mxu0 }
  0xfd   :  { %v371_v30 = vpop.f32.mrb[3].mxu1  ;;  %v311_v31 = vadd.f32 %v310_v29, %v309_v26  ;;  %v260_v32 = vadd.f32 %v273_v28, %v228_v25 }
  0xff   :  { %v233_v33 = vadd.f32 %v311_v31, %v232_v27  ;;  %v312_v34 = vpop.f32.mrb[4].mxu0  ;;  %v263_v37 = vmax.f32 %v260_v32, 0.0 }
 0x100   :  { %v237_v35 = vpop.f32.mrb[4].mxu1  ;;  %v313_v4 = vpop.f32.mrb[5].mxu0 }
 0x101   :  { %v374_v36 = vpop.f32.mrb[5].mxu1  ;;  %v314_v38 = vadd.f32 %v313_v4, %v312_v34  ;;  %266 = vst [vmem:[%s669_s3] sm:$0xff] %v263_v37  ;;  %v261_v40 = vadd.f32 %v273_v28, %v233_v33 }
 0x103   :  { %v238_v41 = vadd.f32 %v314_v38, %v237_v35  ;;  %v264_v42 = vmax.f32 %v261_v40, 0.0 }
 0x105   :  { %v243_v43 = vadd.f32 %v238_v41, %v23_v39  ;;  %267 = vst [vmem:[%s669_s3 + $0x8] sm:$0xff] %v264_v42 }
 0x107   :  { %246 = vst [vmem:[%s669_s3 + $0x10] sm:$0xf] %v243_v43 }
 0x10e   :  { %v252_v44 = vld [vmem:[%s669_s3 + $0x10] sm:$0xf] }
 0x10f   :  { %v262_v45 = vadd.f32 %v273_v28, %v252_v44 }
 0x111   :  { %v265_v46 = vmax.f32 %v262_v45, 0.0 }
 0x113   :  { %268 = vst [vmem:[%s669_s3 + $0x10] sm:$0xf] %v265_v46 }

// kernel: piczak_forward.10
= control target key start
LH: loop header
LB: loop body
LE: loop exit
PB: predicated region body
PF: predicated region fallthrough
CT: control target
= control target key end

     0   :  { %s44_s0 = inlined_call_operand.vmem [shape: f32[3,6,128], index: 0, kind: input, shape index: {}]   ;;  %s45_s1 = inlined_call_operand.vmem [shape: f32[6,128], index: 1, kind: output, shape index: {}]  }
   0x1   :  { %v8_v0 = vld [vmem:[%s44_s0] sm:$0x3f]  ;;  %v20_v1 = vld [vmem:[%s44_s0 + $0x8] sm:$0x3f]  ;;  %v21_v2 = vld [vmem:[%s44_s0 + $0x10] sm:$0x3f] }
   0x2   :  { %v11_v3 = vmax.f32 %v8_v0, %v20_v1 }
   0x4   :  { %v14_v4 = vmax.f32 %v11_v3, %v21_v2 }
   0x6   :  { %15 = vst [vmem:[%s45_s1] sm:$0x3f] %v14_v4 }

// kernel: piczak_forward.13
= control target key start
LH: loop header
LB: loop body
LE: loop exit
PB: predicated region body
PF: predicated region fallthrough
CT: control target
= control target key end

     0   :  { %8 = vsyncpa [#allocation3], 0  ;;  %s819_s12 = smov 0   ;;  %s821_s13 = smov 0   ;;  %s959_s0 = inlined_call_operand.vmem [shape: f32[2,5120], index: 0, kind: input, shape index: {}]   ;;  %s960_s1 = inlined_call_operand.vmem [shape: f32[5120,128], index: 1, kind: input, shape index: {}]   ;;  %s961_s2 = inlined_call_operand.vmem [shape: f32[1,128], index: 2, kind: input, shape index: {}]   ;;  %s962_s3 = inlined_call_operand.hbm [shape: f32[2,128], index: 3, kind: output, shape index: {}]  }
   0x1   :  { %s823_s14 = smov 0  }
   0x2 LB: > { %s558_s15 = sadd.s32 4294967295, %s794_s14   ;;  %s23_s16 = sadd.s32 1, %s790_s13  ;;  %s794_s14 = sphi %s823_s14, %s14_s14   ;;  %s790_s13 = sphi %s821_s13, %s965_s13   ;;  %s786_s12 = sphi %s819_s12, %s964_s12  }
   0x3   : > { %p24_p0 = scmp.ge.s32.totalorder %s23_s16, 10  ;;  %p562_p1 = scmp.ge.s32.totalorder %s794_s14, 1 }
   0x4   : > { %p175_p2 = scmp.lt.s32.totalorder %s794_s14, 11 }
   0x5   : > { %s967_s16 = smov (%p24_p0, %s23_s16), 0 }
   0x6   : > { %p176_p3 = pnand %p562_p1, %p175_p2 }
   0x7   : > { %s563_s17 = sshll.u32 (!%p176_p3), %s786_s12, 2  ;;  %s565_s18 = sshll.u32 (!%p176_p3), %s786_s12, 6 }
   0x8   : > { %179 = sbr.rel (%p176_p3) target bundleno = 317 (0x13d), region = 32  ;;  %p206_p4 = scmp.lt.s32.totalorder (!%p176_p3), %s563_s17, 39 }
   0x9   : > { %p212_p5 = scmp.lt.s32.totalorder (!%p176_p3), %s565_s18, 639  ;;  %p567_p6 = scmp.ne.s32.totalorder (!%p176_p3), %s786_s12, 0 }
   0xf   : > { %s969_s17 = smov (!%p206_p4, %s563_s17), 39  ;;  %s971_s18 = smov (!%p212_p5, %s565_s18), 639 }
  0x10   : > { %s564_s19 = sshll.u32 %s969_s17, 1  ;;  %s566_s23 = sshll.u32 %s971_s18, 3  ;;  %v796_v0 = vmov (!%p567_p6), 0.0  }
  0x11   : > { %s845_s22 = scalar_lea.vmem %s959_s0, %s564_s19  ;;  %s850_s26 = scalar_lea.vmem %s960_s1, %s566_s23  ;;  %227 = vst [vmem:[#allocation2] sm:$0x3] (!%p567_p6), %v796_v0 }
  0x12   : > { %226 = sbr.rel (%p567_p6) target bundleno = 25 (0x19), region = 36 }
  0x19 PF: > { %v246_v1 = vld [vmem:[%s850_s26 + $0x80] sm:$0xff]  ;;  %v247_v2 = vld [vmem:[%s850_s26 + $0x88] sm:$0xff]  ;;  %v248_v12 = vld [vmem:[%s850_s26 + $0x90] sm:$0xff]  ;;  %v797_v48 = vmov 1983009808   ;;  %v299_v50 = vlaneseq  ;;  %p568_p7 = scmp.ne.s32.totalorder %s786_s12, 9 }
  0x1a   : > { %v278_v3 = vld [vmem:[%s850_s26 + $0x180] sm:$0xff]  ;;  %v644_v4 = vpack.c.bf16 %v247_v2, %v246_v1  ;;  %v279_v5 = vld [vmem:[%s850_s26 + $0x188] sm:$0xff]  ;;  %v249_v14 = vld [vmem:[%s850_s26 + $0x98] sm:$0xff]  ;;  %v297_v49 = vunpack.c.l.s4 %v797_v48 }
  0x1b   : > { %v230_v6 = vld [vmem:[%s850_s26] sm:$0xff]  ;;  %v231_v7 = vld [vmem:[%s850_s26 + $0x8] sm:$0xff]  ;;  %v676_v8 = vpack.c.bf16 %v279_v5, %v278_v3  ;;  %v280_v15 = vld [vmem:[%s850_s26 + $0x190] sm:$0xff]  ;;  %v648_v17 = vpack.c.bf16 %v249_v14, %v248_v12  ;;  %v300_v1 = vshrl.u32 %v299_v50, 7 }
  0x1c   : > { %v646_v9 = vpack.c.bf16 %v231_v7, %v230_v6  ;;  %v262_v10 = vld [vmem:[%s850_s26 + $0x100] sm:$0xff]  ;;  %v263_v11 = vld [vmem:[%s850_s26 + $0x108] sm:$0xff]  ;;  %645 = vmatprep.subr.bf16.mxu0 %v644_v4  ;;  %v281_v16 = vld [vmem:[%s850_s26 + $0x198] sm:$0xff]  ;;  %v298_v0 = vunpack.c.0.s8 %v297_v49 }
  0x1d   : > { %v678_v13 = vpack.c.bf16 %v263_v11, %v262_v10  ;;  %677 = vmatprep.subr.bf16.mxu1 %v676_v8  ;;  %v680_v18 = vpack.c.bf16 %v281_v16, %v280_v15  ;;  %v232_v19 = vld [vmem:[%s850_s26 + $0x10] sm:$0xff]  ;;  %v233_v20 = vld [vmem:[%s850_s26 + $0x18] sm:$0xff]  ;;  %v250_v24 = vld [vmem:[%s850_s26 + $0xa0] sm:$0xff] }
  0x1e   : > { %647 = vmatpush3.bf16.msra.mxu0 %v646_v9  ;;  %v264_v21 = vld [vmem:[%s850_s26 + $0x110] sm:$0xff]  ;;  %v650_v22 = vpack.c.bf16 %v233_v20, %v232_v19  ;;  %v265_v23 = vld [vmem:[%s850_s26 + $0x118] sm:$0xff]  ;;  %v251_v25 = vld [vmem:[%s850_s26 + $0xa8] sm:$0xff]  ;;  %v301_v14 = vsub.s32 %v298_v0, %v300_v1 }
  0x1f   : > { %679 = vmatpush3.bf16.msra.mxu1 %v678_v13  ;;  %649 = vmatprep.subr.bf16.mxu0 %v648_v17  ;;  %v682_v26 = vpack.c.bf16 %v265_v23, %v264_v21  ;;  %v652_v27 = vpack.c.bf16 %v251_v25, %v250_v24  ;;  %v282_v28 = vld [vmem:[%s850_s26 + $0x1a0] sm:$0xff]  ;;  %v283_v29 = vld [vmem:[%s850_s26 + $0x1a8] sm:$0xff]  ;;  %v252_v36 = vld [vmem:[%s850_s26 + $0xb0] sm:$0xff] }
  0x20   : > { %681 = vmatprep.subr.bf16.mxu1 %v680_v18  ;;  %v234_v30 = vld [vmem:[%s850_s26 + $0x20] sm:$0xff]  ;;  %v684_v31 = vpack.c.bf16 %v283_v29, %v282_v28  ;;  %v235_v32 = vld [vmem:[%s850_s26 + $0x28] sm:$0xff]  ;;  %v253_v37 = vld [vmem:[%s850_s26 + $0xb8] sm:$0xff] }
  0x21   : > { %v266_v33 = vld [vmem:[%s850_s26 + $0x120] sm:$0xff]  ;;  %v267_v34 = vld [vmem:[%s850_s26 + $0x128] sm:$0xff]  ;;  %v654_v35 = vpack.c.bf16 %v235_v32, %v234_v30  ;;  %v284_v38 = vld [vmem:[%s850_s26 + $0x1b0] sm:$0xff]  ;;  %v656_v40 = vpack.c.bf16 %v253_v37, %v252_v36 }
  0x22   : > { %651 = vmatpush3.bf16.msra.mxu0 %v650_v22  ;;  %v686_v39 = vpack.c.bf16 %v267_v34, %v266_v33  ;;  %v285_v41 = vld [vmem:[%s850_s26 + $0x1b8] sm:$0xff]  ;;  %v236_v42 = vld [vmem:[%s850_s26 + $0x30] sm:$0xff]  ;;  %v254_v47 = vld [vmem:[%s850_s26 + $0xc0] sm:$0xff] }
  0x23   : > { %683 = vmatpush3.bf16.msra.mxu1 %v682_v26  ;;  %653 = vmatprep.subr.bf16.mxu0 %v652_v27  ;;  %v237_v43 = vld [vmem:[%s850_s26 + $0x38] sm:$0xff]  ;;  %v688_v44 = vpack.c.bf16 %v285_v41, %v284_v38  ;;  %v268_v45 = vld [vmem:[%s850_s26 + $0x130] sm:$0xff]  ;;  %v255_v51 = vld [vmem:[%s850_s26 + $0xc8] sm:$0xff] }
  0x24   : > { %685 = vmatprep.subr.bf16.mxu1 %v684_v31  ;;  %v269_v46 = vld [vmem:[%s850_s26 + $0x138] sm:$0xff]  ;;  %v286_v52 = vld [vmem:[%s850_s26 + $0x1c0] sm:$0xff]  ;;  %v287_v53 = vld [vmem:[%s850_s26 + $0x1c8] sm:$0xff]  ;;  %v658_v54 = vpack.c.bf16 %v237_v43, %v236_v42  ;;  %v660_v56 = vpack.c.bf16 %v255_v51, %v254_v47 }
  0x25   : > { %v690_v55 = vpack.c.bf16 %v269_v46, %v268_v45  ;;  %v238_v57 = vld [vmem:[%s850_s26 + $0x40] sm:$0xff]  ;;  %v239_v58 = vld [vmem:[%s850_s26 + $0x48] sm:$0xff]  ;;  %v692_v60 = vpack.c.bf16 %v287_v53, %v286_v52  ;;  %v256_v62 = vld [vmem:[%s850_s26 + $0xd0] sm:$0xff] }
  0x26   : > { %655 = vmatpush3.bf16.msra.mxu0 %v654_v35  ;;  %v270_v59 = vld [vmem:[%s850_s26 + $0x140] sm:$0xff]  ;;  %v271_v61 = vld [vmem:[%s850_s26 + $0x148] sm:$0xff]  ;;  %v257_v63 = vld [vmem:[%s850_s26 + $0xd8] sm:$0xff]  ;;  %v662_v4 = vpack.c.bf16 %v239_v58, %v238_v57 }
  0x27   : > { %687 = vmatpush3.bf16.msra.mxu1 %v686_v39  ;;  %657 = vmatprep.subr.bf16.mxu0 %v656_v40  ;;  %v288_v2 = vld [vmem:[%s850_s26 + $0x1d0] sm:$0xff]  ;;  %v289_v3 = vld [vmem:[%s850_s26 + $0x1d8] sm:$0xff]  ;;  %v694_v5 = vpack.c.bf16 %v271_v61, %v270_v59  ;;  %v664_v6 = vpack.c.bf16 %v257_v63, %v256_v62  ;;  %v258_v12 = vld [vmem:[%s850_s26 + $0xe0] sm:$0xff] }
  0x28   : > { %689 = vmatprep.subr.bf16.mxu1 %v688_v44  ;;  %v240_v7 = vld [vmem:[%s850_s26 + $0x50] sm:$0xff]  ;;  %v241_v8 = vld [vmem:[%s850_s26 + $0x58] sm:$0xff]  ;;  %v696_v10 = vpack.c.bf16 %v289_v3, %v288_v2  ;;  %v259_v13 = vld [vmem:[%s850_s26 + $0xe8] sm:$0xff] }
  0x29   : > { %v272_v9 = vld [vmem:[%s850_s26 + $0x150] sm:$0xff]  ;;  %v273_v11 = vld [vmem:[%s850_s26 + $0x158] sm:$0xff]  ;;  %v290_v15 = vld [vmem:[%s850_s26 + $0x1e0] sm:$0xff]  ;;  %v666_v17 = vpack.c.bf16 %v241_v8, %v240_v7  ;;  %v668_v20 = vpack.c.bf16 %v259_v13, %v258_v12 }
  0x2a   : > { %659 = vmatpush3.bf16.msra.mxu0 %v658_v54  ;;  %v291_v16 = vld [vmem:[%s850_s26 + $0x1e8] sm:$0xff]  ;;  %v242_v18 = vld [vmem:[%s850_s26 + $0x60] sm:$0xff]  ;;  %v698_v19 = vpack.c.bf16 %v273_v11, %v272_v9  ;;  %v260_v26 = vld [vmem:[%s850_s26 + $0xf0] sm:$0xff] }
  0x2b   : > { %691 = vmatpush3.bf16.msra.mxu1 %v690_v55  ;;  %661 = vmatprep.subr.bf16.mxu0 %v660_v56  ;;  %v243_v21 = vld [vmem:[%s850_s26 + $0x68] sm:$0xff]  ;;  %v274_v22 = vld [vmem:[%s850_s26 + $0x160] sm:$0xff]  ;;  %v700_v24 = vpack.c.bf16 %v291_v16, %v290_v15  ;;  %v261_v27 = vld [vmem:[%s850_s26 + $0xf8] sm:$0xff] }
  0x2c   : > { %693 = vmatprep.subr.bf16.mxu1 %v692_v60  ;;  %v229_v23 = vld [vmem:[%s845_s22] sm:$0xff]  ;;  %v275_v25 = vld [vmem:[%s850_s26 + $0x168] sm:$0xff]  ;;  %v292_v30 = vld [vmem:[%s850_s26 + $0x1f0] sm:$0xff]  ;;  %v670_v32 = vpack.c.bf16 %v243_v21, %v242_v18  ;;  %v672_v36 = vpack.c.bf16 %v261_v27, %v260_v26 }
  0x2d   : > { %v302_v28 = vrot.slane %v229_v23, %v301_v14  ;;  %v295_v29 = vcombine.high %v229_v23, %v229_v23  ;;  %v293_v31 = vld [vmem:[%s850_s26 + $0x1f8] sm:$0xff]  ;;  %v702_v35 = vpack.c.bf16 %v275_v25, %v274_v22  ;;  %v244_v37 = vld [vmem:[%s850_s26 + $0x70] sm:$0xff]  ;;  %v228_v51 = vld [vmem:[#allocation2] sm:$0x3] }
  0x2e   : > { %663 = vmatpush3.bf16.msra.mxu0 %v662_v4  ;;  %v245_v38 = vld [vmem:[%s850_s26 + $0x78] sm:$0xff]  ;;  %v704_v39 = vpack.c.bf16 %v293_v31, %v292_v30  ;;  %v276_v40 = vld [vmem:[%s850_s26 + $0x170] sm:$0xff]  ;;  %v569_v55 = vld [vmem:[%s961_s2] ss:$0 sm:$0xff] (!%p568_p7) }
  0x2f   : > { %695 = vmatpush3.bf16.msra.mxu1 %v694_v5  ;;  %665 = vmatprep.subr.bf16.mxu0 %v664_v6  ;;  %v310_v33 = vcombine.high %v302_v28, %v302_v28  ;;  %v309_v34 = vrot.slane %v295_v29, %v301_v14  ;;  %v277_v41 = vld [vmem:[%s850_s26 + $0x178] sm:$0xff]  ;;  %v674_v43 = vpack.c.bf16 %v245_v38, %v244_v37 }
  0x30   : > { %697 = vmatprep.subr.bf16.mxu1 %v696_v10  ;;  %v706_v44 = vpack.c.bf16 %v277_v41, %v276_v40 }
  0x31   : > { %380 = vmatprep.mubr.f32.mxu0 %v310_v33  ;;  %v311_v42 = vcombine.high %v309_v34, %v309_v34 }
  0x32   : > { %667 = vmatpush3.bf16.msra.mxu0 %v666_v17 }
  0x33   : > { %699 = vmatpush3.bf16.msra.mxu1 %v698_v19  ;;  %669 = vmatprep.subr.bf16.mxu0 %v668_v20 }
  0x34   : > { %701 = vmatprep.subr.bf16.mxu1 %v700_v24  ;;  %450 = vmatprep.mubr.f32.mxu1 %v311_v42 }
  0x36   : > { %671 = vmatpush3.bf16.msra.mxu0 %v670_v32 }
  0x37   : > { %703 = vmatpush3.bf16.msra.mxu1 %v702_v35  ;;  %673 = vmatprep.subr.bf16.mxu0 %v672_v36 }
  0x38   : > { %705 = vmatprep.subr.bf16.mxu1 %v704_v39 }
  0x3a   : > { %675 = vmatpush3.bf16.msra.mxu0 %v674_v43 }
  0x3b   : > { %707 = vmatpush3.bf16.msra.mxu1 %v706_v44 }
  0x3d   : > { %381 = vmatmul.mubr.f32.vlgmr.msra.gmra.mrb[0].mxu0 %v302_v28 }
  0x3e   : > { %451 = vmatmul.mubr.f32.vlgmr.msra.gmra.mrb[0].mxu1 %v309_v34 }
 0x110   : > { %v606_v45 = vpop.f32.mrb[0].mxu0 }
 0x111   : > { %v641_v46 = vpop.f32.mrb[0].mxu1  ;;  %v607_v47 = vpop.f32.mrb[1].mxu0 }
 0x112   : > { %v608_v48 = vadd.f32 %v607_v47, %v606_v45  ;;  %v642_v49 = vpop.f32.mrb[1].mxu1 }
 0x113   : > { %v643_v50 = vadd.f32 %v642_v49, %v641_v46  ;;  %461 = sbr.rel (%p568_p7) target bundleno = 292 (0x124), region = 40 }
 0x115   : > { %v453_v52 = vadd.f32 %v643_v50, %v608_v48 }
 0x117   : > { %v456_v53 = vadd.f32 %v453_v52, %v228_v51 }
 0x119   : > { %457 = vst [vmem:[#allocation2] sm:$0x3] %v456_v53 }
 0x120   : > { %v462_v54 = vld [vmem:[#allocation2] sm:$0x3] }
 0x121   : > { %v470_v56 = vadd.f32 %v569_v55, %v462_v54 }
 0x123   : > { %471 = vst [vmem:[#allocation2] sm:$0x3] %v470_v56 }
 0x124 PF: > { %p924_p8 = scmp.eq.s32.totalorder %s558_s15, 9  ;;  %s798_s30 = smov [#allocation2]  }
 0x125   : > { %s481_s4 = sshll.u32 %s798_s30, 4  ;;  %s482_s4 = int_to_ptr.vmem [resolvable:$true] %s481_s4 }
 0x126   : > { %s742_s5 = scalar_lea.vmem %s482_s4, 32  ;;  %p749_p12 = scmp.lt.s32.totalorder %s482_s4, %s482_s4 }
 0x127   : > { %p743_p9 = scmp.ne.s32.totalorder %s482_s4, %s742_s5  ;;  %p750_p13 = scmp.lt.s32.totalorder %s742_s5, %s742_s5 }
 0x129   : > { %p744_p10 = pnand %p743_p9, %p924_p8  ;;  %p751_p0 = por %p750_p13, %p749_p12 }
 0x12b   : > { %p745_p11 = pneg %p744_p10 }
 0x12d   : > { %p752_p1 = pnand %p751_p0, %p745_p11 }
 0x12f   : > { %755 = shalt.err (!%p752_p1)
}
 0x130   : > { %s756_s8 = scalar_lea.hbm %s962_s3, 32 }
 0x131   : > { %p757_p2 = scmp.ne.s32.totalorder %s962_s3, %s756_s8  ;;  %p762_p5 = scmp.lt.u32.totalorder %s756_s8, %s962_s3 }
 0x133   : > { %p758_p3 = pnand %p757_p2, %p924_p8 }
 0x135   : > { %p759_p4 = pneg %p758_p3 }
 0x137   : > { %p764_p6 = pnand %p762_p5, %p759_p4 }
 0x139   : > { %767 = shalt.err (!%p764_p6)
}
 0x13a   : > { %709 = dma.vmem_to_hbm [thread:$0]  (%p924_p8), %s482_s4, 32, %s962_s3, [#allocation3]  }
 0x13b   : > { %781 = dma.done.wait (%p924_p8), [#allocation3], 32  }
 0x13c   : > { %783 = vsyncadd (%p924_p8), [#allocation3], 4294967264 }
 0x13d PF: > { %s14_s14 = sadd.s32 1, %s794_s14   ;;  %s964_s12 = smov %s790_s13 }
 0x13e   : > { %p11_p7 = scmp.ge.s32.totalorder %s14_s14, 12   ;;  %s965_s13 = smov %s967_s16 }
 0x140   :  { %13 = sbr.rel (!%p11_p7) target bundleno = 2 (0x2), region = 74 }
 0x147   :  { %494 = vsyncpa [#allocation3], 1 }
 0x148   :  { %496 = vsyncpa [#allocation3 + $0x1], 1 }

// kernel: piczak_forward.12
= control target key start
LH: loop header
LB: loop body
LE: loop exit
PB: predicated region body
PF: predicated region fallthrough
CT: control target
= control target key end

     0   :  { %8 = vsyncpa [#allocation3], 0  ;;  %s8150_s0 = inlined_call_operand.vmem [shape: f32[2,5120], index: 0, kind: input, shape index: {}]   ;;  %s8151_s1 = inlined_call_operand.hbm [shape: bf16[5120,5120], index: 1, kind: input, shape index: {}]   ;;  %s8152_s2 = inlined_call_operand.vmem [shape: f32[1,5120], index: 2, kind: input, shape index: {}]   ;;  %s8153_s3 = inlined_call_operand.vmem [shape: f32[2,5120], index: 3, kind: output, shape index: {}]  }
   0x1   :  { %10 = vsyncpa [#allocation3 + $0x1], 0  ;;  %s7235_s12 = smov 0   ;;  %s7237_s13 = smov 0  }
   0x2   :  { %s7239_s14 = smov 0   ;;  %s7241_s15 = smov 0  }
   0x3   :  { %s7243_s16 = smov 0   ;;  %s7245_s17 = smov 0  }
   0x4   :  { %s7247_s18 = smov 0   ;;  %s7249_s19 = smov 0  }
   0x5 LB: > { %s5376_s20 = sadd.s32 4294967295, %s7207_s19   ;;  %s25_s21 = sadd.s32 1, %s7199_s17  ;;  %s7207_s19 = sphi %s7249_s19, %s16_s19   ;;  %s7203_s18 = sphi %s7247_s18, %s8162_s18   ;;  %s7199_s17 = sphi %s7245_s17, %s8161_s17   ;;  %s7195_s16 = sphi %s7243_s16, %s8160_s16   ;;  %s7191_s15 = sphi %s7241_s15, %s8159_s15   ;;  %s7187_s14 = sphi %s7239_s14, %s8158_s14   ;;  %s7183_s13 = sphi %s7237_s13, %s8157_s13   ;;  %s7179_s12 = sphi %s7235_s12, %s8156_s12  }
   0x6   : > { %p26_p0 = scmp.ge.s32.totalorder %s25_s21, 10  ;;  %s28_s22 = sadd.s32 1, %s7203_s18 }
   0x7   : > { %s63_s23 = sadd.s32 1, %s7187_s14  ;;  %p70_p1 = scmp.ne.s32.totalorder %s7187_s14, %s7183_s13 }
   0x8   : > { %s8164_s21 = smov (%p26_p0, %s25_s21), 0  ;;  %s8166_s22 = smov (!%p26_p0, %s28_s22), %s7203_s18 }
   0x9   : > { %s58_s24 = ssub.s32 %s7199_s17, %s8164_s21  ;;  %p71_p2 = scmp.eq.s32.totalorder %s7207_s19, 0 }
   0xa   : > { %p30_p3 = scmp.ge.s32.totalorder %s8166_s22, 2  ;;  %p76_p4 = scmp.ne.s32.totalorder %s7183_s13, %s7179_s12 }
   0xb   : > { %p72_p5 = por %p71_p2, %p70_p1  ;;  %p77_p6 = scmp.eq.s32.totalorder %s5376_s20, 0 }
   0xc   : > { %s8168_s22 = smov (%p30_p3, %s8166_s22), 0  ;;  %p6080_p8 = scmp.lt.s32.totalorder %s7207_s19, 20 }
   0xd   : > { %p7288_p7 = por %p77_p6, %p76_p4  ;;  %s59_s26 = ssub.s32 %s7203_s18, %s8168_s22 }
   0xe   : > { %s60_s27 = sor.u32 %s59_s26, %s58_s24  ;;  %s161_s28 = sand.u32 1, %s7187_s14  }
   0xf   : > { %p61_p9 = scmp.eq.s32.totalorder %s60_s27, 0  ;;  %s6071_s29 = smul.u32 5120, %s161_s28 }
  0x10   : > { %p7296_p10 = pnand %p6080_p8, %p72_p5  ;;  %s167_s5 = smul.u32 20, %s7203_s18 }
  0x11   : > { %s7301_s4 = scalar_select %p61_p9, %s7187_s14, %s63_s23  }
  0x12   : > { %s6072_s6 = smul.u32 2560, %s7199_s17  ;;  %s165_s7 = scalar_lea.vmem [#allocation2], %s6071_s29 }
  0x13   : > { %s175_s8 = sshll.u32 %s165_s7, 4  ;;  %s7312_s24 = scalar_lea.sflag [#allocation3], %s161_s28  ;;  %s7305_s8 = int_to_ptr.vmem [resolvable:$true] %s175_s8 }
  0x14   : > { %s172_s9 = sadd.s32 %s6072_s6, %s167_s5  ;;  %p7113_p12 = pneg %p7296_p10 }
  0x15   : > { %s5382_s10 = sshll.u32 %s172_s9, 6  ;;  %s7116_s29 = scalar_lea.hbm %s8151_s1, 1638400 }
  0x16   : > { %s7310_s20 = scalar_lea.hbm %s8151_s1, %s5382_s10 }
  0x17   : > { %s7111_s23 = scalar_lea.hbm %s7310_s20, 81920  ;;  %p7117_p1 = scmp.lt.u32.totalorder %s7310_s20, %s8151_s1 }
  0x18   : > { %p7112_p11 = scmp.ne.s32.totalorder %s7310_s20, %s7111_s23  ;;  %p7118_p2 = scmp.lt.u32.totalorder %s7116_s29, %s7111_s23 }
  0x19   : > { %p7120_p4 = scmp.lt.u32.totalorder %s7111_s23, %s7310_s20 }
  0x1a   : > { %p7114_p13 = pnand %p7113_p12, %p7112_p11  ;;  %p7119_p3 = por %p7118_p2, %p7117_p1 }
  0x1c   : > { %p7115_p0 = pneg %p7114_p13  ;;  %p7121_p5 = por %p7120_p4, %p7119_p3 }
  0x1e   : > { %p7122_p6 = pnand %p7121_p5, %p7115_p0 }
  0x20   : > { %7125 = shalt.err (!%p7122_p6)
}
  0x21   : > { %s7126_s28 = scalar_lea.vmem %s7305_s8, 81920  ;;  %s7209_s7 = smov [#allocation2]  }
  0x22   : > { %p7127_p8 = scmp.ne.s32.totalorder %s7305_s8, %s7126_s28  ;;  %s7131_s9 = sshll.u32 %s7209_s7, 4  ;;  %s7132_s9 = int_to_ptr.vmem [resolvable:$false] %s7131_s9 }
  0x23   : > { %s7133_s10 = scalar_lea.vmem %s7132_s9, 163840  ;;  %p7134_p13 = scmp.lt.s32.totalorder %s7305_s8, %s7132_s9 }
  0x24   : > { %p7129_p9 = pnand %p7127_p8, %p7113_p12  ;;  %p7135_p1 = scmp.lt.s32.totalorder %s7133_s10, %s7126_s28 }
  0x26   : > { %p7130_p11 = pneg %p7129_p9  ;;  %p7136_p2 = por %p7135_p1, %p7134_p13 }
  0x28   : > { %p7137_p3 = pnand %p7136_p2, %p7130_p11 }
  0x2a   : > { %7140 = shalt.err (!%p7137_p3)
}
  0x2b   : > { %s7210_s11 = smov 2560   ;;  %s7211_s12 = smov 1280  }
  0x2c   : > { %s7212_s23 = smov 80   ;;  %p5383_p12 = scmp.ge.s32.totalorder %s7207_s19, 1 }
  0x2d   : > { %6079 = dma.hbm_to_vmem [thread:$0]  (!%p7296_p10), %s7310_s20, 81920, %s7305_s8, %s7312_s24, %s7210_s11, %s7211_s12, %s7212_s23  }
  0x2e   : > { %p191_p0 = scmp.lt.s32.totalorder %s7207_s19, 21 }
  0x30   : > { %p192_p4 = pnand %p5383_p12, %p191_p0 }
  0x31   : > { %s197_s26 = sand.u32 (!%p192_p4), 1, %s7183_s13  }
  0x32   : > { %195 = sbr.rel (%p192_p4) target bundleno = 944 (0x3b0), region = 32  ;;  %s198_s29 = scalar_lea.sflag (!%p192_p4), [#allocation3], %s197_s26 }
  0x33   : > { %s6073_s27 = smul.u32 (!%p192_p4), 5120, %s197_s26 }
  0x35   : > { %s7343_s5 = scalar_lea.vmem (!%p192_p4), [#allocation2], %s6073_s27 }
  0x39   : > { %7174 = dma.done.wait (%p7288_p7), %s198_s29, 81920  }
  0x3a   : > { %7176 = vsyncadd (%p7288_p7), %s198_s29, 4294885376  ;;  %s5384_s30 = sshll.u32 %s7191_s15, 2  ;;  %s241_s8 = smul.u32 20, %s7195_s16 }
  0x3b   : > { %p234_p10 = scmp.lt.s32.totalorder %s5384_s30, 39  ;;  %p5387_p7 = scmp.ne.s32.totalorder %s7191_s15, 0 }
  0x3c   : > { %p242_p5 = scmp.lt.s32.totalorder %s241_s8, 39  ;;  %v7213_v0 = vmov (!%p5387_p7), 0.0  }
  0x3d   : > { %s8170_s30 = smov (!%p234_p10, %s5384_s30), 39  ;;  %255 = sbr.rel (%p5387_p7) target bundleno = 69 (0x45), region = 40 }
  0x3e   : > { %s8172_s8 = smov (!%p242_p5, %s241_s8), 39  ;;  %s5385_s20 = sshll.u32 %s8170_s30, 1 }
  0x3f   : > { %s7354_s28 = scalar_lea.vmem %s8150_s0, %s5385_s20  ;;  %s7359_s10 = scalar_lea.vmem %s8152_s2, %s8172_s8 }
  0x40   : > { %s5386_s25 = sshll.u32 %s8172_s8, 1 }
  0x41   : > { %s7364_s16 = scalar_lea.vmem %s8153_s3, %s5386_s25 }
  0x42   : > { %256 = vst [vmem:[%s7364_s16] sm:$0xff] (!%p5387_p7), %v7213_v0  ;;  %257 = vst [vmem:[%s7364_s16 + $0x8] sm:$0xff] (!%p5387_p7), %v7213_v0 }
  0x43   : > { %258 = vst [vmem:[%s7364_s16 + $0x10] sm:$0xff] (!%p5387_p7), %v7213_v0  ;;  %259 = vst [vmem:[%s7364_s16 + $0x18] sm:$0xff] (!%p5387_p7), %v7213_v0 }
  0x44   : > { %260 = vst [vmem:[%s7364_s16 + $0x20] sm:$0xff] %v7213_v0 }
  0x45 PF: > { %v6150_v1 = vld [vmem:[%s7343_s5 + $0x4] ss:$80 sps:$4 sm:$0xff]   ;;  %v6152_v2 = vld [vmem:[%s7343_s5 + $0xc] ss:$80 sps:$4 sm:$0xff]   ;;  %v6154_v3 = vld [vmem:[%s7343_s5] ss:$80 sps:$4 sm:$0xff]   ;;  %v272_v39 = vlaneseq }
  0x46   : > { %4133 = vmatprep.subr.bf16.mxu0 %v6150_v1  ;;  %v6155_v4 = vld [vmem:[%s7343_s5 + $0x8] ss:$80 sps:$4 sm:$0xff]   ;;  %4215 = vmatprep.subr.bf16.mxu1 %v6152_v2  ;;  %v6156_v5 = vld [vmem:[%s7343_s5 + $0xa4] ss:$80 sps:$4 sm:$0xff]   ;;  %v6158_v6 = vld [vmem:[%s7343_s5 + $0xac] ss:$80 sps:$4 sm:$0xff]  }
  0x47   : > { %4134 = vmatpush1.bf16.msra.mxu0 %v6154_v3  ;;  %4216 = vmatpush1.bf16.msra.mxu1 %v6155_v4  ;;  %v6160_v7 = vld [vmem:[%s7343_s5 + $0xa0] ss:$80 sps:$4 sm:$0xff]   ;;  %v6161_v8 = vld [vmem:[%s7343_s5 + $0xa8] ss:$80 sps:$4 sm:$0xff]   ;;  %v6162_v9 = vld [vmem:[%s7343_s5 + $0x144] ss:$80 sps:$4 sm:$0xff]  }
  0x48   : > { %4135 = vmatprep.subr.bf16.mxu0 %v6156_v5  ;;  %4217 = vmatprep.subr.bf16.mxu1 %v6158_v6  ;;  %v6164_v10 = vld [vmem:[%s7343_s5 + $0x14c] ss:$80 sps:$4 sm:$0xff]   ;;  %v6166_v11 = vld [vmem:[%s7343_s5 + $0x140] ss:$80 sps:$4 sm:$0xff]   ;;  %v6167_v12 = vld [vmem:[%s7343_s5 + $0x148] ss:$80 sps:$4 sm:$0xff]  }
  0x49   : > { %v6168_v13 = vld [vmem:[%s7343_s5 + $0x1e4] ss:$80 sps:$4 sm:$0xff]   ;;  %v6170_v14 = vld [vmem:[%s7343_s5 + $0x1ec] ss:$80 sps:$4 sm:$0xff]   ;;  %v6172_v15 = vld [vmem:[%s7343_s5 + $0x1e0] ss:$80 sps:$4 sm:$0xff]  }
  0x4a   : > { %v6173_v16 = vld [vmem:[%s7343_s5 + $0x1e8] ss:$80 sps:$4 sm:$0xff]   ;;  %v6174_v17 = vld [vmem:[%s7343_s5 + $0x284] ss:$80 sps:$4 sm:$0xff]   ;;  %v6176_v18 = vld [vmem:[%s7343_s5 + $0x28c] ss:$80 sps:$4 sm:$0xff]  }
  0x4b   : > { %4136 = vmatpush1.bf16.msra.mxu0 %v6160_v7  ;;  %4218 = vmatpush1.bf16.msra.mxu1 %v6161_v8  ;;  %v6178_v19 = vld [vmem:[%s7343_s5 + $0x280] ss:$80 sps:$4 sm:$0xff]   ;;  %v6179_v20 = vld [vmem:[%s7343_s5 + $0x288] ss:$80 sps:$4 sm:$0xff]   ;;  %v6180_v21 = vld [vmem:[%s7343_s5 + $0x324] ss:$80 sps:$4 sm:$0xff]  }
  0x4c   : > { %4137 = vmatprep.subr.bf16.mxu0 %v6162_v9  ;;  %4219 = vmatprep.subr.bf16.mxu1 %v6164_v10  ;;  %v6182_v22 = vld [vmem:[%s7343_s5 + $0x32c] ss:$80 sps:$4 sm:$0xff]   ;;  %v6184_v23 = vld [vmem:[%s7343_s5 + $0x320] ss:$80 sps:$4 sm:$0xff]   ;;  %v6185_v24 = vld [vmem:[%s7343_s5 + $0x328] ss:$80 sps:$4 sm:$0xff]  }
  0x4d   : > { %v6186_v25 = vld [vmem:[%s7343_s5 + $0x3c4] ss:$80 sps:$4 sm:$0xff]   ;;  %v6188_v26 = vld [vmem:[%s7343_s5 + $0x3cc] ss:$80 sps:$4 sm:$0xff]   ;;  %v6190_v27 = vld [vmem:[%s7343_s5 + $0x3c0] ss:$80 sps:$4 sm:$0xff]  }
  0x4e   : > { %v6191_v28 = vld [vmem:[%s7343_s5 + $0x3c8] ss:$80 sps:$4 sm:$0xff]   ;;  %v6192_v29 = vld [vmem:[%s7343_s5 + $0x464] ss:$80 sps:$4 sm:$0xff]   ;;  %v6194_v30 = vld [vmem:[%s7343_s5 + $0x46c] ss:$80 sps:$4 sm:$0xff]  }
  0x4f   : > { %4138 = vmatpush1.bf16.msra.mxu0 %v6166_v11  ;;  %4220 = vmatpush1.bf16.msra.mxu1 %v6167_v12  ;;  %v6196_v31 = vld [vmem:[%s7343_s5 + $0x460] ss:$80 sps:$4 sm:$0xff]   ;;  %v6197_v32 = vld [vmem:[%s7343_s5 + $0x468] ss:$80 sps:$4 sm:$0xff]   ;;  %v6198_v33 = vld [vmem:[%s7343_s5 + $0x504] ss:$80 sps:$4 sm:$0xff]  }
  0x50   : > { %4139 = vmatprep.subr.bf16.mxu0 %v6168_v13  ;;  %4221 = vmatprep.subr.bf16.mxu1 %v6170_v14  ;;  %v6200_v34 = vld [vmem:[%s7343_s5 + $0x50c] ss:$80 sps:$4 sm:$0xff]   ;;  %v6202_v35 = vld [vmem:[%s7343_s5 + $0x500] ss:$80 sps:$4 sm:$0xff]   ;;  %v6203_v36 = vld [vmem:[%s7343_s5 + $0x508] ss:$80 sps:$4 sm:$0xff]  }
  0x51   : > { %v7214_v37 = vmov 1983009808   ;;  %v6204_v40 = vld [vmem:[%s7343_s5 + $0x5a4] ss:$80 sps:$4 sm:$0xff]   ;;  %v6206_v41 = vld [vmem:[%s7343_s5 + $0x5ac] ss:$80 sps:$4 sm:$0xff]  }
  0x52   : > { %v270_v38 = vunpack.c.l.s4 %v7214_v37  ;;  %v6208_v42 = vld [vmem:[%s7343_s5 + $0x5a0] ss:$80 sps:$4 sm:$0xff]   ;;  %v7411_v44 = vshrl.u32 %v272_v39, 7  ;;  %v6209_v45 = vld [vmem:[%s7343_s5 + $0x5a8] ss:$80 sps:$4 sm:$0xff]   ;;  %p6028_p6 = scmp.ne.s32.totalorder %s7191_s15, 9 }
  0x53   : > { %4140 = vmatpush1.bf16.msra.mxu0 %v6172_v15  ;;  %4222 = vmatpush1.bf16.msra.mxu1 %v6173_v16  ;;  %v6210_v46 = vld [vmem:[%s7343_s5 + $0x644] ss:$80 sps:$4 sm:$0xff]   ;;  %v6212_v47 = vld [vmem:[%s7343_s5 + $0x64c] ss:$80 sps:$4 sm:$0xff]   ;;  %v6214_v48 = vld [vmem:[%s7343_s5 + $0x640] ss:$80 sps:$4 sm:$0xff]  }
  0x54   : > { %4141 = vmatprep.subr.bf16.mxu0 %v6174_v17  ;;  %4223 = vmatprep.subr.bf16.mxu1 %v6176_v18  ;;  %v271_v43 = vunpack.c.0.s8 %v270_v38  ;;  %v6215_v49 = vld [vmem:[%s7343_s5 + $0x648] ss:$80 sps:$4 sm:$0xff]   ;;  %v6216_v51 = vld [vmem:[%s7343_s5 + $0x6e4] ss:$80 sps:$4 sm:$0xff]   ;;  %v6218_v52 = vld [vmem:[%s7343_s5 + $0x6ec] ss:$80 sps:$4 sm:$0xff]  }
  0x55   : > { %v266_v53 = vld [vmem:[%s7354_s28] sm:$0xff]  ;;  %v6221_v56 = vld [vmem:[%s7343_s5 + $0x6e8] ss:$80 sps:$4 sm:$0xff]   ;;  %v6224_v58 = vld [vmem:[%s7343_s5 + $0x78c] ss:$80 sps:$4 sm:$0xff]  }
  0x56   : > { %v7419_v50 = vsub.s32 %v271_v43, %v7411_v44  ;;  %v6220_v54 = vld [vmem:[%s7343_s5 + $0x6e0] ss:$80 sps:$4 sm:$0xff]   ;;  %v6222_v57 = vld [vmem:[%s7343_s5 + $0x784] ss:$80 sps:$4 sm:$0xff]   ;;  %v6227_v62 = vld [vmem:[%s7343_s5 + $0x788] ss:$80 sps:$4 sm:$0xff]   ;;  %v268_v5 = vcombine.high %v266_v53, %v266_v53 }
  0x57   : > { %4142 = vmatpush1.bf16.msra.mxu0 %v6178_v19  ;;  %4224 = vmatpush1.bf16.msra.mxu1 %v6179_v20  ;;  %v6226_v60 = vld [vmem:[%s7343_s5 + $0x780] ss:$80 sps:$4 sm:$0xff]   ;;  %v6228_v63 = vld [vmem:[%s7343_s5 + $0x824] ss:$80 sps:$4 sm:$0xff]   ;;  %v6230_v0 = vld [vmem:[%s7343_s5 + $0x82c] ss:$80 sps:$4 sm:$0xff]  }
  0x58   : > { %4143 = vmatprep.subr.bf16.mxu0 %v6180_v21  ;;  %4225 = vmatprep.subr.bf16.mxu1 %v6182_v22  ;;  %v275_v55 = vrot.slane %v266_v53, %v7419_v50  ;;  %v6232_v1 = vld [vmem:[%s7343_s5 + $0x820] ss:$80 sps:$4 sm:$0xff]   ;;  %v6233_v2 = vld [vmem:[%s7343_s5 + $0x828] ss:$80 sps:$4 sm:$0xff]   ;;  %v6234_v3 = vld [vmem:[%s7343_s5 + $0x8c4] ss:$80 sps:$4 sm:$0xff]   ;;  %v7446_v10 = vrot.slane %v268_v5, %v7419_v50 }
  0x59   : > { %v6236_v4 = vld [vmem:[%s7343_s5 + $0x8cc] ss:$80 sps:$4 sm:$0xff]   ;;  %v6238_v6 = vld [vmem:[%s7343_s5 + $0x8c0] ss:$80 sps:$4 sm:$0xff]   ;;  %v6239_v7 = vld [vmem:[%s7343_s5 + $0x8c8] ss:$80 sps:$4 sm:$0xff]  }
  0x5a   : > { %v283_v59 = vcombine.high %v275_v55, %v275_v55  ;;  %v6240_v8 = vld [vmem:[%s7343_s5 + $0x964] ss:$80 sps:$4 sm:$0xff]   ;;  %v6242_v9 = vld [vmem:[%s7343_s5 + $0x96c] ss:$80 sps:$4 sm:$0xff]   ;;  %v6244_v11 = vld [vmem:[%s7343_s5 + $0x960] ss:$80 sps:$4 sm:$0xff]   ;;  %v284_v15 = vcombine.high %v7446_v10, %v7446_v10  ;;  %v7455_v17 = vpack.c.bf16 %v275_v55, %v275_v55 }
  0x5b   : > { %4144 = vmatpush1.bf16.msra.mxu0 %v6184_v23  ;;  %4226 = vmatpush1.bf16.msra.mxu1 %v6185_v24  ;;  %v6245_v12 = vld [vmem:[%s7343_s5 + $0x968] ss:$80 sps:$4 sm:$0xff]   ;;  %v6248_v13 = vld [vmem:[%s7343_s5 + $0xa04] ss:$80 sps:$4 sm:$0xff]   ;;  %v6251_v14 = vld [vmem:[%s7343_s5 + $0xa0c] ss:$80 sps:$4 sm:$0xff]  }
  0x5c   : > { %4145 = vmatprep.subr.bf16.mxu0 %v6186_v25  ;;  %4227 = vmatprep.subr.bf16.mxu1 %v6188_v26  ;;  %v7430_v61 = vpack.c.bf16 %v283_v59, %v283_v59  ;;  %v6246_v16 = vld [vmem:[%s7343_s5 + $0xa00] ss:$80 sps:$4 sm:$0xff]   ;;  %v6249_v18 = vld [vmem:[%s7343_s5 + $0xa08] ss:$80 sps:$4 sm:$0xff]   ;;  %v6254_v19 = vld [vmem:[%s7343_s5 + $0xaa4] ss:$80 sps:$4 sm:$0xff]   ;;  %v7460_v21 = vpack.c.bf16 %v284_v15, %v284_v15 }
  0x5d   : > { %v6257_v20 = vld [vmem:[%s7343_s5 + $0xaac] ss:$80 sps:$4 sm:$0xff]   ;;  %v6252_v22 = vld [vmem:[%s7343_s5 + $0xaa0] ss:$80 sps:$4 sm:$0xff]   ;;  %v6255_v23 = vld [vmem:[%s7343_s5 + $0xaa8] ss:$80 sps:$4 sm:$0xff]  }
  0x5e   : > { %4165 = vmatprep.mubr.bf16.mxu0 %v7430_v61  ;;  %4247 = vmatprep.mubr.bf16.mxu1 %v7430_v61  ;;  %v6260_v24 = vld [vmem:[%s7343_s5 + $0xb44] ss:$80 sps:$4 sm:$0xff]   ;;  %v6263_v25 = vld [vmem:[%s7343_s5 + $0xb4c] ss:$80 sps:$4 sm:$0xff]   ;;  %v6258_v26 = vld [vmem:[%s7343_s5 + $0xb40] ss:$80 sps:$4 sm:$0xff]  }
  0x5f   : > { %4146 = vmatpush1.bf16.msra.mxu0 %v6190_v27  ;;  %4228 = vmatpush1.bf16.msra.mxu1 %v6191_v28  ;;  %v6261_v27 = vld [vmem:[%s7343_s5 + $0xb48] ss:$80 sps:$4 sm:$0xff]   ;;  %v6266_v28 = vld [vmem:[%s7343_s5 + $0xbe4] ss:$80 sps:$4 sm:$0xff]   ;;  %v6281_v37 = vld [vmem:[%s7343_s5 + $0xd2c] ss:$80 sps:$4 sm:$0xff]  }
  0x60   : > { %4147 = vmatprep.subr.bf16.mxu0 %v6192_v29  ;;  %4229 = vmatprep.subr.bf16.mxu1 %v6194_v30  ;;  %v6269_v29 = vld [vmem:[%s7343_s5 + $0xbec] ss:$80 sps:$4 sm:$0xff]   ;;  %v6264_v30 = vld [vmem:[%s7343_s5 + $0xbe0] ss:$80 sps:$4 sm:$0xff]   ;;  %v6279_v39 = vld [vmem:[%s7343_s5 + $0xd28] ss:$80 sps:$4 sm:$0xff]  }
  0x61   : > { %v6276_v38 = vld [vmem:[%s7343_s5 + $0xd20] ss:$80 sps:$4 sm:$0xff]   ;;  %v6285_v43 = vld [vmem:[%s7343_s5 + $0xdc8] ss:$80 sps:$4 sm:$0xff]   ;;  %v6305_v55 = vld [vmem:[%s7343_s5 + $0xfac] ss:$80 sps:$4 sm:$0xff]  }
  0x62   : > { %v6297_v53 = vld [vmem:[%s7343_s5 + $0xf08] ss:$80 sps:$4 sm:$0xff]   ;;  %v6311_v59 = vld [vmem:[%s7343_s5 + $0x104c] ss:$80 sps:$4 sm:$0xff]   ;;  %v6318_v5 = vld [vmem:[%s7343_s5 + $0x1180] ss:$80 sps:$4 sm:$0xff]  }
  0x63   : > { %4148 = vmatpush1.bf16.msra.mxu0 %v6196_v31  ;;  %4230 = vmatpush1.bf16.msra.mxu1 %v6197_v32  ;;  %v6267_v31 = vld [vmem:[%s7343_s5 + $0xbe8] ss:$80 sps:$4 sm:$0xff]   ;;  %v6272_v32 = vld [vmem:[%s7343_s5 + $0xc84] ss:$80 sps:$4 sm:$0xff]  }
  0x64   : > { %4149 = vmatprep.subr.bf16.mxu0 %v6198_v33  ;;  %4231 = vmatprep.subr.bf16.mxu1 %v6200_v34  ;;  %v6275_v33 = vld [vmem:[%s7343_s5 + $0xc8c] ss:$80 sps:$4 sm:$0xff]   ;;  %v6270_v34 = vld [vmem:[%s7343_s5 + $0xc80] ss:$80 sps:$4 sm:$0xff]   ;;  %v6333_v15 = vld [vmem:[%s7343_s5 + $0x12c8] ss:$80 sps:$4 sm:$0xff]  }
  0x67   : > { %4150 = vmatpush1.bf16.msra.mxu0 %v6202_v35  ;;  %4232 = vmatpush1.bf16.msra.mxu1 %v6203_v36  ;;  %v6273_v35 = vld [vmem:[%s7343_s5 + $0xc88] ss:$80 sps:$4 sm:$0xff]   ;;  %v6278_v36 = vld [vmem:[%s7343_s5 + $0xd24] ss:$80 sps:$4 sm:$0xff]  }
  0x68   : > { %4151 = vmatprep.subr.bf16.mxu0 %v6204_v40  ;;  %4233 = vmatprep.subr.bf16.mxu1 %v6206_v41  ;;  %v6284_v40 = vld [vmem:[%s7343_s5 + $0xdc4] ss:$80 sps:$4 sm:$0xff]   ;;  %v6287_v41 = vld [vmem:[%s7343_s5 + $0xdcc] ss:$80 sps:$4 sm:$0xff]  }
  0x6b   : > { %4152 = vmatpush1.bf16.msra.mxu0 %v6208_v42  ;;  %4234 = vmatpush1.bf16.msra.mxu1 %v6209_v45  ;;  %v6282_v42 = vld [vmem:[%s7343_s5 + $0xdc0] ss:$80 sps:$4 sm:$0xff]   ;;  %v6290_v45 = vld [vmem:[%s7343_s5 + $0xe64] ss:$80 sps:$4 sm:$0xff]  }
  0x6c   : > { %4153 = vmatprep.subr.bf16.mxu0 %v6210_v46  ;;  %4235 = vmatprep.subr.bf16.mxu1 %v6212_v47  ;;  %v6293_v46 = vld [vmem:[%s7343_s5 + $0xe6c] ss:$80 sps:$4 sm:$0xff]   ;;  %v6288_v47 = vld [vmem:[%s7343_s5 + $0xe60] ss:$80 sps:$4 sm:$0xff]  }
  0x6f   : > { %4154 = vmatpush1.bf16.msra.mxu0 %v6214_v48  ;;  %4236 = vmatpush1.bf16.msra.mxu1 %v6215_v49  ;;  %v6291_v48 = vld [vmem:[%s7343_s5 + $0xe68] ss:$80 sps:$4 sm:$0xff]   ;;  %v6296_v49 = vld [vmem:[%s7343_s5 + $0xf04] ss:$80 sps:$4 sm:$0xff]  }
  0x70   : > { %4155 = vmatprep.subr.bf16.mxu0 %v6216_v51  ;;  %4237 = vmatprep.subr.bf16.mxu1 %v6218_v52  ;;  %v6299_v51 = vld [vmem:[%s7343_s5 + $0xf0c] ss:$80 sps:$4 sm:$0xff]   ;;  %v6294_v52 = vld [vmem:[%s7343_s5 + $0xf00] ss:$80 sps:$4 sm:$0xff]  }
  0x73   : > { %4156 = vmatpush1.bf16.msra.mxu0 %v6220_v54  ;;  %4238 = vmatpush1.bf16.msra.mxu1 %v6221_v56  ;;  %v6302_v54 = vld [vmem:[%s7343_s5 + $0xfa4] ss:$80 sps:$4 sm:$0xff]   ;;  %v6300_v56 = vld [vmem:[%s7343_s5 + $0xfa0] ss:$80 sps:$4 sm:$0xff]  }
  0x74   : > { %4157 = vmatprep.subr.bf16.mxu0 %v6222_v57  ;;  %4239 = vmatprep.subr.bf16.mxu1 %v6224_v58  ;;  %v6303_v57 = vld [vmem:[%s7343_s5 + $0xfa8] ss:$80 sps:$4 sm:$0xff]   ;;  %v6308_v58 = vld [vmem:[%s7343_s5 + $0x1044] ss:$80 sps:$4 sm:$0xff]  }
  0x77   : > { %4158 = vmatpush1.bf16.msra.mxu0 %v6226_v60  ;;  %4240 = vmatpush1.bf16.msra.mxu1 %v6227_v62  ;;  %v6306_v60 = vld [vmem:[%s7343_s5 + $0x1040] ss:$80 sps:$4 sm:$0xff]   ;;  %v6309_v62 = vld [vmem:[%s7343_s5 + $0x1048] ss:$80 sps:$4 sm:$0xff]  }
  0x78   : > { %4159 = vmatprep.subr.bf16.mxu0 %v6228_v63  ;;  %4241 = vmatprep.subr.bf16.mxu1 %v6230_v0  ;;  %v6314_v63 = vld [vmem:[%s7343_s5 + $0x10e4] ss:$80 sps:$4 sm:$0xff]   ;;  %v6317_v0 = vld [vmem:[%s7343_s5 + $0x10ec] ss:$80 sps:$4 sm:$0xff]  }
  0x7b   : > { %4160 = vmatpush1.bf16.msra.mxu0 %v6232_v1  ;;  %4242 = vmatpush1.bf16.msra.mxu1 %v6233_v2  ;;  %v6312_v1 = vld [vmem:[%s7343_s5 + $0x10e0] ss:$80 sps:$4 sm:$0xff]   ;;  %v6315_v2 = vld [vmem:[%s7343_s5 + $0x10e8] ss:$80 sps:$4 sm:$0xff]  }
  0x7c   : > { %4161 = vmatprep.subr.bf16.mxu0 %v6234_v3  ;;  %4243 = vmatprep.subr.bf16.mxu1 %v6236_v4  ;;  %v6320_v3 = vld [vmem:[%s7343_s5 + $0x1184] ss:$80 sps:$4 sm:$0xff]   ;;  %v6323_v4 = vld [vmem:[%s7343_s5 + $0x118c] ss:$80 sps:$4 sm:$0xff]  }
  0x7f   : > { %4162 = vmatpush1.bf16.msra.mxu0 %v6238_v6  ;;  %4244 = vmatpush1.bf16.msra.mxu1 %v6239_v7  ;;  %v6321_v6 = vld [vmem:[%s7343_s5 + $0x1188] ss:$80 sps:$4 sm:$0xff]   ;;  %v6326_v7 = vld [vmem:[%s7343_s5 + $0x1224] ss:$80 sps:$4 sm:$0xff]  }
  0x80   : > { %4163 = vmatprep.subr.bf16.mxu0 %v6240_v8  ;;  %4245 = vmatprep.subr.bf16.mxu1 %v6242_v9  ;;  %v6329_v8 = vld [vmem:[%s7343_s5 + $0x122c] ss:$80 sps:$4 sm:$0xff]   ;;  %v6324_v9 = vld [vmem:[%s7343_s5 + $0x1220] ss:$80 sps:$4 sm:$0xff]  }
  0x83   : > { %4164 = vmatpush1.bf16.msra.mxu0 %v6244_v11  ;;  %4246 = vmatpush1.bf16.msra.mxu1 %v6245_v12  ;;  %v6327_v11 = vld [vmem:[%s7343_s5 + $0x1228] ss:$80 sps:$4 sm:$0xff]   ;;  %v6332_v12 = vld [vmem:[%s7343_s5 + $0x12c4] ss:$80 sps:$4 sm:$0xff]  }
  0x84   : > { %4174 = vmatprep.subr.bf16.mxu0 %v6248_v13  ;;  %4256 = vmatprep.subr.bf16.mxu1 %v6251_v14  ;;  %v6335_v13 = vld [vmem:[%s7343_s5 + $0x12cc] ss:$80 sps:$4 sm:$0xff]   ;;  %v6330_v14 = vld [vmem:[%s7343_s5 + $0x12c0] ss:$80 sps:$4 sm:$0xff]  }
  0x86   : > { %4166 = vmatmul.mubr.bf16.vlgmr.msra.gmra.mrb[0].mxu0 %v7455_v17  ;;  %4248 = vmatmul.mubr.bf16.vlgmr.msra.gmra.mrb[0].mxu1 %v7455_v17 }
  0x87   : > { %4175 = vmatpush1.bf16.msra.mxu0 %v6246_v16  ;;  %4257 = vmatpush1.bf16.msra.mxu1 %v6249_v18  ;;  %v6338_v16 = vld [vmem:[%s7343_s5 + $0x1364] ss:$80 sps:$4 sm:$0xff]   ;;  %v6341_v18 = vld [vmem:[%s7343_s5 + $0x136c] ss:$80 sps:$4 sm:$0xff]  }
  0x88   : > { %4176 = vmatprep.subr.bf16.mxu0 %v6254_v19  ;;  %4258 = vmatprep.subr.bf16.mxu1 %v6257_v20  ;;  %v6336_v19 = vld [vmem:[%s7343_s5 + $0x1360] ss:$80 sps:$4 sm:$0xff]   ;;  %v6339_v20 = vld [vmem:[%s7343_s5 + $0x1368] ss:$80 sps:$4 sm:$0xff]  }
  0x89   : > { %4206 = vmatprep.mubr.bf16.mxu0 %v7460_v21  ;;  %4288 = vmatprep.mubr.bf16.mxu1 %v7460_v21 }
  0x8b   : > { %4177 = vmatpush1.bf16.msra.mxu0 %v6252_v22  ;;  %4259 = vmatpush1.bf16.msra.mxu1 %v6255_v23  ;;  %v6345_v22 = vld [vmem:[%s7343_s5 + $0x14] ss:$80 sps:$4 sm:$0xff]   ;;  %v6348_v23 = vld [vmem:[%s7343_s5 + $0x1c] ss:$80 sps:$4 sm:$0xff]  }
  0x8c   : > { %4178 = vmatprep.subr.bf16.mxu0 %v6260_v24  ;;  %4260 = vmatprep.subr.bf16.mxu1 %v6263_v25  ;;  %v7528_v24 = vpack.c.bf16 %v7446_v10, %v7446_v10  ;;  %v6343_v25 = vld [vmem:[%s7343_s5 + $0x10] ss:$80 sps:$4 sm:$0xff]   ;;  %v6352_v10 = vld [vmem:[%s7343_s5 + $0xb8] ss:$80 sps:$4 sm:$0xff]  }
  0x8f   : > { %4179 = vmatpush1.bf16.msra.mxu0 %v6258_v26  ;;  %4261 = vmatpush1.bf16.msra.mxu1 %v6261_v27  ;;  %v6346_v26 = vld [vmem:[%s7343_s5 + $0x18] ss:$80 sps:$4 sm:$0xff]   ;;  %v6351_v27 = vld [vmem:[%s7343_s5 + $0xb4] ss:$80 sps:$4 sm:$0xff]  }
  0x90   : > { %4180 = vmatprep.subr.bf16.mxu0 %v6266_v28  ;;  %4262 = vmatprep.subr.bf16.mxu1 %v6269_v29  ;;  %v6354_v28 = vld [vmem:[%s7343_s5 + $0xbc] ss:$80 sps:$4 sm:$0xff]   ;;  %v6349_v29 = vld [vmem:[%s7343_s5 + $0xb0] ss:$80 sps:$4 sm:$0xff]  }
  0x93   : > { %4181 = vmatpush1.bf16.msra.mxu0 %v6264_v30  ;;  %4263 = vmatpush1.bf16.msra.mxu1 %v6267_v31  ;;  %v6357_v30 = vld [vmem:[%s7343_s5 + $0x154] ss:$80 sps:$4 sm:$0xff]   ;;  %v6360_v31 = vld [vmem:[%s7343_s5 + $0x15c] ss:$80 sps:$4 sm:$0xff]  }
  0x94   : > { %4182 = vmatprep.subr.bf16.mxu0 %v6272_v32  ;;  %4264 = vmatprep.subr.bf16.mxu1 %v6275_v33  ;;  %v6355_v32 = vld [vmem:[%s7343_s5 + $0x150] ss:$80 sps:$4 sm:$0xff]   ;;  %v6358_v33 = vld [vmem:[%s7343_s5 + $0x158] ss:$80 sps:$4 sm:$0xff]  }
  0x97   : > { %4183 = vmatpush1.bf16.msra.mxu0 %v6270_v34  ;;  %4265 = vmatpush1.bf16.msra.mxu1 %v6273_v35  ;;  %v6363_v34 = vld [vmem:[%s7343_s5 + $0x1f4] ss:$80 sps:$4 sm:$0xff]   ;;  %v6366_v35 = vld [vmem:[%s7343_s5 + $0x1fc] ss:$80 sps:$4 sm:$0xff]  }
  0x98   : > { %4184 = vmatprep.subr.bf16.mxu0 %v6278_v36  ;;  %4266 = vmatprep.subr.bf16.mxu1 %v6281_v37  ;;  %v6361_v36 = vld [vmem:[%s7343_s5 + $0x1f0] ss:$80 sps:$4 sm:$0xff]   ;;  %v6364_v37 = vld [vmem:[%s7343_s5 + $0x1f8] ss:$80 sps:$4 sm:$0xff]  }
  0x9b   : > { %4185 = vmatpush1.bf16.msra.mxu0 %v6276_v38  ;;  %4267 = vmatpush1.bf16.msra.mxu1 %v6279_v39  ;;  %v6369_v38 = vld [vmem:[%s7343_s5 + $0x294] ss:$80 sps:$4 sm:$0xff]   ;;  %v6372_v39 = vld [vmem:[%s7343_s5 + $0x29c] ss:$80 sps:$4 sm:$0xff]  }
  0x9c   : > { %4186 = vmatprep.subr.bf16.mxu0 %v6284_v40  ;;  %4268 = vmatprep.subr.bf16.mxu1 %v6287_v41  ;;  %v6367_v40 = vld [vmem:[%s7343_s5 + $0x290] ss:$80 sps:$4 sm:$0xff]   ;;  %v6370_v41 = vld [vmem:[%s7343_s5 + $0x298] ss:$80 sps:$4 sm:$0xff]  }
  0x9f   : > { %4187 = vmatpush1.bf16.msra.mxu0 %v6282_v42  ;;  %4269 = vmatpush1.bf16.msra.mxu1 %v6285_v43  ;;  %v6375_v42 = vld [vmem:[%s7343_s5 + $0x334] ss:$80 sps:$4 sm:$0xff]   ;;  %v6378_v43 = vld [vmem:[%s7343_s5 + $0x33c] ss:$80 sps:$4 sm:$0xff]  }
  0xa0   : > { %4188 = vmatprep.subr.bf16.mxu0 %v6290_v45  ;;  %4270 = vmatprep.subr.bf16.mxu1 %v6293_v46  ;;  %v6373_v45 = vld [vmem:[%s7343_s5 + $0x330] ss:$80 sps:$4 sm:$0xff]   ;;  %v6376_v46 = vld [vmem:[%s7343_s5 + $0x338] ss:$80 sps:$4 sm:$0xff]  }
  0xa3   : > { %4189 = vmatpush1.bf16.msra.mxu0 %v6288_v47  ;;  %4271 = vmatpush1.bf16.msra.mxu1 %v6291_v48  ;;  %v6381_v47 = vld [vmem:[%s7343_s5 + $0x3d4] ss:$80 sps:$4 sm:$0xff]   ;;  %v6384_v48 = vld [vmem:[%s7343_s5 + $0x3dc] ss:$80 sps:$4 sm:$0xff]  }
  0xa4   : > { %4190 = vmatprep.subr.bf16.mxu0 %v6296_v49  ;;  %4272 = vmatprep.subr.bf16.mxu1 %v6299_v51  ;;  %v6379_v49 = vld [vmem:[%s7343_s5 + $0x3d0] ss:$80 sps:$4 sm:$0xff]   ;;  %v6382_v51 = vld [vmem:[%s7343_s5 + $0x3d8] ss:$80 sps:$4 sm:$0xff]  }
  0xa7   : > { %4191 = vmatpush1.bf16.msra.mxu0 %v6294_v52  ;;  %4273 = vmatpush1.bf16.msra.mxu1 %v6297_v53  ;;  %v6387_v52 = vld [vmem:[%s7343_s5 + $0x474] ss:$80 sps:$4 sm:$0xff]   ;;  %v6390_v53 = vld [vmem:[%s7343_s5 + $0x47c] ss:$80 sps:$4 sm:$0xff]  }
  0xa8   : > { %4192 = vmatprep.subr.bf16.mxu0 %v6302_v54  ;;  %4274 = vmatprep.subr.bf16.mxu1 %v6305_v55  ;;  %v6385_v54 = vld [vmem:[%s7343_s5 + $0x470] ss:$80 sps:$4 sm:$0xff]   ;;  %v6388_v55 = vld [vmem:[%s7343_s5 + $0x478] ss:$80 sps:$4 sm:$0xff]  }
  0xab   : > { %4193 = vmatpush1.bf16.msra.mxu0 %v6300_v56  ;;  %4275 = vmatpush1.bf16.msra.mxu1 %v6303_v57  ;;  %v6393_v56 = vld [vmem:[%s7343_s5 + $0x514] ss:$80 sps:$4 sm:$0xff]   ;;  %v6396_v57 = vld [vmem:[%s7343_s5 + $0x51c] ss:$80 sps:$4 sm:$0xff]  }
  0xac   : > { %4194 = vmatprep.subr.bf16.mxu0 %v6308_v58  ;;  %4276 = vmatprep.subr.bf16.mxu1 %v6311_v59  ;;  %v6391_v58 = vld [vmem:[%s7343_s5 + $0x510] ss:$80 sps:$4 sm:$0xff]   ;;  %v6394_v59 = vld [vmem:[%s7343_s5 + $0x518] ss:$80 sps:$4 sm:$0xff]  }
  0xaf   : > { %4195 = vmatpush1.bf16.msra.mxu0 %v6306_v60  ;;  %4277 = vmatpush1.bf16.msra.mxu1 %v6309_v62  ;;  %v6399_v60 = vld [vmem:[%s7343_s5 + $0x5b4] ss:$80 sps:$4 sm:$0xff]   ;;  %v6402_v62 = vld [vmem:[%s7343_s5 + $0x5bc] ss:$80 sps:$4 sm:$0xff]  }
  0xb0   : > { %4196 = vmatprep.subr.bf16.mxu0 %v6314_v63  ;;  %4278 = vmatprep.subr.bf16.mxu1 %v6317_v0  ;;  %v6397_v63 = vld [vmem:[%s7343_s5 + $0x5b0] ss:$80 sps:$4 sm:$0xff]   ;;  %v6400_v0 = vld [vmem:[%s7343_s5 + $0x5b8] ss:$80 sps:$4 sm:$0xff]  }
  0xb3   : > { %4197 = vmatpush1.bf16.msra.mxu0 %v6312_v1  ;;  %4279 = vmatpush1.bf16.msra.mxu1 %v6315_v2  ;;  %v6405_v1 = vld [vmem:[%s7343_s5 + $0x654] ss:$80 sps:$4 sm:$0xff]   ;;  %v6408_v2 = vld [vmem:[%s7343_s5 + $0x65c] ss:$80 sps:$4 sm:$0xff]  }
  0xb4   : > { %4198 = vmatprep.subr.bf16.mxu0 %v6320_v3  ;;  %4280 = vmatprep.subr.bf16.mxu1 %v6323_v4  ;;  %v6403_v3 = vld [vmem:[%s7343_s5 + $0x650] ss:$80 sps:$4 sm:$0xff]   ;;  %v6406_v4 = vld [vmem:[%s7343_s5 + $0x658] ss:$80 sps:$4 sm:$0xff]  }
  0xb7   : > { %4199 = vmatpush1.bf16.msra.mxu0 %v6318_v5  ;;  %4281 = vmatpush1.bf16.msra.mxu1 %v6321_v6  ;;  %v6411_v5 = vld [vmem:[%s7343_s5 + $0x6f4] ss:$80 sps:$4 sm:$0xff]   ;;  %v6414_v6 = vld [vmem:[%s7343_s5 + $0x6fc] ss:$80 sps:$4 sm:$0xff]  }
  0xb8   : > { %4200 = vmatprep.subr.bf16.mxu0 %v6326_v7  ;;  %4282 = vmatprep.subr.bf16.mxu1 %v6329_v8  ;;  %v6409_v7 = vld [vmem:[%s7343_s5 + $0x6f0] ss:$80 sps:$4 sm:$0xff]   ;;  %v6412_v8 = vld [vmem:[%s7343_s5 + $0x6f8] ss:$80 sps:$4 sm:$0xff]  }
  0xbb   : > { %4201 = vmatpush1.bf16.msra.mxu0 %v6324_v9  ;;  %4283 = vmatpush1.bf16.msra.mxu1 %v6327_v11  ;;  %v6417_v9 = vld [vmem:[%s7343_s5 + $0x794] ss:$80 sps:$4 sm:$0xff]   ;;  %v6420_v11 = vld [vmem:[%s7343_s5 + $0x79c] ss:$80 sps:$4 sm:$0xff]  }
  0xbc   : > { %4202 = vmatprep.subr.bf16.mxu0 %v6332_v12  ;;  %4284 = vmatprep.subr.bf16.mxu1 %v6335_v13  ;;  %v6415_v12 = vld [vmem:[%s7343_s5 + $0x790] ss:$80 sps:$4 sm:$0xff]   ;;  %v6418_v13 = vld [vmem:[%s7343_s5 + $0x798] ss:$80 sps:$4 sm:$0xff]  }
  0xbf   : > { %4203 = vmatpush1.bf16.msra.mxu0 %v6330_v14  ;;  %4285 = vmatpush1.bf16.msra.mxu1 %v6333_v15  ;;  %v6423_v14 = vld [vmem:[%s7343_s5 + $0x834] ss:$80 sps:$4 sm:$0xff]   ;;  %v6426_v15 = vld [vmem:[%s7343_s5 + $0x83c] ss:$80 sps:$4 sm:$0xff]  }
  0xc0   : > { %4204 = vmatprep.subr.bf16.mxu0 %v6338_v16  ;;  %4286 = vmatprep.subr.bf16.mxu1 %v6341_v18  ;;  %v6421_v16 = vld [vmem:[%s7343_s5 + $0x830] ss:$80 sps:$4 sm:$0xff]   ;;  %v6424_v18 = vld [vmem:[%s7343_s5 + $0x838] ss:$80 sps:$4 sm:$0xff]  }
  0xc3   : > { %4205 = vmatpush1.bf16.msra.mxu0 %v6336_v19  ;;  %4287 = vmatpush1.bf16.msra.mxu1 %v6339_v20  ;;  %v6429_v19 = vld [vmem:[%s7343_s5 + $0x8d4] ss:$80 sps:$4 sm:$0xff]   ;;  %v6432_v20 = vld [vmem:[%s7343_s5 + $0x8dc] ss:$80 sps:$4 sm:$0xff]  }
  0xc4   : > { %4297 = vmatprep.subr.bf16.mxu0 %v6345_v22  ;;  %4379 = vmatprep.subr.bf16.mxu1 %v6348_v23  ;;  %v6427_v22 = vld [vmem:[%s7343_s5 + $0x8d0] ss:$80 sps:$4 sm:$0xff]   ;;  %v6430_v23 = vld [vmem:[%s7343_s5 + $0x8d8] ss:$80 sps:$4 sm:$0xff]  }
  0xc6   : > { %4207 = vmatmul.mubr.bf16.vlgmr.msra.gmra.mrb[0].mxu0 %v7528_v24  ;;  %4289 = vmatmul.mubr.bf16.vlgmr.msra.gmra.mrb[0].mxu1 %v7528_v24 }
  0xc7   : > { %4298 = vmatpush1.bf16.msra.mxu0 %v6343_v25  ;;  %4380 = vmatpush1.bf16.msra.mxu1 %v6346_v26  ;;  %v6435_v25 = vld [vmem:[%s7343_s5 + $0x974] ss:$80 sps:$4 sm:$0xff]   ;;  %v6438_v26 = vld [vmem:[%s7343_s5 + $0x97c] ss:$80 sps:$4 sm:$0xff]  }
  0xc8   : > { %4299 = vmatprep.subr.bf16.mxu0 %v6351_v27  ;;  %4381 = vmatprep.subr.bf16.mxu1 %v6354_v28  ;;  %v6433_v27 = vld [vmem:[%s7343_s5 + $0x970] ss:$80 sps:$4 sm:$0xff]   ;;  %v6436_v28 = vld [vmem:[%s7343_s5 + $0x978] ss:$80 sps:$4 sm:$0xff]  }
  0xc9   : > { %4329 = vmatprep.mubr.bf16.mxu0 %v7430_v61  ;;  %4411 = vmatprep.mubr.bf16.mxu1 %v7430_v61 }
  0xcb   : > { %4300 = vmatpush1.bf16.msra.mxu0 %v6349_v29  ;;  %4382 = vmatpush1.bf16.msra.mxu1 %v6352_v10  ;;  %v6441_v29 = vld [vmem:[%s7343_s5 + $0xa14] ss:$80 sps:$4 sm:$0xff]   ;;  %v6444_v10 = vld [vmem:[%s7343_s5 + $0xa1c] ss:$80 sps:$4 sm:$0xff]  }
  0xcc   : > { %4301 = vmatprep.subr.bf16.mxu0 %v6357_v30  ;;  %4383 = vmatprep.subr.bf16.mxu1 %v6360_v31  ;;  %v6439_v30 = vld [vmem:[%s7343_s5 + $0xa10] ss:$80 sps:$4 sm:$0xff]   ;;  %v6442_v31 = vld [vmem:[%s7343_s5 + $0xa18] ss:$80 sps:$4 sm:$0xff]  }
  0xcf   : > { %4302 = vmatpush1.bf16.msra.mxu0 %v6355_v32  ;;  %4384 = vmatpush1.bf16.msra.mxu1 %v6358_v33  ;;  %v6447_v32 = vld [vmem:[%s7343_s5 + $0xab4] ss:$80 sps:$4 sm:$0xff]   ;;  %v6450_v33 = vld [vmem:[%s7343_s5 + $0xabc] ss:$80 sps:$4 sm:$0xff]  }
  0xd0   : > { %4303 = vmatprep.subr.bf16.mxu0 %v6363_v34  ;;  %4385 = vmatprep.subr.bf16.mxu1 %v6366_v35  ;;  %v6445_v34 = vld [vmem:[%s7343_s5 + $0xab0] ss:$80 sps:$4 sm:$0xff]   ;;  %v6448_v35 = vld [vmem:[%s7343_s5 + $0xab8] ss:$80 sps:$4 sm:$0xff]  }
  0xd3   : > { %4304 = vmatpush1.bf16.msra.mxu0 %v6361_v36  ;;  %4386 = vmatpush1.bf16.msra.mxu1 %v6364_v37  ;;  %v6453_v36 = vld [vmem:[%s7343_s5 + $0xb54] ss:$80 sps:$4 sm:$0xff]   ;;  %v6456_v37 = vld [vmem:[%s7343_s5 + $0xb5c] ss:$80 sps:$4 sm:$0xff]  }
  0xd4   : > { %4305 = vmatprep.subr.bf16.mxu0 %v6369_v38  ;;  %4387 = vmatprep.subr.bf16.mxu1 %v6372_v39  ;;  %v6451_v38 = vld [vmem:[%s7343_s5 + $0xb50] ss:$80 sps:$4 sm:$0xff]   ;;  %v6454_v39 = vld [vmem:[%s7343_s5 + $0xb58] ss:$80 sps:$4 sm:$0xff]  }
  0xd7   : > { %4306 = vmatpush1.bf16.msra.mxu0 %v6367_v40  ;;  %4388 = vmatpush1.bf16.msra.mxu1 %v6370_v41  ;;  %v6459_v40 = vld [vmem:[%s7343_s5 + $0xbf4] ss:$80 sps:$4 sm:$0xff]   ;;  %v6462_v41 = vld [vmem:[%s7343_s5 + $0xbfc] ss:$80 sps:$4 sm:$0xff]  }
  0xd8   : > { %4307 = vmatprep.subr.bf16.mxu0 %v6375_v42  ;;  %4389 = vmatprep.subr.bf16.mxu1 %v6378_v43  ;;  %v6457_v42 = vld [vmem:[%s7343_s5 + $0xbf0] ss:$80 sps:$4 sm:$0xff]   ;;  %v6460_v43 = vld [vmem:[%s7343_s5 + $0xbf8] ss:$80 sps:$4 sm:$0xff]  }
  0xdb   : > { %4308 = vmatpush1.bf16.msra.mxu0 %v6373_v45  ;;  %4390 = vmatpush1.bf16.msra.mxu1 %v6376_v46  ;;  %v6465_v45 = vld [vmem:[%s7343_s5 + $0xc94] ss:$80 sps:$4 sm:$0xff]   ;;  %v6468_v46 = vld [vmem:[%s7343_s5 + $0xc9c] ss:$80 sps:$4 sm:$0xff]  }
  0xdc   : > { %4309 = vmatprep.subr.bf16.mxu0 %v6381_v47  ;;  %4391 = vmatprep.subr.bf16.mxu1 %v6384_v48  ;;  %v6463_v47 = vld [vmem:[%s7343_s5 + $0xc90] ss:$80 sps:$4 sm:$0xff]   ;;  %v6466_v48 = vld [vmem:[%s7343_s5 + $0xc98] ss:$80 sps:$4 sm:$0xff]  }
  0xdf   : > { %4310 = vmatpush1.bf16.msra.mxu0 %v6379_v49  ;;  %4392 = vmatpush1.bf16.msra.mxu1 %v6382_v51  ;;  %v6471_v49 = vld [vmem:[%s7343_s5 + $0xd34] ss:$80 sps:$4 sm:$0xff]   ;;  %v6474_v51 = vld [vmem:[%s7343_s5 + $0xd3c] ss:$80 sps:$4 sm:$0xff]  }
  0xe0   : > { %4311 = vmatprep.subr.bf16.mxu0 %v6387_v52  ;;  %4393 = vmatprep.subr.bf16.mxu1 %v6390_v53  ;;  %v6469_v52 = vld [vmem:[%s7343_s5 + $0xd30] ss:$80 sps:$4 sm:$0xff]   ;;  %v6472_v53 = vld [vmem:[%s7343_s5 + $0xd38] ss:$80 sps:$4 sm:$0xff]  }
  0xe3   : > { %4312 = vmatpush1.bf16.msra.mxu0 %v6385_v54  ;;  %4394 = vmatpush1.bf16.msra.mxu1 %v6388_v55  ;;  %v6477_v54 = vld [vmem:[%s7343_s5 + $0xdd4] ss:$80 sps:$4 sm:$0xff]   ;;  %v6480_v55 = vld [vmem:[%s7343_s5 + $0xddc] ss:$80 sps:$4 sm:$0xff]  }
  0xe4   : > { %4313 = vmatprep.subr.bf16.mxu0 %v6393_v56  ;;  %4395 = vmatprep.subr.bf16.mxu1 %v6396_v57  ;;  %v6475_v56 = vld [vmem:[%s7343_s5 + $0xdd0] ss:$80 sps:$4 sm:$0xff]   ;;  %v6478_v57 = vld [vmem:[%s7343_s5 + $0xdd8] ss:$80 sps:$4 sm:$0xff]  }
  0xe7   : > { %4314 = vmatpush1.bf16.msra.mxu0 %v6391_v58  ;;  %4396 = vmatpush1.bf16.msra.mxu1 %v6394_v59  ;;  %v6483_v58 = vld [vmem:[%s7343_s5 + $0xe74] ss:$80 sps:$4 sm:$0xff]   ;;  %v6486_v59 = vld [vmem:[%s7343_s5 + $0xe7c] ss:$80 sps:$4 sm:$0xff]  }
  0xe8   : > { %4315 = vmatprep.subr.bf16.mxu0 %v6399_v60  ;;  %4397 = vmatprep.subr.bf16.mxu1 %v6402_v62  ;;  %v6481_v60 = vld [vmem:[%s7343_s5 + $0xe70] ss:$80 sps:$4 sm:$0xff]   ;;  %v6484_v62 = vld [vmem:[%s7343_s5 + $0xe78] ss:$80 sps:$4 sm:$0xff]  }
  0xeb   : > { %4316 = vmatpush1.bf16.msra.mxu0 %v6397_v63  ;;  %4398 = vmatpush1.bf16.msra.mxu1 %v6400_v0  ;;  %v6489_v63 = vld [vmem:[%s7343_s5 + $0xf14] ss:$80 sps:$4 sm:$0xff]   ;;  %v6492_v0 = vld [vmem:[%s7343_s5 + $0xf1c] ss:$80 sps:$4 sm:$0xff]  }
  0xec   : > { %4317 = vmatprep.subr.bf16.mxu0 %v6405_v1  ;;  %4399 = vmatprep.subr.bf16.mxu1 %v6408_v2  ;;  %v6487_v1 = vld [vmem:[%s7343_s5 + $0xf10] ss:$80 sps:$4 sm:$0xff]   ;;  %v6490_v2 = vld [vmem:[%s7343_s5 + $0xf18] ss:$80 sps:$4 sm:$0xff]  }
  0xef   : > { %4318 = vmatpush1.bf16.msra.mxu0 %v6403_v3  ;;  %4400 = vmatpush1.bf16.msra.mxu1 %v6406_v4  ;;  %v6495_v3 = vld [vmem:[%s7343_s5 + $0xfb4] ss:$80 sps:$4 sm:$0xff]   ;;  %v6498_v4 = vld [vmem:[%s7343_s5 + $0xfbc] ss:$80 sps:$4 sm:$0xff]  }
  0xf0   : > { %4319 = vmatprep.subr.bf16.mxu0 %v6411_v5  ;;  %4401 = vmatprep.subr.bf16.mxu1 %v6414_v6  ;;  %v6493_v5 = vld [vmem:[%s7343_s5 + $0xfb0] ss:$80 sps:$4 sm:$0xff]   ;;  %v6496_v6 = vld [vmem:[%s7343_s5 + $0xfb8] ss:$80 sps:$4 sm:$0xff]  }
  0xf3   : > { %4320 = vmatpush1.bf16.msra.mxu0 %v6409_v7  ;;  %4402 = vmatpush1.bf16.msra.mxu1 %v6412_v8  ;;  %v6501_v7 = vld [vmem:[%s7343_s5 + $0x1054] ss:$80 sps:$4 sm:$0xff]   ;;  %v6504_v8 = vld [vmem:[%s7343_s5 + $0x105c] ss:$80 sps:$4 sm:$0xff]  }
  0xf4   : > { %4321 = vmatprep.subr.bf16.mxu0 %v6417_v9  ;;  %4403 = vmatprep.subr.bf16.mxu1 %v6420_v11  ;;  %v6499_v9 = vld [vmem:[%s7343_s5 + $0x1050] ss:$80 sps:$4 sm:$0xff]   ;;  %v6502_v11 = vld [vmem:[%s7343_s5 + $0x1058] ss:$80 sps:$4 sm:$0xff]  }
  0xf7   : > { %4322 = vmatpush1.bf16.msra.mxu0 %v6415_v12  ;;  %4404 = vmatpush1.bf16.msra.mxu1 %v6418_v13  ;;  %v6507_v12 = vld [vmem:[%s7343_s5 + $0x10f4] ss:$80 sps:$4 sm:$0xff]   ;;  %v6510_v13 = vld [vmem:[%s7343_s5 + $0x10fc] ss:$80 sps:$4 sm:$0xff]  }
  0xf8   : > { %4323 = vmatprep.subr.bf16.mxu0 %v6423_v14  ;;  %4405 = vmatprep.subr.bf16.mxu1 %v6426_v15  ;;  %v6505_v14 = vld [vmem:[%s7343_s5 + $0x10f0] ss:$80 sps:$4 sm:$0xff]   ;;  %v6508_v15 = vld [vmem:[%s7343_s5 + $0x10f8] ss:$80 sps:$4 sm:$0xff]  }
  0xfb   : > { %4324 = vmatpush1.bf16.msra.mxu0 %v6421_v16  ;;  %4406 = vmatpush1.bf16.msra.mxu1 %v6424_v18  ;;  %v6513_v16 = vld [vmem:[%s7343_s5 + $0x1194] ss:$80 sps:$4 sm:$0xff]   ;;  %v6516_v18 = vld [vmem:[%s7343_s5 + $0x119c] ss:$80 sps:$4 sm:$0xff]  }
  0xfc   : > { %4325 = vmatprep.subr.bf16.mxu0 %v6429_v19  ;;  %4407 = vmatprep.subr.bf16.mxu1 %v6432_v20  ;;  %v6511_v19 = vld [vmem:[%s7343_s5 + $0x1190] ss:$80 sps:$4 sm:$0xff]   ;;  %v6514_v20 = vld [vmem:[%s7343_s5 + $0x1198] ss:$80 sps:$4 sm:$0xff]  }
  0xff   : > { %4326 = vmatpush1.bf16.msra.mxu0 %v6427_v22  ;;  %4408 = vmatpush1.bf16.msra.mxu1 %v6430_v23  ;;  %v6519_v22 = vld [vmem:[%s7343_s5 + $0x1234] ss:$80 sps:$4 sm:$0xff]   ;;  %v6522_v23 = vld [vmem:[%s7343_s5 + $0x123c] ss:$80 sps:$4 sm:$0xff]  }
 0x100   : > { %4327 = vmatprep.subr.bf16.mxu0 %v6435_v25  ;;  %4409 = vmatprep.subr.bf16.mxu1 %v6438_v26  ;;  %v6517_v25 = vld [vmem:[%s7343_s5 + $0x1230] ss:$80 sps:$4 sm:$0xff]   ;;  %v6520_v26 = vld [vmem:[%s7343_s5 + $0x1238] ss:$80 sps:$4 sm:$0xff]  }
 0x103   : > { %4328 = vmatpush1.bf16.msra.mxu0 %v6433_v27  ;;  %4410 = vmatpush1.bf16.msra.mxu1 %v6436_v28  ;;  %v6525_v27 = vld [vmem:[%s7343_s5 + $0x12d4] ss:$80 sps:$4 sm:$0xff]   ;;  %v6528_v28 = vld [vmem:[%s7343_s5 + $0x12dc] ss:$80 sps:$4 sm:$0xff]  }
 0x104   : > { %4338 = vmatprep.subr.bf16.mxu0 %v6441_v29  ;;  %4420 = vmatprep.subr.bf16.mxu1 %v6444_v10  ;;  %v6523_v29 = vld [vmem:[%s7343_s5 + $0x12d0] ss:$80 sps:$4 sm:$0xff]   ;;  %v6526_v10 = vld [vmem:[%s7343_s5 + $0x12d8] ss:$80 sps:$4 sm:$0xff]  }
 0x106   : > { %4330 = vmatmul.mubr.bf16.vlgmr.msra.gmra.mrb[4].mxu0 %v7455_v17  ;;  %4412 = vmatmul.mubr.bf16.vlgmr.msra.gmra.mrb[4].mxu1 %v7455_v17 }
 0x107   : > { %4339 = vmatpush1.bf16.msra.mxu0 %v6439_v30  ;;  %4421 = vmatpush1.bf16.msra.mxu1 %v6442_v31  ;;  %v6531_v30 = vld [vmem:[%s7343_s5 + $0x1374] ss:$80 sps:$4 sm:$0xff]   ;;  %v6534_v31 = vld [vmem:[%s7343_s5 + $0x137c] ss:$80 sps:$4 sm:$0xff]  }
 0x108   : > { %4340 = vmatprep.subr.bf16.mxu0 %v6447_v32  ;;  %4422 = vmatprep.subr.bf16.mxu1 %v6450_v33  ;;  %v6529_v32 = vld [vmem:[%s7343_s5 + $0x1370] ss:$80 sps:$4 sm:$0xff]   ;;  %v6532_v33 = vld [vmem:[%s7343_s5 + $0x1378] ss:$80 sps:$4 sm:$0xff]  }
 0x109   : > { %4370 = vmatprep.mubr.bf16.mxu0 %v7460_v21  ;;  %4452 = vmatprep.mubr.bf16.mxu1 %v7460_v21 }
 0x10b   : > { %4341 = vmatpush1.bf16.msra.mxu0 %v6445_v34  ;;  %4423 = vmatpush1.bf16.msra.mxu1 %v6448_v35  ;;  %v6537_v34 = vld [vmem:[%s7343_s5 + $0x24] ss:$80 sps:$4 sm:$0xff]   ;;  %v6540_v35 = vld [vmem:[%s7343_s5 + $0x2c] ss:$80 sps:$4 sm:$0xff]  }
 0x10c   : > { %4342 = vmatprep.subr.bf16.mxu0 %v6453_v36  ;;  %4424 = vmatprep.subr.bf16.mxu1 %v6456_v37  ;;  %v6535_v36 = vld [vmem:[%s7343_s5 + $0x20] ss:$80 sps:$4 sm:$0xff]   ;;  %v6538_v37 = vld [vmem:[%s7343_s5 + $0x28] ss:$80 sps:$4 sm:$0xff]  }
 0x10f   : > { %4343 = vmatpush1.bf16.msra.mxu0 %v6451_v38  ;;  %4425 = vmatpush1.bf16.msra.mxu1 %v6454_v39  ;;  %v6543_v38 = vld [vmem:[%s7343_s5 + $0xc4] ss:$80 sps:$4 sm:$0xff]   ;;  %v6546_v39 = vld [vmem:[%s7343_s5 + $0xcc] ss:$80 sps:$4 sm:$0xff]  }
 0x110   : > { %4344 = vmatprep.subr.bf16.mxu0 %v6459_v40  ;;  %4426 = vmatprep.subr.bf16.mxu1 %v6462_v41  ;;  %v6541_v40 = vld [vmem:[%s7343_s5 + $0xc0] ss:$80 sps:$4 sm:$0xff]   ;;  %v6544_v41 = vld [vmem:[%s7343_s5 + $0xc8] ss:$80 sps:$4 sm:$0xff]  }
 0x113   : > { %4345 = vmatpush1.bf16.msra.mxu0 %v6457_v42  ;;  %4427 = vmatpush1.bf16.msra.mxu1 %v6460_v43  ;;  %v6549_v42 = vld [vmem:[%s7343_s5 + $0x164] ss:$80 sps:$4 sm:$0xff]   ;;  %v6552_v43 = vld [vmem:[%s7343_s5 + $0x16c] ss:$80 sps:$4 sm:$0xff]  }
 0x114   : > { %4346 = vmatprep.subr.bf16.mxu0 %v6465_v45  ;;  %4428 = vmatprep.subr.bf16.mxu1 %v6468_v46  ;;  %v6547_v45 = vld [vmem:[%s7343_s5 + $0x160] ss:$80 sps:$4 sm:$0xff]   ;;  %v6550_v46 = vld [vmem:[%s7343_s5 + $0x168] ss:$80 sps:$4 sm:$0xff]  }
 0x117   : > { %4347 = vmatpush1.bf16.msra.mxu0 %v6463_v47  ;;  %4429 = vmatpush1.bf16.msra.mxu1 %v6466_v48  ;;  %v6555_v47 = vld [vmem:[%s7343_s5 + $0x204] ss:$80 sps:$4 sm:$0xff]   ;;  %v6558_v48 = vld [vmem:[%s7343_s5 + $0x20c] ss:$80 sps:$4 sm:$0xff]  }
 0x118   : > { %4348 = vmatprep.subr.bf16.mxu0 %v6471_v49  ;;  %4430 = vmatprep.subr.bf16.mxu1 %v6474_v51  ;;  %v6553_v49 = vld [vmem:[%s7343_s5 + $0x200] ss:$80 sps:$4 sm:$0xff]   ;;  %v6556_v51 = vld [vmem:[%s7343_s5 + $0x208] ss:$80 sps:$4 sm:$0xff]  }
 0x11b   : > { %4349 = vmatpush1.bf16.msra.mxu0 %v6469_v52  ;;  %4431 = vmatpush1.bf16.msra.mxu1 %v6472_v53  ;;  %v6561_v52 = vld [vmem:[%s7343_s5 + $0x2a4] ss:$80 sps:$4 sm:$0xff]   ;;  %v6564_v53 = vld [vmem:[%s7343_s5 + $0x2ac] ss:$80 sps:$4 sm:$0xff]  }
 0x11c   : > { %4350 = vmatprep.subr.bf16.mxu0 %v6477_v54  ;;  %4432 = vmatprep.subr.bf16.mxu1 %v6480_v55  ;;  %v6559_v54 = vld [vmem:[%s7343_s5 + $0x2a0] ss:$80 sps:$4 sm:$0xff]   ;;  %v6562_v55 = vld [vmem:[%s7343_s5 + $0x2a8] ss:$80 sps:$4 sm:$0xff]  }
 0x11f   : > { %4351 = vmatpush1.bf16.msra.mxu0 %v6475_v56  ;;  %4433 = vmatpush1.bf16.msra.mxu1 %v6478_v57  ;;  %v6567_v56 = vld [vmem:[%s7343_s5 + $0x344] ss:$80 sps:$4 sm:$0xff]   ;;  %v6570_v57 = vld [vmem:[%s7343_s5 + $0x34c] ss:$80 sps:$4 sm:$0xff]  }
 0x120   : > { %4352 = vmatprep.subr.bf16.mxu0 %v6483_v58  ;;  %4434 = vmatprep.subr.bf16.mxu1 %v6486_v59  ;;  %v6565_v58 = vld [vmem:[%s7343_s5 + $0x340] ss:$80 sps:$4 sm:$0xff]   ;;  %v6568_v59 = vld [vmem:[%s7343_s5 + $0x348] ss:$80 sps:$4 sm:$0xff]  }
 0x123   : > { %4353 = vmatpush1.bf16.msra.mxu0 %v6481_v60  ;;  %4435 = vmatpush1.bf16.msra.mxu1 %v6484_v62  ;;  %v6573_v60 = vld [vmem:[%s7343_s5 + $0x3e4] ss:$80 sps:$4 sm:$0xff]   ;;  %v6576_v62 = vld [vmem:[%s7343_s5 + $0x3ec] ss:$80 sps:$4 sm:$0xff]  }
 0x124   : > { %4354 = vmatprep.subr.bf16.mxu0 %v6489_v63  ;;  %4436 = vmatprep.subr.bf16.mxu1 %v6492_v0  ;;  %v6571_v63 = vld [vmem:[%s7343_s5 + $0x3e0] ss:$80 sps:$4 sm:$0xff]   ;;  %v6574_v0 = vld [vmem:[%s7343_s5 + $0x3e8] ss:$80 sps:$4 sm:$0xff]  }
 0x127   : > { %4355 = vmatpush1.bf16.msra.mxu0 %v6487_v1  ;;  %4437 = vmatpush1.bf16.msra.mxu1 %v6490_v2  ;;  %v6579_v1 = vld [vmem:[%s7343_s5 + $0x484] ss:$80 sps:$4 sm:$0xff]   ;;  %v6582_v2 = vld [vmem:[%s7343_s5 + $0x48c] ss:$80 sps:$4 sm:$0xff]  }
 0x128   : > { %4356 = vmatprep.subr.bf16.mxu0 %v6495_v3  ;;  %4438 = vmatprep.subr.bf16.mxu1 %v6498_v4  ;;  %v6577_v3 = vld [vmem:[%s7343_s5 + $0x480] ss:$80 sps:$4 sm:$0xff]   ;;  %v6580_v4 = vld [vmem:[%s7343_s5 + $0x488] ss:$80 sps:$4 sm:$0xff]  }
 0x12b   : > { %4357 = vmatpush1.bf16.msra.mxu0 %v6493_v5  ;;  %4439 = vmatpush1.bf16.msra.mxu1 %v6496_v6  ;;  %v6585_v5 = vld [vmem:[%s7343_s5 + $0x524] ss:$80 sps:$4 sm:$0xff]   ;;  %v6588_v6 = vld [vmem:[%s7343_s5 + $0x52c] ss:$80 sps:$4 sm:$0xff]  }
 0x12c   : > { %4358 = vmatprep.subr.bf16.mxu0 %v6501_v7  ;;  %4440 = vmatprep.subr.bf16.mxu1 %v6504_v8  ;;  %v6583_v7 = vld [vmem:[%s7343_s5 + $0x520] ss:$80 sps:$4 sm:$0xff]   ;;  %v6586_v8 = vld [vmem:[%s7343_s5 + $0x528] ss:$80 sps:$4 sm:$0xff]  }
 0x12f   : > { %4359 = vmatpush1.bf16.msra.mxu0 %v6499_v9  ;;  %4441 = vmatpush1.bf16.msra.mxu1 %v6502_v11  ;;  %v6591_v9 = vld [vmem:[%s7343_s5 + $0x5c4] ss:$80 sps:$4 sm:$0xff]   ;;  %v6594_v11 = vld [vmem:[%s7343_s5 + $0x5cc] ss:$80 sps:$4 sm:$0xff]  }
 0x130   : > { %4360 = vmatprep.subr.bf16.mxu0 %v6507_v12  ;;  %4442 = vmatprep.subr.bf16.mxu1 %v6510_v13  ;;  %v6589_v12 = vld [vmem:[%s7343_s5 + $0x5c0] ss:$80 sps:$4 sm:$0xff]   ;;  %v6592_v13 = vld [vmem:[%s7343_s5 + $0x5c8] ss:$80 sps:$4 sm:$0xff]  }
 0x133   : > { %4361 = vmatpush1.bf16.msra.mxu0 %v6505_v14  ;;  %4443 = vmatpush1.bf16.msra.mxu1 %v6508_v15  ;;  %v6597_v14 = vld [vmem:[%s7343_s5 + $0x664] ss:$80 sps:$4 sm:$0xff]   ;;  %v6600_v15 = vld [vmem:[%s7343_s5 + $0x66c] ss:$80 sps:$4 sm:$0xff]  }
 0x134   : > { %4362 = vmatprep.subr.bf16.mxu0 %v6513_v16  ;;  %4444 = vmatprep.subr.bf16.mxu1 %v6516_v18  ;;  %v6595_v16 = vld [vmem:[%s7343_s5 + $0x660] ss:$80 sps:$4 sm:$0xff]   ;;  %v6598_v18 = vld [vmem:[%s7343_s5 + $0x668] ss:$80 sps:$4 sm:$0xff]  }
 0x137   : > { %4363 = vmatpush1.bf16.msra.mxu0 %v6511_v19  ;;  %4445 = vmatpush1.bf16.msra.mxu1 %v6514_v20  ;;  %v6603_v19 = vld [vmem:[%s7343_s5 + $0x704] ss:$80 sps:$4 sm:$0xff]   ;;  %v6606_v20 = vld [vmem:[%s7343_s5 + $0x70c] ss:$80 sps:$4 sm:$0xff]  }
 0x138   : > { %4364 = vmatprep.subr.bf16.mxu0 %v6519_v22  ;;  %4446 = vmatprep.subr.bf16.mxu1 %v6522_v23  ;;  %v6601_v22 = vld [vmem:[%s7343_s5 + $0x700] ss:$80 sps:$4 sm:$0xff]   ;;  %v6604_v23 = vld [vmem:[%s7343_s5 + $0x708] ss:$80 sps:$4 sm:$0xff]  }
 0x13b   : > { %4365 = vmatpush1.bf16.msra.mxu0 %v6517_v25  ;;  %4447 = vmatpush1.bf16.msra.mxu1 %v6520_v26  ;;  %v6609_v25 = vld [vmem:[%s7343_s5 + $0x7a4] ss:$80 sps:$4 sm:$0xff]   ;;  %v6612_v26 = vld [vmem:[%s7343_s5 + $0x7ac] ss:$80 sps:$4 sm:$0xff]  }
 0x13c   : > { %4366 = vmatprep.subr.bf16.mxu0 %v6525_v27  ;;  %4448 = vmatprep.subr.bf16.mxu1 %v6528_v28  ;;  %v6607_v27 = vld [vmem:[%s7343_s5 + $0x7a0] ss:$80 sps:$4 sm:$0xff]   ;;  %v6610_v28 = vld [vmem:[%s7343_s5 + $0x7a8] ss:$80 sps:$4 sm:$0xff]  }
 0x13f   : > { %4367 = vmatpush1.bf16.msra.mxu0 %v6523_v29  ;;  %4449 = vmatpush1.bf16.msra.mxu1 %v6526_v10  ;;  %v6615_v29 = vld [vmem:[%s7343_s5 + $0x844] ss:$80 sps:$4 sm:$0xff]   ;;  %v6618_v10 = vld [vmem:[%s7343_s5 + $0x84c] ss:$80 sps:$4 sm:$0xff]  }
 0x140   : > { %4368 = vmatprep.subr.bf16.mxu0 %v6531_v30  ;;  %4450 = vmatprep.subr.bf16.mxu1 %v6534_v31  ;;  %v6613_v30 = vld [vmem:[%s7343_s5 + $0x840] ss:$80 sps:$4 sm:$0xff]   ;;  %v6616_v31 = vld [vmem:[%s7343_s5 + $0x848] ss:$80 sps:$4 sm:$0xff]  }
 0x143   : > { %4369 = vmatpush1.bf16.msra.mxu0 %v6529_v32  ;;  %4451 = vmatpush1.bf16.msra.mxu1 %v6532_v33  ;;  %v6621_v32 = vld [vmem:[%s7343_s5 + $0x8e4] ss:$80 sps:$4 sm:$0xff]   ;;  %v6624_v33 = vld [vmem:[%s7343_s5 + $0x8ec] ss:$80 sps:$4 sm:$0xff]  }
 0x144   : > { %4461 = vmatprep.subr.bf16.mxu0 %v6537_v34  ;;  %4543 = vmatprep.subr.bf16.mxu1 %v6540_v35  ;;  %v6619_v34 = vld [vmem:[%s7343_s5 + $0x8e0] ss:$80 sps:$4 sm:$0xff]   ;;  %v6622_v35 = vld [vmem:[%s7343_s5 + $0x8e8] ss:$80 sps:$4 sm:$0xff]  }
 0x146   : > { %4371 = vmatmul.mubr.bf16.vlgmr.msra.gmra.mrb[4].mxu0 %v7528_v24  ;;  %4453 = vmatmul.mubr.bf16.vlgmr.msra.gmra.mrb[4].mxu1 %v7528_v24 }
 0x147   : > { %4462 = vmatpush1.bf16.msra.mxu0 %v6535_v36  ;;  %4544 = vmatpush1.bf16.msra.mxu1 %v6538_v37  ;;  %v6627_v36 = vld [vmem:[%s7343_s5 + $0x984] ss:$80 sps:$4 sm:$0xff]   ;;  %v6630_v37 = vld [vmem:[%s7343_s5 + $0x98c] ss:$80 sps:$4 sm:$0xff]  }
 0x148   : > { %4463 = vmatprep.subr.bf16.mxu0 %v6543_v38  ;;  %4545 = vmatprep.subr.bf16.mxu1 %v6546_v39  ;;  %v6625_v38 = vld [vmem:[%s7343_s5 + $0x980] ss:$80 sps:$4 sm:$0xff]   ;;  %v6628_v39 = vld [vmem:[%s7343_s5 + $0x988] ss:$80 sps:$4 sm:$0xff]  }
 0x149   : > { %4493 = vmatprep.mubr.bf16.mxu0 %v7430_v61  ;;  %4575 = vmatprep.mubr.bf16.mxu1 %v7430_v61 }
 0x14b   : > { %4464 = vmatpush1.bf16.msra.mxu0 %v6541_v40  ;;  %4546 = vmatpush1.bf16.msra.mxu1 %v6544_v41  ;;  %v6633_v40 = vld [vmem:[%s7343_s5 + $0xa24] ss:$80 sps:$4 sm:$0xff]   ;;  %v6636_v41 = vld [vmem:[%s7343_s5 + $0xa2c] ss:$80 sps:$4 sm:$0xff]  }
 0x14c   : > { %4465 = vmatprep.subr.bf16.mxu0 %v6549_v42  ;;  %4547 = vmatprep.subr.bf16.mxu1 %v6552_v43  ;;  %v6631_v42 = vld [vmem:[%s7343_s5 + $0xa20] ss:$80 sps:$4 sm:$0xff]   ;;  %v6634_v43 = vld [vmem:[%s7343_s5 + $0xa28] ss:$80 sps:$4 sm:$0xff]  }
 0x14f   : > { %4466 = vmatpush1.bf16.msra.mxu0 %v6547_v45  ;;  %4548 = vmatpush1.bf16.msra.mxu1 %v6550_v46  ;;  %v6639_v45 = vld [vmem:[%s7343_s5 + $0xac4] ss:$80 sps:$4 sm:$0xff]   ;;  %v6642_v46 = vld [vmem:[%s7343_s5 + $0xacc] ss:$80 sps:$4 sm:$0xff]  }
 0x150   : > { %4467 = vmatprep.subr.bf16.mxu0 %v6555_v47  ;;  %4549 = vmatprep.subr.bf16.mxu1 %v6558_v48  ;;  %v6637_v47 = vld [vmem:[%s7343_s5 + $0xac0] ss:$80 sps:$4 sm:$0xff]   ;;  %v6640_v48 = vld [vmem:[%s7343_s5 + $0xac8] ss:$80 sps:$4 sm:$0xff]  }
 0x153   : > { %4468 = vmatpush1.bf16.msra.mxu0 %v6553_v49  ;;  %4550 = vmatpush1.bf16.msra.mxu1 %v6556_v51  ;;  %v6645_v49 = vld [vmem:[%s7343_s5 + $0xb64] ss:$80 sps:$4 sm:$0xff]   ;;  %v6648_v51 = vld [vmem:[%s7343_s5 + $0xb6c] ss:$80 sps:$4 sm:$0xff]  }
 0x154   : > { %4469 = vmatprep.subr.bf16.mxu0 %v6561_v52  ;;  %4551 = vmatprep.subr.bf16.mxu1 %v6564_v53  ;;  %v6643_v52 = vld [vmem:[%s7343_s5 + $0xb60] ss:$80 sps:$4 sm:$0xff]   ;;  %v6646_v53 = vld [vmem:[%s7343_s5 + $0xb68] ss:$80 sps:$4 sm:$0xff]  }
 0x157   : > { %4470 = vmatpush1.bf16.msra.mxu0 %v6559_v54  ;;  %4552 = vmatpush1.bf16.msra.mxu1 %v6562_v55  ;;  %v6651_v54 = vld [vmem:[%s7343_s5 + $0xc04] ss:$80 sps:$4 sm:$0xff]   ;;  %v6654_v55 = vld [vmem:[%s7343_s5 + $0xc0c] ss:$80 sps:$4 sm:$0xff]  }
 0x158   : > { %4471 = vmatprep.subr.bf16.mxu0 %v6567_v56  ;;  %4553 = vmatprep.subr.bf16.mxu1 %v6570_v57  ;;  %v6649_v56 = vld [vmem:[%s7343_s5 + $0xc00] ss:$80 sps:$4 sm:$0xff]   ;;  %v6652_v57 = vld [vmem:[%s7343_s5 + $0xc08] ss:$80 sps:$4 sm:$0xff]  }
 0x15b   : > { %4472 = vmatpush1.bf16.msra.mxu0 %v6565_v58  ;;  %4554 = vmatpush1.bf16.msra.mxu1 %v6568_v59  ;;  %v6657_v58 = vld [vmem:[%s7343_s5 + $0xca4] ss:$80 sps:$4 sm:$0xff]   ;;  %v6660_v59 = vld [vmem:[%s7343_s5 + $0xcac] ss:$80 sps:$4 sm:$0xff]  }
 0x15c   : > { %4473 = vmatprep.subr.bf16.mxu0 %v6573_v60  ;;  %4555 = vmatprep.subr.bf16.mxu1 %v6576_v62  ;;  %v6655_v60 = vld [vmem:[%s7343_s5 + $0xca0] ss:$80 sps:$4 sm:$0xff]   ;;  %v6658_v62 = vld [vmem:[%s7343_s5 + $0xca8] ss:$80 sps:$4 sm:$0xff]  }
 0x15f   : > { %4474 = vmatpush1.bf16.msra.mxu0 %v6571_v63  ;;  %4556 = vmatpush1.bf16.msra.mxu1 %v6574_v0  ;;  %v6663_v63 = vld [vmem:[%s7343_s5 + $0xd44] ss:$80 sps:$4 sm:$0xff]   ;;  %v6666_v0 = vld [vmem:[%s7343_s5 + $0xd4c] ss:$80 sps:$4 sm:$0xff]  }
 0x160   : > { %4475 = vmatprep.subr.bf16.mxu0 %v6579_v1  ;;  %4557 = vmatprep.subr.bf16.mxu1 %v6582_v2  ;;  %v6661_v1 = vld [vmem:[%s7343_s5 + $0xd40] ss:$80 sps:$4 sm:$0xff]   ;;  %v6664_v2 = vld [vmem:[%s7343_s5 + $0xd48] ss:$80 sps:$4 sm:$0xff]  }
 0x163   : > { %4476 = vmatpush1.bf16.msra.mxu0 %v6577_v3  ;;  %4558 = vmatpush1.bf16.msra.mxu1 %v6580_v4  ;;  %v6669_v3 = vld [vmem:[%s7343_s5 + $0xde4] ss:$80 sps:$4 sm:$0xff]   ;;  %v6672_v4 = vld [vmem:[%s7343_s5 + $0xdec] ss:$80 sps:$4 sm:$0xff]  }
 0x164   : > { %4477 = vmatprep.subr.bf16.mxu0 %v6585_v5  ;;  %4559 = vmatprep.subr.bf16.mxu1 %v6588_v6 }
 0x167   : > { %4478 = vmatpush1.bf16.msra.mxu0 %v6583_v7  ;;  %4560 = vmatpush1.bf16.msra.mxu1 %v6586_v8  ;;  %v6667_v7 = vld [vmem:[%s7343_s5 + $0xde0] ss:$80 sps:$4 sm:$0xff]   ;;  %v6670_v8 = vld [vmem:[%s7343_s5 + $0xde8] ss:$80 sps:$4 sm:$0xff]  }
 0x168   : > { %4479 = vmatprep.subr.bf16.mxu0 %v6591_v9  ;;  %4561 = vmatprep.subr.bf16.mxu1 %v6594_v11 }
 0x16b   : > { %4480 = vmatpush1.bf16.msra.mxu0 %v6589_v12  ;;  %4562 = vmatpush1.bf16.msra.mxu1 %v6592_v13 }
 0x16c   : > { %4481 = vmatprep.subr.bf16.mxu0 %v6597_v14  ;;  %4563 = vmatprep.subr.bf16.mxu1 %v6600_v15 }
 0x16f   : > { %4482 = vmatpush1.bf16.msra.mxu0 %v6595_v16  ;;  %4564 = vmatpush1.bf16.msra.mxu1 %v6598_v18 }
 0x170   : > { %4483 = vmatprep.subr.bf16.mxu0 %v6603_v19  ;;  %4565 = vmatprep.subr.bf16.mxu1 %v6606_v20  ;;  %v6675_v19 = vld [vmem:[%s7343_s5 + $0xe84] ss:$80 sps:$4 sm:$0xff]   ;;  %v6678_v20 = vld [vmem:[%s7343_s5 + $0xe8c] ss:$80 sps:$4 sm:$0xff]  }
 0x173   : > { %4484 = vmatpush1.bf16.msra.mxu0 %v6601_v22  ;;  %4566 = vmatpush1.bf16.msra.mxu1 %v6604_v23  ;;  %v261_v23 = vld [vmem:[%s7364_s16] sm:$0xff] }
 0x174   : > { %4485 = vmatprep.subr.bf16.mxu0 %v6609_v25  ;;  %4567 = vmatprep.subr.bf16.mxu1 %v6612_v26  ;;  %v6673_v26 = vld [vmem:[%s7343_s5 + $0xe80] ss:$80 sps:$4 sm:$0xff]  }
 0x177   : > { %4486 = vmatpush1.bf16.msra.mxu0 %v6607_v27  ;;  %4568 = vmatpush1.bf16.msra.mxu1 %v6610_v28  ;;  %v6676_v27 = vld [vmem:[%s7343_s5 + $0xe88] ss:$80 sps:$4 sm:$0xff]  }
 0x178   : > { %4487 = vmatprep.subr.bf16.mxu0 %v6615_v29  ;;  %4569 = vmatprep.subr.bf16.mxu1 %v6618_v10  ;;  %v6681_v29 = vld [vmem:[%s7343_s5 + $0xf24] ss:$80 sps:$4 sm:$0xff]   ;;  %v6684_v10 = vld [vmem:[%s7343_s5 + $0xf2c] ss:$80 sps:$4 sm:$0xff]  }
 0x17b   : > { %4488 = vmatpush1.bf16.msra.mxu0 %v6613_v30  ;;  %4570 = vmatpush1.bf16.msra.mxu1 %v6616_v31  ;;  %v6679_v31 = vld [vmem:[%s7343_s5 + $0xf20] ss:$80 sps:$4 sm:$0xff]  }
 0x17c   : > { %4489 = vmatprep.subr.bf16.mxu0 %v6621_v32  ;;  %4571 = vmatprep.subr.bf16.mxu1 %v6624_v33  ;;  %v6682_v32 = vld [vmem:[%s7343_s5 + $0xf28] ss:$80 sps:$4 sm:$0xff]   ;;  %v6687_v33 = vld [vmem:[%s7343_s5 + $0xfc4] ss:$80 sps:$4 sm:$0xff]  }
 0x17f   : > { %4490 = vmatpush1.bf16.msra.mxu0 %v6619_v34  ;;  %4572 = vmatpush1.bf16.msra.mxu1 %v6622_v35  ;;  %v6690_v34 = vld [vmem:[%s7343_s5 + $0xfcc] ss:$80 sps:$4 sm:$0xff]   ;;  %v6685_v35 = vld [vmem:[%s7343_s5 + $0xfc0] ss:$80 sps:$4 sm:$0xff]  }
 0x180   : > { %4491 = vmatprep.subr.bf16.mxu0 %v6627_v36  ;;  %4573 = vmatprep.subr.bf16.mxu1 %v6630_v37  ;;  %v6688_v36 = vld [vmem:[%s7343_s5 + $0xfc8] ss:$80 sps:$4 sm:$0xff]   ;;  %v6693_v37 = vld [vmem:[%s7343_s5 + $0x1064] ss:$80 sps:$4 sm:$0xff]  }
 0x183   : > { %4492 = vmatpush1.bf16.msra.mxu0 %v6625_v38  ;;  %4574 = vmatpush1.bf16.msra.mxu1 %v6628_v39  ;;  %v6696_v38 = vld [vmem:[%s7343_s5 + $0x106c] ss:$80 sps:$4 sm:$0xff]   ;;  %v6691_v39 = vld [vmem:[%s7343_s5 + $0x1060] ss:$80 sps:$4 sm:$0xff]  }
 0x184   : > { %4502 = vmatprep.subr.bf16.mxu0 %v6633_v40  ;;  %4584 = vmatprep.subr.bf16.mxu1 %v6636_v41  ;;  %v6694_v40 = vld [vmem:[%s7343_s5 + $0x1068] ss:$80 sps:$4 sm:$0xff]   ;;  %v6699_v41 = vld [vmem:[%s7343_s5 + $0x1104] ss:$80 sps:$4 sm:$0xff]  }
 0x186   : > { %4494 = vmatmul.mubr.bf16.vlgmr.msra.gmra.mrb[8].mxu0 %v7455_v17  ;;  %4576 = vmatmul.mubr.bf16.vlgmr.msra.gmra.mrb[8].mxu1 %v7455_v17 }
 0x187   : > { %4503 = vmatpush1.bf16.msra.mxu0 %v6631_v42  ;;  %4585 = vmatpush1.bf16.msra.mxu1 %v6634_v43  ;;  %v6702_v42 = vld [vmem:[%s7343_s5 + $0x110c] ss:$80 sps:$4 sm:$0xff]   ;;  %v6697_v43 = vld [vmem:[%s7343_s5 + $0x1100] ss:$80 sps:$4 sm:$0xff]  }
 0x188   : > { %4504 = vmatprep.subr.bf16.mxu0 %v6639_v45  ;;  %4586 = vmatprep.subr.bf16.mxu1 %v6642_v46  ;;  %v6700_v45 = vld [vmem:[%s7343_s5 + $0x1108] ss:$80 sps:$4 sm:$0xff]   ;;  %v6705_v46 = vld [vmem:[%s7343_s5 + $0x11a4] ss:$80 sps:$4 sm:$0xff]  }
 0x189   : > { %4534 = vmatprep.mubr.bf16.mxu0 %v7460_v21  ;;  %4616 = vmatprep.mubr.bf16.mxu1 %v7460_v21 }
 0x18b   : > { %4505 = vmatpush1.bf16.msra.mxu0 %v6637_v47  ;;  %4587 = vmatpush1.bf16.msra.mxu1 %v6640_v48  ;;  %v6708_v47 = vld [vmem:[%s7343_s5 + $0x11ac] ss:$80 sps:$4 sm:$0xff]   ;;  %v6703_v48 = vld [vmem:[%s7343_s5 + $0x11a0] ss:$80 sps:$4 sm:$0xff]  }
 0x18c   : > { %4506 = vmatprep.subr.bf16.mxu0 %v6645_v49  ;;  %4588 = vmatprep.subr.bf16.mxu1 %v6648_v51  ;;  %v6706_v49 = vld [vmem:[%s7343_s5 + $0x11a8] ss:$80 sps:$4 sm:$0xff]   ;;  %v6711_v51 = vld [vmem:[%s7343_s5 + $0x1244] ss:$80 sps:$4 sm:$0xff]  }
 0x18f   : > { %4507 = vmatpush1.bf16.msra.mxu0 %v6643_v52  ;;  %4589 = vmatpush1.bf16.msra.mxu1 %v6646_v53  ;;  %v6714_v52 = vld [vmem:[%s7343_s5 + $0x124c] ss:$80 sps:$4 sm:$0xff]   ;;  %v6709_v53 = vld [vmem:[%s7343_s5 + $0x1240] ss:$80 sps:$4 sm:$0xff]  }
 0x190   : > { %4508 = vmatprep.subr.bf16.mxu0 %v6651_v54  ;;  %4590 = vmatprep.subr.bf16.mxu1 %v6654_v55  ;;  %v6712_v54 = vld [vmem:[%s7343_s5 + $0x1248] ss:$80 sps:$4 sm:$0xff]   ;;  %v6717_v55 = vld [vmem:[%s7343_s5 + $0x12e4] ss:$80 sps:$4 sm:$0xff]  }
 0x193   : > { %4509 = vmatpush1.bf16.msra.mxu0 %v6649_v56  ;;  %4591 = vmatpush1.bf16.msra.mxu1 %v6652_v57  ;;  %v6720_v56 = vld [vmem:[%s7343_s5 + $0x12ec] ss:$80 sps:$4 sm:$0xff]   ;;  %v6715_v57 = vld [vmem:[%s7343_s5 + $0x12e0] ss:$80 sps:$4 sm:$0xff]  }
 0x194   : > { %4510 = vmatprep.subr.bf16.mxu0 %v6657_v58  ;;  %4592 = vmatprep.subr.bf16.mxu1 %v6660_v59  ;;  %v6718_v58 = vld [vmem:[%s7343_s5 + $0x12e8] ss:$80 sps:$4 sm:$0xff]   ;;  %v6723_v59 = vld [vmem:[%s7343_s5 + $0x1384] ss:$80 sps:$4 sm:$0xff]  }
 0x197   : > { %4511 = vmatpush1.bf16.msra.mxu0 %v6655_v60  ;;  %4593 = vmatpush1.bf16.msra.mxu1 %v6658_v62  ;;  %v6726_v60 = vld [vmem:[%s7343_s5 + $0x138c] ss:$80 sps:$4 sm:$0xff]   ;;  %v6721_v62 = vld [vmem:[%s7343_s5 + $0x1380] ss:$80 sps:$4 sm:$0xff]  }
 0x198   : > { %4512 = vmatprep.subr.bf16.mxu0 %v6663_v63  ;;  %4594 = vmatprep.subr.bf16.mxu1 %v6666_v0  ;;  %v6724_v63 = vld [vmem:[%s7343_s5 + $0x1388] ss:$80 sps:$4 sm:$0xff]   ;;  %v6729_v0 = vld [vmem:[%s7343_s5 + $0x34] ss:$80 sps:$4 sm:$0xff]  }
 0x199   : > { %v4208_v5 = vpop.f32.mrb[0].mxu0  ;;  %v4290_v6 = vpop.f32.mrb[0].mxu1 }
 0x19a   : > { %v4210_v9 = vpop.f32.mrb[1].mxu0  ;;  %v4292_v11 = vpop.f32.mrb[1].mxu1 }
 0x19b   : > { %v4973_v12 = vcombine.low %v4208_v5, %v4210_v9  ;;  %v4974_v13 = vcombine.low %v4290_v6, %v4292_v11  ;;  %v4212_v14 = vpop.f32.mrb[2].mxu0  ;;  %v4294_v15 = vpop.f32.mrb[2].mxu1  ;;  %4513 = vmatpush1.bf16.msra.mxu0 %v6661_v1  ;;  %4595 = vmatpush1.bf16.msra.mxu1 %v6664_v2  ;;  %v6732_v1 = vld [vmem:[%s7343_s5 + $0x3c] ss:$80 sps:$4 sm:$0xff]   ;;  %v6727_v2 = vld [vmem:[%s7343_s5 + $0x30] ss:$80 sps:$4 sm:$0xff]  }
 0x19c   : > { %v4213_v16 = vpop.f32.mrb[3].mxu0  ;;  %v4295_v18 = vpop.f32.mrb[3].mxu1  ;;  %4514 = vmatprep.subr.bf16.mxu0 %v6669_v3  ;;  %4596 = vmatprep.subr.bf16.mxu1 %v6672_v4  ;;  %v6730_v3 = vld [vmem:[%s7343_s5 + $0x38] ss:$80 sps:$4 sm:$0xff]   ;;  %v6735_v4 = vld [vmem:[%s7343_s5 + $0xd4] ss:$80 sps:$4 sm:$0xff]  }
 0x19d   : > { %v4981_v22 = vrot.slane %v4973_v12, %v7419_v50  ;;  %v4988_v25 = vrot.slane %v4974_v13, %v7419_v50  ;;  %v6738_v5 = vld [vmem:[%s7343_s5 + $0xdc] ss:$80 sps:$4 sm:$0xff]   ;;  %v6733_v6 = vld [vmem:[%s7343_s5 + $0xd0] ss:$80 sps:$4 sm:$0xff]   ;;  %v6742_v12 = vld [vmem:[%s7343_s5 + $0x178] ss:$80 sps:$4 sm:$0xff]  }
 0x19e   : > { %v6744_v9 = vld [vmem:[%s7343_s5 + $0x17c] ss:$80 sps:$4 sm:$0xff]   ;;  %v6739_v11 = vld [vmem:[%s7343_s5 + $0x170] ss:$80 sps:$4 sm:$0xff]   ;;  %v6747_v13 = vld [vmem:[%s7343_s5 + $0x214] ss:$80 sps:$4 sm:$0xff]  }
 0x19f   : > { %v4989_v28 = vcombine.low %v4981_v22, %v4988_v25  ;;  %4515 = vmatpush1.bf16.msra.mxu0 %v6667_v7  ;;  %4597 = vmatpush1.bf16.msra.mxu1 %v6670_v8  ;;  %v6736_v7 = vld [vmem:[%s7343_s5 + $0xd8] ss:$80 sps:$4 sm:$0xff]   ;;  %v6741_v8 = vld [vmem:[%s7343_s5 + $0x174] ss:$80 sps:$4 sm:$0xff]   ;;  %v6750_v14 = vld [vmem:[%s7343_s5 + $0x21c] ss:$80 sps:$4 sm:$0xff]  }
 0x1a0   : > { %4516 = vmatprep.subr.bf16.mxu0 %v6675_v19  ;;  %4598 = vmatprep.subr.bf16.mxu1 %v6678_v20  ;;  %v6745_v15 = vld [vmem:[%s7343_s5 + $0x210] ss:$80 sps:$4 sm:$0xff]   ;;  %v6748_v16 = vld [vmem:[%s7343_s5 + $0x218] ss:$80 sps:$4 sm:$0xff]   ;;  %v6753_v18 = vld [vmem:[%s7343_s5 + $0x2b4] ss:$80 sps:$4 sm:$0xff]  }
 0x1a1   : > { %v5063_v30 = vadd.f32 %v4989_v28, %v261_v23  ;;  %v6756_v19 = vld [vmem:[%s7343_s5 + $0x2bc] ss:$80 sps:$4 sm:$0xff]   ;;  %v6751_v20 = vld [vmem:[%s7343_s5 + $0x2b0] ss:$80 sps:$4 sm:$0xff]   ;;  %v6754_v22 = vld [vmem:[%s7343_s5 + $0x2b8] ss:$80 sps:$4 sm:$0xff]  }
 0x1a2   : > { %v6759_v23 = vld [vmem:[%s7343_s5 + $0x354] ss:$80 sps:$4 sm:$0xff]   ;;  %v6762_v25 = vld [vmem:[%s7343_s5 + $0x35c] ss:$80 sps:$4 sm:$0xff]  }
 0x1a3   : > { %5068 = vst [vmem:[%s7364_s16] sm:$0xff] %v5063_v30  ;;  %4517 = vmatpush1.bf16.msra.mxu0 %v6673_v26  ;;  %4599 = vmatpush1.bf16.msra.mxu1 %v6676_v27  ;;  %v6757_v26 = vld [vmem:[%s7343_s5 + $0x350] ss:$80 sps:$4 sm:$0xff]   ;;  %v6760_v27 = vld [vmem:[%s7343_s5 + $0x358] ss:$80 sps:$4 sm:$0xff]   ;;  %v6765_v28 = vld [vmem:[%s7343_s5 + $0x3f4] ss:$80 sps:$4 sm:$0xff]  }
 0x1a4   : > { %4518 = vmatprep.subr.bf16.mxu0 %v6681_v29  ;;  %4600 = vmatprep.subr.bf16.mxu1 %v6684_v10  ;;  %v6768_v29 = vld [vmem:[%s7343_s5 + $0x3fc] ss:$80 sps:$4 sm:$0xff]   ;;  %v6763_v10 = vld [vmem:[%s7343_s5 + $0x3f0] ss:$80 sps:$4 sm:$0xff]   ;;  %v6766_v30 = vld [vmem:[%s7343_s5 + $0x3f8] ss:$80 sps:$4 sm:$0xff]  }
 0x1a7   : > { %4519 = vmatpush1.bf16.msra.mxu0 %v6679_v31  ;;  %4601 = vmatpush1.bf16.msra.mxu1 %v6682_v32  ;;  %v6771_v31 = vld [vmem:[%s7343_s5 + $0x494] ss:$80 sps:$4 sm:$0xff]   ;;  %v6774_v32 = vld [vmem:[%s7343_s5 + $0x49c] ss:$80 sps:$4 sm:$0xff]  }
 0x1a8   : > { %4520 = vmatprep.subr.bf16.mxu0 %v6687_v33  ;;  %4602 = vmatprep.subr.bf16.mxu1 %v6690_v34  ;;  %v6769_v33 = vld [vmem:[%s7343_s5 + $0x490] ss:$80 sps:$4 sm:$0xff]   ;;  %v6772_v34 = vld [vmem:[%s7343_s5 + $0x498] ss:$80 sps:$4 sm:$0xff]  }
 0x1ab   : > { %4521 = vmatpush1.bf16.msra.mxu0 %v6685_v35  ;;  %4603 = vmatpush1.bf16.msra.mxu1 %v6688_v36  ;;  %v6777_v35 = vld [vmem:[%s7343_s5 + $0x534] ss:$80 sps:$4 sm:$0xff]   ;;  %v6780_v36 = vld [vmem:[%s7343_s5 + $0x53c] ss:$80 sps:$4 sm:$0xff]  }
 0x1ac   : > { %4522 = vmatprep.subr.bf16.mxu0 %v6693_v37  ;;  %4604 = vmatprep.subr.bf16.mxu1 %v6696_v38  ;;  %v6775_v37 = vld [vmem:[%s7343_s5 + $0x530] ss:$80 sps:$4 sm:$0xff]   ;;  %v6778_v38 = vld [vmem:[%s7343_s5 + $0x538] ss:$80 sps:$4 sm:$0xff]  }
 0x1af   : > { %4523 = vmatpush1.bf16.msra.mxu0 %v6691_v39  ;;  %4605 = vmatpush1.bf16.msra.mxu1 %v6694_v40  ;;  %v6783_v39 = vld [vmem:[%s7343_s5 + $0x5d4] ss:$80 sps:$4 sm:$0xff]   ;;  %v6786_v40 = vld [vmem:[%s7343_s5 + $0x5dc] ss:$80 sps:$4 sm:$0xff]  }
 0x1b0   : > { %4524 = vmatprep.subr.bf16.mxu0 %v6699_v41  ;;  %4606 = vmatprep.subr.bf16.mxu1 %v6702_v42  ;;  %v6781_v41 = vld [vmem:[%s7343_s5 + $0x5d0] ss:$80 sps:$4 sm:$0xff]   ;;  %v6784_v42 = vld [vmem:[%s7343_s5 + $0x5d8] ss:$80 sps:$4 sm:$0xff]  }
 0x1b3   : > { %4525 = vmatpush1.bf16.msra.mxu0 %v6697_v43  ;;  %4607 = vmatpush1.bf16.msra.mxu1 %v6700_v45  ;;  %v6789_v43 = vld [vmem:[%s7343_s5 + $0x674] ss:$80 sps:$4 sm:$0xff]   ;;  %v6792_v45 = vld [vmem:[%s7343_s5 + $0x67c] ss:$80 sps:$4 sm:$0xff]  }
 0x1b4   : > { %4526 = vmatprep.subr.bf16.mxu0 %v6705_v46  ;;  %4608 = vmatprep.subr.bf16.mxu1 %v6708_v47  ;;  %v6787_v46 = vld [vmem:[%s7343_s5 + $0x670] ss:$80 sps:$4 sm:$0xff]   ;;  %v6790_v47 = vld [vmem:[%s7343_s5 + $0x678] ss:$80 sps:$4 sm:$0xff]  }
 0x1b7   : > { %4527 = vmatpush1.bf16.msra.mxu0 %v6703_v48  ;;  %4609 = vmatpush1.bf16.msra.mxu1 %v6706_v49  ;;  %v6795_v48 = vld [vmem:[%s7343_s5 + $0x714] ss:$80 sps:$4 sm:$0xff]   ;;  %v6798_v49 = vld [vmem:[%s7343_s5 + $0x71c] ss:$80 sps:$4 sm:$0xff]  }
 0x1b8   : > { %4528 = vmatprep.subr.bf16.mxu0 %v6711_v51  ;;  %4610 = vmatprep.subr.bf16.mxu1 %v6714_v52  ;;  %v6793_v51 = vld [vmem:[%s7343_s5 + $0x710] ss:$80 sps:$4 sm:$0xff]   ;;  %v6796_v52 = vld [vmem:[%s7343_s5 + $0x718] ss:$80 sps:$4 sm:$0xff]  }
 0x1bb   : > { %4529 = vmatpush1.bf16.msra.mxu0 %v6709_v53  ;;  %4611 = vmatpush1.bf16.msra.mxu1 %v6712_v54  ;;  %v6801_v53 = vld [vmem:[%s7343_s5 + $0x7b4] ss:$80 sps:$4 sm:$0xff]   ;;  %v6804_v54 = vld [vmem:[%s7343_s5 + $0x7bc] ss:$80 sps:$4 sm:$0xff]  }
 0x1bc   : > { %4530 = vmatprep.subr.bf16.mxu0 %v6717_v55  ;;  %4612 = vmatprep.subr.bf16.mxu1 %v6720_v56  ;;  %v6799_v55 = vld [vmem:[%s7343_s5 + $0x7b0] ss:$80 sps:$4 sm:$0xff]   ;;  %v6802_v56 = vld [vmem:[%s7343_s5 + $0x7b8] ss:$80 sps:$4 sm:$0xff]  }
 0x1bf   : > { %4531 = vmatpush1.bf16.msra.mxu0 %v6715_v57  ;;  %4613 = vmatpush1.bf16.msra.mxu1 %v6718_v58  ;;  %v6807_v57 = vld [vmem:[%s7343_s5 + $0x854] ss:$80 sps:$4 sm:$0xff]   ;;  %v6810_v58 = vld [vmem:[%s7343_s5 + $0x85c] ss:$80 sps:$4 sm:$0xff]  }
 0x1c0   : > { %4532 = vmatprep.subr.bf16.mxu0 %v6723_v59  ;;  %4614 = vmatprep.subr.bf16.mxu1 %v6726_v60  ;;  %v6805_v59 = vld [vmem:[%s7343_s5 + $0x850] ss:$80 sps:$4 sm:$0xff]   ;;  %v6808_v60 = vld [vmem:[%s7343_s5 + $0x858] ss:$80 sps:$4 sm:$0xff]  }
 0x1c3   : > { %4533 = vmatpush1.bf16.msra.mxu0 %v6721_v62  ;;  %4615 = vmatpush1.bf16.msra.mxu1 %v6724_v63  ;;  %v6813_v62 = vld [vmem:[%s7343_s5 + $0x8f4] ss:$80 sps:$4 sm:$0xff]   ;;  %v6816_v63 = vld [vmem:[%s7343_s5 + $0x8fc] ss:$80 sps:$4 sm:$0xff]  }
 0x1c4   : > { %4625 = vmatprep.subr.bf16.mxu0 %v6729_v0  ;;  %4707 = vmatprep.subr.bf16.mxu1 %v6732_v1  ;;  %v6811_v0 = vld [vmem:[%s7343_s5 + $0x8f0] ss:$80 sps:$4 sm:$0xff]   ;;  %v6814_v1 = vld [vmem:[%s7343_s5 + $0x8f8] ss:$80 sps:$4 sm:$0xff]  }
 0x1c6   : > { %4535 = vmatmul.mubr.bf16.vlgmr.msra.gmra.mrb[8].mxu0 %v7528_v24  ;;  %4617 = vmatmul.mubr.bf16.vlgmr.msra.gmra.mrb[8].mxu1 %v7528_v24 }
 0x1c7   : > { %4626 = vmatpush1.bf16.msra.mxu0 %v6727_v2  ;;  %4708 = vmatpush1.bf16.msra.mxu1 %v6730_v3  ;;  %v6819_v2 = vld [vmem:[%s7343_s5 + $0x994] ss:$80 sps:$4 sm:$0xff]   ;;  %v6822_v3 = vld [vmem:[%s7343_s5 + $0x99c] ss:$80 sps:$4 sm:$0xff]  }
 0x1c8   : > { %4627 = vmatprep.subr.bf16.mxu0 %v6735_v4  ;;  %4709 = vmatprep.subr.bf16.mxu1 %v6738_v5  ;;  %v6817_v4 = vld [vmem:[%s7343_s5 + $0x990] ss:$80 sps:$4 sm:$0xff]   ;;  %v6820_v5 = vld [vmem:[%s7343_s5 + $0x998] ss:$80 sps:$4 sm:$0xff]  }
 0x1c9   : > { %4657 = vmatprep.mubr.bf16.mxu0 %v7430_v61  ;;  %4739 = vmatprep.mubr.bf16.mxu1 %v7430_v61 }
 0x1cb   : > { %4628 = vmatpush1.bf16.msra.mxu0 %v6733_v6  ;;  %4710 = vmatpush1.bf16.msra.mxu1 %v6736_v7  ;;  %v6825_v6 = vld [vmem:[%s7343_s5 + $0xa34] ss:$80 sps:$4 sm:$0xff]   ;;  %v6828_v7 = vld [vmem:[%s7343_s5 + $0xa3c] ss:$80 sps:$4 sm:$0xff]  }
 0x1cc   : > { %4629 = vmatprep.subr.bf16.mxu0 %v6741_v8  ;;  %4711 = vmatprep.subr.bf16.mxu1 %v6744_v9  ;;  %v6823_v8 = vld [vmem:[%s7343_s5 + $0xa30] ss:$80 sps:$4 sm:$0xff]   ;;  %v6826_v9 = vld [vmem:[%s7343_s5 + $0xa38] ss:$80 sps:$4 sm:$0xff]  }
 0x1cf   : > { %4630 = vmatpush1.bf16.msra.mxu0 %v6739_v11  ;;  %4712 = vmatpush1.bf16.msra.mxu1 %v6742_v12  ;;  %v6831_v11 = vld [vmem:[%s7343_s5 + $0xad4] ss:$80 sps:$4 sm:$0xff]   ;;  %v6834_v12 = vld [vmem:[%s7343_s5 + $0xadc] ss:$80 sps:$4 sm:$0xff]  }
 0x1d0   : > { %4631 = vmatprep.subr.bf16.mxu0 %v6747_v13  ;;  %4713 = vmatprep.subr.bf16.mxu1 %v6750_v14  ;;  %v6829_v13 = vld [vmem:[%s7343_s5 + $0xad0] ss:$80 sps:$4 sm:$0xff]   ;;  %v6832_v14 = vld [vmem:[%s7343_s5 + $0xad8] ss:$80 sps:$4 sm:$0xff]  }
 0x1d3   : > { %4632 = vmatpush1.bf16.msra.mxu0 %v6745_v15  ;;  %4714 = vmatpush1.bf16.msra.mxu1 %v6748_v16  ;;  %v6837_v15 = vld [vmem:[%s7343_s5 + $0xb74] ss:$80 sps:$4 sm:$0xff]   ;;  %v6840_v16 = vld [vmem:[%s7343_s5 + $0xb7c] ss:$80 sps:$4 sm:$0xff]  }
 0x1d4   : > { %4633 = vmatprep.subr.bf16.mxu0 %v6753_v18  ;;  %4715 = vmatprep.subr.bf16.mxu1 %v6756_v19  ;;  %v6835_v18 = vld [vmem:[%s7343_s5 + $0xb70] ss:$80 sps:$4 sm:$0xff]   ;;  %v6838_v19 = vld [vmem:[%s7343_s5 + $0xb78] ss:$80 sps:$4 sm:$0xff]  }
 0x1d7   : > { %4634 = vmatpush1.bf16.msra.mxu0 %v6751_v20  ;;  %4716 = vmatpush1.bf16.msra.mxu1 %v6754_v22  ;;  %v6843_v20 = vld [vmem:[%s7343_s5 + $0xc14] ss:$80 sps:$4 sm:$0xff]   ;;  %v6846_v22 = vld [vmem:[%s7343_s5 + $0xc1c] ss:$80 sps:$4 sm:$0xff]  }
 0x1d8   : > { %4635 = vmatprep.subr.bf16.mxu0 %v6759_v23  ;;  %4717 = vmatprep.subr.bf16.mxu1 %v6762_v25  ;;  %v6841_v23 = vld [vmem:[%s7343_s5 + $0xc10] ss:$80 sps:$4 sm:$0xff]   ;;  %v6844_v25 = vld [vmem:[%s7343_s5 + $0xc18] ss:$80 sps:$4 sm:$0xff]  }
 0x1db   : > { %4636 = vmatpush1.bf16.msra.mxu0 %v6757_v26  ;;  %4718 = vmatpush1.bf16.msra.mxu1 %v6760_v27  ;;  %v6849_v26 = vld [vmem:[%s7343_s5 + $0xcb4] ss:$80 sps:$4 sm:$0xff]   ;;  %v6852_v27 = vld [vmem:[%s7343_s5 + $0xcbc] ss:$80 sps:$4 sm:$0xff]  }
 0x1dc   : > { %4637 = vmatprep.subr.bf16.mxu0 %v6765_v28  ;;  %4719 = vmatprep.subr.bf16.mxu1 %v6768_v29  ;;  %v6847_v28 = vld [vmem:[%s7343_s5 + $0xcb0] ss:$80 sps:$4 sm:$0xff]   ;;  %v6850_v29 = vld [vmem:[%s7343_s5 + $0xcb8] ss:$80 sps:$4 sm:$0xff]  }
 0x1df   : > { %4638 = vmatpush1.bf16.msra.mxu0 %v6763_v10  ;;  %4720 = vmatpush1.bf16.msra.mxu1 %v6766_v30  ;;  %v6855_v10 = vld [vmem:[%s7343_s5 + $0xd54] ss:$80 sps:$4 sm:$0xff]   ;;  %v6858_v30 = vld [vmem:[%s7343_s5 + $0xd5c] ss:$80 sps:$4 sm:$0xff]  }
 0x1e0   : > { %4639 = vmatprep.subr.bf16.mxu0 %v6771_v31  ;;  %4721 = vmatprep.subr.bf16.mxu1 %v6774_v32  ;;  %v6853_v31 = vld [vmem:[%s7343_s5 + $0xd50] ss:$80 sps:$4 sm:$0xff]   ;;  %v6856_v32 = vld [vmem:[%s7343_s5 + $0xd58] ss:$80 sps:$4 sm:$0xff]  }
 0x1e3   : > { %4640 = vmatpush1.bf16.msra.mxu0 %v6769_v33  ;;  %4722 = vmatpush1.bf16.msra.mxu1 %v6772_v34  ;;  %v6861_v33 = vld [vmem:[%s7343_s5 + $0xdf4] ss:$80 sps:$4 sm:$0xff]   ;;  %v6864_v34 = vld [vmem:[%s7343_s5 + $0xdfc] ss:$80 sps:$4 sm:$0xff]  }
 0x1e4   : > { %4641 = vmatprep.subr.bf16.mxu0 %v6777_v35  ;;  %4723 = vmatprep.subr.bf16.mxu1 %v6780_v36 }
 0x1e7   : > { %4642 = vmatpush1.bf16.msra.mxu0 %v6775_v37  ;;  %4724 = vmatpush1.bf16.msra.mxu1 %v6778_v38 }
 0x1e8   : > { %4643 = vmatprep.subr.bf16.mxu0 %v6783_v39  ;;  %4725 = vmatprep.subr.bf16.mxu1 %v6786_v40 }
 0x1eb   : > { %4644 = vmatpush1.bf16.msra.mxu0 %v6781_v41  ;;  %4726 = vmatpush1.bf16.msra.mxu1 %v6784_v42 }
 0x1ec   : > { %4645 = vmatprep.subr.bf16.mxu0 %v6789_v43  ;;  %4727 = vmatprep.subr.bf16.mxu1 %v6792_v45  ;;  %v6859_v43 = vld [vmem:[%s7343_s5 + $0xdf0] ss:$80 sps:$4 sm:$0xff]   ;;  %v6862_v45 = vld [vmem:[%s7343_s5 + $0xdf8] ss:$80 sps:$4 sm:$0xff]  }
 0x1ef   : > { %4646 = vmatpush1.bf16.msra.mxu0 %v6787_v46  ;;  %4728 = vmatpush1.bf16.msra.mxu1 %v6790_v47 }
 0x1f0   : > { %4647 = vmatprep.subr.bf16.mxu0 %v6795_v48  ;;  %4729 = vmatprep.subr.bf16.mxu1 %v6798_v49  ;;  %v6867_v48 = vld [vmem:[%s7343_s5 + $0xe94] ss:$80 sps:$4 sm:$0xff]   ;;  %v6870_v49 = vld [vmem:[%s7343_s5 + $0xe9c] ss:$80 sps:$4 sm:$0xff]  }
 0x1f3   : > { %4648 = vmatpush1.bf16.msra.mxu0 %v6793_v51  ;;  %4730 = vmatpush1.bf16.msra.mxu1 %v6796_v52 }
 0x1f4   : > { %4649 = vmatprep.subr.bf16.mxu0 %v6801_v53  ;;  %4731 = vmatprep.subr.bf16.mxu1 %v6804_v54  ;;  %v262_v53 = vld [vmem:[%s7364_s16 + $0x8] sm:$0xff] }
 0x1f7   : > { %4650 = vmatpush1.bf16.msra.mxu0 %v6799_v55  ;;  %4732 = vmatpush1.bf16.msra.mxu1 %v6802_v56  ;;  %v6865_v55 = vld [vmem:[%s7343_s5 + $0xe90] ss:$80 sps:$4 sm:$0xff]   ;;  %v6868_v56 = vld [vmem:[%s7343_s5 + $0xe98] ss:$80 sps:$4 sm:$0xff]  }
 0x1f8   : > { %4651 = vmatprep.subr.bf16.mxu0 %v6807_v57  ;;  %4733 = vmatprep.subr.bf16.mxu1 %v6810_v58  ;;  %v6873_v57 = vld [vmem:[%s7343_s5 + $0xf34] ss:$80 sps:$4 sm:$0xff]   ;;  %v6876_v58 = vld [vmem:[%s7343_s5 + $0xf3c] ss:$80 sps:$4 sm:$0xff]  }
 0x1fb   : > { %4652 = vmatpush1.bf16.msra.mxu0 %v6805_v59  ;;  %4734 = vmatpush1.bf16.msra.mxu1 %v6808_v60  ;;  %v6871_v60 = vld [vmem:[%s7343_s5 + $0xf30] ss:$80 sps:$4 sm:$0xff]  }
 0x1fc   : > { %4653 = vmatprep.subr.bf16.mxu0 %v6813_v62  ;;  %4735 = vmatprep.subr.bf16.mxu1 %v6816_v63  ;;  %v6874_v62 = vld [vmem:[%s7343_s5 + $0xf38] ss:$80 sps:$4 sm:$0xff]   ;;  %v6879_v63 = vld [vmem:[%s7343_s5 + $0xfd4] ss:$80 sps:$4 sm:$0xff]  }
 0x1ff   : > { %4654 = vmatpush1.bf16.msra.mxu0 %v6811_v0  ;;  %4736 = vmatpush1.bf16.msra.mxu1 %v6814_v1  ;;  %v6882_v0 = vld [vmem:[%s7343_s5 + $0xfdc] ss:$80 sps:$4 sm:$0xff]   ;;  %v6877_v1 = vld [vmem:[%s7343_s5 + $0xfd0] ss:$80 sps:$4 sm:$0xff]  }
 0x200   : > { %4655 = vmatprep.subr.bf16.mxu0 %v6819_v2  ;;  %4737 = vmatprep.subr.bf16.mxu1 %v6822_v3  ;;  %v6880_v2 = vld [vmem:[%s7343_s5 + $0xfd8] ss:$80 sps:$4 sm:$0xff]   ;;  %v6885_v3 = vld [vmem:[%s7343_s5 + $0x1074] ss:$80 sps:$4 sm:$0xff]  }
 0x203   : > { %4656 = vmatpush1.bf16.msra.mxu0 %v6817_v4  ;;  %4738 = vmatpush1.bf16.msra.mxu1 %v6820_v5  ;;  %v6888_v4 = vld [vmem:[%s7343_s5 + $0x107c] ss:$80 sps:$4 sm:$0xff]   ;;  %v6883_v5 = vld [vmem:[%s7343_s5 + $0x1070] ss:$80 sps:$4 sm:$0xff]  }
 0x204   : > { %4666 = vmatprep.subr.bf16.mxu0 %v6825_v6  ;;  %4748 = vmatprep.subr.bf16.mxu1 %v6828_v7  ;;  %v6886_v6 = vld [vmem:[%s7343_s5 + $0x1078] ss:$80 sps:$4 sm:$0xff]   ;;  %v6891_v7 = vld [vmem:[%s7343_s5 + $0x1114] ss:$80 sps:$4 sm:$0xff]  }
 0x206   : > { %4658 = vmatmul.mubr.bf16.vlgmr.msra.gmra.mrb[12].mxu0 %v7455_v17  ;;  %4740 = vmatmul.mubr.bf16.vlgmr.msra.gmra.mrb[12].mxu1 %v7455_v17 }
 0x207   : > { %4667 = vmatpush1.bf16.msra.mxu0 %v6823_v8  ;;  %4749 = vmatpush1.bf16.msra.mxu1 %v6826_v9  ;;  %v6894_v8 = vld [vmem:[%s7343_s5 + $0x111c] ss:$80 sps:$4 sm:$0xff]   ;;  %v6889_v9 = vld [vmem:[%s7343_s5 + $0x1110] ss:$80 sps:$4 sm:$0xff]  }
 0x208   : > { %4668 = vmatprep.subr.bf16.mxu0 %v6831_v11  ;;  %4750 = vmatprep.subr.bf16.mxu1 %v6834_v12  ;;  %v6892_v11 = vld [vmem:[%s7343_s5 + $0x1118] ss:$80 sps:$4 sm:$0xff]   ;;  %v6897_v12 = vld [vmem:[%s7343_s5 + $0x11b4] ss:$80 sps:$4 sm:$0xff]  }
 0x209   : > { %4698 = vmatprep.mubr.bf16.mxu0 %v7460_v21  ;;  %4780 = vmatprep.mubr.bf16.mxu1 %v7460_v21 }
 0x20b   : > { %4669 = vmatpush1.bf16.msra.mxu0 %v6829_v13  ;;  %4751 = vmatpush1.bf16.msra.mxu1 %v6832_v14  ;;  %v6900_v13 = vld [vmem:[%s7343_s5 + $0x11bc] ss:$80 sps:$4 sm:$0xff]   ;;  %v6895_v14 = vld [vmem:[%s7343_s5 + $0x11b0] ss:$80 sps:$4 sm:$0xff]  }
 0x20c   : > { %4670 = vmatprep.subr.bf16.mxu0 %v6837_v15  ;;  %4752 = vmatprep.subr.bf16.mxu1 %v6840_v16  ;;  %v6898_v15 = vld [vmem:[%s7343_s5 + $0x11b8] ss:$80 sps:$4 sm:$0xff]   ;;  %v6903_v16 = vld [vmem:[%s7343_s5 + $0x1254] ss:$80 sps:$4 sm:$0xff]  }
 0x20f   : > { %4671 = vmatpush1.bf16.msra.mxu0 %v6835_v18  ;;  %4753 = vmatpush1.bf16.msra.mxu1 %v6838_v19  ;;  %v6906_v18 = vld [vmem:[%s7343_s5 + $0x125c] ss:$80 sps:$4 sm:$0xff]   ;;  %v6901_v19 = vld [vmem:[%s7343_s5 + $0x1250] ss:$80 sps:$4 sm:$0xff]  }
 0x210   : > { %4672 = vmatprep.subr.bf16.mxu0 %v6843_v20  ;;  %4754 = vmatprep.subr.bf16.mxu1 %v6846_v22  ;;  %v6904_v20 = vld [vmem:[%s7343_s5 + $0x1258] ss:$80 sps:$4 sm:$0xff]   ;;  %v6909_v22 = vld [vmem:[%s7343_s5 + $0x12f4] ss:$80 sps:$4 sm:$0xff]  }
 0x213   : > { %4673 = vmatpush1.bf16.msra.mxu0 %v6841_v23  ;;  %4755 = vmatpush1.bf16.msra.mxu1 %v6844_v25  ;;  %v6912_v23 = vld [vmem:[%s7343_s5 + $0x12fc] ss:$80 sps:$4 sm:$0xff]   ;;  %v6907_v25 = vld [vmem:[%s7343_s5 + $0x12f0] ss:$80 sps:$4 sm:$0xff]  }
 0x214   : > { %4674 = vmatprep.subr.bf16.mxu0 %v6849_v26  ;;  %4756 = vmatprep.subr.bf16.mxu1 %v6852_v27  ;;  %v6910_v26 = vld [vmem:[%s7343_s5 + $0x12f8] ss:$80 sps:$4 sm:$0xff]   ;;  %v6915_v27 = vld [vmem:[%s7343_s5 + $0x1394] ss:$80 sps:$4 sm:$0xff]  }
 0x217   : > { %4675 = vmatpush1.bf16.msra.mxu0 %v6847_v28  ;;  %4757 = vmatpush1.bf16.msra.mxu1 %v6850_v29  ;;  %v6918_v28 = vld [vmem:[%s7343_s5 + $0x139c] ss:$80 sps:$4 sm:$0xff]   ;;  %v6913_v29 = vld [vmem:[%s7343_s5 + $0x1390] ss:$80 sps:$4 sm:$0xff]  }
 0x218   : > { %4676 = vmatprep.subr.bf16.mxu0 %v6855_v10  ;;  %4758 = vmatprep.subr.bf16.mxu1 %v6858_v30  ;;  %v6916_v10 = vld [vmem:[%s7343_s5 + $0x1398] ss:$80 sps:$4 sm:$0xff]   ;;  %v6921_v30 = vld [vmem:[%s7343_s5 + $0x44] ss:$80 sps:$4 sm:$0xff]  }
 0x219   : > { %v4372_v35 = vpop.f32.mrb[4].mxu0  ;;  %v4454_v36 = vpop.f32.mrb[4].mxu1 }
 0x21a   : > { %v4374_v37 = vpop.f32.mrb[5].mxu0  ;;  %v4456_v38 = vpop.f32.mrb[5].mxu1 }
 0x21b   : > { %v4990_v39 = vcombine.low %v4372_v35, %v4374_v37  ;;  %v4991_v40 = vcombine.low %v4454_v36, %v4456_v38  ;;  %v4376_v41 = vpop.f32.mrb[6].mxu0  ;;  %v4458_v42 = vpop.f32.mrb[6].mxu1  ;;  %4677 = vmatpush1.bf16.msra.mxu0 %v6853_v31  ;;  %4759 = vmatpush1.bf16.msra.mxu1 %v6856_v32  ;;  %v6924_v31 = vld [vmem:[%s7343_s5 + $0x4c] ss:$80 sps:$4 sm:$0xff]   ;;  %v6919_v32 = vld [vmem:[%s7343_s5 + $0x40] ss:$80 sps:$4 sm:$0xff]  }
 0x21c   : > { %v4377_v46 = vpop.f32.mrb[7].mxu0  ;;  %v4459_v47 = vpop.f32.mrb[7].mxu1  ;;  %4678 = vmatprep.subr.bf16.mxu0 %v6861_v33  ;;  %4760 = vmatprep.subr.bf16.mxu1 %v6864_v34  ;;  %v6922_v33 = vld [vmem:[%s7343_s5 + $0x48] ss:$80 sps:$4 sm:$0xff]   ;;  %v6927_v34 = vld [vmem:[%s7343_s5 + $0xe4] ss:$80 sps:$4 sm:$0xff]  }
 0x21d   : > { %v4998_v51 = vrot.slane %v4990_v39, %v7419_v50  ;;  %v5005_v52 = vrot.slane %v4991_v40, %v7419_v50  ;;  %v6930_v35 = vld [vmem:[%s7343_s5 + $0xec] ss:$80 sps:$4 sm:$0xff]   ;;  %v6925_v36 = vld [vmem:[%s7343_s5 + $0xe0] ss:$80 sps:$4 sm:$0xff]   ;;  %v6928_v37 = vld [vmem:[%s7343_s5 + $0xe8] ss:$80 sps:$4 sm:$0xff]  }
 0x21e   : > { %v6933_v38 = vld [vmem:[%s7343_s5 + $0x184] ss:$80 sps:$4 sm:$0xff]   ;;  %v6936_v39 = vld [vmem:[%s7343_s5 + $0x18c] ss:$80 sps:$4 sm:$0xff]   ;;  %v6931_v40 = vld [vmem:[%s7343_s5 + $0x180] ss:$80 sps:$4 sm:$0xff]  }
 0x21f   : > { %v5006_v54 = vcombine.low %v4998_v51, %v5005_v52  ;;  %4679 = vmatpush1.bf16.msra.mxu0 %v6859_v43  ;;  %4761 = vmatpush1.bf16.msra.mxu1 %v6862_v45  ;;  %v6934_v41 = vld [vmem:[%s7343_s5 + $0x188] ss:$80 sps:$4 sm:$0xff]   ;;  %v6939_v42 = vld [vmem:[%s7343_s5 + $0x224] ss:$80 sps:$4 sm:$0xff]   ;;  %v6942_v43 = vld [vmem:[%s7343_s5 + $0x22c] ss:$80 sps:$4 sm:$0xff]  }
 0x220   : > { %4680 = vmatprep.subr.bf16.mxu0 %v6867_v48  ;;  %4762 = vmatprep.subr.bf16.mxu1 %v6870_v49  ;;  %v6937_v45 = vld [vmem:[%s7343_s5 + $0x220] ss:$80 sps:$4 sm:$0xff]   ;;  %v6940_v46 = vld [vmem:[%s7343_s5 + $0x228] ss:$80 sps:$4 sm:$0xff]   ;;  %v6948_v47 = vld [vmem:[%s7343_s5 + $0x2cc] ss:$80 sps:$4 sm:$0xff]  }
 0x221   : > { %v5064_v59 = vadd.f32 %v5006_v54, %v262_v53  ;;  %v6943_v48 = vld [vmem:[%s7343_s5 + $0x2c0] ss:$80 sps:$4 sm:$0xff]   ;;  %v6946_v49 = vld [vmem:[%s7343_s5 + $0x2c8] ss:$80 sps:$4 sm:$0xff]   ;;  %v6951_v51 = vld [vmem:[%s7343_s5 + $0x364] ss:$80 sps:$4 sm:$0xff]  }
 0x222   : > { %v6954_v52 = vld [vmem:[%s7343_s5 + $0x36c] ss:$80 sps:$4 sm:$0xff]   ;;  %v6949_v53 = vld [vmem:[%s7343_s5 + $0x360] ss:$80 sps:$4 sm:$0xff]   ;;  %v6952_v54 = vld [vmem:[%s7343_s5 + $0x368] ss:$80 sps:$4 sm:$0xff]  }
 0x223   : > { %5069 = vst [vmem:[%s7364_s16 + $0x8] sm:$0xff] %v5064_v59  ;;  %4681 = vmatpush1.bf16.msra.mxu0 %v6865_v55  ;;  %4763 = vmatpush1.bf16.msra.mxu1 %v6868_v56  ;;  %v6957_v55 = vld [vmem:[%s7343_s5 + $0x404] ss:$80 sps:$4 sm:$0xff]   ;;  %v6960_v56 = vld [vmem:[%s7343_s5 + $0x40c] ss:$80 sps:$4 sm:$0xff]  }
 0x224   : > { %4682 = vmatprep.subr.bf16.mxu0 %v6873_v57  ;;  %4764 = vmatprep.subr.bf16.mxu1 %v6876_v58  ;;  %v6955_v57 = vld [vmem:[%s7343_s5 + $0x400] ss:$80 sps:$4 sm:$0xff]   ;;  %v6958_v58 = vld [vmem:[%s7343_s5 + $0x408] ss:$80 sps:$4 sm:$0xff]   ;;  %v6963_v59 = vld [vmem:[%s7343_s5 + $0x4a4] ss:$80 sps:$4 sm:$0xff]  }
 0x227   : > { %4683 = vmatpush1.bf16.msra.mxu0 %v6871_v60  ;;  %4765 = vmatpush1.bf16.msra.mxu1 %v6874_v62  ;;  %v6966_v60 = vld [vmem:[%s7343_s5 + $0x4ac] ss:$80 sps:$4 sm:$0xff]   ;;  %v6961_v62 = vld [vmem:[%s7343_s5 + $0x4a0] ss:$80 sps:$4 sm:$0xff]  }
 0x228   : > { %4684 = vmatprep.subr.bf16.mxu0 %v6879_v63  ;;  %4766 = vmatprep.subr.bf16.mxu1 %v6882_v0  ;;  %v6964_v63 = vld [vmem:[%s7343_s5 + $0x4a8] ss:$80 sps:$4 sm:$0xff]   ;;  %v6969_v0 = vld [vmem:[%s7343_s5 + $0x544] ss:$80 sps:$4 sm:$0xff]  }
 0x22b   : > { %4685 = vmatpush1.bf16.msra.mxu0 %v6877_v1  ;;  %4767 = vmatpush1.bf16.msra.mxu1 %v6880_v2  ;;  %v6972_v1 = vld [vmem:[%s7343_s5 + $0x54c] ss:$80 sps:$4 sm:$0xff]   ;;  %v6967_v2 = vld [vmem:[%s7343_s5 + $0x540] ss:$80 sps:$4 sm:$0xff]  }
 0x22c   : > { %4686 = vmatprep.subr.bf16.mxu0 %v6885_v3  ;;  %4768 = vmatprep.subr.bf16.mxu1 %v6888_v4  ;;  %v6970_v3 = vld [vmem:[%s7343_s5 + $0x548] ss:$80 sps:$4 sm:$0xff]   ;;  %v6975_v4 = vld [vmem:[%s7343_s5 + $0x5e4] ss:$80 sps:$4 sm:$0xff]  }
 0x22f   : > { %4687 = vmatpush1.bf16.msra.mxu0 %v6883_v5  ;;  %4769 = vmatpush1.bf16.msra.mxu1 %v6886_v6  ;;  %v6978_v5 = vld [vmem:[%s7343_s5 + $0x5ec] ss:$80 sps:$4 sm:$0xff]   ;;  %v6973_v6 = vld [vmem:[%s7343_s5 + $0x5e0] ss:$80 sps:$4 sm:$0xff]  }
 0x230   : > { %4688 = vmatprep.subr.bf16.mxu0 %v6891_v7  ;;  %4770 = vmatprep.subr.bf16.mxu1 %v6894_v8  ;;  %v6976_v7 = vld [vmem:[%s7343_s5 + $0x5e8] ss:$80 sps:$4 sm:$0xff]   ;;  %v6981_v8 = vld [vmem:[%s7343_s5 + $0x684] ss:$80 sps:$4 sm:$0xff]  }
 0x233   : > { %4689 = vmatpush1.bf16.msra.mxu0 %v6889_v9  ;;  %4771 = vmatpush1.bf16.msra.mxu1 %v6892_v11  ;;  %v6984_v9 = vld [vmem:[%s7343_s5 + $0x68c] ss:$80 sps:$4 sm:$0xff]   ;;  %v6979_v11 = vld [vmem:[%s7343_s5 + $0x680] ss:$80 sps:$4 sm:$0xff]  }
 0x234   : > { %4690 = vmatprep.subr.bf16.mxu0 %v6897_v12  ;;  %4772 = vmatprep.subr.bf16.mxu1 %v6900_v13  ;;  %v6982_v12 = vld [vmem:[%s7343_s5 + $0x688] ss:$80 sps:$4 sm:$0xff]   ;;  %v6987_v13 = vld [vmem:[%s7343_s5 + $0x724] ss:$80 sps:$4 sm:$0xff]  }
 0x237   : > { %4691 = vmatpush1.bf16.msra.mxu0 %v6895_v14  ;;  %4773 = vmatpush1.bf16.msra.mxu1 %v6898_v15  ;;  %v6990_v14 = vld [vmem:[%s7343_s5 + $0x72c] ss:$80 sps:$4 sm:$0xff]   ;;  %v6985_v15 = vld [vmem:[%s7343_s5 + $0x720] ss:$80 sps:$4 sm:$0xff]  }
 0x238   : > { %4692 = vmatprep.subr.bf16.mxu0 %v6903_v16  ;;  %4774 = vmatprep.subr.bf16.mxu1 %v6906_v18  ;;  %v6988_v16 = vld [vmem:[%s7343_s5 + $0x728] ss:$80 sps:$4 sm:$0xff]   ;;  %v6993_v18 = vld [vmem:[%s7343_s5 + $0x7c4] ss:$80 sps:$4 sm:$0xff]  }
 0x23b   : > { %4693 = vmatpush1.bf16.msra.mxu0 %v6901_v19  ;;  %4775 = vmatpush1.bf16.msra.mxu1 %v6904_v20  ;;  %v6996_v19 = vld [vmem:[%s7343_s5 + $0x7cc] ss:$80 sps:$4 sm:$0xff]   ;;  %v6991_v20 = vld [vmem:[%s7343_s5 + $0x7c0] ss:$80 sps:$4 sm:$0xff]  }
 0x23c   : > { %4694 = vmatprep.subr.bf16.mxu0 %v6909_v22  ;;  %4776 = vmatprep.subr.bf16.mxu1 %v6912_v23  ;;  %v6994_v22 = vld [vmem:[%s7343_s5 + $0x7c8] ss:$80 sps:$4 sm:$0xff]   ;;  %v6999_v23 = vld [vmem:[%s7343_s5 + $0x864] ss:$80 sps:$4 sm:$0xff]  }
 0x23f   : > { %4695 = vmatpush1.bf16.msra.mxu0 %v6907_v25  ;;  %4777 = vmatpush1.bf16.msra.mxu1 %v6910_v26  ;;  %v7002_v25 = vld [vmem:[%s7343_s5 + $0x86c] ss:$80 sps:$4 sm:$0xff]   ;;  %v6997_v26 = vld [vmem:[%s7343_s5 + $0x860] ss:$80 sps:$4 sm:$0xff]  }
 0x240   : > { %4696 = vmatprep.subr.bf16.mxu0 %v6915_v27  ;;  %4778 = vmatprep.subr.bf16.mxu1 %v6918_v28  ;;  %v7000_v27 = vld [vmem:[%s7343_s5 + $0x868] ss:$80 sps:$4 sm:$0xff]   ;;  %v7005_v28 = vld [vmem:[%s7343_s5 + $0x904] ss:$80 sps:$4 sm:$0xff]  }
 0x243   : > { %4697 = vmatpush1.bf16.msra.mxu0 %v6913_v29  ;;  %4779 = vmatpush1.bf16.msra.mxu1 %v6916_v10  ;;  %v7008_v29 = vld [vmem:[%s7343_s5 + $0x90c] ss:$80 sps:$4 sm:$0xff]   ;;  %v7003_v10 = vld [vmem:[%s7343_s5 + $0x900] ss:$80 sps:$4 sm:$0xff]  }
 0x244   : > { %4789 = vmatprep.subr.bf16.mxu0 %v6921_v30  ;;  %4871 = vmatprep.subr.bf16.mxu1 %v6924_v31  ;;  %v7006_v30 = vld [vmem:[%s7343_s5 + $0x908] ss:$80 sps:$4 sm:$0xff]   ;;  %v7011_v31 = vld [vmem:[%s7343_s5 + $0x9a4] ss:$80 sps:$4 sm:$0xff]  }
 0x246   : > { %4699 = vmatmul.mubr.bf16.vlgmr.msra.gmra.mrb[12].mxu0 %v7528_v24  ;;  %4781 = vmatmul.mubr.bf16.vlgmr.msra.gmra.mrb[12].mxu1 %v7528_v24 }
 0x247   : > { %4790 = vmatpush1.bf16.msra.mxu0 %v6919_v32  ;;  %4872 = vmatpush1.bf16.msra.mxu1 %v6922_v33  ;;  %v7014_v32 = vld [vmem:[%s7343_s5 + $0x9ac] ss:$80 sps:$4 sm:$0xff]   ;;  %v7009_v33 = vld [vmem:[%s7343_s5 + $0x9a0] ss:$80 sps:$4 sm:$0xff]  }
 0x248   : > { %4791 = vmatprep.subr.bf16.mxu0 %v6927_v34  ;;  %4873 = vmatprep.subr.bf16.mxu1 %v6930_v35  ;;  %v7012_v34 = vld [vmem:[%s7343_s5 + $0x9a8] ss:$80 sps:$4 sm:$0xff]   ;;  %v7017_v35 = vld [vmem:[%s7343_s5 + $0xa44] ss:$80 sps:$4 sm:$0xff]  }
 0x249   : > { %4821 = vmatprep.mubr.bf16.mxu0 %v7430_v61  ;;  %4903 = vmatprep.mubr.bf16.mxu1 %v7430_v61  ;;  %v6945_v61 = vld [vmem:[%s7343_s5 + $0x2c4] ss:$80 sps:$4 sm:$0xff]  }
 0x24b   : > { %4792 = vmatpush1.bf16.msra.mxu0 %v6925_v36  ;;  %4874 = vmatpush1.bf16.msra.mxu1 %v6928_v37  ;;  %v7020_v36 = vld [vmem:[%s7343_s5 + $0xa4c] ss:$80 sps:$4 sm:$0xff]   ;;  %v7015_v37 = vld [vmem:[%s7343_s5 + $0xa40] ss:$80 sps:$4 sm:$0xff]  }
 0x24c   : > { %4793 = vmatprep.subr.bf16.mxu0 %v6933_v38  ;;  %4875 = vmatprep.subr.bf16.mxu1 %v6936_v39  ;;  %v7018_v38 = vld [vmem:[%s7343_s5 + $0xa48] ss:$80 sps:$4 sm:$0xff]   ;;  %v7023_v39 = vld [vmem:[%s7343_s5 + $0xae4] ss:$80 sps:$4 sm:$0xff]  }
 0x24f   : > { %4794 = vmatpush1.bf16.msra.mxu0 %v6931_v40  ;;  %4876 = vmatpush1.bf16.msra.mxu1 %v6934_v41  ;;  %v7026_v40 = vld [vmem:[%s7343_s5 + $0xaec] ss:$80 sps:$4 sm:$0xff]   ;;  %v7021_v41 = vld [vmem:[%s7343_s5 + $0xae0] ss:$80 sps:$4 sm:$0xff]  }
 0x250   : > { %4795 = vmatprep.subr.bf16.mxu0 %v6939_v42  ;;  %4877 = vmatprep.subr.bf16.mxu1 %v6942_v43  ;;  %v7024_v42 = vld [vmem:[%s7343_s5 + $0xae8] ss:$80 sps:$4 sm:$0xff]   ;;  %v7029_v43 = vld [vmem:[%s7343_s5 + $0xb84] ss:$80 sps:$4 sm:$0xff]  }
 0x253   : > { %4796 = vmatpush1.bf16.msra.mxu0 %v6937_v45  ;;  %4878 = vmatpush1.bf16.msra.mxu1 %v6940_v46  ;;  %v7032_v45 = vld [vmem:[%s7343_s5 + $0xb8c] ss:$80 sps:$4 sm:$0xff]   ;;  %v7030_v46 = vld [vmem:[%s7343_s5 + $0xb88] ss:$80 sps:$4 sm:$0xff]  }
 0x254   : > { %4797 = vmatprep.subr.bf16.mxu0 %v6945_v61  ;;  %4879 = vmatprep.subr.bf16.mxu1 %v6948_v47  ;;  %v7035_v61 = vld [vmem:[%s7343_s5 + $0xc24] ss:$80 sps:$4 sm:$0xff]   ;;  %v7038_v47 = vld [vmem:[%s7343_s5 + $0xc2c] ss:$80 sps:$4 sm:$0xff]  }
 0x257   : > { %4798 = vmatpush1.bf16.msra.mxu0 %v6943_v48  ;;  %4880 = vmatpush1.bf16.msra.mxu1 %v6946_v49  ;;  %v7033_v48 = vld [vmem:[%s7343_s5 + $0xc20] ss:$80 sps:$4 sm:$0xff]   ;;  %v7036_v49 = vld [vmem:[%s7343_s5 + $0xc28] ss:$80 sps:$4 sm:$0xff]  }
 0x258   : > { %4799 = vmatprep.subr.bf16.mxu0 %v6951_v51  ;;  %4881 = vmatprep.subr.bf16.mxu1 %v6954_v52  ;;  %v7044_v51 = vld [vmem:[%s7343_s5 + $0xccc] ss:$80 sps:$4 sm:$0xff]   ;;  %v7039_v52 = vld [vmem:[%s7343_s5 + $0xcc0] ss:$80 sps:$4 sm:$0xff]  }
 0x25b   : > { %4800 = vmatpush1.bf16.msra.mxu0 %v6949_v53  ;;  %4882 = vmatpush1.bf16.msra.mxu1 %v6952_v54  ;;  %v7042_v53 = vld [vmem:[%s7343_s5 + $0xcc8] ss:$80 sps:$4 sm:$0xff]   ;;  %v7047_v54 = vld [vmem:[%s7343_s5 + $0xd64] ss:$80 sps:$4 sm:$0xff]  }
 0x25c   : > { %4801 = vmatprep.subr.bf16.mxu0 %v6957_v55  ;;  %4883 = vmatprep.subr.bf16.mxu1 %v6960_v56  ;;  %v7050_v55 = vld [vmem:[%s7343_s5 + $0xd6c] ss:$80 sps:$4 sm:$0xff]   ;;  %v7045_v56 = vld [vmem:[%s7343_s5 + $0xd60] ss:$80 sps:$4 sm:$0xff]  }
 0x25f   : > { %4802 = vmatpush1.bf16.msra.mxu0 %v6955_v57  ;;  %4884 = vmatpush1.bf16.msra.mxu1 %v6958_v58  ;;  %v7048_v57 = vld [vmem:[%s7343_s5 + $0xd68] ss:$80 sps:$4 sm:$0xff]   ;;  %v7053_v58 = vld [vmem:[%s7343_s5 + $0xe04] ss:$80 sps:$4 sm:$0xff]  }
 0x260   : > { %4803 = vmatprep.subr.bf16.mxu0 %v6963_v59  ;;  %4885 = vmatprep.subr.bf16.mxu1 %v6966_v60  ;;  %v7056_v59 = vld [vmem:[%s7343_s5 + $0xe0c] ss:$80 sps:$4 sm:$0xff]  }
 0x263   : > { %4804 = vmatpush1.bf16.msra.mxu0 %v6961_v62  ;;  %4886 = vmatpush1.bf16.msra.mxu1 %v6964_v63 }
 0x264   : > { %4805 = vmatprep.subr.bf16.mxu0 %v6969_v0  ;;  %4887 = vmatprep.subr.bf16.mxu1 %v6972_v1 }
 0x267   : > { %4806 = vmatpush1.bf16.msra.mxu0 %v6967_v2  ;;  %4888 = vmatpush1.bf16.msra.mxu1 %v6970_v3 }
 0x268   : > { %4807 = vmatprep.subr.bf16.mxu0 %v6975_v4  ;;  %4889 = vmatprep.subr.bf16.mxu1 %v6978_v5  ;;  %v7051_v5 = vld [vmem:[%s7343_s5 + $0xe00] ss:$80 sps:$4 sm:$0xff]  }
 0x26b   : > { %4808 = vmatpush1.bf16.msra.mxu0 %v6973_v6  ;;  %4890 = vmatpush1.bf16.msra.mxu1 %v6976_v7  ;;  %v7054_v6 = vld [vmem:[%s7343_s5 + $0xe08] ss:$80 sps:$4 sm:$0xff]  }
 0x26c   : > { %4809 = vmatprep.subr.bf16.mxu0 %v6981_v8  ;;  %4891 = vmatprep.subr.bf16.mxu1 %v6984_v9  ;;  %v7059_v9 = vld [vmem:[%s7343_s5 + $0xea4] ss:$80 sps:$4 sm:$0xff]  }
 0x26f   : > { %4810 = vmatpush1.bf16.msra.mxu0 %v6979_v11  ;;  %4892 = vmatpush1.bf16.msra.mxu1 %v6982_v12  ;;  %v7062_v11 = vld [vmem:[%s7343_s5 + $0xeac] ss:$80 sps:$4 sm:$0xff]  }
 0x270   : > { %4811 = vmatprep.subr.bf16.mxu0 %v6987_v13  ;;  %4893 = vmatprep.subr.bf16.mxu1 %v6990_v14  ;;  %v263_v14 = vld [vmem:[%s7364_s16 + $0x10] sm:$0xff] }
 0x273   : > { %4812 = vmatpush1.bf16.msra.mxu0 %v6985_v15  ;;  %4894 = vmatpush1.bf16.msra.mxu1 %v6988_v16  ;;  %v7057_v16 = vld [vmem:[%s7343_s5 + $0xea0] ss:$80 sps:$4 sm:$0xff]  }
 0x274   : > { %4813 = vmatprep.subr.bf16.mxu0 %v6993_v18  ;;  %4895 = vmatprep.subr.bf16.mxu1 %v6996_v19  ;;  %v7060_v18 = vld [vmem:[%s7343_s5 + $0xea8] ss:$80 sps:$4 sm:$0xff]   ;;  %v7065_v19 = vld [vmem:[%s7343_s5 + $0xf44] ss:$80 sps:$4 sm:$0xff]  }
 0x277   : > { %4814 = vmatpush1.bf16.msra.mxu0 %v6991_v20  ;;  %4896 = vmatpush1.bf16.msra.mxu1 %v6994_v22  ;;  %v7068_v20 = vld [vmem:[%s7343_s5 + $0xf4c] ss:$80 sps:$4 sm:$0xff]  }
 0x278   : > { %4815 = vmatprep.subr.bf16.mxu0 %v6999_v23  ;;  %4897 = vmatprep.subr.bf16.mxu1 %v7002_v25  ;;  %v7063_v23 = vld [vmem:[%s7343_s5 + $0xf40] ss:$80 sps:$4 sm:$0xff]   ;;  %v7066_v25 = vld [vmem:[%s7343_s5 + $0xf48] ss:$80 sps:$4 sm:$0xff]  }
 0x27b   : > { %4816 = vmatpush1.bf16.msra.mxu0 %v6997_v26  ;;  %4898 = vmatpush1.bf16.msra.mxu1 %v7000_v27  ;;  %v7071_v26 = vld [vmem:[%s7343_s5 + $0xfe4] ss:$80 sps:$4 sm:$0xff]   ;;  %v7074_v27 = vld [vmem:[%s7343_s5 + $0xfec] ss:$80 sps:$4 sm:$0xff]  }
 0x27c   : > { %4817 = vmatprep.subr.bf16.mxu0 %v7005_v28  ;;  %4899 = vmatprep.subr.bf16.mxu1 %v7008_v29  ;;  %v7069_v28 = vld [vmem:[%s7343_s5 + $0xfe0] ss:$80 sps:$4 sm:$0xff]   ;;  %v7072_v29 = vld [vmem:[%s7343_s5 + $0xfe8] ss:$80 sps:$4 sm:$0xff]  }
 0x27f   : > { %4818 = vmatpush1.bf16.msra.mxu0 %v7003_v10  ;;  %4900 = vmatpush1.bf16.msra.mxu1 %v7006_v30  ;;  %v7077_v10 = vld [vmem:[%s7343_s5 + $0x1084] ss:$80 sps:$4 sm:$0xff]   ;;  %v7080_v30 = vld [vmem:[%s7343_s5 + $0x108c] ss:$80 sps:$4 sm:$0xff]  }
 0x280   : > { %4819 = vmatprep.subr.bf16.mxu0 %v7011_v31  ;;  %4901 = vmatprep.subr.bf16.mxu1 %v7014_v32  ;;  %v7075_v31 = vld [vmem:[%s7343_s5 + $0x1080] ss:$80 sps:$4 sm:$0xff]   ;;  %v7078_v32 = vld [vmem:[%s7343_s5 + $0x1088] ss:$80 sps:$4 sm:$0xff]  }
 0x283   : > { %4820 = vmatpush1.bf16.msra.mxu0 %v7009_v33  ;;  %4902 = vmatpush1.bf16.msra.mxu1 %v7012_v34  ;;  %v7083_v33 = vld [vmem:[%s7343_s5 + $0x1124] ss:$80 sps:$4 sm:$0xff]   ;;  %v7086_v34 = vld [vmem:[%s7343_s5 + $0x112c] ss:$80 sps:$4 sm:$0xff]  }
 0x284   : > { %4830 = vmatprep.subr.bf16.mxu0 %v7017_v35  ;;  %4912 = vmatprep.subr.bf16.mxu1 %v7020_v36  ;;  %v7081_v35 = vld [vmem:[%s7343_s5 + $0x1120] ss:$80 sps:$4 sm:$0xff]   ;;  %v7084_v36 = vld [vmem:[%s7343_s5 + $0x1128] ss:$80 sps:$4 sm:$0xff]  }
 0x286   : > { %4822 = vmatmul.mubr.bf16.vlgmr.msra.gmra.mrb[16].mxu0 %v7455_v17  ;;  %4904 = vmatmul.mubr.bf16.vlgmr.msra.gmra.mrb[16].mxu1 %v7455_v17  ;;  %v7027_v17 = vld [vmem:[%s7343_s5 + $0xb80] ss:$80 sps:$4 sm:$0xff]  }
 0x287   : > { %4831 = vmatpush1.bf16.msra.mxu0 %v7015_v37  ;;  %4913 = vmatpush1.bf16.msra.mxu1 %v7018_v38  ;;  %v7089_v37 = vld [vmem:[%s7343_s5 + $0x11c4] ss:$80 sps:$4 sm:$0xff]   ;;  %v7092_v38 = vld [vmem:[%s7343_s5 + $0x11cc] ss:$80 sps:$4 sm:$0xff]  }
 0x288   : > { %4832 = vmatprep.subr.bf16.mxu0 %v7023_v39  ;;  %4914 = vmatprep.subr.bf16.mxu1 %v7026_v40  ;;  %v7087_v39 = vld [vmem:[%s7343_s5 + $0x11c0] ss:$80 sps:$4 sm:$0xff]   ;;  %v7090_v40 = vld [vmem:[%s7343_s5 + $0x11c8] ss:$80 sps:$4 sm:$0xff]  }
 0x289   : > { %4862 = vmatprep.mubr.bf16.mxu0 %v7460_v21  ;;  %4944 = vmatprep.mubr.bf16.mxu1 %v7460_v21  ;;  %v7041_v21 = vld [vmem:[%s7343_s5 + $0xcc4] ss:$80 sps:$4 sm:$0xff]  }
 0x28b   : > { %4833 = vmatpush1.bf16.msra.mxu0 %v7021_v41  ;;  %4915 = vmatpush1.bf16.msra.mxu1 %v7024_v42  ;;  %v7095_v41 = vld [vmem:[%s7343_s5 + $0x1264] ss:$80 sps:$4 sm:$0xff]   ;;  %v7098_v42 = vld [vmem:[%s7343_s5 + $0x126c] ss:$80 sps:$4 sm:$0xff]  }
 0x28c   : > { %4834 = vmatprep.subr.bf16.mxu0 %v7029_v43  ;;  %4916 = vmatprep.subr.bf16.mxu1 %v7032_v45  ;;  %v7093_v43 = vld [vmem:[%s7343_s5 + $0x1260] ss:$80 sps:$4 sm:$0xff]   ;;  %v7096_v45 = vld [vmem:[%s7343_s5 + $0x1268] ss:$80 sps:$4 sm:$0xff]  }
 0x28f   : > { %4835 = vmatpush1.bf16.msra.mxu0 %v7027_v17  ;;  %4917 = vmatpush1.bf16.msra.mxu1 %v7030_v46  ;;  %v7101_v17 = vld [vmem:[%s7343_s5 + $0x1304] ss:$80 sps:$4 sm:$0xff]   ;;  %v7104_v46 = vld [vmem:[%s7343_s5 + $0x130c] ss:$80 sps:$4 sm:$0xff]  }
 0x290   : > { %4836 = vmatprep.subr.bf16.mxu0 %v7035_v61  ;;  %4918 = vmatprep.subr.bf16.mxu1 %v7038_v47  ;;  %v7099_v61 = vld [vmem:[%s7343_s5 + $0x1300] ss:$80 sps:$4 sm:$0xff]   ;;  %v7102_v47 = vld [vmem:[%s7343_s5 + $0x1308] ss:$80 sps:$4 sm:$0xff]  }
 0x293   : > { %4837 = vmatpush1.bf16.msra.mxu0 %v7033_v48  ;;  %4919 = vmatpush1.bf16.msra.mxu1 %v7036_v49  ;;  %v7107_v48 = vld [vmem:[%s7343_s5 + $0x13a4] ss:$80 sps:$4 sm:$0xff]   ;;  %v7110_v49 = vld [vmem:[%s7343_s5 + $0x13ac] ss:$80 sps:$4 sm:$0xff]  }
 0x294   : > { %4838 = vmatprep.subr.bf16.mxu0 %v7041_v21  ;;  %4920 = vmatprep.subr.bf16.mxu1 %v7044_v51  ;;  %v7105_v21 = vld [vmem:[%s7343_s5 + $0x13a0] ss:$80 sps:$4 sm:$0xff]   ;;  %v7108_v51 = vld [vmem:[%s7343_s5 + $0x13a8] ss:$80 sps:$4 sm:$0xff]  }
 0x297   : > { %4839 = vmatpush1.bf16.msra.mxu0 %v7039_v52  ;;  %4921 = vmatpush1.bf16.msra.mxu1 %v7042_v53 }
 0x298   : > { %4840 = vmatprep.subr.bf16.mxu0 %v7047_v54  ;;  %4922 = vmatprep.subr.bf16.mxu1 %v7050_v55 }
 0x299   : > { %v4536_v60 = vpop.f32.mrb[8].mxu0  ;;  %v4618_v62 = vpop.f32.mrb[8].mxu1 }
 0x29a   : > { %v4538_v63 = vpop.f32.mrb[9].mxu0  ;;  %v4620_v0 = vpop.f32.mrb[9].mxu1 }
 0x29b   : > { %v5007_v1 = vcombine.low %v4536_v60, %v4538_v63  ;;  %v5008_v2 = vcombine.low %v4618_v62, %v4620_v0  ;;  %v4540_v3 = vpop.f32.mrb[10].mxu0  ;;  %v4622_v4 = vpop.f32.mrb[10].mxu1  ;;  %4841 = vmatpush1.bf16.msra.mxu0 %v7045_v56  ;;  %4923 = vmatpush1.bf16.msra.mxu1 %v7048_v57 }
 0x29c   : > { %v4541_v7 = vpop.f32.mrb[11].mxu0  ;;  %v4623_v8 = vpop.f32.mrb[11].mxu1  ;;  %4842 = vmatprep.subr.bf16.mxu0 %v7053_v58  ;;  %4924 = vmatprep.subr.bf16.mxu1 %v7056_v59 }
 0x29d   : > { %v5015_v12 = vrot.slane %v5007_v1, %v7419_v50  ;;  %v5022_v13 = vrot.slane %v5008_v2, %v7419_v50  ;;  %v264_v1 = vld [vmem:[%s7364_s16 + $0x18] sm:$0xff] }
 0x29f   : > { %v5023_v15 = vcombine.low %v5015_v12, %v5022_v13  ;;  %4843 = vmatpush1.bf16.msra.mxu0 %v7051_v5  ;;  %4925 = vmatpush1.bf16.msra.mxu1 %v7054_v6 }
 0x2a0   : > { %4844 = vmatprep.subr.bf16.mxu0 %v7059_v9  ;;  %4926 = vmatprep.subr.bf16.mxu1 %v7062_v11 }
 0x2a1   : > { %v5065_v22 = vadd.f32 %v5023_v15, %v263_v14 }
 0x2a3   : > { %5070 = vst [vmem:[%s7364_s16 + $0x10] sm:$0xff] %v5065_v22  ;;  %4845 = vmatpush1.bf16.msra.mxu0 %v7057_v16  ;;  %4927 = vmatpush1.bf16.msra.mxu1 %v7060_v18  ;;  %v265_v16 = vld [vmem:[%s7364_s16 + $0x20] sm:$0xff]  ;;  %v5090_v22 = vsub.s32 (!%p6028_p6), 0, %v7411_v44 }
 0x2a4   : > { %4846 = vmatprep.subr.bf16.mxu0 %v7065_v19  ;;  %4928 = vmatprep.subr.bf16.mxu1 %v7068_v20  ;;  %v5082_v20 = vld [vmem:[%s7359_s10] sm:$0xff] (!%p6028_p6) }
 0x2a7   : > { %4847 = vmatpush1.bf16.msra.mxu0 %v7063_v23  ;;  %4929 = vmatpush1.bf16.msra.mxu1 %v7066_v25  ;;  %v5094_v23 = vsub.s32 (!%p6028_p6), 1, %v7411_v44  ;;  %v5098_v25 = vsub.s32 (!%p6028_p6), 2, %v7411_v44 }
 0x2a8   : > { %4848 = vmatprep.subr.bf16.mxu0 %v7071_v26  ;;  %4930 = vmatprep.subr.bf16.mxu1 %v7074_v27  ;;  %v5102_v26 = vsub.s32 (!%p6028_p6), 3, %v7411_v44  ;;  %v5106_v27 = vsub.s32 (!%p6028_p6), 4, %v7411_v44 }
 0x2ab   : > { %4849 = vmatpush1.bf16.msra.mxu0 %v7069_v28  ;;  %4931 = vmatpush1.bf16.msra.mxu1 %v7072_v29  ;;  %v5110_v28 = vsub.s32 (!%p6028_p6), 5, %v7411_v44  ;;  %v5114_v29 = vsub.s32 (!%p6028_p6), 6, %v7411_v44 }
 0x2ac   : > { %4850 = vmatprep.subr.bf16.mxu0 %v7077_v10  ;;  %4932 = vmatprep.subr.bf16.mxu1 %v7080_v30  ;;  %v5118_v10 = vsub.s32 (!%p6028_p6), 7, %v7411_v44  ;;  %v5091_v30 = vrot.slane (!%p6028_p6), %v5082_v20, %v5090_v22 }
 0x2af   : > { %4851 = vmatpush1.bf16.msra.mxu0 %v7075_v31  ;;  %4933 = vmatpush1.bf16.msra.mxu1 %v7078_v32  ;;  %v5095_v31 = vrot.slane (!%p6028_p6), %v5082_v20, %v5094_v23  ;;  %v5099_v32 = vrot.slane (!%p6028_p6), %v5082_v20, %v5098_v25 }
 0x2b0   : > { %4852 = vmatprep.subr.bf16.mxu0 %v7083_v33  ;;  %4934 = vmatprep.subr.bf16.mxu1 %v7086_v34  ;;  %v5103_v33 = vrot.slane (!%p6028_p6), %v5082_v20, %v5102_v26  ;;  %v5083_v34 = vld [vmem:[%s7359_s10 + $0x8] sm:$0xff] (!%p6028_p6) }
 0x2b1   : > { %v5135_v44 = vrot.slane (!%p6028_p6), %v5083_v34, %v5102_v26 }
 0x2b3   : > { %4853 = vmatpush1.bf16.msra.mxu0 %v7081_v35  ;;  %4935 = vmatpush1.bf16.msra.mxu1 %v7084_v36  ;;  %v5107_v35 = vrot.slane (!%p6028_p6), %v5082_v20, %v5106_v27  ;;  %v5111_v36 = vrot.slane (!%p6028_p6), %v5082_v20, %v5110_v28 }
 0x2b4   : > { %4854 = vmatprep.subr.bf16.mxu0 %v7089_v37  ;;  %4936 = vmatprep.subr.bf16.mxu1 %v7092_v38  ;;  %v5115_v37 = vrot.slane (!%p6028_p6), %v5082_v20, %v5114_v29  ;;  %v5119_v38 = vrot.slane (!%p6028_p6), %v5082_v20, %v5118_v10 }
 0x2b7   : > { %4855 = vmatpush1.bf16.msra.mxu0 %v7087_v39  ;;  %4937 = vmatpush1.bf16.msra.mxu1 %v7090_v40  ;;  %v5168_v39 = vcombine.low (!%p6028_p6), %v5091_v30, %v5095_v31  ;;  %v5169_v40 = vcombine.low (!%p6028_p6), %v5099_v32, %v5103_v33 }
 0x2b8   : > { %4856 = vmatprep.subr.bf16.mxu0 %v7095_v41  ;;  %4938 = vmatprep.subr.bf16.mxu1 %v7098_v42  ;;  %v5123_v41 = vrot.slane (!%p6028_p6), %v5083_v34, %v5090_v22  ;;  %v5127_v42 = vrot.slane (!%p6028_p6), %v5083_v34, %v5094_v23 }
 0x2bb   : > { %4857 = vmatpush1.bf16.msra.mxu0 %v7093_v43  ;;  %4939 = vmatpush1.bf16.msra.mxu1 %v7096_v45  ;;  %v5185_v43 = vcombine.low (!%p6028_p6), %v5107_v35, %v5111_v36  ;;  %v5186_v45 = vcombine.low (!%p6028_p6), %v5115_v37, %v5119_v38 }
 0x2bc   : > { %4858 = vmatprep.subr.bf16.mxu0 %v7101_v17  ;;  %4940 = vmatprep.subr.bf16.mxu1 %v7104_v46  ;;  %v5131_v17 = vrot.slane (!%p6028_p6), %v5083_v34, %v5098_v25  ;;  %v5176_v46 = vrot.slane (!%p6028_p6), %v5168_v39, %v7419_v50 }
 0x2bf   : > { %4859 = vmatpush1.bf16.msra.mxu0 %v7099_v61  ;;  %4941 = vmatpush1.bf16.msra.mxu1 %v7102_v47  ;;  %v5183_v61 = vrot.slane (!%p6028_p6), %v5169_v40, %v7419_v50  ;;  %v5202_v47 = vcombine.low (!%p6028_p6), %v5123_v41, %v5127_v42 }
 0x2c0   : > { %4860 = vmatprep.subr.bf16.mxu0 %v7107_v48  ;;  %4942 = vmatprep.subr.bf16.mxu1 %v7110_v49  ;;  %v5139_v48 = vrot.slane (!%p6028_p6), %v5083_v34, %v5106_v27  ;;  %v5084_v49 = vld [vmem:[%s7359_s10 + $0x10] sm:$0xf] (!%p6028_p6) }
 0x2c3   : > { %4861 = vmatpush1.bf16.msra.mxu0 %v7105_v21  ;;  %4943 = vmatpush1.bf16.msra.mxu1 %v7108_v51  ;;  %v5077_v21 = vld [vmem:[%s7364_s16] sm:$0xff] (!%p6028_p6)  ;;  %v5193_v51 = vrot.slane (!%p6028_p6), %v5185_v43, %v7419_v50 }
 0x2c6   : > { %4863 = vmatmul.mubr.bf16.vlgmr.msra.gmra.mrb[16].mxu0 %v7528_v24  ;;  %4945 = vmatmul.mubr.bf16.vlgmr.msra.gmra.mrb[16].mxu1 %v7528_v24 }
 0x319   : > { %v4700_v52 = vpop.f32.mrb[12].mxu0  ;;  %v4782_v53 = vpop.f32.mrb[12].mxu1 }
 0x31a   : > { %v4702_v54 = vpop.f32.mrb[13].mxu0  ;;  %v4784_v55 = vpop.f32.mrb[13].mxu1 }
 0x31b   : > { %v5024_v56 = vcombine.low %v4700_v52, %v4702_v54  ;;  %v5025_v57 = vcombine.low %v4782_v53, %v4784_v55  ;;  %v4704_v58 = vpop.f32.mrb[14].mxu0  ;;  %v4786_v59 = vpop.f32.mrb[14].mxu1  ;;  %v5200_v52 = vrot.slane (!%p6028_p6), %v5186_v45, %v7419_v50  ;;  %v5203_v53 = vcombine.low (!%p6028_p6), %v5131_v17, %v5135_v44 }
 0x31c   : > { %v4705_v60 = vpop.f32.mrb[15].mxu0  ;;  %v4787_v62 = vpop.f32.mrb[15].mxu1  ;;  %v5143_v54 = vrot.slane (!%p6028_p6), %v5083_v34, %v5110_v28  ;;  %v5184_v55 = vcombine.low (!%p6028_p6), %v5176_v46, %v5183_v61  ;;  %v5147_v58 = vrot.slane (!%p6028_p6), %v5083_v34, %v5114_v29  ;;  %v5151_v59 = vrot.slane (!%p6028_p6), %v5083_v34, %v5118_v10 }
 0x31d   : > { %v5032_v63 = vrot.slane %v5024_v56, %v7419_v50  ;;  %v5039_v0 = vrot.slane %v5025_v57, %v7419_v50  ;;  %v5078_v56 = vld [vmem:[%s7364_s16 + $0x8] sm:$0xff] (!%p6028_p6)  ;;  %v5210_v57 = vrot.slane (!%p6028_p6), %v5202_v47, %v7419_v50  ;;  %v5201_v60 = vcombine.low (!%p6028_p6), %v5193_v51, %v5200_v52 }
 0x31e   : > { %v5217_v62 = vrot.slane (!%p6028_p6), %v5203_v53, %v7419_v50 }
 0x31f   : > { %v5040_v2 = vcombine.low %v5032_v63, %v5039_v0  ;;  %v5219_v63 = vcombine.low (!%p6028_p6), %v5139_v48, %v5143_v54  ;;  %v5155_v0 = vrot.slane (!%p6028_p6), %v5084_v49, %v5090_v22 }
 0x321   : > { %v5066_v3 = vadd.f32 %v5040_v2, %v264_v1  ;;  %v5258_v1 = vadd.f32 (!%p6028_p6), %v5184_v55, %v5077_v21  ;;  %v5079_v2 = vld [vmem:[%s7364_s16 + $0x10] sm:$0xff] (!%p6028_p6) }
 0x323   : > { %5071 = vst [vmem:[%s7364_s16 + $0x18] sm:$0xff] %v5066_v3  ;;  %v5220_v3 = vcombine.low (!%p6028_p6), %v5147_v58, %v5151_v59 }
 0x399   : > { %v4864_v24 = vpop.f32.mrb[16].mxu0  ;;  %v4946_v4 = vpop.f32.mrb[16].mxu1 }
 0x39a   : > { %v4866_v5 = vpop.f32.mrb[17].mxu0  ;;  %v4948_v6 = vpop.f32.mrb[17].mxu1 }
 0x39b   : > { %v5041_v7 = vcombine.low %v4864_v24, %v4866_v5  ;;  %v5042_v8 = vcombine.low %v4946_v4, %v4948_v6  ;;  %v4868_v9 = vpop.f32.mrb[18].mxu0  ;;  %v4950_v11 = vpop.f32.mrb[18].mxu1  ;;  %v5159_v24 = vrot.slane (!%p6028_p6), %v5084_v49, %v5094_v23  ;;  %v5163_v4 = vrot.slane (!%p6028_p6), %v5084_v49, %v5098_v25 }
 0x39c   : > { %v4869_v12 = vpop.f32.mrb[19].mxu0  ;;  %v4951_v13 = vpop.f32.mrb[19].mxu1  ;;  %v5259_v5 = vadd.f32 (!%p6028_p6), %v5201_v60, %v5078_v56  ;;  %v5218_v6 = vcombine.low (!%p6028_p6), %v5210_v57, %v5217_v62  ;;  %v5263_v9 = vmax.f32 (!%p6028_p6), %v5258_v1, 0.0  ;;  %v5234_v11 = vrot.slane (!%p6028_p6), %v5220_v3, %v7419_v50 }
 0x39d   : > { %v5049_v14 = vrot.slane %v5041_v7, %v7419_v50  ;;  %v5056_v15 = vrot.slane %v5042_v8, %v7419_v50  ;;  %5076 = sbr.rel (%p6028_p6) target bundleno = 944 (0x3b0), region = 44  ;;  %v5227_v7 = vrot.slane (!%p6028_p6), %v5219_v63, %v7419_v50  ;;  %v5167_v8 = vrot.slane (!%p6028_p6), %v5084_v49, %v5102_v26 }
 0x39e   : > { %v5236_v12 = vcombine.low (!%p6028_p6), %v5155_v0, %v5159_v24  ;;  %v5264_v13 = vmax.f32 (!%p6028_p6), %v5259_v5, 0.0  ;;  %5268 = vst [vmem:[%s7364_s16] sm:$0xff] (!%p6028_p6), %v5263_v9 }
 0x39f   : > { %v5057_v18 = vcombine.low %v5049_v14, %v5056_v15  ;;  %v5260_v14 = vadd.f32 (!%p6028_p6), %v5218_v6, %v5079_v2  ;;  %v5080_v15 = vld [vmem:[%s7364_s16 + $0x18] sm:$0xff] (!%p6028_p6) }
 0x3a0   : > { %5269 = vst [vmem:[%s7364_s16 + $0x8] sm:$0xff] (!%p6028_p6), %v5264_v13 }
 0x3a1   : > { %v5067_v19 = vadd.f32 %v5057_v18, %v265_v16  ;;  %v5237_v16 = vcombine.low (!%p6028_p6), %v5163_v4, %v5167_v8  ;;  %v5235_v18 = vcombine.low (!%p6028_p6), %v5227_v7, %v5234_v11  ;;  %v5265_v20 = vmax.f32 (!%p6028_p6), %v5260_v14, 0.0 }
 0x3a3   : > { %5072 = vst [vmem:[%s7364_s16 + $0x20] sm:$0xff] %v5067_v19  ;;  %v5244_v19 = vrot.slane (!%p6028_p6), %v5236_v12, %v7419_v50  ;;  %v5251_v22 = vrot.slane (!%p6028_p6), %v5237_v16, %v7419_v50  ;;  %v5261_v23 = vadd.f32 (!%p6028_p6), %v5235_v18, %v5080_v15  ;;  %5270 = vst [vmem:[%s7364_s16 + $0x10] sm:$0xff] (!%p6028_p6), %v5265_v20 }
 0x3a5   : > { %v5252_v26 = vcombine.low %v5244_v19, %v5251_v22  ;;  %v5266_v27 = vmax.f32 %v5261_v23, 0.0 }
 0x3a7   : > { %5271 = vst [vmem:[%s7364_s16 + $0x18] sm:$0xff] %v5266_v27 }
 0x3aa   : > { %v5081_v25 = vld [vmem:[%s7364_s16 + $0x20] sm:$0xff] }
 0x3ab   : > { %v5262_v28 = vadd.f32 %v5252_v26, %v5081_v25 }
 0x3ad   : > { %v5267_v29 = vmax.f32 %v5262_v28, 0.0 }
 0x3af   : > { %5272 = vst [vmem:[%s7364_s16 + $0x20] sm:$0xff] %v5267_v29 }
 0x3b0 PF: > { %s16_s19 = sadd.s32 1, %s7207_s19   ;;  %s8156_s12 = smov %s7183_s13 }
 0x3b1   : > { %p13_p8 = scmp.ge.s32.totalorder %s16_s19, 22   ;;  %s8157_s13 = smov %s7187_s14 }
 0x3b2   : > { %s8158_s14 = smov %s7301_s4  ;;  %s8159_s15 = smov %s7199_s17 }
 0x3b3   : > { %s8160_s16 = smov %s7203_s18  ;;  %s8161_s17 = smov %s8164_s21 }
 0x3b4   : > { %s8162_s18 = smov %s8168_s22  ;;  %15 = sbr.rel (!%p13_p8) target bundleno = 5 (0x5), region = 86 }
 0x3bb   :  { %5295 = vsyncpa [#allocation3], 1 }
 0x3bc   :  { %5297 = vsyncpa [#allocation3 + $0x1], 1 }

// kernel: piczak_forward.11
= control target key start
LH: loop header
LB: loop body
LE: loop exit
PB: predicated region body
PF: predicated region fallthrough
CT: control target
= control target key end

     0   :  { %s6725_s12 = smov 0   ;;  %s6727_s13 = smov 0   ;;  %s8396_s0 = inlined_call_operand.vmem [shape: f32[2,384], index: 0, kind: input, shape index: {}]   ;;  %s8397_s1 = inlined_call_operand.vmem [shape: bf16[384,5120], index: 1, kind: input, shape index: {}]   ;;  %s8398_s2 = inlined_call_operand.vmem [shape: f32[1,5120], index: 2, kind: input, shape index: {}]   ;;  %s8399_s3 = inlined_call_operand.vmem [shape: f32[2,5120], index: 3, kind: output, shape index: {}]  }
   0x1   :  { %s6729_s14 = smov 0   ;;  %s6731_s15 = smov 0  }
   0x2   :  { %s6733_s16 = smov 0  }
   0x3 LB: > { %s25_s17 = sadd.s32 1, %s6697_s15  ;;  %p67_p1 = scmp.ne.s32.totalorder %s6689_s13, %s6685_s12  ;;  %s6701_s16 = sphi %s6733_s16, %s13_s16   ;;  %s6697_s15 = sphi %s6731_s15, %s8403_s15   ;;  %s6693_s14 = sphi %s6729_s14, %s8402_s14   ;;  %s6689_s13 = sphi %s6727_s13, %s8401_s13   ;;  %s6685_s12 = sphi %s6725_s12, %s8400_s12  }
   0x4   : > { %p27_p0 = scmp.ge.s32.totalorder %s25_s17, 2  ;;  %p68_p2 = scmp.eq.s32.totalorder %s6701_s16, 0 }
   0x5   : > { %s60_s19 = sadd.s32 1, %s6689_s13  ;;  %p5370_p5 = scmp.ge.s32.totalorder %s6701_s16, 2 }
   0x6   : > { %s8405_s17 = smov (%p27_p0, %s25_s17), 0  ;;  %p69_p3 = por %p68_p2, %p67_p1 }
   0x7   : > { %s56_s18 = ssub.s32 %s6697_s15, %s8405_s17  ;;  %154 = sbr.rel (%p5370_p5) target bundleno = 259 (0x103), region = 20 }
   0x8   : > { %p58_p4 = scmp.eq.s32.totalorder %s56_s18, 0 }
   0xa   : > { %s6760_s20 = scalar_select %p58_p4, %s6689_s13, %s60_s19  }
   0xe   : > { %157 = sbr.rel (!%p69_p3) target bundleno = 259 (0x103), region = 24  ;;  %s159_s21 = sand.u32 (%p69_p3), 1, %s6689_s13  }
   0xf   : > { %s5856_s22 = smul.u32 (%p69_p3), 80, %s6697_s15 }
  0x10   : > { %s5897_s23 = smul.u32 (%p69_p3), 3840, %s159_s21 }
  0x11   : > { %s6768_s26 = scalar_lea.vmem (%p69_p3), %s8397_s1, %s5856_s22 }
  0x12   : > { %v180_v0 = vld [vmem:[%s6768_s26] sm:$0xff] (%p69_p3)  ;;  %v182_v1 = vld [vmem:[%s6768_s26 + $0x8] sm:$0xff] (%p69_p3)  ;;  %v184_v2 = vld [vmem:[%s6768_s26 + $0x10] sm:$0xff] (%p69_p3)  ;;  %s6773_s27 = scalar_lea.vmem (%p69_p3), [#allocation2], %s5897_s23 }
  0x13   : > { %181 = vst [vmem:[%s6773_s27] sm:$0xff] (%p69_p3), %v180_v0  ;;  %183 = vst [vmem:[%s6773_s27 + $0x8] sm:$0xff] (%p69_p3), %v182_v1  ;;  %v186_v3 = vld [vmem:[%s6768_s26 + $0x18] sm:$0xff] (%p69_p3)  ;;  %v188_v4 = vld [vmem:[%s6768_s26 + $0x20] sm:$0xff] (%p69_p3) }
  0x14   : > { %185 = vst [vmem:[%s6773_s27 + $0x10] sm:$0xff] (%p69_p3), %v184_v2  ;;  %v190_v5 = vld [vmem:[%s6768_s26 + $0x28] sm:$0xff] (%p69_p3)  ;;  %187 = vst [vmem:[%s6773_s27 + $0x18] sm:$0xff] (%p69_p3), %v186_v3  ;;  %v192_v6 = vld [vmem:[%s6768_s26 + $0x30] sm:$0xff] (%p69_p3) }
  0x15   : > { %189 = vst [vmem:[%s6773_s27 + $0x20] sm:$0xff] %v188_v4  ;;  %191 = vst [vmem:[%s6773_s27 + $0x28] sm:$0xff] %v190_v5  ;;  %v194_v7 = vld [vmem:[%s6768_s26 + $0x38] sm:$0xff]  ;;  %v196_v8 = vld [vmem:[%s6768_s26 + $0x40] sm:$0xff] }
  0x16   : > { %193 = vst [vmem:[%s6773_s27 + $0x30] sm:$0xff] %v192_v6  ;;  %195 = vst [vmem:[%s6773_s27 + $0x38] sm:$0xff] %v194_v7  ;;  %v198_v9 = vld [vmem:[%s6768_s26 + $0x48] sm:$0xff]  ;;  %v200_v10 = vld [vmem:[%s6768_s26 + $0xa0] sm:$0xff] }
  0x17   : > { %197 = vst [vmem:[%s6773_s27 + $0x40] sm:$0xff] %v196_v8  ;;  %v202_v11 = vld [vmem:[%s6768_s26 + $0xa8] sm:$0xff]  ;;  %199 = vst [vmem:[%s6773_s27 + $0x48] sm:$0xff] %v198_v9  ;;  %v204_v12 = vld [vmem:[%s6768_s26 + $0xb0] sm:$0xff] }
  0x18   : > { %201 = vst [vmem:[%s6773_s27 + $0x50] sm:$0xff] %v200_v10  ;;  %203 = vst [vmem:[%s6773_s27 + $0x58] sm:$0xff] %v202_v11  ;;  %v206_v13 = vld [vmem:[%s6768_s26 + $0xb8] sm:$0xff]  ;;  %v208_v14 = vld [vmem:[%s6768_s26 + $0xc0] sm:$0xff] }
  0x19   : > { %205 = vst [vmem:[%s6773_s27 + $0x60] sm:$0xff] %v204_v12  ;;  %207 = vst [vmem:[%s6773_s27 + $0x68] sm:$0xff] %v206_v13  ;;  %v210_v15 = vld [vmem:[%s6768_s26 + $0xc8] sm:$0xff]  ;;  %v212_v16 = vld [vmem:[%s6768_s26 + $0xd0] sm:$0xff] }
  0x1a   : > { %209 = vst [vmem:[%s6773_s27 + $0x70] sm:$0xff] %v208_v14  ;;  %v214_v17 = vld [vmem:[%s6768_s26 + $0xd8] sm:$0xff]  ;;  %211 = vst [vmem:[%s6773_s27 + $0x78] sm:$0xff] %v210_v15  ;;  %v216_v18 = vld [vmem:[%s6768_s26 + $0xe0] sm:$0xff] }
  0x1b   : > { %213 = vst [vmem:[%s6773_s27 + $0x80] sm:$0xff] %v212_v16  ;;  %215 = vst [vmem:[%s6773_s27 + $0x88] sm:$0xff] %v214_v17  ;;  %v218_v19 = vld [vmem:[%s6768_s26 + $0xe8] sm:$0xff]  ;;  %v220_v20 = vld [vmem:[%s6768_s26 + $0x140] sm:$0xff] }
  0x1c   : > { %217 = vst [vmem:[%s6773_s27 + $0x90] sm:$0xff] %v216_v18  ;;  %219 = vst [vmem:[%s6773_s27 + $0x98] sm:$0xff] %v218_v19  ;;  %v222_v21 = vld [vmem:[%s6768_s26 + $0x148] sm:$0xff]  ;;  %v224_v22 = vld [vmem:[%s6768_s26 + $0x150] sm:$0xff] }
  0x1d   : > { %221 = vst [vmem:[%s6773_s27 + $0xa0] sm:$0xff] %v220_v20  ;;  %v226_v23 = vld [vmem:[%s6768_s26 + $0x158] sm:$0xff]  ;;  %223 = vst [vmem:[%s6773_s27 + $0xa8] sm:$0xff] %v222_v21  ;;  %v228_v24 = vld [vmem:[%s6768_s26 + $0x160] sm:$0xff] }
  0x1e   : > { %225 = vst [vmem:[%s6773_s27 + $0xb0] sm:$0xff] %v224_v22  ;;  %227 = vst [vmem:[%s6773_s27 + $0xb8] sm:$0xff] %v226_v23  ;;  %v230_v25 = vld [vmem:[%s6768_s26 + $0x168] sm:$0xff]  ;;  %v232_v26 = vld [vmem:[%s6768_s26 + $0x170] sm:$0xff] }
  0x1f   : > { %229 = vst [vmem:[%s6773_s27 + $0xc0] sm:$0xff] %v228_v24  ;;  %231 = vst [vmem:[%s6773_s27 + $0xc8] sm:$0xff] %v230_v25  ;;  %v234_v27 = vld [vmem:[%s6768_s26 + $0x178] sm:$0xff]  ;;  %v236_v28 = vld [vmem:[%s6768_s26 + $0x180] sm:$0xff] }
  0x20   : > { %233 = vst [vmem:[%s6773_s27 + $0xd0] sm:$0xff] %v232_v26  ;;  %v238_v29 = vld [vmem:[%s6768_s26 + $0x188] sm:$0xff]  ;;  %235 = vst [vmem:[%s6773_s27 + $0xd8] sm:$0xff] %v234_v27  ;;  %v240_v30 = vld [vmem:[%s6768_s26 + $0x1e0] sm:$0xff] }
  0x21   : > { %237 = vst [vmem:[%s6773_s27 + $0xe0] sm:$0xff] %v236_v28  ;;  %239 = vst [vmem:[%s6773_s27 + $0xe8] sm:$0xff] %v238_v29  ;;  %v242_v31 = vld [vmem:[%s6768_s26 + $0x1e8] sm:$0xff]  ;;  %v244_v32 = vld [vmem:[%s6768_s26 + $0x1f0] sm:$0xff] }
  0x22   : > { %241 = vst [vmem:[%s6773_s27 + $0xf0] sm:$0xff] %v240_v30  ;;  %243 = vst [vmem:[%s6773_s27 + $0xf8] sm:$0xff] %v242_v31  ;;  %v246_v33 = vld [vmem:[%s6768_s26 + $0x1f8] sm:$0xff]  ;;  %v248_v34 = vld [vmem:[%s6768_s26 + $0x200] sm:$0xff] }
  0x23   : > { %245 = vst [vmem:[%s6773_s27 + $0x100] sm:$0xff] %v244_v32  ;;  %v250_v35 = vld [vmem:[%s6768_s26 + $0x208] sm:$0xff]  ;;  %247 = vst [vmem:[%s6773_s27 + $0x108] sm:$0xff] %v246_v33  ;;  %v252_v36 = vld [vmem:[%s6768_s26 + $0x210] sm:$0xff] }
  0x24   : > { %249 = vst [vmem:[%s6773_s27 + $0x110] sm:$0xff] %v248_v34  ;;  %251 = vst [vmem:[%s6773_s27 + $0x118] sm:$0xff] %v250_v35  ;;  %v254_v37 = vld [vmem:[%s6768_s26 + $0x218] sm:$0xff]  ;;  %v256_v38 = vld [vmem:[%s6768_s26 + $0x220] sm:$0xff] }
  0x25   : > { %253 = vst [vmem:[%s6773_s27 + $0x120] sm:$0xff] %v252_v36  ;;  %255 = vst [vmem:[%s6773_s27 + $0x128] sm:$0xff] %v254_v37  ;;  %v258_v39 = vld [vmem:[%s6768_s26 + $0x228] sm:$0xff]  ;;  %v260_v40 = vld [vmem:[%s6768_s26 + $0x280] sm:$0xff] }
  0x26   : > { %257 = vst [vmem:[%s6773_s27 + $0x130] sm:$0xff] %v256_v38  ;;  %v262_v41 = vld [vmem:[%s6768_s26 + $0x288] sm:$0xff]  ;;  %259 = vst [vmem:[%s6773_s27 + $0x138] sm:$0xff] %v258_v39  ;;  %v264_v42 = vld [vmem:[%s6768_s26 + $0x290] sm:$0xff] }
  0x27   : > { %261 = vst [vmem:[%s6773_s27 + $0x140] sm:$0xff] %v260_v40  ;;  %263 = vst [vmem:[%s6773_s27 + $0x148] sm:$0xff] %v262_v41  ;;  %v266_v43 = vld [vmem:[%s6768_s26 + $0x298] sm:$0xff]  ;;  %v268_v44 = vld [vmem:[%s6768_s26 + $0x2a0] sm:$0xff] }
  0x28   : > { %265 = vst [vmem:[%s6773_s27 + $0x150] sm:$0xff] %v264_v42  ;;  %267 = vst [vmem:[%s6773_s27 + $0x158] sm:$0xff] %v266_v43  ;;  %v270_v45 = vld [vmem:[%s6768_s26 + $0x2a8] sm:$0xff]  ;;  %v272_v46 = vld [vmem:[%s6768_s26 + $0x2b0] sm:$0xff] }
  0x29   : > { %269 = vst [vmem:[%s6773_s27 + $0x160] sm:$0xff] %v268_v44  ;;  %v274_v47 = vld [vmem:[%s6768_s26 + $0x2b8] sm:$0xff]  ;;  %271 = vst [vmem:[%s6773_s27 + $0x168] sm:$0xff] %v270_v45  ;;  %v276_v48 = vld [vmem:[%s6768_s26 + $0x2c0] sm:$0xff] }
  0x2a   : > { %273 = vst [vmem:[%s6773_s27 + $0x170] sm:$0xff] %v272_v46  ;;  %275 = vst [vmem:[%s6773_s27 + $0x178] sm:$0xff] %v274_v47  ;;  %v278_v49 = vld [vmem:[%s6768_s26 + $0x2c8] sm:$0xff]  ;;  %v280_v50 = vld [vmem:[%s6768_s26 + $0x320] sm:$0xff] }
  0x2b   : > { %277 = vst [vmem:[%s6773_s27 + $0x180] sm:$0xff] %v276_v48  ;;  %279 = vst [vmem:[%s6773_s27 + $0x188] sm:$0xff] %v278_v49  ;;  %v282_v51 = vld [vmem:[%s6768_s26 + $0x328] sm:$0xff]  ;;  %v284_v52 = vld [vmem:[%s6768_s26 + $0x330] sm:$0xff] }
  0x2c   : > { %281 = vst [vmem:[%s6773_s27 + $0x190] sm:$0xff] %v280_v50  ;;  %v286_v53 = vld [vmem:[%s6768_s26 + $0x338] sm:$0xff]  ;;  %283 = vst [vmem:[%s6773_s27 + $0x198] sm:$0xff] %v282_v51  ;;  %v288_v54 = vld [vmem:[%s6768_s26 + $0x340] sm:$0xff] }
  0x2d   : > { %285 = vst [vmem:[%s6773_s27 + $0x1a0] sm:$0xff] %v284_v52  ;;  %287 = vst [vmem:[%s6773_s27 + $0x1a8] sm:$0xff] %v286_v53  ;;  %v290_v55 = vld [vmem:[%s6768_s26 + $0x348] sm:$0xff]  ;;  %v292_v56 = vld [vmem:[%s6768_s26 + $0x350] sm:$0xff] }
  0x2e   : > { %289 = vst [vmem:[%s6773_s27 + $0x1b0] sm:$0xff] %v288_v54  ;;  %291 = vst [vmem:[%s6773_s27 + $0x1b8] sm:$0xff] %v290_v55  ;;  %v294_v57 = vld [vmem:[%s6768_s26 + $0x358] sm:$0xff]  ;;  %v296_v58 = vld [vmem:[%s6768_s26 + $0x360] sm:$0xff] }
  0x2f   : > { %293 = vst [vmem:[%s6773_s27 + $0x1c0] sm:$0xff] %v292_v56  ;;  %v298_v59 = vld [vmem:[%s6768_s26 + $0x368] sm:$0xff]  ;;  %295 = vst [vmem:[%s6773_s27 + $0x1c8] sm:$0xff] %v294_v57  ;;  %v300_v60 = vld [vmem:[%s6768_s26 + $0x3c0] sm:$0xff] }
  0x30   : > { %297 = vst [vmem:[%s6773_s27 + $0x1d0] sm:$0xff] %v296_v58  ;;  %299 = vst [vmem:[%s6773_s27 + $0x1d8] sm:$0xff] %v298_v59  ;;  %v302_v61 = vld [vmem:[%s6768_s26 + $0x3c8] sm:$0xff]  ;;  %v304_v62 = vld [vmem:[%s6768_s26 + $0x3d0] sm:$0xff] }
  0x31   : > { %301 = vst [vmem:[%s6773_s27 + $0x1e0] sm:$0xff] %v300_v60  ;;  %303 = vst [vmem:[%s6773_s27 + $0x1e8] sm:$0xff] %v302_v61  ;;  %v306_v63 = vld [vmem:[%s6768_s26 + $0x3d8] sm:$0xff]  ;;  %v308_v0 = vld [vmem:[%s6768_s26 + $0x3e0] sm:$0xff] }
  0x32   : > { %305 = vst [vmem:[%s6773_s27 + $0x1f0] sm:$0xff] %v304_v62  ;;  %v310_v1 = vld [vmem:[%s6768_s26 + $0x3e8] sm:$0xff]  ;;  %307 = vst [vmem:[%s6773_s27 + $0x1f8] sm:$0xff] %v306_v63  ;;  %v312_v2 = vld [vmem:[%s6768_s26 + $0x3f0] sm:$0xff] }
  0x33   : > { %309 = vst [vmem:[%s6773_s27 + $0x200] sm:$0xff] %v308_v0  ;;  %311 = vst [vmem:[%s6773_s27 + $0x208] sm:$0xff] %v310_v1  ;;  %v314_v3 = vld [vmem:[%s6768_s26 + $0x3f8] sm:$0xff]  ;;  %v316_v4 = vld [vmem:[%s6768_s26 + $0x400] sm:$0xff] }
  0x34   : > { %313 = vst [vmem:[%s6773_s27 + $0x210] sm:$0xff] %v312_v2  ;;  %315 = vst [vmem:[%s6773_s27 + $0x218] sm:$0xff] %v314_v3  ;;  %v318_v5 = vld [vmem:[%s6768_s26 + $0x408] sm:$0xff]  ;;  %v320_v6 = vld [vmem:[%s6768_s26 + $0x460] sm:$0xff] }
  0x35   : > { %317 = vst [vmem:[%s6773_s27 + $0x220] sm:$0xff] %v316_v4  ;;  %v322_v7 = vld [vmem:[%s6768_s26 + $0x468] sm:$0xff]  ;;  %319 = vst [vmem:[%s6773_s27 + $0x228] sm:$0xff] %v318_v5  ;;  %v324_v8 = vld [vmem:[%s6768_s26 + $0x470] sm:$0xff] }
  0x36   : > { %321 = vst [vmem:[%s6773_s27 + $0x230] sm:$0xff] %v320_v6  ;;  %323 = vst [vmem:[%s6773_s27 + $0x238] sm:$0xff] %v322_v7  ;;  %v326_v9 = vld [vmem:[%s6768_s26 + $0x478] sm:$0xff]  ;;  %v328_v10 = vld [vmem:[%s6768_s26 + $0x480] sm:$0xff] }
  0x37   : > { %325 = vst [vmem:[%s6773_s27 + $0x240] sm:$0xff] %v324_v8  ;;  %327 = vst [vmem:[%s6773_s27 + $0x248] sm:$0xff] %v326_v9  ;;  %v330_v11 = vld [vmem:[%s6768_s26 + $0x488] sm:$0xff]  ;;  %v332_v12 = vld [vmem:[%s6768_s26 + $0x490] sm:$0xff] }
  0x38   : > { %329 = vst [vmem:[%s6773_s27 + $0x250] sm:$0xff] %v328_v10  ;;  %v334_v13 = vld [vmem:[%s6768_s26 + $0x498] sm:$0xff]  ;;  %331 = vst [vmem:[%s6773_s27 + $0x258] sm:$0xff] %v330_v11  ;;  %v336_v14 = vld [vmem:[%s6768_s26 + $0x4a0] sm:$0xff] }
  0x39   : > { %333 = vst [vmem:[%s6773_s27 + $0x260] sm:$0xff] %v332_v12  ;;  %335 = vst [vmem:[%s6773_s27 + $0x268] sm:$0xff] %v334_v13  ;;  %v338_v15 = vld [vmem:[%s6768_s26 + $0x4a8] sm:$0xff]  ;;  %v340_v16 = vld [vmem:[%s6768_s26 + $0x500] sm:$0xff] }
  0x3a   : > { %337 = vst [vmem:[%s6773_s27 + $0x270] sm:$0xff] %v336_v14  ;;  %339 = vst [vmem:[%s6773_s27 + $0x278] sm:$0xff] %v338_v15  ;;  %v342_v17 = vld [vmem:[%s6768_s26 + $0x508] sm:$0xff]  ;;  %v344_v18 = vld [vmem:[%s6768_s26 + $0x510] sm:$0xff] }
  0x3b   : > { %341 = vst [vmem:[%s6773_s27 + $0x280] sm:$0xff] %v340_v16  ;;  %v346_v19 = vld [vmem:[%s6768_s26 + $0x518] sm:$0xff]  ;;  %343 = vst [vmem:[%s6773_s27 + $0x288] sm:$0xff] %v342_v17  ;;  %v348_v20 = vld [vmem:[%s6768_s26 + $0x520] sm:$0xff] }
  0x3c   : > { %345 = vst [vmem:[%s6773_s27 + $0x290] sm:$0xff] %v344_v18  ;;  %347 = vst [vmem:[%s6773_s27 + $0x298] sm:$0xff] %v346_v19  ;;  %v350_v21 = vld [vmem:[%s6768_s26 + $0x528] sm:$0xff]  ;;  %v352_v22 = vld [vmem:[%s6768_s26 + $0x530] sm:$0xff] }
  0x3d   : > { %349 = vst [vmem:[%s6773_s27 + $0x2a0] sm:$0xff] %v348_v20  ;;  %351 = vst [vmem:[%s6773_s27 + $0x2a8] sm:$0xff] %v350_v21  ;;  %v354_v23 = vld [vmem:[%s6768_s26 + $0x538] sm:$0xff]  ;;  %v356_v24 = vld [vmem:[%s6768_s26 + $0x540] sm:$0xff] }
  0x3e   : > { %353 = vst [vmem:[%s6773_s27 + $0x2b0] sm:$0xff] %v352_v22  ;;  %v358_v25 = vld [vmem:[%s6768_s26 + $0x548] sm:$0xff]  ;;  %355 = vst [vmem:[%s6773_s27 + $0x2b8] sm:$0xff] %v354_v23  ;;  %v360_v26 = vld [vmem:[%s6768_s26 + $0x5a0] sm:$0xff] }
  0x3f   : > { %357 = vst [vmem:[%s6773_s27 + $0x2c0] sm:$0xff] %v356_v24  ;;  %359 = vst [vmem:[%s6773_s27 + $0x2c8] sm:$0xff] %v358_v25  ;;  %v362_v27 = vld [vmem:[%s6768_s26 + $0x5a8] sm:$0xff]  ;;  %v364_v28 = vld [vmem:[%s6768_s26 + $0x5b0] sm:$0xff] }
  0x40   : > { %361 = vst [vmem:[%s6773_s27 + $0x2d0] sm:$0xff] %v360_v26  ;;  %363 = vst [vmem:[%s6773_s27 + $0x2d8] sm:$0xff] %v362_v27  ;;  %v366_v29 = vld [vmem:[%s6768_s26 + $0x5b8] sm:$0xff]  ;;  %v368_v30 = vld [vmem:[%s6768_s26 + $0x5c0] sm:$0xff] }
  0x41   : > { %365 = vst [vmem:[%s6773_s27 + $0x2e0] sm:$0xff] %v364_v28  ;;  %v370_v31 = vld [vmem:[%s6768_s26 + $0x5c8] sm:$0xff]  ;;  %367 = vst [vmem:[%s6773_s27 + $0x2e8] sm:$0xff] %v366_v29  ;;  %v372_v32 = vld [vmem:[%s6768_s26 + $0x5d0] sm:$0xff] }
  0x42   : > { %369 = vst [vmem:[%s6773_s27 + $0x2f0] sm:$0xff] %v368_v30  ;;  %371 = vst [vmem:[%s6773_s27 + $0x2f8] sm:$0xff] %v370_v31  ;;  %v374_v33 = vld [vmem:[%s6768_s26 + $0x5d8] sm:$0xff]  ;;  %v376_v34 = vld [vmem:[%s6768_s26 + $0x5e0] sm:$0xff] }
  0x43   : > { %373 = vst [vmem:[%s6773_s27 + $0x300] sm:$0xff] %v372_v32  ;;  %375 = vst [vmem:[%s6773_s27 + $0x308] sm:$0xff] %v374_v33  ;;  %v378_v35 = vld [vmem:[%s6768_s26 + $0x5e8] sm:$0xff]  ;;  %v380_v36 = vld [vmem:[%s6768_s26 + $0x640] sm:$0xff] }
  0x44   : > { %377 = vst [vmem:[%s6773_s27 + $0x310] sm:$0xff] %v376_v34  ;;  %v382_v37 = vld [vmem:[%s6768_s26 + $0x648] sm:$0xff]  ;;  %379 = vst [vmem:[%s6773_s27 + $0x318] sm:$0xff] %v378_v35  ;;  %v384_v38 = vld [vmem:[%s6768_s26 + $0x650] sm:$0xff] }
  0x45   : > { %381 = vst [vmem:[%s6773_s27 + $0x320] sm:$0xff] %v380_v36  ;;  %383 = vst [vmem:[%s6773_s27 + $0x328] sm:$0xff] %v382_v37  ;;  %v386_v39 = vld [vmem:[%s6768_s26 + $0x658] sm:$0xff]  ;;  %v388_v40 = vld [vmem:[%s6768_s26 + $0x660] sm:$0xff] }
  0x46   : > { %385 = vst [vmem:[%s6773_s27 + $0x330] sm:$0xff] %v384_v38  ;;  %387 = vst [vmem:[%s6773_s27 + $0x338] sm:$0xff] %v386_v39  ;;  %v390_v41 = vld [vmem:[%s6768_s26 + $0x668] sm:$0xff]  ;;  %v392_v42 = vld [vmem:[%s6768_s26 + $0x670] sm:$0xff] }
  0x47   : > { %389 = vst [vmem:[%s6773_s27 + $0x340] sm:$0xff] %v388_v40  ;;  %v394_v43 = vld [vmem:[%s6768_s26 + $0x678] sm:$0xff]  ;;  %391 = vst [vmem:[%s6773_s27 + $0x348] sm:$0xff] %v390_v41  ;;  %v396_v44 = vld [vmem:[%s6768_s26 + $0x680] sm:$0xff] }
  0x48   : > { %393 = vst [vmem:[%s6773_s27 + $0x350] sm:$0xff] %v392_v42  ;;  %395 = vst [vmem:[%s6773_s27 + $0x358] sm:$0xff] %v394_v43  ;;  %v398_v45 = vld [vmem:[%s6768_s26 + $0x688] sm:$0xff]  ;;  %v400_v46 = vld [vmem:[%s6768_s26 + $0x6e0] sm:$0xff] }
  0x49   : > { %397 = vst [vmem:[%s6773_s27 + $0x360] sm:$0xff] %v396_v44  ;;  %399 = vst [vmem:[%s6773_s27 + $0x368] sm:$0xff] %v398_v45  ;;  %v402_v47 = vld [vmem:[%s6768_s26 + $0x6e8] sm:$0xff]  ;;  %v404_v48 = vld [vmem:[%s6768_s26 + $0x6f0] sm:$0xff] }
  0x4a   : > { %401 = vst [vmem:[%s6773_s27 + $0x370] sm:$0xff] %v400_v46  ;;  %v406_v49 = vld [vmem:[%s6768_s26 + $0x6f8] sm:$0xff]  ;;  %403 = vst [vmem:[%s6773_s27 + $0x378] sm:$0xff] %v402_v47  ;;  %v408_v50 = vld [vmem:[%s6768_s26 + $0x700] sm:$0xff] }
  0x4b   : > { %405 = vst [vmem:[%s6773_s27 + $0x380] sm:$0xff] %v404_v48  ;;  %407 = vst [vmem:[%s6773_s27 + $0x388] sm:$0xff] %v406_v49  ;;  %v410_v51 = vld [vmem:[%s6768_s26 + $0x708] sm:$0xff]  ;;  %v412_v52 = vld [vmem:[%s6768_s26 + $0x710] sm:$0xff] }
  0x4c   : > { %409 = vst [vmem:[%s6773_s27 + $0x390] sm:$0xff] %v408_v50  ;;  %411 = vst [vmem:[%s6773_s27 + $0x398] sm:$0xff] %v410_v51  ;;  %v414_v53 = vld [vmem:[%s6768_s26 + $0x718] sm:$0xff]  ;;  %v416_v54 = vld [vmem:[%s6768_s26 + $0x720] sm:$0xff] }
  0x4d   : > { %413 = vst [vmem:[%s6773_s27 + $0x3a0] sm:$0xff] %v412_v52  ;;  %v418_v55 = vld [vmem:[%s6768_s26 + $0x728] sm:$0xff]  ;;  %415 = vst [vmem:[%s6773_s27 + $0x3a8] sm:$0xff] %v414_v53  ;;  %v420_v56 = vld [vmem:[%s6768_s26 + $0x780] sm:$0xff] }
  0x4e   : > { %417 = vst [vmem:[%s6773_s27 + $0x3b0] sm:$0xff] %v416_v54  ;;  %419 = vst [vmem:[%s6773_s27 + $0x3b8] sm:$0xff] %v418_v55  ;;  %v422_v57 = vld [vmem:[%s6768_s26 + $0x788] sm:$0xff]  ;;  %v424_v58 = vld [vmem:[%s6768_s26 + $0x790] sm:$0xff] }
  0x4f   : > { %421 = vst [vmem:[%s6773_s27 + $0x3c0] sm:$0xff] %v420_v56  ;;  %423 = vst [vmem:[%s6773_s27 + $0x3c8] sm:$0xff] %v422_v57  ;;  %v426_v59 = vld [vmem:[%s6768_s26 + $0x798] sm:$0xff]  ;;  %v428_v60 = vld [vmem:[%s6768_s26 + $0x7a0] sm:$0xff] }
  0x50   : > { %425 = vst [vmem:[%s6773_s27 + $0x3d0] sm:$0xff] %v424_v58  ;;  %v430_v61 = vld [vmem:[%s6768_s26 + $0x7a8] sm:$0xff]  ;;  %427 = vst [vmem:[%s6773_s27 + $0x3d8] sm:$0xff] %v426_v59  ;;  %v432_v62 = vld [vmem:[%s6768_s26 + $0x7b0] sm:$0xff] }
  0x51   : > { %429 = vst [vmem:[%s6773_s27 + $0x3e0] sm:$0xff] %v428_v60  ;;  %431 = vst [vmem:[%s6773_s27 + $0x3e8] sm:$0xff] %v430_v61  ;;  %v434_v63 = vld [vmem:[%s6768_s26 + $0x7b8] sm:$0xff]  ;;  %v436_v0 = vld [vmem:[%s6768_s26 + $0x7c0] sm:$0xff] }
  0x52   : > { %433 = vst [vmem:[%s6773_s27 + $0x3f0] sm:$0xff] %v432_v62  ;;  %435 = vst [vmem:[%s6773_s27 + $0x3f8] sm:$0xff] %v434_v63  ;;  %v438_v1 = vld [vmem:[%s6768_s26 + $0x7c8] sm:$0xff]  ;;  %v440_v2 = vld [vmem:[%s6768_s26 + $0x820] sm:$0xff] }
  0x53   : > { %437 = vst [vmem:[%s6773_s27 + $0x400] sm:$0xff] %v436_v0  ;;  %v442_v3 = vld [vmem:[%s6768_s26 + $0x828] sm:$0xff]  ;;  %439 = vst [vmem:[%s6773_s27 + $0x408] sm:$0xff] %v438_v1  ;;  %v444_v4 = vld [vmem:[%s6768_s26 + $0x830] sm:$0xff] }
  0x54   : > { %441 = vst [vmem:[%s6773_s27 + $0x410] sm:$0xff] %v440_v2  ;;  %443 = vst [vmem:[%s6773_s27 + $0x418] sm:$0xff] %v442_v3  ;;  %v446_v5 = vld [vmem:[%s6768_s26 + $0x838] sm:$0xff]  ;;  %v448_v6 = vld [vmem:[%s6768_s26 + $0x840] sm:$0xff] }
  0x55   : > { %445 = vst [vmem:[%s6773_s27 + $0x420] sm:$0xff] %v444_v4  ;;  %447 = vst [vmem:[%s6773_s27 + $0x428] sm:$0xff] %v446_v5  ;;  %v450_v7 = vld [vmem:[%s6768_s26 + $0x848] sm:$0xff]  ;;  %v452_v8 = vld [vmem:[%s6768_s26 + $0x850] sm:$0xff] }
  0x56   : > { %449 = vst [vmem:[%s6773_s27 + $0x430] sm:$0xff] %v448_v6  ;;  %v454_v9 = vld [vmem:[%s6768_s26 + $0x858] sm:$0xff]  ;;  %451 = vst [vmem:[%s6773_s27 + $0x438] sm:$0xff] %v450_v7  ;;  %v456_v10 = vld [vmem:[%s6768_s26 + $0x860] sm:$0xff] }
  0x57   : > { %453 = vst [vmem:[%s6773_s27 + $0x440] sm:$0xff] %v452_v8  ;;  %455 = vst [vmem:[%s6773_s27 + $0x448] sm:$0xff] %v454_v9  ;;  %v458_v11 = vld [vmem:[%s6768_s26 + $0x868] sm:$0xff]  ;;  %v460_v12 = vld [vmem:[%s6768_s26 + $0x8c0] sm:$0xff] }
  0x58   : > { %457 = vst [vmem:[%s6773_s27 + $0x450] sm:$0xff] %v456_v10  ;;  %459 = vst [vmem:[%s6773_s27 + $0x458] sm:$0xff] %v458_v11  ;;  %v462_v13 = vld [vmem:[%s6768_s26 + $0x8c8] sm:$0xff]  ;;  %v464_v14 = vld [vmem:[%s6768_s26 + $0x8d0] sm:$0xff] }
  0x59   : > { %461 = vst [vmem:[%s6773_s27 + $0x460] sm:$0xff] %v460_v12  ;;  %v466_v15 = vld [vmem:[%s6768_s26 + $0x8d8] sm:$0xff]  ;;  %463 = vst [vmem:[%s6773_s27 + $0x468] sm:$0xff] %v462_v13  ;;  %v468_v16 = vld [vmem:[%s6768_s26 + $0x8e0] sm:$0xff] }
  0x5a   : > { %465 = vst [vmem:[%s6773_s27 + $0x470] sm:$0xff] %v464_v14  ;;  %467 = vst [vmem:[%s6773_s27 + $0x478] sm:$0xff] %v466_v15  ;;  %v470_v17 = vld [vmem:[%s6768_s26 + $0x8e8] sm:$0xff]  ;;  %v472_v18 = vld [vmem:[%s6768_s26 + $0x8f0] sm:$0xff] }
  0x5b   : > { %469 = vst [vmem:[%s6773_s27 + $0x480] sm:$0xff] %v468_v16  ;;  %471 = vst [vmem:[%s6773_s27 + $0x488] sm:$0xff] %v470_v17  ;;  %v474_v19 = vld [vmem:[%s6768_s26 + $0x8f8] sm:$0xff]  ;;  %v476_v20 = vld [vmem:[%s6768_s26 + $0x900] sm:$0xff] }
  0x5c   : > { %473 = vst [vmem:[%s6773_s27 + $0x490] sm:$0xff] %v472_v18  ;;  %v478_v21 = vld [vmem:[%s6768_s26 + $0x908] sm:$0xff]  ;;  %475 = vst [vmem:[%s6773_s27 + $0x498] sm:$0xff] %v474_v19  ;;  %v480_v22 = vld [vmem:[%s6768_s26 + $0x960] sm:$0xff] }
  0x5d   : > { %477 = vst [vmem:[%s6773_s27 + $0x4a0] sm:$0xff] %v476_v20  ;;  %479 = vst [vmem:[%s6773_s27 + $0x4a8] sm:$0xff] %v478_v21  ;;  %v482_v23 = vld [vmem:[%s6768_s26 + $0x968] sm:$0xff]  ;;  %v484_v24 = vld [vmem:[%s6768_s26 + $0x970] sm:$0xff] }
  0x5e   : > { %481 = vst [vmem:[%s6773_s27 + $0x4b0] sm:$0xff] %v480_v22  ;;  %483 = vst [vmem:[%s6773_s27 + $0x4b8] sm:$0xff] %v482_v23  ;;  %v486_v25 = vld [vmem:[%s6768_s26 + $0x978] sm:$0xff]  ;;  %v488_v26 = vld [vmem:[%s6768_s26 + $0x980] sm:$0xff] }
  0x5f   : > { %485 = vst [vmem:[%s6773_s27 + $0x4c0] sm:$0xff] %v484_v24  ;;  %v490_v27 = vld [vmem:[%s6768_s26 + $0x988] sm:$0xff]  ;;  %487 = vst [vmem:[%s6773_s27 + $0x4c8] sm:$0xff] %v486_v25  ;;  %v492_v28 = vld [vmem:[%s6768_s26 + $0x990] sm:$0xff] }
  0x60   : > { %489 = vst [vmem:[%s6773_s27 + $0x4d0] sm:$0xff] %v488_v26  ;;  %491 = vst [vmem:[%s6773_s27 + $0x4d8] sm:$0xff] %v490_v27  ;;  %v494_v29 = vld [vmem:[%s6768_s26 + $0x998] sm:$0xff]  ;;  %v496_v30 = vld [vmem:[%s6768_s26 + $0x9a0] sm:$0xff] }
  0x61   : > { %493 = vst [vmem:[%s6773_s27 + $0x4e0] sm:$0xff] %v492_v28  ;;  %495 = vst [vmem:[%s6773_s27 + $0x4e8] sm:$0xff] %v494_v29  ;;  %v498_v31 = vld [vmem:[%s6768_s26 + $0x9a8] sm:$0xff]  ;;  %v500_v32 = vld [vmem:[%s6768_s26 + $0xa00] sm:$0xff] }
  0x62   : > { %497 = vst [vmem:[%s6773_s27 + $0x4f0] sm:$0xff] %v496_v30  ;;  %v502_v33 = vld [vmem:[%s6768_s26 + $0xa08] sm:$0xff]  ;;  %499 = vst [vmem:[%s6773_s27 + $0x4f8] sm:$0xff] %v498_v31  ;;  %v504_v34 = vld [vmem:[%s6768_s26 + $0xa10] sm:$0xff] }
  0x63   : > { %501 = vst [vmem:[%s6773_s27 + $0x500] sm:$0xff] %v500_v32  ;;  %503 = vst [vmem:[%s6773_s27 + $0x508] sm:$0xff] %v502_v33  ;;  %v506_v35 = vld [vmem:[%s6768_s26 + $0xa18] sm:$0xff]  ;;  %v508_v36 = vld [vmem:[%s6768_s26 + $0xa20] sm:$0xff] }
  0x64   : > { %505 = vst [vmem:[%s6773_s27 + $0x510] sm:$0xff] %v504_v34  ;;  %507 = vst [vmem:[%s6773_s27 + $0x518] sm:$0xff] %v506_v35  ;;  %v510_v37 = vld [vmem:[%s6768_s26 + $0xa28] sm:$0xff]  ;;  %v512_v38 = vld [vmem:[%s6768_s26 + $0xa30] sm:$0xff] }
  0x65   : > { %509 = vst [vmem:[%s6773_s27 + $0x520] sm:$0xff] %v508_v36  ;;  %v514_v39 = vld [vmem:[%s6768_s26 + $0xa38] sm:$0xff]  ;;  %511 = vst [vmem:[%s6773_s27 + $0x528] sm:$0xff] %v510_v37  ;;  %v516_v40 = vld [vmem:[%s6768_s26 + $0xa40] sm:$0xff] }
  0x66   : > { %513 = vst [vmem:[%s6773_s27 + $0x530] sm:$0xff] %v512_v38  ;;  %515 = vst [vmem:[%s6773_s27 + $0x538] sm:$0xff] %v514_v39  ;;  %v518_v41 = vld [vmem:[%s6768_s26 + $0xa48] sm:$0xff]  ;;  %v520_v42 = vld [vmem:[%s6768_s26 + $0xaa0] sm:$0xff] }
  0x67   : > { %517 = vst [vmem:[%s6773_s27 + $0x540] sm:$0xff] %v516_v40  ;;  %519 = vst [vmem:[%s6773_s27 + $0x548] sm:$0xff] %v518_v41  ;;  %v522_v43 = vld [vmem:[%s6768_s26 + $0xaa8] sm:$0xff]  ;;  %v524_v44 = vld [vmem:[%s6768_s26 + $0xab0] sm:$0xff] }
  0x68   : > { %521 = vst [vmem:[%s6773_s27 + $0x550] sm:$0xff] %v520_v42  ;;  %v526_v45 = vld [vmem:[%s6768_s26 + $0xab8] sm:$0xff]  ;;  %523 = vst [vmem:[%s6773_s27 + $0x558] sm:$0xff] %v522_v43  ;;  %v528_v46 = vld [vmem:[%s6768_s26 + $0xac0] sm:$0xff] }
  0x69   : > { %525 = vst [vmem:[%s6773_s27 + $0x560] sm:$0xff] %v524_v44  ;;  %527 = vst [vmem:[%s6773_s27 + $0x568] sm:$0xff] %v526_v45  ;;  %v530_v47 = vld [vmem:[%s6768_s26 + $0xac8] sm:$0xff]  ;;  %v532_v48 = vld [vmem:[%s6768_s26 + $0xad0] sm:$0xff] }
  0x6a   : > { %529 = vst [vmem:[%s6773_s27 + $0x570] sm:$0xff] %v528_v46  ;;  %531 = vst [vmem:[%s6773_s27 + $0x578] sm:$0xff] %v530_v47  ;;  %v534_v49 = vld [vmem:[%s6768_s26 + $0xad8] sm:$0xff]  ;;  %v536_v50 = vld [vmem:[%s6768_s26 + $0xae0] sm:$0xff] }
  0x6b   : > { %533 = vst [vmem:[%s6773_s27 + $0x580] sm:$0xff] %v532_v48  ;;  %v538_v51 = vld [vmem:[%s6768_s26 + $0xae8] sm:$0xff]  ;;  %535 = vst [vmem:[%s6773_s27 + $0x588] sm:$0xff] %v534_v49  ;;  %v540_v52 = vld [vmem:[%s6768_s26 + $0xb40] sm:$0xff] }
  0x6c   : > { %537 = vst [vmem:[%s6773_s27 + $0x590] sm:$0xff] %v536_v50  ;;  %539 = vst [vmem:[%s6773_s27 + $0x598] sm:$0xff] %v538_v51  ;;  %v542_v53 = vld [vmem:[%s6768_s26 + $0xb48] sm:$0xff]  ;;  %v544_v54 = vld [vmem:[%s6768_s26 + $0xb50] sm:$0xff] }
  0x6d   : > { %541 = vst [vmem:[%s6773_s27 + $0x5a0] sm:$0xff] %v540_v52  ;;  %543 = vst [vmem:[%s6773_s27 + $0x5a8] sm:$0xff] %v542_v53  ;;  %v546_v55 = vld [vmem:[%s6768_s26 + $0xb58] sm:$0xff]  ;;  %v548_v56 = vld [vmem:[%s6768_s26 + $0xb60] sm:$0xff] }
  0x6e   : > { %545 = vst [vmem:[%s6773_s27 + $0x5b0] sm:$0xff] %v544_v54  ;;  %v550_v57 = vld [vmem:[%s6768_s26 + $0xb68] sm:$0xff]  ;;  %547 = vst [vmem:[%s6773_s27 + $0x5b8] sm:$0xff] %v546_v55  ;;  %v552_v58 = vld [vmem:[%s6768_s26 + $0xb70] sm:$0xff] }
  0x6f   : > { %549 = vst [vmem:[%s6773_s27 + $0x5c0] sm:$0xff] %v548_v56  ;;  %551 = vst [vmem:[%s6773_s27 + $0x5c8] sm:$0xff] %v550_v57  ;;  %v554_v59 = vld [vmem:[%s6768_s26 + $0xb78] sm:$0xff]  ;;  %v556_v60 = vld [vmem:[%s6768_s26 + $0xb80] sm:$0xff] }
  0x70   : > { %553 = vst [vmem:[%s6773_s27 + $0x5d0] sm:$0xff] %v552_v58  ;;  %555 = vst [vmem:[%s6773_s27 + $0x5d8] sm:$0xff] %v554_v59  ;;  %v558_v61 = vld [vmem:[%s6768_s26 + $0xb88] sm:$0xff]  ;;  %v560_v62 = vld [vmem:[%s6768_s26 + $0xbe0] sm:$0xff] }
  0x71   : > { %557 = vst [vmem:[%s6773_s27 + $0x5e0] sm:$0xff] %v556_v60  ;;  %v562_v63 = vld [vmem:[%s6768_s26 + $0xbe8] sm:$0xff]  ;;  %559 = vst [vmem:[%s6773_s27 + $0x5e8] sm:$0xff] %v558_v61  ;;  %v564_v0 = vld [vmem:[%s6768_s26 + $0xbf0] sm:$0xff] }
  0x72   : > { %561 = vst [vmem:[%s6773_s27 + $0x5f0] sm:$0xff] %v560_v62  ;;  %563 = vst [vmem:[%s6773_s27 + $0x5f8] sm:$0xff] %v562_v63  ;;  %v566_v1 = vld [vmem:[%s6768_s26 + $0xbf8] sm:$0xff]  ;;  %v568_v2 = vld [vmem:[%s6768_s26 + $0xc00] sm:$0xff] }
  0x73   : > { %565 = vst [vmem:[%s6773_s27 + $0x600] sm:$0xff] %v564_v0  ;;  %567 = vst [vmem:[%s6773_s27 + $0x608] sm:$0xff] %v566_v1  ;;  %v570_v3 = vld [vmem:[%s6768_s26 + $0xc08] sm:$0xff]  ;;  %v572_v4 = vld [vmem:[%s6768_s26 + $0xc10] sm:$0xff] }
  0x74   : > { %569 = vst [vmem:[%s6773_s27 + $0x610] sm:$0xff] %v568_v2  ;;  %v574_v5 = vld [vmem:[%s6768_s26 + $0xc18] sm:$0xff]  ;;  %571 = vst [vmem:[%s6773_s27 + $0x618] sm:$0xff] %v570_v3  ;;  %v576_v6 = vld [vmem:[%s6768_s26 + $0xc20] sm:$0xff] }
  0x75   : > { %573 = vst [vmem:[%s6773_s27 + $0x620] sm:$0xff] %v572_v4  ;;  %575 = vst [vmem:[%s6773_s27 + $0x628] sm:$0xff] %v574_v5  ;;  %v578_v7 = vld [vmem:[%s6768_s26 + $0xc28] sm:$0xff]  ;;  %v580_v8 = vld [vmem:[%s6768_s26 + $0xc80] sm:$0xff] }
  0x76   : > { %577 = vst [vmem:[%s6773_s27 + $0x630] sm:$0xff] %v576_v6  ;;  %579 = vst [vmem:[%s6773_s27 + $0x638] sm:$0xff] %v578_v7  ;;  %v582_v9 = vld [vmem:[%s6768_s26 + $0xc88] sm:$0xff]  ;;  %v584_v10 = vld [vmem:[%s6768_s26 + $0xc90] sm:$0xff] }
  0x77   : > { %581 = vst [vmem:[%s6773_s27 + $0x640] sm:$0xff] %v580_v8  ;;  %v586_v11 = vld [vmem:[%s6768_s26 + $0xc98] sm:$0xff]  ;;  %583 = vst [vmem:[%s6773_s27 + $0x648] sm:$0xff] %v582_v9  ;;  %v588_v12 = vld [vmem:[%s6768_s26 + $0xca0] sm:$0xff] }
  0x78   : > { %585 = vst [vmem:[%s6773_s27 + $0x650] sm:$0xff] %v584_v10  ;;  %587 = vst [vmem:[%s6773_s27 + $0x658] sm:$0xff] %v586_v11  ;;  %v590_v13 = vld [vmem:[%s6768_s26 + $0xca8] sm:$0xff]  ;;  %v592_v14 = vld [vmem:[%s6768_s26 + $0xcb0] sm:$0xff] }
  0x79   : > { %589 = vst [vmem:[%s6773_s27 + $0x660] sm:$0xff] %v588_v12  ;;  %591 = vst [vmem:[%s6773_s27 + $0x668] sm:$0xff] %v590_v13  ;;  %v594_v15 = vld [vmem:[%s6768_s26 + $0xcb8] sm:$0xff]  ;;  %v596_v16 = vld [vmem:[%s6768_s26 + $0xcc0] sm:$0xff] }
  0x7a   : > { %593 = vst [vmem:[%s6773_s27 + $0x670] sm:$0xff] %v592_v14  ;;  %v598_v17 = vld [vmem:[%s6768_s26 + $0xcc8] sm:$0xff]  ;;  %595 = vst [vmem:[%s6773_s27 + $0x678] sm:$0xff] %v594_v15  ;;  %v600_v18 = vld [vmem:[%s6768_s26 + $0xd20] sm:$0xff] }
  0x7b   : > { %597 = vst [vmem:[%s6773_s27 + $0x680] sm:$0xff] %v596_v16  ;;  %599 = vst [vmem:[%s6773_s27 + $0x688] sm:$0xff] %v598_v17  ;;  %v602_v19 = vld [vmem:[%s6768_s26 + $0xd28] sm:$0xff]  ;;  %v604_v20 = vld [vmem:[%s6768_s26 + $0xd30] sm:$0xff] }
  0x7c   : > { %601 = vst [vmem:[%s6773_s27 + $0x690] sm:$0xff] %v600_v18  ;;  %603 = vst [vmem:[%s6773_s27 + $0x698] sm:$0xff] %v602_v19  ;;  %v606_v21 = vld [vmem:[%s6768_s26 + $0xd38] sm:$0xff]  ;;  %v608_v22 = vld [vmem:[%s6768_s26 + $0xd40] sm:$0xff] }
  0x7d   : > { %605 = vst [vmem:[%s6773_s27 + $0x6a0] sm:$0xff] %v604_v20  ;;  %v610_v23 = vld [vmem:[%s6768_s26 + $0xd48] sm:$0xff]  ;;  %607 = vst [vmem:[%s6773_s27 + $0x6a8] sm:$0xff] %v606_v21  ;;  %v612_v24 = vld [vmem:[%s6768_s26 + $0xd50] sm:$0xff] }
  0x7e   : > { %609 = vst [vmem:[%s6773_s27 + $0x6b0] sm:$0xff] %v608_v22  ;;  %611 = vst [vmem:[%s6773_s27 + $0x6b8] sm:$0xff] %v610_v23  ;;  %v614_v25 = vld [vmem:[%s6768_s26 + $0xd58] sm:$0xff]  ;;  %v616_v26 = vld [vmem:[%s6768_s26 + $0xd60] sm:$0xff] }
  0x7f   : > { %613 = vst [vmem:[%s6773_s27 + $0x6c0] sm:$0xff] %v612_v24  ;;  %615 = vst [vmem:[%s6773_s27 + $0x6c8] sm:$0xff] %v614_v25  ;;  %v618_v27 = vld [vmem:[%s6768_s26 + $0xd68] sm:$0xff]  ;;  %v620_v28 = vld [vmem:[%s6768_s26 + $0xdc0] sm:$0xff] }
  0x80   : > { %617 = vst [vmem:[%s6773_s27 + $0x6d0] sm:$0xff] %v616_v26  ;;  %v622_v29 = vld [vmem:[%s6768_s26 + $0xdc8] sm:$0xff]  ;;  %619 = vst [vmem:[%s6773_s27 + $0x6d8] sm:$0xff] %v618_v27  ;;  %v624_v30 = vld [vmem:[%s6768_s26 + $0xdd0] sm:$0xff] }
  0x81   : > { %621 = vst [vmem:[%s6773_s27 + $0x6e0] sm:$0xff] %v620_v28  ;;  %623 = vst [vmem:[%s6773_s27 + $0x6e8] sm:$0xff] %v622_v29  ;;  %v626_v31 = vld [vmem:[%s6768_s26 + $0xdd8] sm:$0xff]  ;;  %v628_v32 = vld [vmem:[%s6768_s26 + $0xde0] sm:$0xff] }
  0x82   : > { %625 = vst [vmem:[%s6773_s27 + $0x6f0] sm:$0xff] %v624_v30  ;;  %627 = vst [vmem:[%s6773_s27 + $0x6f8] sm:$0xff] %v626_v31  ;;  %v630_v33 = vld [vmem:[%s6768_s26 + $0xde8] sm:$0xff]  ;;  %v632_v34 = vld [vmem:[%s6768_s26 + $0xdf0] sm:$0xff] }
  0x83   : > { %629 = vst [vmem:[%s6773_s27 + $0x700] sm:$0xff] %v628_v32  ;;  %v634_v35 = vld [vmem:[%s6768_s26 + $0xdf8] sm:$0xff]  ;;  %631 = vst [vmem:[%s6773_s27 + $0x708] sm:$0xff] %v630_v33  ;;  %v636_v36 = vld [vmem:[%s6768_s26 + $0xe00] sm:$0xff] }
  0x84   : > { %633 = vst [vmem:[%s6773_s27 + $0x710] sm:$0xff] %v632_v34  ;;  %635 = vst [vmem:[%s6773_s27 + $0x718] sm:$0xff] %v634_v35  ;;  %v638_v37 = vld [vmem:[%s6768_s26 + $0xe08] sm:$0xff]  ;;  %v640_v38 = vld [vmem:[%s6768_s26 + $0xe60] sm:$0xff] }
  0x85   : > { %637 = vst [vmem:[%s6773_s27 + $0x720] sm:$0xff] %v636_v36  ;;  %639 = vst [vmem:[%s6773_s27 + $0x728] sm:$0xff] %v638_v37  ;;  %v642_v39 = vld [vmem:[%s6768_s26 + $0xe68] sm:$0xff]  ;;  %v644_v40 = vld [vmem:[%s6768_s26 + $0xe70] sm:$0xff] }
  0x86   : > { %641 = vst [vmem:[%s6773_s27 + $0x730] sm:$0xff] %v640_v38  ;;  %v646_v41 = vld [vmem:[%s6768_s26 + $0xe78] sm:$0xff]  ;;  %643 = vst [vmem:[%s6773_s27 + $0x738] sm:$0xff] %v642_v39  ;;  %v648_v42 = vld [vmem:[%s6768_s26 + $0xe80] sm:$0xff] }
  0x87   : > { %645 = vst [vmem:[%s6773_s27 + $0x740] sm:$0xff] %v644_v40  ;;  %647 = vst [vmem:[%s6773_s27 + $0x748] sm:$0xff] %v646_v41  ;;  %v650_v43 = vld [vmem:[%s6768_s26 + $0xe88] sm:$0xff]  ;;  %v652_v44 = vld [vmem:[%s6768_s26 + $0xe90] sm:$0xff] }
  0x88   : > { %649 = vst [vmem:[%s6773_s27 + $0x750] sm:$0xff] %v648_v42  ;;  %651 = vst [vmem:[%s6773_s27 + $0x758] sm:$0xff] %v650_v43  ;;  %v654_v45 = vld [vmem:[%s6768_s26 + $0xe98] sm:$0xff]  ;;  %v656_v46 = vld [vmem:[%s6768_s26 + $0xea0] sm:$0xff] }
  0x89   : > { %653 = vst [vmem:[%s6773_s27 + $0x760] sm:$0xff] %v652_v44  ;;  %v658_v47 = vld [vmem:[%s6768_s26 + $0xea8] sm:$0xff]  ;;  %655 = vst [vmem:[%s6773_s27 + $0x768] sm:$0xff] %v654_v45  ;;  %v660_v48 = vld [vmem:[%s6768_s26 + $0xf00] sm:$0xff] }
  0x8a   : > { %657 = vst [vmem:[%s6773_s27 + $0x770] sm:$0xff] %v656_v46  ;;  %659 = vst [vmem:[%s6773_s27 + $0x778] sm:$0xff] %v658_v47  ;;  %v662_v49 = vld [vmem:[%s6768_s26 + $0xf08] sm:$0xff]  ;;  %v664_v50 = vld [vmem:[%s6768_s26 + $0xf10] sm:$0xff] }
  0x8b   : > { %661 = vst [vmem:[%s6773_s27 + $0x780] sm:$0xff] %v660_v48  ;;  %663 = vst [vmem:[%s6773_s27 + $0x788] sm:$0xff] %v662_v49  ;;  %v666_v51 = vld [vmem:[%s6768_s26 + $0xf18] sm:$0xff]  ;;  %v668_v52 = vld [vmem:[%s6768_s26 + $0xf20] sm:$0xff] }
  0x8c   : > { %665 = vst [vmem:[%s6773_s27 + $0x790] sm:$0xff] %v664_v50  ;;  %v670_v53 = vld [vmem:[%s6768_s26 + $0xf28] sm:$0xff]  ;;  %667 = vst [vmem:[%s6773_s27 + $0x798] sm:$0xff] %v666_v51  ;;  %v672_v54 = vld [vmem:[%s6768_s26 + $0xf30] sm:$0xff] }
  0x8d   : > { %669 = vst [vmem:[%s6773_s27 + $0x7a0] sm:$0xff] %v668_v52  ;;  %671 = vst [vmem:[%s6773_s27 + $0x7a8] sm:$0xff] %v670_v53  ;;  %v674_v55 = vld [vmem:[%s6768_s26 + $0xf38] sm:$0xff]  ;;  %v676_v56 = vld [vmem:[%s6768_s26 + $0xf40] sm:$0xff] }
  0x8e   : > { %673 = vst [vmem:[%s6773_s27 + $0x7b0] sm:$0xff] %v672_v54  ;;  %675 = vst [vmem:[%s6773_s27 + $0x7b8] sm:$0xff] %v674_v55  ;;  %v678_v57 = vld [vmem:[%s6768_s26 + $0xf48] sm:$0xff]  ;;  %v680_v58 = vld [vmem:[%s6768_s26 + $0xfa0] sm:$0xff] }
  0x8f   : > { %677 = vst [vmem:[%s6773_s27 + $0x7c0] sm:$0xff] %v676_v56  ;;  %v682_v59 = vld [vmem:[%s6768_s26 + $0xfa8] sm:$0xff]  ;;  %679 = vst [vmem:[%s6773_s27 + $0x7c8] sm:$0xff] %v678_v57  ;;  %v684_v60 = vld [vmem:[%s6768_s26 + $0xfb0] sm:$0xff] }
  0x90   : > { %681 = vst [vmem:[%s6773_s27 + $0x7d0] sm:$0xff] %v680_v58  ;;  %683 = vst [vmem:[%s6773_s27 + $0x7d8] sm:$0xff] %v682_v59  ;;  %v686_v61 = vld [vmem:[%s6768_s26 + $0xfb8] sm:$0xff]  ;;  %v688_v62 = vld [vmem:[%s6768_s26 + $0xfc0] sm:$0xff] }
  0x91   : > { %685 = vst [vmem:[%s6773_s27 + $0x7e0] sm:$0xff] %v684_v60  ;;  %687 = vst [vmem:[%s6773_s27 + $0x7e8] sm:$0xff] %v686_v61  ;;  %v690_v63 = vld [vmem:[%s6768_s26 + $0xfc8] sm:$0xff]  ;;  %v692_v0 = vld [vmem:[%s6768_s26 + $0xfd0] sm:$0xff] }
  0x92   : > { %689 = vst [vmem:[%s6773_s27 + $0x7f0] sm:$0xff] %v688_v62  ;;  %v694_v1 = vld [vmem:[%s6768_s26 + $0xfd8] sm:$0xff]  ;;  %691 = vst [vmem:[%s6773_s27 + $0x7f8] sm:$0xff] %v690_v63  ;;  %v696_v2 = vld [vmem:[%s6768_s26 + $0xfe0] sm:$0xff] }
  0x93   : > { %693 = vst [vmem:[%s6773_s27 + $0x800] sm:$0xff] %v692_v0  ;;  %695 = vst [vmem:[%s6773_s27 + $0x808] sm:$0xff] %v694_v1  ;;  %v698_v3 = vld [vmem:[%s6768_s26 + $0xfe8] sm:$0xff]  ;;  %v700_v4 = vld [vmem:[%s6768_s26 + $0x1040] sm:$0xff] }
  0x94   : > { %697 = vst [vmem:[%s6773_s27 + $0x810] sm:$0xff] %v696_v2  ;;  %699 = vst [vmem:[%s6773_s27 + $0x818] sm:$0xff] %v698_v3  ;;  %v702_v5 = vld [vmem:[%s6768_s26 + $0x1048] sm:$0xff]  ;;  %v704_v6 = vld [vmem:[%s6768_s26 + $0x1050] sm:$0xff] }
  0x95   : > { %701 = vst [vmem:[%s6773_s27 + $0x820] sm:$0xff] %v700_v4  ;;  %v706_v7 = vld [vmem:[%s6768_s26 + $0x1058] sm:$0xff]  ;;  %703 = vst [vmem:[%s6773_s27 + $0x828] sm:$0xff] %v702_v5  ;;  %v708_v8 = vld [vmem:[%s6768_s26 + $0x1060] sm:$0xff] }
  0x96   : > { %705 = vst [vmem:[%s6773_s27 + $0x830] sm:$0xff] %v704_v6  ;;  %707 = vst [vmem:[%s6773_s27 + $0x838] sm:$0xff] %v706_v7  ;;  %v710_v9 = vld [vmem:[%s6768_s26 + $0x1068] sm:$0xff]  ;;  %v712_v10 = vld [vmem:[%s6768_s26 + $0x1070] sm:$0xff] }
  0x97   : > { %709 = vst [vmem:[%s6773_s27 + $0x840] sm:$0xff] %v708_v8  ;;  %711 = vst [vmem:[%s6773_s27 + $0x848] sm:$0xff] %v710_v9  ;;  %v714_v11 = vld [vmem:[%s6768_s26 + $0x1078] sm:$0xff]  ;;  %v716_v12 = vld [vmem:[%s6768_s26 + $0x1080] sm:$0xff] }
  0x98   : > { %713 = vst [vmem:[%s6773_s27 + $0x850] sm:$0xff] %v712_v10  ;;  %v718_v13 = vld [vmem:[%s6768_s26 + $0x1088] sm:$0xff]  ;;  %715 = vst [vmem:[%s6773_s27 + $0x858] sm:$0xff] %v714_v11  ;;  %v720_v14 = vld [vmem:[%s6768_s26 + $0x10e0] sm:$0xff] }
  0x99   : > { %717 = vst [vmem:[%s6773_s27 + $0x860] sm:$0xff] %v716_v12  ;;  %719 = vst [vmem:[%s6773_s27 + $0x868] sm:$0xff] %v718_v13  ;;  %v722_v15 = vld [vmem:[%s6768_s26 + $0x10e8] sm:$0xff]  ;;  %v724_v16 = vld [vmem:[%s6768_s26 + $0x10f0] sm:$0xff] }
  0x9a   : > { %721 = vst [vmem:[%s6773_s27 + $0x870] sm:$0xff] %v720_v14  ;;  %723 = vst [vmem:[%s6773_s27 + $0x878] sm:$0xff] %v722_v15  ;;  %v726_v17 = vld [vmem:[%s6768_s26 + $0x10f8] sm:$0xff]  ;;  %v728_v18 = vld [vmem:[%s6768_s26 + $0x1100] sm:$0xff] }
  0x9b   : > { %725 = vst [vmem:[%s6773_s27 + $0x880] sm:$0xff] %v724_v16  ;;  %v730_v19 = vld [vmem:[%s6768_s26 + $0x1108] sm:$0xff]  ;;  %727 = vst [vmem:[%s6773_s27 + $0x888] sm:$0xff] %v726_v17  ;;  %v732_v20 = vld [vmem:[%s6768_s26 + $0x1110] sm:$0xff] }
  0x9c   : > { %729 = vst [vmem:[%s6773_s27 + $0x890] sm:$0xff] %v728_v18  ;;  %731 = vst [vmem:[%s6773_s27 + $0x898] sm:$0xff] %v730_v19  ;;  %v734_v21 = vld [vmem:[%s6768_s26 + $0x1118] sm:$0xff]  ;;  %v736_v22 = vld [vmem:[%s6768_s26 + $0x1120] sm:$0xff] }
  0x9d   : > { %733 = vst [vmem:[%s6773_s27 + $0x8a0] sm:$0xff] %v732_v20  ;;  %735 = vst [vmem:[%s6773_s27 + $0x8a8] sm:$0xff] %v734_v21  ;;  %v738_v23 = vld [vmem:[%s6768_s26 + $0x1128] sm:$0xff]  ;;  %v740_v24 = vld [vmem:[%s6768_s26 + $0x1180] sm:$0xff] }
  0x9e   : > { %737 = vst [vmem:[%s6773_s27 + $0x8b0] sm:$0xff] %v736_v22  ;;  %v742_v25 = vld [vmem:[%s6768_s26 + $0x1188] sm:$0xff]  ;;  %739 = vst [vmem:[%s6773_s27 + $0x8b8] sm:$0xff] %v738_v23  ;;  %v744_v26 = vld [vmem:[%s6768_s26 + $0x1190] sm:$0xff] }
  0x9f   : > { %741 = vst [vmem:[%s6773_s27 + $0x8c0] sm:$0xff] %v740_v24  ;;  %743 = vst [vmem:[%s6773_s27 + $0x8c8] sm:$0xff] %v742_v25  ;;  %v746_v27 = vld [vmem:[%s6768_s26 + $0x1198] sm:$0xff]  ;;  %v748_v28 = vld [vmem:[%s6768_s26 + $0x11a0] sm:$0xff] }
  0xa0   : > { %745 = vst [vmem:[%s6773_s27 + $0x8d0] sm:$0xff] %v744_v26  ;;  %747 = vst [vmem:[%s6773_s27 + $0x8d8] sm:$0xff] %v746_v27  ;;  %v750_v29 = vld [vmem:[%s6768_s26 + $0x11a8] sm:$0xff]  ;;  %v752_v30 = vld [vmem:[%s6768_s26 + $0x11b0] sm:$0xff] }
  0xa1   : > { %749 = vst [vmem:[%s6773_s27 + $0x8e0] sm:$0xff] %v748_v28  ;;  %v754_v31 = vld [vmem:[%s6768_s26 + $0x11b8] sm:$0xff]  ;;  %751 = vst [vmem:[%s6773_s27 + $0x8e8] sm:$0xff] %v750_v29  ;;  %v756_v32 = vld [vmem:[%s6768_s26 + $0x11c0] sm:$0xff] }
  0xa2   : > { %753 = vst [vmem:[%s6773_s27 + $0x8f0] sm:$0xff] %v752_v30  ;;  %755 = vst [vmem:[%s6773_s27 + $0x8f8] sm:$0xff] %v754_v31  ;;  %v758_v33 = vld [vmem:[%s6768_s26 + $0x11c8] sm:$0xff]  ;;  %v760_v34 = vld [vmem:[%s6768_s26 + $0x1220] sm:$0xff] }
  0xa3   : > { %757 = vst [vmem:[%s6773_s27 + $0x900] sm:$0xff] %v756_v32  ;;  %759 = vst [vmem:[%s6773_s27 + $0x908] sm:$0xff] %v758_v33  ;;  %v762_v35 = vld [vmem:[%s6768_s26 + $0x1228] sm:$0xff]  ;;  %v764_v36 = vld [vmem:[%s6768_s26 + $0x1230] sm:$0xff] }
  0xa4   : > { %761 = vst [vmem:[%s6773_s27 + $0x910] sm:$0xff] %v760_v34  ;;  %v766_v37 = vld [vmem:[%s6768_s26 + $0x1238] sm:$0xff]  ;;  %763 = vst [vmem:[%s6773_s27 + $0x918] sm:$0xff] %v762_v35  ;;  %v768_v38 = vld [vmem:[%s6768_s26 + $0x1240] sm:$0xff] }
  0xa5   : > { %765 = vst [vmem:[%s6773_s27 + $0x920] sm:$0xff] %v764_v36  ;;  %767 = vst [vmem:[%s6773_s27 + $0x928] sm:$0xff] %v766_v37  ;;  %v770_v39 = vld [vmem:[%s6768_s26 + $0x1248] sm:$0xff]  ;;  %v772_v40 = vld [vmem:[%s6768_s26 + $0x1250] sm:$0xff] }
  0xa6   : > { %769 = vst [vmem:[%s6773_s27 + $0x930] sm:$0xff] %v768_v38  ;;  %771 = vst [vmem:[%s6773_s27 + $0x938] sm:$0xff] %v770_v39  ;;  %v774_v41 = vld [vmem:[%s6768_s26 + $0x1258] sm:$0xff]  ;;  %v776_v42 = vld [vmem:[%s6768_s26 + $0x1260] sm:$0xff] }
  0xa7   : > { %773 = vst [vmem:[%s6773_s27 + $0x940] sm:$0xff] %v772_v40  ;;  %v778_v43 = vld [vmem:[%s6768_s26 + $0x1268] sm:$0xff]  ;;  %775 = vst [vmem:[%s6773_s27 + $0x948] sm:$0xff] %v774_v41  ;;  %v780_v44 = vld [vmem:[%s6768_s26 + $0x12c0] sm:$0xff] }
  0xa8   : > { %777 = vst [vmem:[%s6773_s27 + $0x950] sm:$0xff] %v776_v42  ;;  %779 = vst [vmem:[%s6773_s27 + $0x958] sm:$0xff] %v778_v43  ;;  %v782_v45 = vld [vmem:[%s6768_s26 + $0x12c8] sm:$0xff]  ;;  %v784_v46 = vld [vmem:[%s6768_s26 + $0x12d0] sm:$0xff] }
  0xa9   : > { %781 = vst [vmem:[%s6773_s27 + $0x960] sm:$0xff] %v780_v44  ;;  %783 = vst [vmem:[%s6773_s27 + $0x968] sm:$0xff] %v782_v45  ;;  %v786_v47 = vld [vmem:[%s6768_s26 + $0x12d8] sm:$0xff]  ;;  %v788_v48 = vld [vmem:[%s6768_s26 + $0x12e0] sm:$0xff] }
  0xaa   : > { %785 = vst [vmem:[%s6773_s27 + $0x970] sm:$0xff] %v784_v46  ;;  %v790_v49 = vld [vmem:[%s6768_s26 + $0x12e8] sm:$0xff]  ;;  %787 = vst [vmem:[%s6773_s27 + $0x978] sm:$0xff] %v786_v47  ;;  %v792_v50 = vld [vmem:[%s6768_s26 + $0x12f0] sm:$0xff] }
  0xab   : > { %789 = vst [vmem:[%s6773_s27 + $0x980] sm:$0xff] %v788_v48  ;;  %791 = vst [vmem:[%s6773_s27 + $0x988] sm:$0xff] %v790_v49  ;;  %v794_v51 = vld [vmem:[%s6768_s26 + $0x12f8] sm:$0xff]  ;;  %v796_v52 = vld [vmem:[%s6768_s26 + $0x1300] sm:$0xff] }
  0xac   : > { %793 = vst [vmem:[%s6773_s27 + $0x990] sm:$0xff] %v792_v50  ;;  %795 = vst [vmem:[%s6773_s27 + $0x998] sm:$0xff] %v794_v51  ;;  %v798_v53 = vld [vmem:[%s6768_s26 + $0x1308] sm:$0xff]  ;;  %v800_v54 = vld [vmem:[%s6768_s26 + $0x1360] sm:$0xff] }
  0xad   : > { %797 = vst [vmem:[%s6773_s27 + $0x9a0] sm:$0xff] %v796_v52  ;;  %v802_v55 = vld [vmem:[%s6768_s26 + $0x1368] sm:$0xff]  ;;  %799 = vst [vmem:[%s6773_s27 + $0x9a8] sm:$0xff] %v798_v53  ;;  %v804_v56 = vld [vmem:[%s6768_s26 + $0x1370] sm:$0xff] }
  0xae   : > { %801 = vst [vmem:[%s6773_s27 + $0x9b0] sm:$0xff] %v800_v54  ;;  %803 = vst [vmem:[%s6773_s27 + $0x9b8] sm:$0xff] %v802_v55  ;;  %v806_v57 = vld [vmem:[%s6768_s26 + $0x1378] sm:$0xff]  ;;  %v808_v58 = vld [vmem:[%s6768_s26 + $0x1380] sm:$0xff] }
  0xaf   : > { %805 = vst [vmem:[%s6773_s27 + $0x9c0] sm:$0xff] %v804_v56  ;;  %807 = vst [vmem:[%s6773_s27 + $0x9c8] sm:$0xff] %v806_v57  ;;  %v810_v59 = vld [vmem:[%s6768_s26 + $0x1388] sm:$0xff]  ;;  %v812_v60 = vld [vmem:[%s6768_s26 + $0x1390] sm:$0xff] }
  0xb0   : > { %809 = vst [vmem:[%s6773_s27 + $0x9d0] sm:$0xff] %v808_v58  ;;  %v814_v61 = vld [vmem:[%s6768_s26 + $0x1398] sm:$0xff]  ;;  %811 = vst [vmem:[%s6773_s27 + $0x9d8] sm:$0xff] %v810_v59  ;;  %v816_v62 = vld [vmem:[%s6768_s26 + $0x13a0] sm:$0xff] }
  0xb1   : > { %813 = vst [vmem:[%s6773_s27 + $0x9e0] sm:$0xff] %v812_v60  ;;  %815 = vst [vmem:[%s6773_s27 + $0x9e8] sm:$0xff] %v814_v61  ;;  %v818_v63 = vld [vmem:[%s6768_s26 + $0x13a8] sm:$0xff]  ;;  %v820_v0 = vld [vmem:[%s6768_s26 + $0x1400] sm:$0xff] }
  0xb2   : > { %817 = vst [vmem:[%s6773_s27 + $0x9f0] sm:$0xff] %v816_v62  ;;  %819 = vst [vmem:[%s6773_s27 + $0x9f8] sm:$0xff] %v818_v63  ;;  %v822_v1 = vld [vmem:[%s6768_s26 + $0x1408] sm:$0xff]  ;;  %v824_v2 = vld [vmem:[%s6768_s26 + $0x1410] sm:$0xff] }
  0xb3   : > { %821 = vst [vmem:[%s6773_s27 + $0xa00] sm:$0xff] %v820_v0  ;;  %v826_v3 = vld [vmem:[%s6768_s26 + $0x1418] sm:$0xff]  ;;  %823 = vst [vmem:[%s6773_s27 + $0xa08] sm:$0xff] %v822_v1  ;;  %v828_v4 = vld [vmem:[%s6768_s26 + $0x1420] sm:$0xff] }
  0xb4   : > { %825 = vst [vmem:[%s6773_s27 + $0xa10] sm:$0xff] %v824_v2  ;;  %827 = vst [vmem:[%s6773_s27 + $0xa18] sm:$0xff] %v826_v3  ;;  %v830_v5 = vld [vmem:[%s6768_s26 + $0x1428] sm:$0xff]  ;;  %v832_v6 = vld [vmem:[%s6768_s26 + $0x1430] sm:$0xff] }
  0xb5   : > { %829 = vst [vmem:[%s6773_s27 + $0xa20] sm:$0xff] %v828_v4  ;;  %831 = vst [vmem:[%s6773_s27 + $0xa28] sm:$0xff] %v830_v5  ;;  %v834_v7 = vld [vmem:[%s6768_s26 + $0x1438] sm:$0xff]  ;;  %v836_v8 = vld [vmem:[%s6768_s26 + $0x1440] sm:$0xff] }
  0xb6   : > { %833 = vst [vmem:[%s6773_s27 + $0xa30] sm:$0xff] %v832_v6  ;;  %v838_v9 = vld [vmem:[%s6768_s26 + $0x1448] sm:$0xff]  ;;  %835 = vst [vmem:[%s6773_s27 + $0xa38] sm:$0xff] %v834_v7  ;;  %v840_v10 = vld [vmem:[%s6768_s26 + $0x14a0] sm:$0xff] }
  0xb7   : > { %837 = vst [vmem:[%s6773_s27 + $0xa40] sm:$0xff] %v836_v8  ;;  %839 = vst [vmem:[%s6773_s27 + $0xa48] sm:$0xff] %v838_v9  ;;  %v842_v11 = vld [vmem:[%s6768_s26 + $0x14a8] sm:$0xff]  ;;  %v844_v12 = vld [vmem:[%s6768_s26 + $0x14b0] sm:$0xff] }
  0xb8   : > { %841 = vst [vmem:[%s6773_s27 + $0xa50] sm:$0xff] %v840_v10  ;;  %843 = vst [vmem:[%s6773_s27 + $0xa58] sm:$0xff] %v842_v11  ;;  %v846_v13 = vld [vmem:[%s6768_s26 + $0x14b8] sm:$0xff]  ;;  %v848_v14 = vld [vmem:[%s6768_s26 + $0x14c0] sm:$0xff] }
  0xb9   : > { %845 = vst [vmem:[%s6773_s27 + $0xa60] sm:$0xff] %v844_v12  ;;  %v850_v15 = vld [vmem:[%s6768_s26 + $0x14c8] sm:$0xff]  ;;  %847 = vst [vmem:[%s6773_s27 + $0xa68] sm:$0xff] %v846_v13  ;;  %v852_v16 = vld [vmem:[%s6768_s26 + $0x14d0] sm:$0xff] }
  0xba   : > { %849 = vst [vmem:[%s6773_s27 + $0xa70] sm:$0xff] %v848_v14  ;;  %851 = vst [vmem:[%s6773_s27 + $0xa78] sm:$0xff] %v850_v15  ;;  %v854_v17 = vld [vmem:[%s6768_s26 + $0x14d8] sm:$0xff]  ;;  %v856_v18 = vld [vmem:[%s6768_s26 + $0x14e0] sm:$0xff] }
  0xbb   : > { %853 = vst [vmem:[%s6773_s27 + $0xa80] sm:$0xff] %v852_v16  ;;  %855 = vst [vmem:[%s6773_s27 + $0xa88] sm:$0xff] %v854_v17  ;;  %v858_v19 = vld [vmem:[%s6768_s26 + $0x14e8] sm:$0xff]  ;;  %v860_v20 = vld [vmem:[%s6768_s26 + $0x1540] sm:$0xff] }
  0xbc   : > { %857 = vst [vmem:[%s6773_s27 + $0xa90] sm:$0xff] %v856_v18  ;;  %v862_v21 = vld [vmem:[%s6768_s26 + $0x1548] sm:$0xff]  ;;  %859 = vst [vmem:[%s6773_s27 + $0xa98] sm:$0xff] %v858_v19  ;;  %v864_v22 = vld [vmem:[%s6768_s26 + $0x1550] sm:$0xff] }
  0xbd   : > { %861 = vst [vmem:[%s6773_s27 + $0xaa0] sm:$0xff] %v860_v20  ;;  %863 = vst [vmem:[%s6773_s27 + $0xaa8] sm:$0xff] %v862_v21  ;;  %v866_v23 = vld [vmem:[%s6768_s26 + $0x1558] sm:$0xff]  ;;  %v868_v24 = vld [vmem:[%s6768_s26 + $0x1560] sm:$0xff] }
  0xbe   : > { %865 = vst [vmem:[%s6773_s27 + $0xab0] sm:$0xff] %v864_v22  ;;  %867 = vst [vmem:[%s6773_s27 + $0xab8] sm:$0xff] %v866_v23  ;;  %v870_v25 = vld [vmem:[%s6768_s26 + $0x1568] sm:$0xff]  ;;  %v872_v26 = vld [vmem:[%s6768_s26 + $0x1570] sm:$0xff] }
  0xbf   : > { %869 = vst [vmem:[%s6773_s27 + $0xac0] sm:$0xff] %v868_v24  ;;  %v874_v27 = vld [vmem:[%s6768_s26 + $0x1578] sm:$0xff]  ;;  %871 = vst [vmem:[%s6773_s27 + $0xac8] sm:$0xff] %v870_v25  ;;  %v876_v28 = vld [vmem:[%s6768_s26 + $0x1580] sm:$0xff] }
  0xc0   : > { %873 = vst [vmem:[%s6773_s27 + $0xad0] sm:$0xff] %v872_v26  ;;  %875 = vst [vmem:[%s6773_s27 + $0xad8] sm:$0xff] %v874_v27  ;;  %v878_v29 = vld [vmem:[%s6768_s26 + $0x1588] sm:$0xff]  ;;  %v880_v30 = vld [vmem:[%s6768_s26 + $0x15e0] sm:$0xff] }
  0xc1   : > { %877 = vst [vmem:[%s6773_s27 + $0xae0] sm:$0xff] %v876_v28  ;;  %879 = vst [vmem:[%s6773_s27 + $0xae8] sm:$0xff] %v878_v29  ;;  %v882_v31 = vld [vmem:[%s6768_s26 + $0x15e8] sm:$0xff]  ;;  %v884_v32 = vld [vmem:[%s6768_s26 + $0x15f0] sm:$0xff] }
  0xc2   : > { %881 = vst [vmem:[%s6773_s27 + $0xaf0] sm:$0xff] %v880_v30  ;;  %v886_v33 = vld [vmem:[%s6768_s26 + $0x15f8] sm:$0xff]  ;;  %883 = vst [vmem:[%s6773_s27 + $0xaf8] sm:$0xff] %v882_v31  ;;  %v888_v34 = vld [vmem:[%s6768_s26 + $0x1600] sm:$0xff] }
  0xc3   : > { %885 = vst [vmem:[%s6773_s27 + $0xb00] sm:$0xff] %v884_v32  ;;  %887 = vst [vmem:[%s6773_s27 + $0xb08] sm:$0xff] %v886_v33  ;;  %v890_v35 = vld [vmem:[%s6768_s26 + $0x1608] sm:$0xff]  ;;  %v892_v36 = vld [vmem:[%s6768_s26 + $0x1610] sm:$0xff] }
  0xc4   : > { %889 = vst [vmem:[%s6773_s27 + $0xb10] sm:$0xff] %v888_v34  ;;  %891 = vst [vmem:[%s6773_s27 + $0xb18] sm:$0xff] %v890_v35  ;;  %v894_v37 = vld [vmem:[%s6768_s26 + $0x1618] sm:$0xff]  ;;  %v896_v38 = vld [vmem:[%s6768_s26 + $0x1620] sm:$0xff] }
  0xc5   : > { %893 = vst [vmem:[%s6773_s27 + $0xb20] sm:$0xff] %v892_v36  ;;  %v898_v39 = vld [vmem:[%s6768_s26 + $0x1628] sm:$0xff]  ;;  %895 = vst [vmem:[%s6773_s27 + $0xb28] sm:$0xff] %v894_v37  ;;  %v900_v40 = vld [vmem:[%s6768_s26 + $0x1680] sm:$0xff] }
  0xc6   : > { %897 = vst [vmem:[%s6773_s27 + $0xb30] sm:$0xff] %v896_v38  ;;  %899 = vst [vmem:[%s6773_s27 + $0xb38] sm:$0xff] %v898_v39  ;;  %v902_v41 = vld [vmem:[%s6768_s26 + $0x1688] sm:$0xff]  ;;  %v904_v42 = vld [vmem:[%s6768_s26 + $0x1690] sm:$0xff] }
  0xc7   : > { %901 = vst [vmem:[%s6773_s27 + $0xb40] sm:$0xff] %v900_v40  ;;  %903 = vst [vmem:[%s6773_s27 + $0xb48] sm:$0xff] %v902_v41  ;;  %v906_v43 = vld [vmem:[%s6768_s26 + $0x1698] sm:$0xff]  ;;  %v908_v44 = vld [vmem:[%s6768_s26 + $0x16a0] sm:$0xff] }
  0xc8   : > { %905 = vst [vmem:[%s6773_s27 + $0xb50] sm:$0xff] %v904_v42  ;;  %v910_v45 = vld [vmem:[%s6768_s26 + $0x16a8] sm:$0xff]  ;;  %907 = vst [vmem:[%s6773_s27 + $0xb58] sm:$0xff] %v906_v43  ;;  %v912_v46 = vld [vmem:[%s6768_s26 + $0x16b0] sm:$0xff] }
  0xc9   : > { %909 = vst [vmem:[%s6773_s27 + $0xb60] sm:$0xff] %v908_v44  ;;  %911 = vst [vmem:[%s6773_s27 + $0xb68] sm:$0xff] %v910_v45  ;;  %v914_v47 = vld [vmem:[%s6768_s26 + $0x16b8] sm:$0xff]  ;;  %v916_v48 = vld [vmem:[%s6768_s26 + $0x16c0] sm:$0xff] }
  0xca   : > { %913 = vst [vmem:[%s6773_s27 + $0xb70] sm:$0xff] %v912_v46  ;;  %915 = vst [vmem:[%s6773_s27 + $0xb78] sm:$0xff] %v914_v47  ;;  %v918_v49 = vld [vmem:[%s6768_s26 + $0x16c8] sm:$0xff]  ;;  %v920_v50 = vld [vmem:[%s6768_s26 + $0x1720] sm:$0xff] }
  0xcb   : > { %917 = vst [vmem:[%s6773_s27 + $0xb80] sm:$0xff] %v916_v48  ;;  %v922_v51 = vld [vmem:[%s6768_s26 + $0x1728] sm:$0xff]  ;;  %919 = vst [vmem:[%s6773_s27 + $0xb88] sm:$0xff] %v918_v49  ;;  %v924_v52 = vld [vmem:[%s6768_s26 + $0x1730] sm:$0xff] }
  0xcc   : > { %921 = vst [vmem:[%s6773_s27 + $0xb90] sm:$0xff] %v920_v50  ;;  %923 = vst [vmem:[%s6773_s27 + $0xb98] sm:$0xff] %v922_v51  ;;  %v926_v53 = vld [vmem:[%s6768_s26 + $0x1738] sm:$0xff]  ;;  %v928_v54 = vld [vmem:[%s6768_s26 + $0x1740] sm:$0xff] }
  0xcd   : > { %925 = vst [vmem:[%s6773_s27 + $0xba0] sm:$0xff] %v924_v52  ;;  %927 = vst [vmem:[%s6773_s27 + $0xba8] sm:$0xff] %v926_v53  ;;  %v930_v55 = vld [vmem:[%s6768_s26 + $0x1748] sm:$0xff]  ;;  %v932_v56 = vld [vmem:[%s6768_s26 + $0x1750] sm:$0xff] }
  0xce   : > { %929 = vst [vmem:[%s6773_s27 + $0xbb0] sm:$0xff] %v928_v54  ;;  %v934_v57 = vld [vmem:[%s6768_s26 + $0x1758] sm:$0xff]  ;;  %931 = vst [vmem:[%s6773_s27 + $0xbb8] sm:$0xff] %v930_v55  ;;  %v936_v58 = vld [vmem:[%s6768_s26 + $0x1760] sm:$0xff] }
  0xcf   : > { %933 = vst [vmem:[%s6773_s27 + $0xbc0] sm:$0xff] %v932_v56  ;;  %935 = vst [vmem:[%s6773_s27 + $0xbc8] sm:$0xff] %v934_v57  ;;  %v938_v59 = vld [vmem:[%s6768_s26 + $0x1768] sm:$0xff]  ;;  %v940_v60 = vld [vmem:[%s6768_s26 + $0x17c0] sm:$0xff] }
  0xd0   : > { %937 = vst [vmem:[%s6773_s27 + $0xbd0] sm:$0xff] %v936_v58  ;;  %939 = vst [vmem:[%s6773_s27 + $0xbd8] sm:$0xff] %v938_v59  ;;  %v942_v61 = vld [vmem:[%s6768_s26 + $0x17c8] sm:$0xff]  ;;  %v944_v62 = vld [vmem:[%s6768_s26 + $0x17d0] sm:$0xff] }
  0xd1   : > { %941 = vst [vmem:[%s6773_s27 + $0xbe0] sm:$0xff] %v940_v60  ;;  %v946_v63 = vld [vmem:[%s6768_s26 + $0x17d8] sm:$0xff]  ;;  %943 = vst [vmem:[%s6773_s27 + $0xbe8] sm:$0xff] %v942_v61  ;;  %v948_v0 = vld [vmem:[%s6768_s26 + $0x17e0] sm:$0xff] }
  0xd2   : > { %945 = vst [vmem:[%s6773_s27 + $0xbf0] sm:$0xff] %v944_v62  ;;  %947 = vst [vmem:[%s6773_s27 + $0xbf8] sm:$0xff] %v946_v63  ;;  %v950_v1 = vld [vmem:[%s6768_s26 + $0x17e8] sm:$0xff]  ;;  %v952_v2 = vld [vmem:[%s6768_s26 + $0x17f0] sm:$0xff] }
  0xd3   : > { %949 = vst [vmem:[%s6773_s27 + $0xc00] sm:$0xff] %v948_v0  ;;  %951 = vst [vmem:[%s6773_s27 + $0xc08] sm:$0xff] %v950_v1  ;;  %v954_v3 = vld [vmem:[%s6768_s26 + $0x17f8] sm:$0xff]  ;;  %v956_v4 = vld [vmem:[%s6768_s26 + $0x1800] sm:$0xff] }
  0xd4   : > { %953 = vst [vmem:[%s6773_s27 + $0xc10] sm:$0xff] %v952_v2  ;;  %v958_v5 = vld [vmem:[%s6768_s26 + $0x1808] sm:$0xff]  ;;  %955 = vst [vmem:[%s6773_s27 + $0xc18] sm:$0xff] %v954_v3  ;;  %v960_v6 = vld [vmem:[%s6768_s26 + $0x1860] sm:$0xff] }
  0xd5   : > { %957 = vst [vmem:[%s6773_s27 + $0xc20] sm:$0xff] %v956_v4  ;;  %959 = vst [vmem:[%s6773_s27 + $0xc28] sm:$0xff] %v958_v5  ;;  %v962_v7 = vld [vmem:[%s6768_s26 + $0x1868] sm:$0xff]  ;;  %v964_v8 = vld [vmem:[%s6768_s26 + $0x1870] sm:$0xff] }
  0xd6   : > { %961 = vst [vmem:[%s6773_s27 + $0xc30] sm:$0xff] %v960_v6  ;;  %963 = vst [vmem:[%s6773_s27 + $0xc38] sm:$0xff] %v962_v7  ;;  %v966_v9 = vld [vmem:[%s6768_s26 + $0x1878] sm:$0xff]  ;;  %v968_v10 = vld [vmem:[%s6768_s26 + $0x1880] sm:$0xff] }
  0xd7   : > { %965 = vst [vmem:[%s6773_s27 + $0xc40] sm:$0xff] %v964_v8  ;;  %v970_v11 = vld [vmem:[%s6768_s26 + $0x1888] sm:$0xff]  ;;  %967 = vst [vmem:[%s6773_s27 + $0xc48] sm:$0xff] %v966_v9  ;;  %v972_v12 = vld [vmem:[%s6768_s26 + $0x1890] sm:$0xff] }
  0xd8   : > { %969 = vst [vmem:[%s6773_s27 + $0xc50] sm:$0xff] %v968_v10  ;;  %971 = vst [vmem:[%s6773_s27 + $0xc58] sm:$0xff] %v970_v11  ;;  %v974_v13 = vld [vmem:[%s6768_s26 + $0x1898] sm:$0xff]  ;;  %v976_v14 = vld [vmem:[%s6768_s26 + $0x18a0] sm:$0xff] }
  0xd9   : > { %973 = vst [vmem:[%s6773_s27 + $0xc60] sm:$0xff] %v972_v12  ;;  %975 = vst [vmem:[%s6773_s27 + $0xc68] sm:$0xff] %v974_v13  ;;  %v978_v15 = vld [vmem:[%s6768_s26 + $0x18a8] sm:$0xff]  ;;  %v980_v16 = vld [vmem:[%s6768_s26 + $0x1900] sm:$0xff] }
  0xda   : > { %977 = vst [vmem:[%s6773_s27 + $0xc70] sm:$0xff] %v976_v14  ;;  %v982_v17 = vld [vmem:[%s6768_s26 + $0x1908] sm:$0xff]  ;;  %979 = vst [vmem:[%s6773_s27 + $0xc78] sm:$0xff] %v978_v15  ;;  %v984_v18 = vld [vmem:[%s6768_s26 + $0x1910] sm:$0xff] }
  0xdb   : > { %981 = vst [vmem:[%s6773_s27 + $0xc80] sm:$0xff] %v980_v16  ;;  %983 = vst [vmem:[%s6773_s27 + $0xc88] sm:$0xff] %v982_v17  ;;  %v986_v19 = vld [vmem:[%s6768_s26 + $0x1918] sm:$0xff]  ;;  %v988_v20 = vld [vmem:[%s6768_s26 + $0x1920] sm:$0xff] }
  0xdc   : > { %985 = vst [vmem:[%s6773_s27 + $0xc90] sm:$0xff] %v984_v18  ;;  %987 = vst [vmem:[%s6773_s27 + $0xc98] sm:$0xff] %v986_v19  ;;  %v990_v21 = vld [vmem:[%s6768_s26 + $0x1928] sm:$0xff]  ;;  %v992_v22 = vld [vmem:[%s6768_s26 + $0x1930] sm:$0xff] }
  0xdd   : > { %989 = vst [vmem:[%s6773_s27 + $0xca0] sm:$0xff] %v988_v20  ;;  %v994_v23 = vld [vmem:[%s6768_s26 + $0x1938] sm:$0xff]  ;;  %991 = vst [vmem:[%s6773_s27 + $0xca8] sm:$0xff] %v990_v21  ;;  %v996_v24 = vld [vmem:[%s6768_s26 + $0x1940] sm:$0xff] }
  0xde   : > { %993 = vst [vmem:[%s6773_s27 + $0xcb0] sm:$0xff] %v992_v22  ;;  %995 = vst [vmem:[%s6773_s27 + $0xcb8] sm:$0xff] %v994_v23  ;;  %v998_v25 = vld [vmem:[%s6768_s26 + $0x1948] sm:$0xff]  ;;  %v1000_v26 = vld [vmem:[%s6768_s26 + $0x19a0] sm:$0xff] }
  0xdf   : > { %997 = vst [vmem:[%s6773_s27 + $0xcc0] sm:$0xff] %v996_v24  ;;  %999 = vst [vmem:[%s6773_s27 + $0xcc8] sm:$0xff] %v998_v25  ;;  %v1002_v27 = vld [vmem:[%s6768_s26 + $0x19a8] sm:$0xff]  ;;  %v1004_v28 = vld [vmem:[%s6768_s26 + $0x19b0] sm:$0xff] }
  0xe0   : > { %1001 = vst [vmem:[%s6773_s27 + $0xcd0] sm:$0xff] %v1000_v26  ;;  %v1006_v29 = vld [vmem:[%s6768_s26 + $0x19b8] sm:$0xff]  ;;  %1003 = vst [vmem:[%s6773_s27 + $0xcd8] sm:$0xff] %v1002_v27  ;;  %v1008_v30 = vld [vmem:[%s6768_s26 + $0x19c0] sm:$0xff] }
  0xe1   : > { %1005 = vst [vmem:[%s6773_s27 + $0xce0] sm:$0xff] %v1004_v28  ;;  %1007 = vst [vmem:[%s6773_s27 + $0xce8] sm:$0xff] %v1006_v29  ;;  %v1010_v31 = vld [vmem:[%s6768_s26 + $0x19c8] sm:$0xff]  ;;  %v1012_v32 = vld [vmem:[%s6768_s26 + $0x19d0] sm:$0xff] }
  0xe2   : > { %1009 = vst [vmem:[%s6773_s27 + $0xcf0] sm:$0xff] %v1008_v30  ;;  %1011 = vst [vmem:[%s6773_s27 + $0xcf8] sm:$0xff] %v1010_v31  ;;  %v1014_v33 = vld [vmem:[%s6768_s26 + $0x19d8] sm:$0xff]  ;;  %v1016_v34 = vld [vmem:[%s6768_s26 + $0x19e0] sm:$0xff] }
  0xe3   : > { %1013 = vst [vmem:[%s6773_s27 + $0xd00] sm:$0xff] %v1012_v32  ;;  %v1018_v35 = vld [vmem:[%s6768_s26 + $0x19e8] sm:$0xff]  ;;  %1015 = vst [vmem:[%s6773_s27 + $0xd08] sm:$0xff] %v1014_v33  ;;  %v1020_v36 = vld [vmem:[%s6768_s26 + $0x1a40] sm:$0xff] }
  0xe4   : > { %1017 = vst [vmem:[%s6773_s27 + $0xd10] sm:$0xff] %v1016_v34  ;;  %1019 = vst [vmem:[%s6773_s27 + $0xd18] sm:$0xff] %v1018_v35  ;;  %v1022_v37 = vld [vmem:[%s6768_s26 + $0x1a48] sm:$0xff]  ;;  %v1024_v38 = vld [vmem:[%s6768_s26 + $0x1a50] sm:$0xff] }
  0xe5   : > { %1021 = vst [vmem:[%s6773_s27 + $0xd20] sm:$0xff] %v1020_v36  ;;  %1023 = vst [vmem:[%s6773_s27 + $0xd28] sm:$0xff] %v1022_v37  ;;  %v1026_v39 = vld [vmem:[%s6768_s26 + $0x1a58] sm:$0xff]  ;;  %v1028_v40 = vld [vmem:[%s6768_s26 + $0x1a60] sm:$0xff] }
  0xe6   : > { %1025 = vst [vmem:[%s6773_s27 + $0xd30] sm:$0xff] %v1024_v38  ;;  %v1030_v41 = vld [vmem:[%s6768_s26 + $0x1a68] sm:$0xff]  ;;  %1027 = vst [vmem:[%s6773_s27 + $0xd38] sm:$0xff] %v1026_v39  ;;  %v1032_v42 = vld [vmem:[%s6768_s26 + $0x1a70] sm:$0xff] }
  0xe7   : > { %1029 = vst [vmem:[%s6773_s27 + $0xd40] sm:$0xff] %v1028_v40  ;;  %1031 = vst [vmem:[%s6773_s27 + $0xd48] sm:$0xff] %v1030_v41  ;;  %v1034_v43 = vld [vmem:[%s6768_s26 + $0x1a78] sm:$0xff]  ;;  %v1036_v44 = vld [vmem:[%s6768_s26 + $0x1a80] sm:$0xff] }
  0xe8   : > { %1033 = vst [vmem:[%s6773_s27 + $0xd50] sm:$0xff] %v1032_v42  ;;  %1035 = vst [vmem:[%s6773_s27 + $0xd58] sm:$0xff] %v1034_v43  ;;  %v1038_v45 = vld [vmem:[%s6768_s26 + $0x1a88] sm:$0xff]  ;;  %v1040_v46 = vld [vmem:[%s6768_s26 + $0x1ae0] sm:$0xff] }
  0xe9   : > { %1037 = vst [vmem:[%s6773_s27 + $0xd60] sm:$0xff] %v1036_v44  ;;  %v1042_v47 = vld [vmem:[%s6768_s26 + $0x1ae8] sm:$0xff]  ;;  %1039 = vst [vmem:[%s6773_s27 + $0xd68] sm:$0xff] %v1038_v45  ;;  %v1044_v48 = vld [vmem:[%s6768_s26 + $0x1af0] sm:$0xff] }
  0xea   : > { %1041 = vst [vmem:[%s6773_s27 + $0xd70] sm:$0xff] %v1040_v46  ;;  %1043 = vst [vmem:[%s6773_s27 + $0xd78] sm:$0xff] %v1042_v47  ;;  %v1046_v49 = vld [vmem:[%s6768_s26 + $0x1af8] sm:$0xff]  ;;  %v1048_v50 = vld [vmem:[%s6768_s26 + $0x1b00] sm:$0xff] }
  0xeb   : > { %1045 = vst [vmem:[%s6773_s27 + $0xd80] sm:$0xff] %v1044_v48  ;;  %1047 = vst [vmem:[%s6773_s27 + $0xd88] sm:$0xff] %v1046_v49  ;;  %v1050_v51 = vld [vmem:[%s6768_s26 + $0x1b08] sm:$0xff]  ;;  %v1052_v52 = vld [vmem:[%s6768_s26 + $0x1b10] sm:$0xff] }
  0xec   : > { %1049 = vst [vmem:[%s6773_s27 + $0xd90] sm:$0xff] %v1048_v50  ;;  %v1054_v53 = vld [vmem:[%s6768_s26 + $0x1b18] sm:$0xff]  ;;  %1051 = vst [vmem:[%s6773_s27 + $0xd98] sm:$0xff] %v1050_v51  ;;  %v1056_v54 = vld [vmem:[%s6768_s26 + $0x1b20] sm:$0xff] }
  0xed   : > { %1053 = vst [vmem:[%s6773_s27 + $0xda0] sm:$0xff] %v1052_v52  ;;  %1055 = vst [vmem:[%s6773_s27 + $0xda8] sm:$0xff] %v1054_v53  ;;  %v1058_v55 = vld [vmem:[%s6768_s26 + $0x1b28] sm:$0xff]  ;;  %v1060_v56 = vld [vmem:[%s6768_s26 + $0x1b80] sm:$0xff] }
  0xee   : > { %1057 = vst [vmem:[%s6773_s27 + $0xdb0] sm:$0xff] %v1056_v54  ;;  %1059 = vst [vmem:[%s6773_s27 + $0xdb8] sm:$0xff] %v1058_v55  ;;  %v1062_v57 = vld [vmem:[%s6768_s26 + $0x1b88] sm:$0xff]  ;;  %v1064_v58 = vld [vmem:[%s6768_s26 + $0x1b90] sm:$0xff] }
  0xef   : > { %1061 = vst [vmem:[%s6773_s27 + $0xdc0] sm:$0xff] %v1060_v56  ;;  %v1066_v59 = vld [vmem:[%s6768_s26 + $0x1b98] sm:$0xff]  ;;  %1063 = vst [vmem:[%s6773_s27 + $0xdc8] sm:$0xff] %v1062_v57  ;;  %v1068_v60 = vld [vmem:[%s6768_s26 + $0x1ba0] sm:$0xff] }
  0xf0   : > { %1065 = vst [vmem:[%s6773_s27 + $0xdd0] sm:$0xff] %v1064_v58  ;;  %1067 = vst [vmem:[%s6773_s27 + $0xdd8] sm:$0xff] %v1066_v59  ;;  %v1070_v61 = vld [vmem:[%s6768_s26 + $0x1ba8] sm:$0xff]  ;;  %v1072_v62 = vld [vmem:[%s6768_s26 + $0x1bb0] sm:$0xff] }
  0xf1   : > { %1069 = vst [vmem:[%s6773_s27 + $0xde0] sm:$0xff] %v1068_v60  ;;  %1071 = vst [vmem:[%s6773_s27 + $0xde8] sm:$0xff] %v1070_v61  ;;  %v1074_v63 = vld [vmem:[%s6768_s26 + $0x1bb8] sm:$0xff]  ;;  %v1076_v0 = vld [vmem:[%s6768_s26 + $0x1bc0] sm:$0xff] }
  0xf2   : > { %1073 = vst [vmem:[%s6773_s27 + $0xdf0] sm:$0xff] %v1072_v62  ;;  %v1078_v1 = vld [vmem:[%s6768_s26 + $0x1bc8] sm:$0xff]  ;;  %1075 = vst [vmem:[%s6773_s27 + $0xdf8] sm:$0xff] %v1074_v63  ;;  %v1080_v2 = vld [vmem:[%s6768_s26 + $0x1c20] sm:$0xff] }
  0xf3   : > { %1077 = vst [vmem:[%s6773_s27 + $0xe00] sm:$0xff] %v1076_v0  ;;  %1079 = vst [vmem:[%s6773_s27 + $0xe08] sm:$0xff] %v1078_v1  ;;  %v1082_v3 = vld [vmem:[%s6768_s26 + $0x1c28] sm:$0xff]  ;;  %v1084_v4 = vld [vmem:[%s6768_s26 + $0x1c30] sm:$0xff] }
  0xf4   : > { %1081 = vst [vmem:[%s6773_s27 + $0xe10] sm:$0xff] %v1080_v2  ;;  %1083 = vst [vmem:[%s6773_s27 + $0xe18] sm:$0xff] %v1082_v3  ;;  %v1086_v5 = vld [vmem:[%s6768_s26 + $0x1c38] sm:$0xff]  ;;  %v1088_v6 = vld [vmem:[%s6768_s26 + $0x1c40] sm:$0xff] }
  0xf5   : > { %1085 = vst [vmem:[%s6773_s27 + $0xe20] sm:$0xff] %v1084_v4  ;;  %v1090_v7 = vld [vmem:[%s6768_s26 + $0x1c48] sm:$0xff]  ;;  %1087 = vst [vmem:[%s6773_s27 + $0xe28] sm:$0xff] %v1086_v5  ;;  %v1092_v8 = vld [vmem:[%s6768_s26 + $0x1c50] sm:$0xff] }
  0xf6   : > { %1089 = vst [vmem:[%s6773_s27 + $0xe30] sm:$0xff] %v1088_v6  ;;  %1091 = vst [vmem:[%s6773_s27 + $0xe38] sm:$0xff] %v1090_v7  ;;  %v1094_v9 = vld [vmem:[%s6768_s26 + $0x1c58] sm:$0xff]  ;;  %v1096_v10 = vld [vmem:[%s6768_s26 + $0x1c60] sm:$0xff] }
  0xf7   : > { %1093 = vst [vmem:[%s6773_s27 + $0xe40] sm:$0xff] %v1092_v8  ;;  %1095 = vst [vmem:[%s6773_s27 + $0xe48] sm:$0xff] %v1094_v9  ;;  %v1098_v11 = vld [vmem:[%s6768_s26 + $0x1c68] sm:$0xff]  ;;  %v1100_v12 = vld [vmem:[%s6768_s26 + $0x1cc0] sm:$0xff] }
  0xf8   : > { %1097 = vst [vmem:[%s6773_s27 + $0xe50] sm:$0xff] %v1096_v10  ;;  %v1102_v13 = vld [vmem:[%s6768_s26 + $0x1cc8] sm:$0xff]  ;;  %1099 = vst [vmem:[%s6773_s27 + $0xe58] sm:$0xff] %v1098_v11  ;;  %v1104_v14 = vld [vmem:[%s6768_s26 + $0x1cd0] sm:$0xff] }
  0xf9   : > { %1101 = vst [vmem:[%s6773_s27 + $0xe60] sm:$0xff] %v1100_v12  ;;  %1103 = vst [vmem:[%s6773_s27 + $0xe68] sm:$0xff] %v1102_v13  ;;  %v1106_v15 = vld [vmem:[%s6768_s26 + $0x1cd8] sm:$0xff]  ;;  %v1108_v16 = vld [vmem:[%s6768_s26 + $0x1ce0] sm:$0xff] }
  0xfa   : > { %1105 = vst [vmem:[%s6773_s27 + $0xe70] sm:$0xff] %v1104_v14  ;;  %1107 = vst [vmem:[%s6773_s27 + $0xe78] sm:$0xff] %v1106_v15  ;;  %v1110_v17 = vld [vmem:[%s6768_s26 + $0x1ce8] sm:$0xff]  ;;  %v1112_v18 = vld [vmem:[%s6768_s26 + $0x1cf0] sm:$0xff] }
  0xfb   : > { %1109 = vst [vmem:[%s6773_s27 + $0xe80] sm:$0xff] %v1108_v16  ;;  %v1114_v19 = vld [vmem:[%s6768_s26 + $0x1cf8] sm:$0xff]  ;;  %1111 = vst [vmem:[%s6773_s27 + $0xe88] sm:$0xff] %v1110_v17  ;;  %v1116_v20 = vld [vmem:[%s6768_s26 + $0x1d00] sm:$0xff] }
  0xfc   : > { %1113 = vst [vmem:[%s6773_s27 + $0xe90] sm:$0xff] %v1112_v18  ;;  %1115 = vst [vmem:[%s6773_s27 + $0xe98] sm:$0xff] %v1114_v19  ;;  %v1118_v21 = vld [vmem:[%s6768_s26 + $0x1d08] sm:$0xff]  ;;  %v1120_v22 = vld [vmem:[%s6768_s26 + $0x1d60] sm:$0xff] }
  0xfd   : > { %1117 = vst [vmem:[%s6773_s27 + $0xea0] sm:$0xff] %v1116_v20  ;;  %1119 = vst [vmem:[%s6773_s27 + $0xea8] sm:$0xff] %v1118_v21  ;;  %v1122_v23 = vld [vmem:[%s6768_s26 + $0x1d68] sm:$0xff]  ;;  %v1124_v24 = vld [vmem:[%s6768_s26 + $0x1d70] sm:$0xff] }
  0xfe   : > { %1121 = vst [vmem:[%s6773_s27 + $0xeb0] sm:$0xff] %v1120_v22  ;;  %v1126_v25 = vld [vmem:[%s6768_s26 + $0x1d78] sm:$0xff]  ;;  %1123 = vst [vmem:[%s6773_s27 + $0xeb8] sm:$0xff] %v1122_v23  ;;  %v1128_v26 = vld [vmem:[%s6768_s26 + $0x1d80] sm:$0xff] }
  0xff   : > { %1125 = vst [vmem:[%s6773_s27 + $0xec0] sm:$0xff] %v1124_v24  ;;  %1127 = vst [vmem:[%s6773_s27 + $0xec8] sm:$0xff] %v1126_v25  ;;  %v1130_v27 = vld [vmem:[%s6768_s26 + $0x1d88] sm:$0xff]  ;;  %v1132_v28 = vld [vmem:[%s6768_s26 + $0x1d90] sm:$0xff] }
 0x100   : > { %1129 = vst [vmem:[%s6773_s27 + $0xed0] sm:$0xff] %v1128_v26  ;;  %1131 = vst [vmem:[%s6773_s27 + $0xed8] sm:$0xff] %v1130_v27  ;;  %v1134_v29 = vld [vmem:[%s6768_s26 + $0x1d98] sm:$0xff]  ;;  %v1136_v30 = vld [vmem:[%s6768_s26 + $0x1da0] sm:$0xff] }
 0x101   : > { %1133 = vst [vmem:[%s6773_s27 + $0xee0] sm:$0xff] %v1132_v28  ;;  %v1138_v31 = vld [vmem:[%s6768_s26 + $0x1da8] sm:$0xff]  ;;  %1135 = vst [vmem:[%s6773_s27 + $0xee8] sm:$0xff] %v1134_v29 }
 0x102   : > { %1137 = vst [vmem:[%s6773_s27 + $0xef0] sm:$0xff] %v1136_v30  ;;  %1139 = vst [vmem:[%s6773_s27 + $0xef8] sm:$0xff] %v1138_v31 }
 0x103 PF: > { %p5372_p6 = scmp.ge.s32.totalorder %s6701_s16, 1  ;;  %p1152_p7 = scmp.lt.s32.totalorder %s6701_s16, 3 }
 0x105   : > { %p1153_p8 = pnand %p5372_p6, %p1152_p7 }
 0x106   : > { %s1159_s28 = sand.u32 (!%p1153_p8), 1, %s6685_s12   ;;  %v1231_v32 = vlaneseq (!%p1153_p8)  ;;  %v6703_v33 = vmov (!%p1153_p8), 1983009808   ;;  %v7740_v36 = vld [vmem:[%s8396_s0] sm:$0x3f] (!%p1153_p8)  ;;  %s1199_s6 = smul.u32 (!%p1153_p8), 20, %s6693_s14 }
 0x107   : > { %1156 = sbr.rel (%p1153_p8) target bundleno = 972 (0x3cc), region = 51  ;;  %v1229_v34 = vunpack.c.l.s4 (!%p1153_p8), %v6703_v33 }
 0x108   : > { %s5898_s29 = smul.u32 (!%p1153_p8), 3840, %s1159_s28  ;;  %v7735_v35 = vshrl.u32 (!%p1153_p8), %v1231_v32, 7  ;;  %p1200_p9 = scmp.lt.s32.totalorder (!%p1153_p8), %s1199_s6, 39 }
 0x109   : > { %v1230_v37 = vunpack.c.0.s8 (!%p1153_p8), %v1229_v34 }
 0x10a   : > { %s7742_s5 = scalar_lea.vmem (!%p1153_p8), [#allocation2], %s5898_s29 }
 0x10b   : > { %v5942_v38 = vld [vmem:[%s7742_s5 + $0x4] ss:$80 sps:$4 sm:$0xff] (!%p1153_p8)   ;;  %v5944_v39 = vld [vmem:[%s7742_s5 + $0xc] ss:$80 sps:$4 sm:$0xff] (!%p1153_p8)   ;;  %v7747_v40 = vsub.s32 (!%p1153_p8), %v1230_v37, %v7735_v35  ;;  %v5946_v41 = vld [vmem:[%s7742_s5] ss:$80 sps:$4 sm:$0xff] (!%p1153_p8)  }
 0x10c   : > { %4129 = vmatprep.subr.bf16.mxu0 (!%p1153_p8), %v5942_v38  ;;  %v5947_v42 = vld [vmem:[%s7742_s5 + $0x8] ss:$80 sps:$4 sm:$0xff] (!%p1153_p8)   ;;  %4211 = vmatprep.subr.bf16.mxu1 (!%p1153_p8), %v5944_v39  ;;  %v5948_v43 = vld [vmem:[%s7742_s5 + $0xa4] ss:$80 sps:$4 sm:$0xff] (!%p1153_p8)   ;;  %v5950_v45 = vld [vmem:[%s7742_s5 + $0xac] ss:$80 sps:$4 sm:$0xff] (!%p1153_p8)  }
 0x10d   : > { %v7754_v44 = vrot.slane (!%p1153_p8), %v7740_v36, %v7747_v40  ;;  %4130 = vmatpush1.bf16.msra.mxu0 (!%p1153_p8), %v5946_v41  ;;  %4212 = vmatpush1.bf16.msra.mxu1 (!%p1153_p8), %v5947_v42  ;;  %v5952_v46 = vld [vmem:[%s7742_s5 + $0xa0] ss:$80 sps:$4 sm:$0xff] (!%p1153_p8)   ;;  %v5953_v47 = vld [vmem:[%s7742_s5 + $0xa8] ss:$80 sps:$4 sm:$0xff] (!%p1153_p8)   ;;  %v5954_v49 = vld [vmem:[%s7742_s5 + $0x144] ss:$80 sps:$4 sm:$0xff] (!%p1153_p8)  }
 0x10e   : > { %4131 = vmatprep.subr.bf16.mxu0 %v5948_v43  ;;  %4213 = vmatprep.subr.bf16.mxu1 %v5950_v45  ;;  %v5956_v50 = vld [vmem:[%s7742_s5 + $0x14c] ss:$80 sps:$4 sm:$0xff]   ;;  %v5958_v51 = vld [vmem:[%s7742_s5 + $0x140] ss:$80 sps:$4 sm:$0xff]   ;;  %v5959_v52 = vld [vmem:[%s7742_s5 + $0x148] ss:$80 sps:$4 sm:$0xff]  }
 0x10f   : > { %v1242_v48 = vcombine.high %v7754_v44, %v7754_v44  ;;  %v5960_v54 = vld [vmem:[%s7742_s5 + $0x1e4] ss:$80 sps:$4 sm:$0xff]   ;;  %v5962_v55 = vld [vmem:[%s7742_s5 + $0x1ec] ss:$80 sps:$4 sm:$0xff]   ;;  %v5964_v56 = vld [vmem:[%s7742_s5 + $0x1e0] ss:$80 sps:$4 sm:$0xff]  }
 0x110   : > { %v5965_v57 = vld [vmem:[%s7742_s5 + $0x1e8] ss:$80 sps:$4 sm:$0xff]   ;;  %v5966_v58 = vld [vmem:[%s7742_s5 + $0x284] ss:$80 sps:$4 sm:$0xff]   ;;  %v5968_v59 = vld [vmem:[%s7742_s5 + $0x28c] ss:$80 sps:$4 sm:$0xff]  }
 0x111   : > { %v7765_v53 = vpack.c.bf16 %v1242_v48, %v1242_v48  ;;  %4132 = vmatpush1.bf16.msra.mxu0 %v5952_v46  ;;  %4214 = vmatpush1.bf16.msra.mxu1 %v5953_v47  ;;  %v5970_v60 = vld [vmem:[%s7742_s5 + $0x280] ss:$80 sps:$4 sm:$0xff]   ;;  %v5971_v61 = vld [vmem:[%s7742_s5 + $0x288] ss:$80 sps:$4 sm:$0xff]   ;;  %v5972_v62 = vld [vmem:[%s7742_s5 + $0x324] ss:$80 sps:$4 sm:$0xff]  }
 0x112   : > { %4133 = vmatprep.subr.bf16.mxu0 %v5954_v49  ;;  %4215 = vmatprep.subr.bf16.mxu1 %v5956_v50  ;;  %v5974_v63 = vld [vmem:[%s7742_s5 + $0x32c] ss:$80 sps:$4 sm:$0xff]   ;;  %v5976_v0 = vld [vmem:[%s7742_s5 + $0x320] ss:$80 sps:$4 sm:$0xff]   ;;  %v5977_v1 = vld [vmem:[%s7742_s5 + $0x328] ss:$80 sps:$4 sm:$0xff]   ;;  %v7827_v50 = vpack.c.bf16 %v7754_v44, %v7754_v44 }
 0x113   : > { %4161 = vmatprep.mubr.bf16.mxu0 %v7765_v53  ;;  %4243 = vmatprep.mubr.bf16.mxu1 %v7765_v53  ;;  %v5978_v2 = vld [vmem:[%s7742_s5 + $0x3c4] ss:$80 sps:$4 sm:$0xff]   ;;  %v5980_v3 = vld [vmem:[%s7742_s5 + $0x3cc] ss:$80 sps:$4 sm:$0xff]   ;;  %v5982_v4 = vld [vmem:[%s7742_s5 + $0x3c0] ss:$80 sps:$4 sm:$0xff]  }
 0x114   : > { %v5983_v5 = vld [vmem:[%s7742_s5 + $0x3c8] ss:$80 sps:$4 sm:$0xff]   ;;  %v5984_v6 = vld [vmem:[%s7742_s5 + $0x464] ss:$80 sps:$4 sm:$0xff]   ;;  %v5986_v7 = vld [vmem:[%s7742_s5 + $0x46c] ss:$80 sps:$4 sm:$0xff]  }
 0x115   : > { %4134 = vmatpush1.bf16.msra.mxu0 %v5958_v51  ;;  %4216 = vmatpush1.bf16.msra.mxu1 %v5959_v52  ;;  %v5988_v8 = vld [vmem:[%s7742_s5 + $0x460] ss:$80 sps:$4 sm:$0xff]   ;;  %v5989_v9 = vld [vmem:[%s7742_s5 + $0x468] ss:$80 sps:$4 sm:$0xff]   ;;  %v5990_v10 = vld [vmem:[%s7742_s5 + $0x504] ss:$80 sps:$4 sm:$0xff]  }
 0x116   : > { %4135 = vmatprep.subr.bf16.mxu0 %v5960_v54  ;;  %4217 = vmatprep.subr.bf16.mxu1 %v5962_v55  ;;  %v5992_v11 = vld [vmem:[%s7742_s5 + $0x50c] ss:$80 sps:$4 sm:$0xff]   ;;  %v5994_v12 = vld [vmem:[%s7742_s5 + $0x500] ss:$80 sps:$4 sm:$0xff]   ;;  %v5995_v13 = vld [vmem:[%s7742_s5 + $0x508] ss:$80 sps:$4 sm:$0xff]  }
 0x117   : > { %v5996_v14 = vld [vmem:[%s7742_s5 + $0x5a4] ss:$80 sps:$4 sm:$0xff]   ;;  %v5998_v15 = vld [vmem:[%s7742_s5 + $0x5ac] ss:$80 sps:$4 sm:$0xff]   ;;  %v6000_v16 = vld [vmem:[%s7742_s5 + $0x5a0] ss:$80 sps:$4 sm:$0xff]  }
 0x118   : > { %v6001_v17 = vld [vmem:[%s7742_s5 + $0x5a8] ss:$80 sps:$4 sm:$0xff]   ;;  %v6002_v18 = vld [vmem:[%s7742_s5 + $0x644] ss:$80 sps:$4 sm:$0xff]   ;;  %v6004_v19 = vld [vmem:[%s7742_s5 + $0x64c] ss:$80 sps:$4 sm:$0xff]  }
 0x119   : > { %4136 = vmatpush1.bf16.msra.mxu0 %v5964_v56  ;;  %4218 = vmatpush1.bf16.msra.mxu1 %v5965_v57  ;;  %v6006_v20 = vld [vmem:[%s7742_s5 + $0x640] ss:$80 sps:$4 sm:$0xff]   ;;  %v6007_v21 = vld [vmem:[%s7742_s5 + $0x648] ss:$80 sps:$4 sm:$0xff]   ;;  %v6008_v22 = vld [vmem:[%s7742_s5 + $0x6e4] ss:$80 sps:$4 sm:$0xff]  }
 0x11a   : > { %4137 = vmatprep.subr.bf16.mxu0 %v5966_v58  ;;  %4219 = vmatprep.subr.bf16.mxu1 %v5968_v59  ;;  %v6010_v23 = vld [vmem:[%s7742_s5 + $0x6ec] ss:$80 sps:$4 sm:$0xff]   ;;  %v6012_v24 = vld [vmem:[%s7742_s5 + $0x6e0] ss:$80 sps:$4 sm:$0xff]   ;;  %v6013_v25 = vld [vmem:[%s7742_s5 + $0x6e8] ss:$80 sps:$4 sm:$0xff]  }
 0x11b   : > { %v6014_v26 = vld [vmem:[%s7742_s5 + $0x784] ss:$80 sps:$4 sm:$0xff]   ;;  %v6016_v27 = vld [vmem:[%s7742_s5 + $0x78c] ss:$80 sps:$4 sm:$0xff]   ;;  %v6018_v28 = vld [vmem:[%s7742_s5 + $0x780] ss:$80 sps:$4 sm:$0xff]  }
 0x11c   : > { %v6019_v29 = vld [vmem:[%s7742_s5 + $0x788] ss:$80 sps:$4 sm:$0xff]   ;;  %v6020_v30 = vld [vmem:[%s7742_s5 + $0x824] ss:$80 sps:$4 sm:$0xff]   ;;  %v6022_v31 = vld [vmem:[%s7742_s5 + $0x82c] ss:$80 sps:$4 sm:$0xff]  }
 0x11d   : > { %4138 = vmatpush1.bf16.msra.mxu0 %v5970_v60  ;;  %4220 = vmatpush1.bf16.msra.mxu1 %v5971_v61  ;;  %v6024_v32 = vld [vmem:[%s7742_s5 + $0x820] ss:$80 sps:$4 sm:$0xff]   ;;  %v6025_v33 = vld [vmem:[%s7742_s5 + $0x828] ss:$80 sps:$4 sm:$0xff]   ;;  %v6026_v34 = vld [vmem:[%s7742_s5 + $0x8c4] ss:$80 sps:$4 sm:$0xff]  }
 0x11e   : > { %4139 = vmatprep.subr.bf16.mxu0 %v5972_v62  ;;  %4221 = vmatprep.subr.bf16.mxu1 %v5974_v63  ;;  %v6028_v37 = vld [vmem:[%s7742_s5 + $0x8cc] ss:$80 sps:$4 sm:$0xff]   ;;  %v6030_v38 = vld [vmem:[%s7742_s5 + $0x8c0] ss:$80 sps:$4 sm:$0xff]   ;;  %v6031_v39 = vld [vmem:[%s7742_s5 + $0x8c8] ss:$80 sps:$4 sm:$0xff]  }
 0x11f   : > { %v6032_v41 = vld [vmem:[%s7742_s5 + $0x964] ss:$80 sps:$4 sm:$0xff]   ;;  %v6034_v42 = vld [vmem:[%s7742_s5 + $0x96c] ss:$80 sps:$4 sm:$0xff]   ;;  %v6036_v43 = vld [vmem:[%s7742_s5 + $0x960] ss:$80 sps:$4 sm:$0xff]  }
 0x120   : > { %v6037_v45 = vld [vmem:[%s7742_s5 + $0x968] ss:$80 sps:$4 sm:$0xff]   ;;  %v6040_v46 = vld [vmem:[%s7742_s5 + $0xa04] ss:$80 sps:$4 sm:$0xff]   ;;  %v6043_v47 = vld [vmem:[%s7742_s5 + $0xa0c] ss:$80 sps:$4 sm:$0xff]  }
 0x121   : > { %4140 = vmatpush1.bf16.msra.mxu0 %v5976_v0  ;;  %4222 = vmatpush1.bf16.msra.mxu1 %v5977_v1  ;;  %v6038_v48 = vld [vmem:[%s7742_s5 + $0xa00] ss:$80 sps:$4 sm:$0xff]   ;;  %v6041_v49 = vld [vmem:[%s7742_s5 + $0xa08] ss:$80 sps:$4 sm:$0xff]   ;;  %v6046_v51 = vld [vmem:[%s7742_s5 + $0xaa4] ss:$80 sps:$4 sm:$0xff]  }
 0x122   : > { %4141 = vmatprep.subr.bf16.mxu0 %v5978_v2  ;;  %4223 = vmatprep.subr.bf16.mxu1 %v5980_v3  ;;  %v6049_v52 = vld [vmem:[%s7742_s5 + $0xaac] ss:$80 sps:$4 sm:$0xff]   ;;  %v6044_v54 = vld [vmem:[%s7742_s5 + $0xaa0] ss:$80 sps:$4 sm:$0xff]   ;;  %v6047_v55 = vld [vmem:[%s7742_s5 + $0xaa8] ss:$80 sps:$4 sm:$0xff]  }
 0x123   : > { %v6052_v44 = vld [vmem:[%s7742_s5 + $0xb44] ss:$80 sps:$4 sm:$0xff]   ;;  %v6055_v56 = vld [vmem:[%s7742_s5 + $0xb4c] ss:$80 sps:$4 sm:$0xff]   ;;  %v6704_v57 = vmov 0   ;;  %s8407_s6 = smov (!%p1200_p9, %s1199_s6), 39 }
 0x124   : > { %v6050_v58 = vld [vmem:[%s7742_s5 + $0xb40] ss:$80 sps:$4 sm:$0xff]   ;;  %v6053_v59 = vld [vmem:[%s7742_s5 + $0xb48] ss:$80 sps:$4 sm:$0xff]   ;;  %v6058_v60 = vld [vmem:[%s7742_s5 + $0xbe4] ss:$80 sps:$4 sm:$0xff]   ;;  %s8099_s9 = scalar_lea.vmem %s8398_s2, %s8407_s6 }
 0x125   : > { %4142 = vmatpush1.bf16.msra.mxu0 %v5982_v4  ;;  %4224 = vmatpush1.bf16.msra.mxu1 %v5983_v5  ;;  %v6061_v61 = vld [vmem:[%s7742_s5 + $0xbec] ss:$80 sps:$4 sm:$0xff]   ;;  %v6056_v62 = vld [vmem:[%s7742_s5 + $0xbe0] ss:$80 sps:$4 sm:$0xff]   ;;  %v6059_v63 = vld [vmem:[%s7742_s5 + $0xbe8] ss:$80 sps:$4 sm:$0xff]  }
 0x126   : > { %4143 = vmatprep.subr.bf16.mxu0 %v5984_v6  ;;  %4225 = vmatprep.subr.bf16.mxu1 %v5986_v7  ;;  %v6064_v0 = vld [vmem:[%s7742_s5 + $0xc84] ss:$80 sps:$4 sm:$0xff]   ;;  %v6067_v1 = vld [vmem:[%s7742_s5 + $0xc8c] ss:$80 sps:$4 sm:$0xff]   ;;  %v6062_v2 = vld [vmem:[%s7742_s5 + $0xc80] ss:$80 sps:$4 sm:$0xff]  }
 0x127   : > { %v6065_v3 = vld [vmem:[%s7742_s5 + $0xc88] ss:$80 sps:$4 sm:$0xff]   ;;  %v6070_v4 = vld [vmem:[%s7742_s5 + $0xd24] ss:$80 sps:$4 sm:$0xff]   ;;  %v6073_v5 = vld [vmem:[%s7742_s5 + $0xd2c] ss:$80 sps:$4 sm:$0xff]  }
 0x128   : > { %v6068_v6 = vld [vmem:[%s7742_s5 + $0xd20] ss:$80 sps:$4 sm:$0xff]   ;;  %v6071_v7 = vld [vmem:[%s7742_s5 + $0xd28] ss:$80 sps:$4 sm:$0xff]   ;;  %s5373_s10 = sshll.u32 %s8407_s6, 1 }
 0x129   : > { %4144 = vmatpush1.bf16.msra.mxu0 %v5988_v8  ;;  %4226 = vmatpush1.bf16.msra.mxu1 %v5989_v9  ;;  %v6076_v8 = vld [vmem:[%s7742_s5 + $0xdc4] ss:$80 sps:$4 sm:$0xff]   ;;  %v6079_v9 = vld [vmem:[%s7742_s5 + $0xdcc] ss:$80 sps:$4 sm:$0xff]   ;;  %s8154_s14 = scalar_lea.vmem %s8399_s3, %s5373_s10 }
 0x12a   : > { %4145 = vmatprep.subr.bf16.mxu0 %v5990_v10  ;;  %4227 = vmatprep.subr.bf16.mxu1 %v5992_v11  ;;  %v6074_v10 = vld [vmem:[%s7742_s5 + $0xdc0] ss:$80 sps:$4 sm:$0xff]   ;;  %v6077_v11 = vld [vmem:[%s7742_s5 + $0xdc8] ss:$80 sps:$4 sm:$0xff]  }
 0x12d   : > { %4146 = vmatpush1.bf16.msra.mxu0 %v5994_v12  ;;  %4228 = vmatpush1.bf16.msra.mxu1 %v5995_v13  ;;  %v1227_v12 = vcombine.high %v7740_v36, %v7740_v36  ;;  %v6082_v13 = vld [vmem:[%s7742_s5 + $0xe64] ss:$80 sps:$4 sm:$0xff]   ;;  %v6092_v36 = vld [vmem:[%s7742_s5 + $0x1c] ss:$80 sps:$4 sm:$0xff]  }
 0x12e   : > { %4147 = vmatprep.subr.bf16.mxu0 %v5996_v14  ;;  %4229 = vmatprep.subr.bf16.mxu1 %v5998_v15  ;;  %v6085_v14 = vld [vmem:[%s7742_s5 + $0xe6c] ss:$80 sps:$4 sm:$0xff]   ;;  %v6080_v15 = vld [vmem:[%s7742_s5 + $0xe60] ss:$80 sps:$4 sm:$0xff]  }
 0x131   : > { %4148 = vmatpush1.bf16.msra.mxu0 %v6000_v16  ;;  %4230 = vmatpush1.bf16.msra.mxu1 %v6001_v17  ;;  %v6083_v16 = vld [vmem:[%s7742_s5 + $0xe68] ss:$80 sps:$4 sm:$0xff]   ;;  %v1241_v17 = vrot.slane %v1227_v12, %v7747_v40  ;;  %v6167_v12 = vld [vmem:[%s7742_s5 + $0x834] ss:$80 sps:$4 sm:$0xff]  }
 0x132   : > { %4149 = vmatprep.subr.bf16.mxu0 %v6002_v18  ;;  %4231 = vmatprep.subr.bf16.mxu1 %v6004_v19  ;;  %v6089_v18 = vld [vmem:[%s7742_s5 + $0x14] ss:$80 sps:$4 sm:$0xff]  }
 0x133   : > { %v7866_v19 = vpack.c.bf16 %v1241_v17, %v1241_v17  ;;  %v6176_v17 = vld [vmem:[%s7742_s5 + $0x8dc] ss:$80 sps:$4 sm:$0xff]  }
 0x135   : > { %4150 = vmatpush1.bf16.msra.mxu0 %v6006_v20  ;;  %4232 = vmatpush1.bf16.msra.mxu1 %v6007_v21  ;;  %v6087_v20 = vld [vmem:[%s7742_s5 + $0x10] ss:$80 sps:$4 sm:$0xff]   ;;  %v6090_v21 = vld [vmem:[%s7742_s5 + $0x18] ss:$80 sps:$4 sm:$0xff]  }
 0x136   : > { %4151 = vmatprep.subr.bf16.mxu0 %v6008_v22  ;;  %4233 = vmatprep.subr.bf16.mxu1 %v6010_v23  ;;  %v6095_v22 = vld [vmem:[%s7742_s5 + $0xb4] ss:$80 sps:$4 sm:$0xff]   ;;  %v6098_v23 = vld [vmem:[%s7742_s5 + $0xbc] ss:$80 sps:$4 sm:$0xff]  }
 0x139   : > { %4152 = vmatpush1.bf16.msra.mxu0 %v6012_v24  ;;  %4234 = vmatpush1.bf16.msra.mxu1 %v6013_v25  ;;  %v6093_v24 = vld [vmem:[%s7742_s5 + $0xb0] ss:$80 sps:$4 sm:$0xff]   ;;  %v6096_v25 = vld [vmem:[%s7742_s5 + $0xb8] ss:$80 sps:$4 sm:$0xff]  }
 0x13a   : > { %4153 = vmatprep.subr.bf16.mxu0 %v6014_v26  ;;  %4235 = vmatprep.subr.bf16.mxu1 %v6016_v27  ;;  %v6101_v26 = vld [vmem:[%s7742_s5 + $0x154] ss:$80 sps:$4 sm:$0xff]   ;;  %v6104_v27 = vld [vmem:[%s7742_s5 + $0x15c] ss:$80 sps:$4 sm:$0xff]  }
 0x13d   : > { %4154 = vmatpush1.bf16.msra.mxu0 %v6018_v28  ;;  %4236 = vmatpush1.bf16.msra.mxu1 %v6019_v29  ;;  %v6099_v28 = vld [vmem:[%s7742_s5 + $0x150] ss:$80 sps:$4 sm:$0xff]   ;;  %v6102_v29 = vld [vmem:[%s7742_s5 + $0x158] ss:$80 sps:$4 sm:$0xff]  }
 0x13e   : > { %4155 = vmatprep.subr.bf16.mxu0 %v6020_v30  ;;  %4237 = vmatprep.subr.bf16.mxu1 %v6022_v31  ;;  %v6107_v30 = vld [vmem:[%s7742_s5 + $0x1f4] ss:$80 sps:$4 sm:$0xff]   ;;  %v6110_v31 = vld [vmem:[%s7742_s5 + $0x1fc] ss:$80 sps:$4 sm:$0xff]  }
 0x141   : > { %4156 = vmatpush1.bf16.msra.mxu0 %v6024_v32  ;;  %4238 = vmatpush1.bf16.msra.mxu1 %v6025_v33  ;;  %v6105_v32 = vld [vmem:[%s7742_s5 + $0x1f0] ss:$80 sps:$4 sm:$0xff]   ;;  %v6108_v33 = vld [vmem:[%s7742_s5 + $0x1f8] ss:$80 sps:$4 sm:$0xff]  }
 0x142   : > { %4157 = vmatprep.subr.bf16.mxu0 %v6026_v34  ;;  %4239 = vmatprep.subr.bf16.mxu1 %v6028_v37  ;;  %v6113_v34 = vld [vmem:[%s7742_s5 + $0x294] ss:$80 sps:$4 sm:$0xff]   ;;  %v6116_v37 = vld [vmem:[%s7742_s5 + $0x29c] ss:$80 sps:$4 sm:$0xff]  }
 0x145   : > { %4158 = vmatpush1.bf16.msra.mxu0 %v6030_v38  ;;  %4240 = vmatpush1.bf16.msra.mxu1 %v6031_v39  ;;  %v6111_v38 = vld [vmem:[%s7742_s5 + $0x290] ss:$80 sps:$4 sm:$0xff]   ;;  %v6114_v39 = vld [vmem:[%s7742_s5 + $0x298] ss:$80 sps:$4 sm:$0xff]  }
 0x146   : > { %4159 = vmatprep.subr.bf16.mxu0 %v6032_v41  ;;  %4241 = vmatprep.subr.bf16.mxu1 %v6034_v42  ;;  %v6119_v41 = vld [vmem:[%s7742_s5 + $0x334] ss:$80 sps:$4 sm:$0xff]   ;;  %v6122_v42 = vld [vmem:[%s7742_s5 + $0x33c] ss:$80 sps:$4 sm:$0xff]  }
 0x149   : > { %4160 = vmatpush1.bf16.msra.mxu0 %v6036_v43  ;;  %4242 = vmatpush1.bf16.msra.mxu1 %v6037_v45  ;;  %v6117_v43 = vld [vmem:[%s7742_s5 + $0x330] ss:$80 sps:$4 sm:$0xff]   ;;  %v6120_v45 = vld [vmem:[%s7742_s5 + $0x338] ss:$80 sps:$4 sm:$0xff]  }
 0x14a   : > { %4170 = vmatprep.subr.bf16.mxu0 %v6040_v46  ;;  %4252 = vmatprep.subr.bf16.mxu1 %v6043_v47  ;;  %v6125_v46 = vld [vmem:[%s7742_s5 + $0x3d4] ss:$80 sps:$4 sm:$0xff]   ;;  %v6128_v47 = vld [vmem:[%s7742_s5 + $0x3dc] ss:$80 sps:$4 sm:$0xff]  }
 0x14c   : > { %4162 = vmatmul.mubr.bf16.vlgmr.msra.gmra.mrb[0].mxu0 %v7827_v50  ;;  %4244 = vmatmul.mubr.bf16.vlgmr.msra.gmra.mrb[0].mxu1 %v7827_v50 }
 0x14d   : > { %4171 = vmatpush1.bf16.msra.mxu0 %v6038_v48  ;;  %4253 = vmatpush1.bf16.msra.mxu1 %v6041_v49  ;;  %v6123_v48 = vld [vmem:[%s7742_s5 + $0x3d0] ss:$80 sps:$4 sm:$0xff]   ;;  %v6126_v49 = vld [vmem:[%s7742_s5 + $0x3d8] ss:$80 sps:$4 sm:$0xff]  }
 0x14e   : > { %4172 = vmatprep.subr.bf16.mxu0 %v6046_v51  ;;  %4254 = vmatprep.subr.bf16.mxu1 %v6049_v52  ;;  %v6131_v51 = vld [vmem:[%s7742_s5 + $0x474] ss:$80 sps:$4 sm:$0xff]   ;;  %v6134_v52 = vld [vmem:[%s7742_s5 + $0x47c] ss:$80 sps:$4 sm:$0xff]  }
 0x14f   : > { %4202 = vmatprep.mubr.bf16.mxu0 %v6704_v57  ;;  %4284 = vmatprep.mubr.bf16.mxu1 %v6704_v57 }
 0x151   : > { %4173 = vmatpush1.bf16.msra.mxu0 %v6044_v54  ;;  %4255 = vmatpush1.bf16.msra.mxu1 %v6047_v55  ;;  %v6129_v54 = vld [vmem:[%s7742_s5 + $0x470] ss:$80 sps:$4 sm:$0xff]   ;;  %v6132_v55 = vld [vmem:[%s7742_s5 + $0x478] ss:$80 sps:$4 sm:$0xff]  }
 0x152   : > { %4174 = vmatprep.subr.bf16.mxu0 %v6052_v44  ;;  %4256 = vmatprep.subr.bf16.mxu1 %v6055_v56  ;;  %v6137_v44 = vld [vmem:[%s7742_s5 + $0x514] ss:$80 sps:$4 sm:$0xff]   ;;  %v6140_v56 = vld [vmem:[%s7742_s5 + $0x51c] ss:$80 sps:$4 sm:$0xff]  }
 0x155   : > { %4175 = vmatpush1.bf16.msra.mxu0 %v6050_v58  ;;  %4257 = vmatpush1.bf16.msra.mxu1 %v6053_v59  ;;  %v6135_v58 = vld [vmem:[%s7742_s5 + $0x510] ss:$80 sps:$4 sm:$0xff]   ;;  %v6138_v59 = vld [vmem:[%s7742_s5 + $0x518] ss:$80 sps:$4 sm:$0xff]  }
 0x156   : > { %4176 = vmatprep.subr.bf16.mxu0 %v6058_v60  ;;  %4258 = vmatprep.subr.bf16.mxu1 %v6061_v61  ;;  %v6143_v60 = vld [vmem:[%s7742_s5 + $0x5b4] ss:$80 sps:$4 sm:$0xff]   ;;  %v6146_v61 = vld [vmem:[%s7742_s5 + $0x5bc] ss:$80 sps:$4 sm:$0xff]  }
 0x159   : > { %4177 = vmatpush1.bf16.msra.mxu0 %v6056_v62  ;;  %4259 = vmatpush1.bf16.msra.mxu1 %v6059_v63  ;;  %v6141_v62 = vld [vmem:[%s7742_s5 + $0x5b0] ss:$80 sps:$4 sm:$0xff]   ;;  %v6144_v63 = vld [vmem:[%s7742_s5 + $0x5b8] ss:$80 sps:$4 sm:$0xff]  }
 0x15a   : > { %4178 = vmatprep.subr.bf16.mxu0 %v6064_v0  ;;  %4260 = vmatprep.subr.bf16.mxu1 %v6067_v1  ;;  %v6149_v0 = vld [vmem:[%s7742_s5 + $0x654] ss:$80 sps:$4 sm:$0xff]   ;;  %v6152_v1 = vld [vmem:[%s7742_s5 + $0x65c] ss:$80 sps:$4 sm:$0xff]  }
 0x15d   : > { %4179 = vmatpush1.bf16.msra.mxu0 %v6062_v2  ;;  %4261 = vmatpush1.bf16.msra.mxu1 %v6065_v3  ;;  %v6147_v2 = vld [vmem:[%s7742_s5 + $0x650] ss:$80 sps:$4 sm:$0xff]   ;;  %v6150_v3 = vld [vmem:[%s7742_s5 + $0x658] ss:$80 sps:$4 sm:$0xff]  }
 0x15e   : > { %4180 = vmatprep.subr.bf16.mxu0 %v6070_v4  ;;  %4262 = vmatprep.subr.bf16.mxu1 %v6073_v5  ;;  %v6155_v4 = vld [vmem:[%s7742_s5 + $0x6f4] ss:$80 sps:$4 sm:$0xff]   ;;  %v6158_v5 = vld [vmem:[%s7742_s5 + $0x6fc] ss:$80 sps:$4 sm:$0xff]  }
 0x161   : > { %4181 = vmatpush1.bf16.msra.mxu0 %v6068_v6  ;;  %4263 = vmatpush1.bf16.msra.mxu1 %v6071_v7  ;;  %v6153_v6 = vld [vmem:[%s7742_s5 + $0x6f0] ss:$80 sps:$4 sm:$0xff]   ;;  %v6156_v7 = vld [vmem:[%s7742_s5 + $0x6f8] ss:$80 sps:$4 sm:$0xff]  }
 0x162   : > { %4182 = vmatprep.subr.bf16.mxu0 %v6076_v8  ;;  %4264 = vmatprep.subr.bf16.mxu1 %v6079_v9  ;;  %v6161_v8 = vld [vmem:[%s7742_s5 + $0x794] ss:$80 sps:$4 sm:$0xff]   ;;  %v6164_v9 = vld [vmem:[%s7742_s5 + $0x79c] ss:$80 sps:$4 sm:$0xff]  }
 0x165   : > { %4183 = vmatpush1.bf16.msra.mxu0 %v6074_v10  ;;  %4265 = vmatpush1.bf16.msra.mxu1 %v6077_v11  ;;  %v6159_v10 = vld [vmem:[%s7742_s5 + $0x790] ss:$80 sps:$4 sm:$0xff]   ;;  %v6162_v11 = vld [vmem:[%s7742_s5 + $0x798] ss:$80 sps:$4 sm:$0xff]  }
 0x166   : > { %4184 = vmatprep.subr.bf16.mxu0 %v6082_v13  ;;  %4266 = vmatprep.subr.bf16.mxu1 %v6085_v14  ;;  %v6170_v13 = vld [vmem:[%s7742_s5 + $0x83c] ss:$80 sps:$4 sm:$0xff]   ;;  %v6165_v14 = vld [vmem:[%s7742_s5 + $0x830] ss:$80 sps:$4 sm:$0xff]  }
 0x169   : > { %4185 = vmatpush1.bf16.msra.mxu0 %v6080_v15  ;;  %4267 = vmatpush1.bf16.msra.mxu1 %v6083_v16  ;;  %v6168_v15 = vld [vmem:[%s7742_s5 + $0x838] ss:$80 sps:$4 sm:$0xff]   ;;  %v6173_v16 = vld [vmem:[%s7742_s5 + $0x8d4] ss:$80 sps:$4 sm:$0xff]  }
 0x16a   : > { %4293 = vmatprep.subr.bf16.mxu0 %v6089_v18  ;;  %4375 = vmatprep.subr.bf16.mxu1 %v6092_v36  ;;  %v6171_v18 = vld [vmem:[%s7742_s5 + $0x8d0] ss:$80 sps:$4 sm:$0xff]   ;;  %v6174_v36 = vld [vmem:[%s7742_s5 + $0x8d8] ss:$80 sps:$4 sm:$0xff]  }
 0x16c   : > { %4203 = vmatmul.mubr.bf16.vlgmr.msra.gmra.mrb[0].mxu0 %v7866_v19  ;;  %4285 = vmatmul.mubr.bf16.vlgmr.msra.gmra.mrb[0].mxu1 %v7866_v19 }
 0x16d   : > { %4294 = vmatpush1.bf16.msra.mxu0 %v6087_v20  ;;  %4376 = vmatpush1.bf16.msra.mxu1 %v6090_v21  ;;  %v6179_v20 = vld [vmem:[%s7742_s5 + $0x974] ss:$80 sps:$4 sm:$0xff]   ;;  %v6182_v21 = vld [vmem:[%s7742_s5 + $0x97c] ss:$80 sps:$4 sm:$0xff]  }
 0x16e   : > { %4295 = vmatprep.subr.bf16.mxu0 %v6095_v22  ;;  %4377 = vmatprep.subr.bf16.mxu1 %v6098_v23  ;;  %v6177_v22 = vld [vmem:[%s7742_s5 + $0x970] ss:$80 sps:$4 sm:$0xff]   ;;  %v6180_v23 = vld [vmem:[%s7742_s5 + $0x978] ss:$80 sps:$4 sm:$0xff]  }
 0x16f   : > { %4325 = vmatprep.mubr.bf16.mxu0 %v7765_v53  ;;  %4407 = vmatprep.mubr.bf16.mxu1 %v7765_v53 }
 0x171   : > { %4296 = vmatpush1.bf16.msra.mxu0 %v6093_v24  ;;  %4378 = vmatpush1.bf16.msra.mxu1 %v6096_v25  ;;  %v6185_v24 = vld [vmem:[%s7742_s5 + $0xa14] ss:$80 sps:$4 sm:$0xff]   ;;  %v6188_v25 = vld [vmem:[%s7742_s5 + $0xa1c] ss:$80 sps:$4 sm:$0xff]  }
 0x172   : > { %4297 = vmatprep.subr.bf16.mxu0 %v6101_v26  ;;  %4379 = vmatprep.subr.bf16.mxu1 %v6104_v27  ;;  %v6183_v26 = vld [vmem:[%s7742_s5 + $0xa10] ss:$80 sps:$4 sm:$0xff]   ;;  %v6186_v27 = vld [vmem:[%s7742_s5 + $0xa18] ss:$80 sps:$4 sm:$0xff]  }
 0x175   : > { %4298 = vmatpush1.bf16.msra.mxu0 %v6099_v28  ;;  %4380 = vmatpush1.bf16.msra.mxu1 %v6102_v29  ;;  %v6191_v28 = vld [vmem:[%s7742_s5 + $0xab4] ss:$80 sps:$4 sm:$0xff]   ;;  %v6194_v29 = vld [vmem:[%s7742_s5 + $0xabc] ss:$80 sps:$4 sm:$0xff]  }
 0x176   : > { %4299 = vmatprep.subr.bf16.mxu0 %v6107_v30  ;;  %4381 = vmatprep.subr.bf16.mxu1 %v6110_v31  ;;  %v6189_v30 = vld [vmem:[%s7742_s5 + $0xab0] ss:$80 sps:$4 sm:$0xff]   ;;  %v6192_v31 = vld [vmem:[%s7742_s5 + $0xab8] ss:$80 sps:$4 sm:$0xff]  }
 0x179   : > { %4300 = vmatpush1.bf16.msra.mxu0 %v6105_v32  ;;  %4382 = vmatpush1.bf16.msra.mxu1 %v6108_v33  ;;  %v6197_v32 = vld [vmem:[%s7742_s5 + $0xb54] ss:$80 sps:$4 sm:$0xff]   ;;  %v6200_v33 = vld [vmem:[%s7742_s5 + $0xb5c] ss:$80 sps:$4 sm:$0xff]  }
 0x17a   : > { %4301 = vmatprep.subr.bf16.mxu0 %v6113_v34  ;;  %4383 = vmatprep.subr.bf16.mxu1 %v6116_v37  ;;  %v6195_v34 = vld [vmem:[%s7742_s5 + $0xb50] ss:$80 sps:$4 sm:$0xff]   ;;  %v6198_v37 = vld [vmem:[%s7742_s5 + $0xb58] ss:$80 sps:$4 sm:$0xff]  }
 0x17d   : > { %4302 = vmatpush1.bf16.msra.mxu0 %v6111_v38  ;;  %4384 = vmatpush1.bf16.msra.mxu1 %v6114_v39  ;;  %v6203_v38 = vld [vmem:[%s7742_s5 + $0xbf4] ss:$80 sps:$4 sm:$0xff]   ;;  %v6206_v39 = vld [vmem:[%s7742_s5 + $0xbfc] ss:$80 sps:$4 sm:$0xff]  }
 0x17e   : > { %4303 = vmatprep.subr.bf16.mxu0 %v6119_v41  ;;  %4385 = vmatprep.subr.bf16.mxu1 %v6122_v42  ;;  %v6201_v41 = vld [vmem:[%s7742_s5 + $0xbf0] ss:$80 sps:$4 sm:$0xff]   ;;  %v6204_v42 = vld [vmem:[%s7742_s5 + $0xbf8] ss:$80 sps:$4 sm:$0xff]  }
 0x181   : > { %4304 = vmatpush1.bf16.msra.mxu0 %v6117_v43  ;;  %4386 = vmatpush1.bf16.msra.mxu1 %v6120_v45  ;;  %v6209_v43 = vld [vmem:[%s7742_s5 + $0xc94] ss:$80 sps:$4 sm:$0xff]   ;;  %v6212_v45 = vld [vmem:[%s7742_s5 + $0xc9c] ss:$80 sps:$4 sm:$0xff]  }
 0x182   : > { %4305 = vmatprep.subr.bf16.mxu0 %v6125_v46  ;;  %4387 = vmatprep.subr.bf16.mxu1 %v6128_v47  ;;  %v6207_v46 = vld [vmem:[%s7742_s5 + $0xc90] ss:$80 sps:$4 sm:$0xff]   ;;  %v6210_v47 = vld [vmem:[%s7742_s5 + $0xc98] ss:$80 sps:$4 sm:$0xff]  }
 0x185   : > { %4306 = vmatpush1.bf16.msra.mxu0 %v6123_v48  ;;  %4388 = vmatpush1.bf16.msra.mxu1 %v6126_v49  ;;  %v6215_v48 = vld [vmem:[%s7742_s5 + $0xd34] ss:$80 sps:$4 sm:$0xff]   ;;  %v6218_v49 = vld [vmem:[%s7742_s5 + $0xd3c] ss:$80 sps:$4 sm:$0xff]  }
 0x186   : > { %4307 = vmatprep.subr.bf16.mxu0 %v6131_v51  ;;  %4389 = vmatprep.subr.bf16.mxu1 %v6134_v52  ;;  %v6213_v51 = vld [vmem:[%s7742_s5 + $0xd30] ss:$80 sps:$4 sm:$0xff]   ;;  %v6216_v52 = vld [vmem:[%s7742_s5 + $0xd38] ss:$80 sps:$4 sm:$0xff]  }
 0x189   : > { %4308 = vmatpush1.bf16.msra.mxu0 %v6129_v54  ;;  %4390 = vmatpush1.bf16.msra.mxu1 %v6132_v55  ;;  %v6221_v54 = vld [vmem:[%s7742_s5 + $0xdd4] ss:$80 sps:$4 sm:$0xff]   ;;  %v6224_v55 = vld [vmem:[%s7742_s5 + $0xddc] ss:$80 sps:$4 sm:$0xff]  }
 0x18a   : > { %4309 = vmatprep.subr.bf16.mxu0 %v6137_v44  ;;  %4391 = vmatprep.subr.bf16.mxu1 %v6140_v56  ;;  %v6219_v44 = vld [vmem:[%s7742_s5 + $0xdd0] ss:$80 sps:$4 sm:$0xff]   ;;  %v6222_v56 = vld [vmem:[%s7742_s5 + $0xdd8] ss:$80 sps:$4 sm:$0xff]  }
 0x18d   : > { %4310 = vmatpush1.bf16.msra.mxu0 %v6135_v58  ;;  %4392 = vmatpush1.bf16.msra.mxu1 %v6138_v59  ;;  %v6227_v58 = vld [vmem:[%s7742_s5 + $0xe74] ss:$80 sps:$4 sm:$0xff]   ;;  %v6230_v59 = vld [vmem:[%s7742_s5 + $0xe7c] ss:$80 sps:$4 sm:$0xff]  }
 0x18e   : > { %4311 = vmatprep.subr.bf16.mxu0 %v6143_v60  ;;  %4393 = vmatprep.subr.bf16.mxu1 %v6146_v61  ;;  %v6225_v60 = vld [vmem:[%s7742_s5 + $0xe70] ss:$80 sps:$4 sm:$0xff]   ;;  %v6228_v61 = vld [vmem:[%s7742_s5 + $0xe78] ss:$80 sps:$4 sm:$0xff]  }
 0x191   : > { %4312 = vmatpush1.bf16.msra.mxu0 %v6141_v62  ;;  %4394 = vmatpush1.bf16.msra.mxu1 %v6144_v63  ;;  %v6233_v62 = vld [vmem:[%s7742_s5 + $0x24] ss:$80 sps:$4 sm:$0xff]   ;;  %v6236_v63 = vld [vmem:[%s7742_s5 + $0x2c] ss:$80 sps:$4 sm:$0xff]  }
 0x192   : > { %4313 = vmatprep.subr.bf16.mxu0 %v6149_v0  ;;  %4395 = vmatprep.subr.bf16.mxu1 %v6152_v1  ;;  %v6231_v0 = vld [vmem:[%s7742_s5 + $0x20] ss:$80 sps:$4 sm:$0xff]   ;;  %v6234_v1 = vld [vmem:[%s7742_s5 + $0x28] ss:$80 sps:$4 sm:$0xff]  }
 0x195   : > { %4314 = vmatpush1.bf16.msra.mxu0 %v6147_v2  ;;  %4396 = vmatpush1.bf16.msra.mxu1 %v6150_v3  ;;  %v6239_v2 = vld [vmem:[%s7742_s5 + $0xc4] ss:$80 sps:$4 sm:$0xff]   ;;  %v6242_v3 = vld [vmem:[%s7742_s5 + $0xcc] ss:$80 sps:$4 sm:$0xff]  }
 0x196   : > { %4315 = vmatprep.subr.bf16.mxu0 %v6155_v4  ;;  %4397 = vmatprep.subr.bf16.mxu1 %v6158_v5  ;;  %v6237_v4 = vld [vmem:[%s7742_s5 + $0xc0] ss:$80 sps:$4 sm:$0xff]   ;;  %v6240_v5 = vld [vmem:[%s7742_s5 + $0xc8] ss:$80 sps:$4 sm:$0xff]  }
 0x199   : > { %4316 = vmatpush1.bf16.msra.mxu0 %v6153_v6  ;;  %4398 = vmatpush1.bf16.msra.mxu1 %v6156_v7  ;;  %v6245_v6 = vld [vmem:[%s7742_s5 + $0x164] ss:$80 sps:$4 sm:$0xff]   ;;  %v6248_v7 = vld [vmem:[%s7742_s5 + $0x16c] ss:$80 sps:$4 sm:$0xff]  }
 0x19a   : > { %4317 = vmatprep.subr.bf16.mxu0 %v6161_v8  ;;  %4399 = vmatprep.subr.bf16.mxu1 %v6164_v9  ;;  %v6243_v8 = vld [vmem:[%s7742_s5 + $0x160] ss:$80 sps:$4 sm:$0xff]   ;;  %v6246_v9 = vld [vmem:[%s7742_s5 + $0x168] ss:$80 sps:$4 sm:$0xff]  }
 0x19d   : > { %4318 = vmatpush1.bf16.msra.mxu0 %v6159_v10  ;;  %4400 = vmatpush1.bf16.msra.mxu1 %v6162_v11  ;;  %v6251_v10 = vld [vmem:[%s7742_s5 + $0x204] ss:$80 sps:$4 sm:$0xff]   ;;  %v6254_v11 = vld [vmem:[%s7742_s5 + $0x20c] ss:$80 sps:$4 sm:$0xff]  }
 0x19e   : > { %4319 = vmatprep.subr.bf16.mxu0 %v6167_v12  ;;  %4401 = vmatprep.subr.bf16.mxu1 %v6170_v13  ;;  %v6249_v12 = vld [vmem:[%s7742_s5 + $0x200] ss:$80 sps:$4 sm:$0xff]   ;;  %v6252_v13 = vld [vmem:[%s7742_s5 + $0x208] ss:$80 sps:$4 sm:$0xff]  }
 0x1a1   : > { %4320 = vmatpush1.bf16.msra.mxu0 %v6165_v14  ;;  %4402 = vmatpush1.bf16.msra.mxu1 %v6168_v15  ;;  %v6257_v14 = vld [vmem:[%s7742_s5 + $0x2a4] ss:$80 sps:$4 sm:$0xff]   ;;  %v6260_v15 = vld [vmem:[%s7742_s5 + $0x2ac] ss:$80 sps:$4 sm:$0xff]  }
 0x1a2   : > { %4321 = vmatprep.subr.bf16.mxu0 %v6173_v16  ;;  %4403 = vmatprep.subr.bf16.mxu1 %v6176_v17  ;;  %v6255_v16 = vld [vmem:[%s7742_s5 + $0x2a0] ss:$80 sps:$4 sm:$0xff]   ;;  %v6258_v17 = vld [vmem:[%s7742_s5 + $0x2a8] ss:$80 sps:$4 sm:$0xff]  }
 0x1a5   : > { %4322 = vmatpush1.bf16.msra.mxu0 %v6171_v18  ;;  %4404 = vmatpush1.bf16.msra.mxu1 %v6174_v36  ;;  %v6263_v18 = vld [vmem:[%s7742_s5 + $0x344] ss:$80 sps:$4 sm:$0xff]   ;;  %v6266_v36 = vld [vmem:[%s7742_s5 + $0x34c] ss:$80 sps:$4 sm:$0xff]  }
 0x1a6   : > { %4323 = vmatprep.subr.bf16.mxu0 %v6179_v20  ;;  %4405 = vmatprep.subr.bf16.mxu1 %v6182_v21  ;;  %v6261_v20 = vld [vmem:[%s7742_s5 + $0x340] ss:$80 sps:$4 sm:$0xff]   ;;  %v6264_v21 = vld [vmem:[%s7742_s5 + $0x348] ss:$80 sps:$4 sm:$0xff]  }
 0x1a9   : > { %4324 = vmatpush1.bf16.msra.mxu0 %v6177_v22  ;;  %4406 = vmatpush1.bf16.msra.mxu1 %v6180_v23  ;;  %v6269_v22 = vld [vmem:[%s7742_s5 + $0x3e4] ss:$80 sps:$4 sm:$0xff]   ;;  %v6272_v23 = vld [vmem:[%s7742_s5 + $0x3ec] ss:$80 sps:$4 sm:$0xff]  }
 0x1aa   : > { %4334 = vmatprep.subr.bf16.mxu0 %v6185_v24  ;;  %4416 = vmatprep.subr.bf16.mxu1 %v6188_v25  ;;  %v6267_v24 = vld [vmem:[%s7742_s5 + $0x3e0] ss:$80 sps:$4 sm:$0xff]   ;;  %v6270_v25 = vld [vmem:[%s7742_s5 + $0x3e8] ss:$80 sps:$4 sm:$0xff]  }
 0x1ac   : > { %4326 = vmatmul.mubr.bf16.vlgmr.msra.gmra.mrb[4].mxu0 %v7827_v50  ;;  %4408 = vmatmul.mubr.bf16.vlgmr.msra.gmra.mrb[4].mxu1 %v7827_v50 }
 0x1ad   : > { %4335 = vmatpush1.bf16.msra.mxu0 %v6183_v26  ;;  %4417 = vmatpush1.bf16.msra.mxu1 %v6186_v27  ;;  %v6275_v26 = vld [vmem:[%s7742_s5 + $0x484] ss:$80 sps:$4 sm:$0xff]   ;;  %v6278_v27 = vld [vmem:[%s7742_s5 + $0x48c] ss:$80 sps:$4 sm:$0xff]  }
 0x1ae   : > { %4336 = vmatprep.subr.bf16.mxu0 %v6191_v28  ;;  %4418 = vmatprep.subr.bf16.mxu1 %v6194_v29  ;;  %v6273_v28 = vld [vmem:[%s7742_s5 + $0x480] ss:$80 sps:$4 sm:$0xff]   ;;  %v6276_v29 = vld [vmem:[%s7742_s5 + $0x488] ss:$80 sps:$4 sm:$0xff]  }
 0x1af   : > { %4366 = vmatprep.mubr.bf16.mxu0 %v6704_v57  ;;  %4448 = vmatprep.mubr.bf16.mxu1 %v6704_v57 }
 0x1b1   : > { %4337 = vmatpush1.bf16.msra.mxu0 %v6189_v30  ;;  %4419 = vmatpush1.bf16.msra.mxu1 %v6192_v31  ;;  %v6281_v30 = vld [vmem:[%s7742_s5 + $0x524] ss:$80 sps:$4 sm:$0xff]   ;;  %v6284_v31 = vld [vmem:[%s7742_s5 + $0x52c] ss:$80 sps:$4 sm:$0xff]  }
 0x1b2   : > { %4338 = vmatprep.subr.bf16.mxu0 %v6197_v32  ;;  %4420 = vmatprep.subr.bf16.mxu1 %v6200_v33  ;;  %v6279_v32 = vld [vmem:[%s7742_s5 + $0x520] ss:$80 sps:$4 sm:$0xff]   ;;  %v6282_v33 = vld [vmem:[%s7742_s5 + $0x528] ss:$80 sps:$4 sm:$0xff]  }
 0x1b5   : > { %4339 = vmatpush1.bf16.msra.mxu0 %v6195_v34  ;;  %4421 = vmatpush1.bf16.msra.mxu1 %v6198_v37  ;;  %v6287_v34 = vld [vmem:[%s7742_s5 + $0x5c4] ss:$80 sps:$4 sm:$0xff]   ;;  %v6290_v37 = vld [vmem:[%s7742_s5 + $0x5cc] ss:$80 sps:$4 sm:$0xff]  }
 0x1b6   : > { %4340 = vmatprep.subr.bf16.mxu0 %v6203_v38  ;;  %4422 = vmatprep.subr.bf16.mxu1 %v6206_v39  ;;  %v6285_v38 = vld [vmem:[%s7742_s5 + $0x5c0] ss:$80 sps:$4 sm:$0xff]   ;;  %v6288_v39 = vld [vmem:[%s7742_s5 + $0x5c8] ss:$80 sps:$4 sm:$0xff]  }
 0x1b9   : > { %4341 = vmatpush1.bf16.msra.mxu0 %v6201_v41  ;;  %4423 = vmatpush1.bf16.msra.mxu1 %v6204_v42  ;;  %v6293_v41 = vld [vmem:[%s7742_s5 + $0x664] ss:$80 sps:$4 sm:$0xff]   ;;  %v6296_v42 = vld [vmem:[%s7742_s5 + $0x66c] ss:$80 sps:$4 sm:$0xff]  }
 0x1ba   : > { %4342 = vmatprep.subr.bf16.mxu0 %v6209_v43  ;;  %4424 = vmatprep.subr.bf16.mxu1 %v6212_v45  ;;  %v6291_v43 = vld [vmem:[%s7742_s5 + $0x660] ss:$80 sps:$4 sm:$0xff]   ;;  %v6294_v45 = vld [vmem:[%s7742_s5 + $0x668] ss:$80 sps:$4 sm:$0xff]  }
 0x1bd   : > { %4343 = vmatpush1.bf16.msra.mxu0 %v6207_v46  ;;  %4425 = vmatpush1.bf16.msra.mxu1 %v6210_v47  ;;  %v6299_v46 = vld [vmem:[%s7742_s5 + $0x704] ss:$80 sps:$4 sm:$0xff]   ;;  %v6302_v47 = vld [vmem:[%s7742_s5 + $0x70c] ss:$80 sps:$4 sm:$0xff]  }
 0x1be   : > { %4344 = vmatprep.subr.bf16.mxu0 %v6215_v48  ;;  %4426 = vmatprep.subr.bf16.mxu1 %v6218_v49  ;;  %v6297_v48 = vld [vmem:[%s7742_s5 + $0x700] ss:$80 sps:$4 sm:$0xff]   ;;  %v6300_v49 = vld [vmem:[%s7742_s5 + $0x708] ss:$80 sps:$4 sm:$0xff]  }
 0x1c1   : > { %4345 = vmatpush1.bf16.msra.mxu0 %v6213_v51  ;;  %4427 = vmatpush1.bf16.msra.mxu1 %v6216_v52  ;;  %v6305_v51 = vld [vmem:[%s7742_s5 + $0x7a4] ss:$80 sps:$4 sm:$0xff]   ;;  %v6308_v52 = vld [vmem:[%s7742_s5 + $0x7ac] ss:$80 sps:$4 sm:$0xff]  }
 0x1c2   : > { %4346 = vmatprep.subr.bf16.mxu0 %v6221_v54  ;;  %4428 = vmatprep.subr.bf16.mxu1 %v6224_v55  ;;  %v6303_v54 = vld [vmem:[%s7742_s5 + $0x7a0] ss:$80 sps:$4 sm:$0xff]   ;;  %v6306_v55 = vld [vmem:[%s7742_s5 + $0x7a8] ss:$80 sps:$4 sm:$0xff]  }
 0x1c5   : > { %4347 = vmatpush1.bf16.msra.mxu0 %v6219_v44  ;;  %4429 = vmatpush1.bf16.msra.mxu1 %v6222_v56  ;;  %v6311_v44 = vld [vmem:[%s7742_s5 + $0x844] ss:$80 sps:$4 sm:$0xff]   ;;  %v6314_v56 = vld [vmem:[%s7742_s5 + $0x84c] ss:$80 sps:$4 sm:$0xff]  }
 0x1c6   : > { %4348 = vmatprep.subr.bf16.mxu0 %v6227_v58  ;;  %4430 = vmatprep.subr.bf16.mxu1 %v6230_v59  ;;  %v6309_v58 = vld [vmem:[%s7742_s5 + $0x840] ss:$80 sps:$4 sm:$0xff]   ;;  %v6312_v59 = vld [vmem:[%s7742_s5 + $0x848] ss:$80 sps:$4 sm:$0xff]  }
 0x1c9   : > { %4349 = vmatpush1.bf16.msra.mxu0 %v6225_v60  ;;  %4431 = vmatpush1.bf16.msra.mxu1 %v6228_v61  ;;  %v6317_v60 = vld [vmem:[%s7742_s5 + $0x8e4] ss:$80 sps:$4 sm:$0xff]   ;;  %v6320_v61 = vld [vmem:[%s7742_s5 + $0x8ec] ss:$80 sps:$4 sm:$0xff]  }
 0x1ca   : > { %4457 = vmatprep.subr.bf16.mxu0 %v6233_v62  ;;  %4539 = vmatprep.subr.bf16.mxu1 %v6236_v63  ;;  %v6315_v62 = vld [vmem:[%s7742_s5 + $0x8e0] ss:$80 sps:$4 sm:$0xff]   ;;  %v6318_v63 = vld [vmem:[%s7742_s5 + $0x8e8] ss:$80 sps:$4 sm:$0xff]  }
 0x1cc   : > { %4367 = vmatmul.mubr.bf16.vlgmr.msra.gmra.mrb[4].mxu0 %v7866_v19  ;;  %4449 = vmatmul.mubr.bf16.vlgmr.msra.gmra.mrb[4].mxu1 %v7866_v19 }
 0x1cd   : > { %4458 = vmatpush1.bf16.msra.mxu0 %v6231_v0  ;;  %4540 = vmatpush1.bf16.msra.mxu1 %v6234_v1  ;;  %v6323_v0 = vld [vmem:[%s7742_s5 + $0x984] ss:$80 sps:$4 sm:$0xff]   ;;  %v6326_v1 = vld [vmem:[%s7742_s5 + $0x98c] ss:$80 sps:$4 sm:$0xff]  }
 0x1ce   : > { %4459 = vmatprep.subr.bf16.mxu0 %v6239_v2  ;;  %4541 = vmatprep.subr.bf16.mxu1 %v6242_v3  ;;  %v6321_v2 = vld [vmem:[%s7742_s5 + $0x980] ss:$80 sps:$4 sm:$0xff]   ;;  %v6324_v3 = vld [vmem:[%s7742_s5 + $0x988] ss:$80 sps:$4 sm:$0xff]  }
 0x1cf   : > { %4489 = vmatprep.mubr.bf16.mxu0 %v7765_v53  ;;  %4571 = vmatprep.mubr.bf16.mxu1 %v7765_v53 }
 0x1d1   : > { %4460 = vmatpush1.bf16.msra.mxu0 %v6237_v4  ;;  %4542 = vmatpush1.bf16.msra.mxu1 %v6240_v5  ;;  %v6329_v4 = vld [vmem:[%s7742_s5 + $0xa24] ss:$80 sps:$4 sm:$0xff]   ;;  %v6332_v5 = vld [vmem:[%s7742_s5 + $0xa2c] ss:$80 sps:$4 sm:$0xff]  }
 0x1d2   : > { %4461 = vmatprep.subr.bf16.mxu0 %v6245_v6  ;;  %4543 = vmatprep.subr.bf16.mxu1 %v6248_v7  ;;  %v6327_v6 = vld [vmem:[%s7742_s5 + $0xa20] ss:$80 sps:$4 sm:$0xff]   ;;  %v6330_v7 = vld [vmem:[%s7742_s5 + $0xa28] ss:$80 sps:$4 sm:$0xff]  }
 0x1d5   : > { %4462 = vmatpush1.bf16.msra.mxu0 %v6243_v8  ;;  %4544 = vmatpush1.bf16.msra.mxu1 %v6246_v9  ;;  %v6335_v8 = vld [vmem:[%s7742_s5 + $0xac4] ss:$80 sps:$4 sm:$0xff]   ;;  %v6338_v9 = vld [vmem:[%s7742_s5 + $0xacc] ss:$80 sps:$4 sm:$0xff]  }
 0x1d6   : > { %4463 = vmatprep.subr.bf16.mxu0 %v6251_v10  ;;  %4545 = vmatprep.subr.bf16.mxu1 %v6254_v11  ;;  %v6333_v10 = vld [vmem:[%s7742_s5 + $0xac0] ss:$80 sps:$4 sm:$0xff]   ;;  %v6336_v11 = vld [vmem:[%s7742_s5 + $0xac8] ss:$80 sps:$4 sm:$0xff]  }
 0x1d9   : > { %4464 = vmatpush1.bf16.msra.mxu0 %v6249_v12  ;;  %4546 = vmatpush1.bf16.msra.mxu1 %v6252_v13  ;;  %v6341_v12 = vld [vmem:[%s7742_s5 + $0xb64] ss:$80 sps:$4 sm:$0xff]   ;;  %v6344_v13 = vld [vmem:[%s7742_s5 + $0xb6c] ss:$80 sps:$4 sm:$0xff]  }
 0x1da   : > { %4465 = vmatprep.subr.bf16.mxu0 %v6257_v14  ;;  %4547 = vmatprep.subr.bf16.mxu1 %v6260_v15  ;;  %v6339_v14 = vld [vmem:[%s7742_s5 + $0xb60] ss:$80 sps:$4 sm:$0xff]   ;;  %v6342_v15 = vld [vmem:[%s7742_s5 + $0xb68] ss:$80 sps:$4 sm:$0xff]  }
 0x1dd   : > { %4466 = vmatpush1.bf16.msra.mxu0 %v6255_v16  ;;  %4548 = vmatpush1.bf16.msra.mxu1 %v6258_v17  ;;  %v6347_v16 = vld [vmem:[%s7742_s5 + $0xc04] ss:$80 sps:$4 sm:$0xff]   ;;  %v6350_v17 = vld [vmem:[%s7742_s5 + $0xc0c] ss:$80 sps:$4 sm:$0xff]  }
 0x1de   : > { %4467 = vmatprep.subr.bf16.mxu0 %v6263_v18  ;;  %4549 = vmatprep.subr.bf16.mxu1 %v6266_v36  ;;  %v6345_v18 = vld [vmem:[%s7742_s5 + $0xc00] ss:$80 sps:$4 sm:$0xff]   ;;  %v6348_v36 = vld [vmem:[%s7742_s5 + $0xc08] ss:$80 sps:$4 sm:$0xff]  }
 0x1e1   : > { %4468 = vmatpush1.bf16.msra.mxu0 %v6261_v20  ;;  %4550 = vmatpush1.bf16.msra.mxu1 %v6264_v21  ;;  %v6353_v20 = vld [vmem:[%s7742_s5 + $0xca4] ss:$80 sps:$4 sm:$0xff]   ;;  %v6356_v21 = vld [vmem:[%s7742_s5 + $0xcac] ss:$80 sps:$4 sm:$0xff]  }
 0x1e2   : > { %4469 = vmatprep.subr.bf16.mxu0 %v6269_v22  ;;  %4551 = vmatprep.subr.bf16.mxu1 %v6272_v23  ;;  %v6351_v22 = vld [vmem:[%s7742_s5 + $0xca0] ss:$80 sps:$4 sm:$0xff]   ;;  %v6354_v23 = vld [vmem:[%s7742_s5 + $0xca8] ss:$80 sps:$4 sm:$0xff]  }
 0x1e5   : > { %4470 = vmatpush1.bf16.msra.mxu0 %v6267_v24  ;;  %4552 = vmatpush1.bf16.msra.mxu1 %v6270_v25  ;;  %v6359_v24 = vld [vmem:[%s7742_s5 + $0xd44] ss:$80 sps:$4 sm:$0xff]   ;;  %v6362_v25 = vld [vmem:[%s7742_s5 + $0xd4c] ss:$80 sps:$4 sm:$0xff]  }
 0x1e6   : > { %4471 = vmatprep.subr.bf16.mxu0 %v6275_v26  ;;  %4553 = vmatprep.subr.bf16.mxu1 %v6278_v27  ;;  %v6357_v26 = vld [vmem:[%s7742_s5 + $0xd40] ss:$80 sps:$4 sm:$0xff]   ;;  %v6360_v27 = vld [vmem:[%s7742_s5 + $0xd48] ss:$80 sps:$4 sm:$0xff]  }
 0x1e9   : > { %4472 = vmatpush1.bf16.msra.mxu0 %v6273_v28  ;;  %4554 = vmatpush1.bf16.msra.mxu1 %v6276_v29  ;;  %v6365_v28 = vld [vmem:[%s7742_s5 + $0xde4] ss:$80 sps:$4 sm:$0xff]   ;;  %v6368_v29 = vld [vmem:[%s7742_s5 + $0xdec] ss:$80 sps:$4 sm:$0xff]  }
 0x1ea   : > { %4473 = vmatprep.subr.bf16.mxu0 %v6281_v30  ;;  %4555 = vmatprep.subr.bf16.mxu1 %v6284_v31  ;;  %v6363_v30 = vld [vmem:[%s7742_s5 + $0xde0] ss:$80 sps:$4 sm:$0xff]   ;;  %v6366_v31 = vld [vmem:[%s7742_s5 + $0xde8] ss:$80 sps:$4 sm:$0xff]  }
 0x1ed   : > { %4474 = vmatpush1.bf16.msra.mxu0 %v6279_v32  ;;  %4556 = vmatpush1.bf16.msra.mxu1 %v6282_v33  ;;  %v6371_v32 = vld [vmem:[%s7742_s5 + $0xe84] ss:$80 sps:$4 sm:$0xff]   ;;  %v6374_v33 = vld [vmem:[%s7742_s5 + $0xe8c] ss:$80 sps:$4 sm:$0xff]  }
 0x1ee   : > { %4475 = vmatprep.subr.bf16.mxu0 %v6287_v34  ;;  %4557 = vmatprep.subr.bf16.mxu1 %v6290_v37  ;;  %v6369_v34 = vld [vmem:[%s7742_s5 + $0xe80] ss:$80 sps:$4 sm:$0xff]   ;;  %v6372_v37 = vld [vmem:[%s7742_s5 + $0xe88] ss:$80 sps:$4 sm:$0xff]  }
 0x1f1   : > { %4476 = vmatpush1.bf16.msra.mxu0 %v6285_v38  ;;  %4558 = vmatpush1.bf16.msra.mxu1 %v6288_v39  ;;  %v6377_v38 = vld [vmem:[%s7742_s5 + $0x34] ss:$80 sps:$4 sm:$0xff]   ;;  %v6380_v39 = vld [vmem:[%s7742_s5 + $0x3c] ss:$80 sps:$4 sm:$0xff]  }
 0x1f2   : > { %4477 = vmatprep.subr.bf16.mxu0 %v6293_v41  ;;  %4559 = vmatprep.subr.bf16.mxu1 %v6296_v42  ;;  %v6375_v41 = vld [vmem:[%s7742_s5 + $0x30] ss:$80 sps:$4 sm:$0xff]   ;;  %v6378_v42 = vld [vmem:[%s7742_s5 + $0x38] ss:$80 sps:$4 sm:$0xff]  }
 0x1f5   : > { %4478 = vmatpush1.bf16.msra.mxu0 %v6291_v43  ;;  %4560 = vmatpush1.bf16.msra.mxu1 %v6294_v45  ;;  %v6383_v43 = vld [vmem:[%s7742_s5 + $0xd4] ss:$80 sps:$4 sm:$0xff]   ;;  %v6386_v45 = vld [vmem:[%s7742_s5 + $0xdc] ss:$80 sps:$4 sm:$0xff]  }
 0x1f6   : > { %4479 = vmatprep.subr.bf16.mxu0 %v6299_v46  ;;  %4561 = vmatprep.subr.bf16.mxu1 %v6302_v47  ;;  %v6381_v46 = vld [vmem:[%s7742_s5 + $0xd0] ss:$80 sps:$4 sm:$0xff]   ;;  %v6384_v47 = vld [vmem:[%s7742_s5 + $0xd8] ss:$80 sps:$4 sm:$0xff]  }
 0x1f9   : > { %4480 = vmatpush1.bf16.msra.mxu0 %v6297_v48  ;;  %4562 = vmatpush1.bf16.msra.mxu1 %v6300_v49  ;;  %v6389_v48 = vld [vmem:[%s7742_s5 + $0x174] ss:$80 sps:$4 sm:$0xff]   ;;  %v6392_v49 = vld [vmem:[%s7742_s5 + $0x17c] ss:$80 sps:$4 sm:$0xff]  }
 0x1fa   : > { %4481 = vmatprep.subr.bf16.mxu0 %v6305_v51  ;;  %4563 = vmatprep.subr.bf16.mxu1 %v6308_v52  ;;  %v6387_v51 = vld [vmem:[%s7742_s5 + $0x170] ss:$80 sps:$4 sm:$0xff]   ;;  %v6390_v52 = vld [vmem:[%s7742_s5 + $0x178] ss:$80 sps:$4 sm:$0xff]  }
 0x1fd   : > { %4482 = vmatpush1.bf16.msra.mxu0 %v6303_v54  ;;  %4564 = vmatpush1.bf16.msra.mxu1 %v6306_v55  ;;  %v6395_v54 = vld [vmem:[%s7742_s5 + $0x214] ss:$80 sps:$4 sm:$0xff]   ;;  %v6398_v55 = vld [vmem:[%s7742_s5 + $0x21c] ss:$80 sps:$4 sm:$0xff]  }
 0x1fe   : > { %4483 = vmatprep.subr.bf16.mxu0 %v6311_v44  ;;  %4565 = vmatprep.subr.bf16.mxu1 %v6314_v56  ;;  %v6393_v44 = vld [vmem:[%s7742_s5 + $0x210] ss:$80 sps:$4 sm:$0xff]   ;;  %v8103_v56 = vsub.s32 0, %v7735_v35 }
 0x201   : > { %4484 = vmatpush1.bf16.msra.mxu0 %v6309_v58  ;;  %4566 = vmatpush1.bf16.msra.mxu1 %v6312_v59  ;;  %v8106_v58 = vsub.s32 1, %v7735_v35  ;;  %v6396_v59 = vld [vmem:[%s7742_s5 + $0x218] ss:$80 sps:$4 sm:$0xff]  }
 0x202   : > { %4485 = vmatprep.subr.bf16.mxu0 %v6317_v60  ;;  %4567 = vmatprep.subr.bf16.mxu1 %v6320_v61  ;;  %v8110_v60 = vld [vmem:[%s8099_s9] sm:$0xff]  ;;  %v8113_v61 = vsub.s32 2, %v7735_v35 }
 0x205   : > { %4486 = vmatpush1.bf16.msra.mxu0 %v6315_v62  ;;  %4568 = vmatpush1.bf16.msra.mxu1 %v6318_v63  ;;  %v8116_v62 = vsub.s32 3, %v7735_v35  ;;  %v6401_v63 = vld [vmem:[%s7742_s5 + $0x2b4] ss:$80 sps:$4 sm:$0xff]  }
 0x206   : > { %4487 = vmatprep.subr.bf16.mxu0 %v6323_v0  ;;  %4569 = vmatprep.subr.bf16.mxu1 %v6326_v1  ;;  %v6404_v0 = vld [vmem:[%s7742_s5 + $0x2bc] ss:$80 sps:$4 sm:$0xff]   ;;  %v5086_v1 = vrot.slane %v8110_v60, %v8103_v56 }
 0x209   : > { %4488 = vmatpush1.bf16.msra.mxu0 %v6321_v2  ;;  %4570 = vmatpush1.bf16.msra.mxu1 %v6324_v3  ;;  %v5090_v2 = vrot.slane %v8110_v60, %v8106_v58  ;;  %v6399_v3 = vld [vmem:[%s7742_s5 + $0x2b0] ss:$80 sps:$4 sm:$0xff]  }
 0x20a   : > { %4498 = vmatprep.subr.bf16.mxu0 %v6329_v4  ;;  %4580 = vmatprep.subr.bf16.mxu1 %v6332_v5  ;;  %v6402_v4 = vld [vmem:[%s7742_s5 + $0x2b8] ss:$80 sps:$4 sm:$0xff]   ;;  %v5094_v5 = vrot.slane %v8110_v60, %v8113_v61 }
 0x20c   : > { %4490 = vmatmul.mubr.bf16.vlgmr.msra.gmra.mrb[8].mxu0 %v7827_v50  ;;  %4572 = vmatmul.mubr.bf16.vlgmr.msra.gmra.mrb[8].mxu1 %v7827_v50 }
 0x20d   : > { %4499 = vmatpush1.bf16.msra.mxu0 %v6327_v6  ;;  %4581 = vmatpush1.bf16.msra.mxu1 %v6330_v7  ;;  %v5098_v6 = vrot.slane %v8110_v60, %v8116_v62  ;;  %v6407_v7 = vld [vmem:[%s7742_s5 + $0x354] ss:$80 sps:$4 sm:$0xff]  }
 0x20e   : > { %4500 = vmatprep.subr.bf16.mxu0 %v6335_v8  ;;  %4582 = vmatprep.subr.bf16.mxu1 %v6338_v9  ;;  %v6410_v8 = vld [vmem:[%s7742_s5 + $0x35c] ss:$80 sps:$4 sm:$0xff]   ;;  %v5163_v9 = vcombine.low %v5086_v1, %v5090_v2  ;;  %v6444_v1 = vld [vmem:[%s7742_s5 + $0x718] ss:$80 sps:$4 sm:$0xff]   ;;  %v6449_v2 = vld [vmem:[%s7742_s5 + $0x7b4] ss:$80 sps:$4 sm:$0xff]  }
 0x20f   : > { %4530 = vmatprep.mubr.bf16.mxu0 %v6704_v57  ;;  %4612 = vmatprep.mubr.bf16.mxu1 %v6704_v57 }
 0x211   : > { %4501 = vmatpush1.bf16.msra.mxu0 %v6333_v10  ;;  %4583 = vmatpush1.bf16.msra.mxu1 %v6336_v11  ;;  %v5164_v10 = vcombine.low %v5094_v5, %v5098_v6  ;;  %v6405_v11 = vld [vmem:[%s7742_s5 + $0x350] ss:$80 sps:$4 sm:$0xff]   ;;  %v6450_v5 = vld [vmem:[%s7742_s5 + $0x7b8] ss:$80 sps:$4 sm:$0xff]   ;;  %v6455_v6 = vld [vmem:[%s7742_s5 + $0x854] ss:$80 sps:$4 sm:$0xff]  }
 0x212   : > { %4502 = vmatprep.subr.bf16.mxu0 %v6341_v12  ;;  %4584 = vmatprep.subr.bf16.mxu1 %v6344_v13  ;;  %v6408_v12 = vld [vmem:[%s7742_s5 + $0x358] ss:$80 sps:$4 sm:$0xff]   ;;  %v6413_v13 = vld [vmem:[%s7742_s5 + $0x3f4] ss:$80 sps:$4 sm:$0xff]  }
 0x215   : > { %4503 = vmatpush1.bf16.msra.mxu0 %v6339_v14  ;;  %4585 = vmatpush1.bf16.msra.mxu1 %v6342_v15  ;;  %v6416_v14 = vld [vmem:[%s7742_s5 + $0x3fc] ss:$80 sps:$4 sm:$0xff]  }
 0x216   : > { %4504 = vmatprep.subr.bf16.mxu0 %v6347_v16  ;;  %4586 = vmatprep.subr.bf16.mxu1 %v6350_v17 }
 0x219   : > { %4505 = vmatpush1.bf16.msra.mxu0 %v6345_v18  ;;  %4587 = vmatpush1.bf16.msra.mxu1 %v6348_v36  ;;  %v5171_v36 = vrot.slane %v5163_v9, %v7747_v40  ;;  %v6456_v9 = vld [vmem:[%s7742_s5 + $0x858] ss:$80 sps:$4 sm:$0xff]  }
 0x21a   : > { %4506 = vmatprep.subr.bf16.mxu0 %v6353_v20  ;;  %4588 = vmatprep.subr.bf16.mxu1 %v6356_v21 }
 0x21d   : > { %4507 = vmatpush1.bf16.msra.mxu0 %v6351_v22  ;;  %4589 = vmatpush1.bf16.msra.mxu1 %v6354_v23  ;;  %v5178_v22 = vrot.slane %v5164_v10, %v7747_v40  ;;  %v6461_v10 = vld [vmem:[%s7742_s5 + $0x8f4] ss:$80 sps:$4 sm:$0xff]  }
 0x21e   : > { %4508 = vmatprep.subr.bf16.mxu0 %v6359_v24  ;;  %4590 = vmatprep.subr.bf16.mxu1 %v6362_v25  ;;  %v6411_v25 = vld [vmem:[%s7742_s5 + $0x3f0] ss:$80 sps:$4 sm:$0xff]  }
 0x221   : > { %4509 = vmatpush1.bf16.msra.mxu0 %v6357_v26  ;;  %4591 = vmatpush1.bf16.msra.mxu1 %v6360_v27  ;;  %v6414_v26 = vld [vmem:[%s7742_s5 + $0x3f8] ss:$80 sps:$4 sm:$0xff]  }
 0x222   : > { %4510 = vmatprep.subr.bf16.mxu0 %v6365_v28  ;;  %4592 = vmatprep.subr.bf16.mxu1 %v6368_v29  ;;  %v6419_v29 = vld [vmem:[%s7742_s5 + $0x494] ss:$80 sps:$4 sm:$0xff]  }
 0x225   : > { %4511 = vmatpush1.bf16.msra.mxu0 %v6363_v30  ;;  %4593 = vmatpush1.bf16.msra.mxu1 %v6366_v31  ;;  %v6422_v30 = vld [vmem:[%s7742_s5 + $0x49c] ss:$80 sps:$4 sm:$0xff]  }
 0x226   : > { %4512 = vmatprep.subr.bf16.mxu0 %v6371_v32  ;;  %4594 = vmatprep.subr.bf16.mxu1 %v6374_v33 }
 0x229   : > { %4513 = vmatpush1.bf16.msra.mxu0 %v6369_v34  ;;  %4595 = vmatpush1.bf16.msra.mxu1 %v6372_v37  ;;  %v5179_v34 = vcombine.low %v5171_v36, %v5178_v22  ;;  %v6417_v37 = vld [vmem:[%s7742_s5 + $0x490] ss:$80 sps:$4 sm:$0xff]   ;;  %v6476_v36 = vld [vmem:[%s7742_s5 + $0xa3c] ss:$80 sps:$4 sm:$0xff]   ;;  %v6479_v22 = vld [vmem:[%s7742_s5 + $0xad4] ss:$80 sps:$4 sm:$0xff]  }
 0x22a   : > { %4621 = vmatprep.subr.bf16.mxu0 %v6377_v38  ;;  %4703 = vmatprep.subr.bf16.mxu1 %v6380_v39  ;;  %v6420_v38 = vld [vmem:[%s7742_s5 + $0x498] ss:$80 sps:$4 sm:$0xff]   ;;  %v6425_v39 = vld [vmem:[%s7742_s5 + $0x534] ss:$80 sps:$4 sm:$0xff]  }
 0x22c   : > { %4531 = vmatmul.mubr.bf16.vlgmr.msra.gmra.mrb[8].mxu0 %v7866_v19  ;;  %4613 = vmatmul.mubr.bf16.vlgmr.msra.gmra.mrb[8].mxu1 %v7866_v19 }
 0x22d   : > { %4622 = vmatpush1.bf16.msra.mxu0 %v6375_v41  ;;  %4704 = vmatpush1.bf16.msra.mxu1 %v6378_v42  ;;  %v6428_v41 = vld [vmem:[%s7742_s5 + $0x53c] ss:$80 sps:$4 sm:$0xff]  }
 0x22e   : > { %4623 = vmatprep.subr.bf16.mxu0 %v6383_v43  ;;  %4705 = vmatprep.subr.bf16.mxu1 %v6386_v45  ;;  %v6423_v43 = vld [vmem:[%s7742_s5 + $0x530] ss:$80 sps:$4 sm:$0xff]   ;;  %v6426_v45 = vld [vmem:[%s7742_s5 + $0x538] ss:$80 sps:$4 sm:$0xff]  }
 0x22f   : > { %4653 = vmatprep.mubr.bf16.mxu0 %v7765_v53  ;;  %4735 = vmatprep.mubr.bf16.mxu1 %v7765_v53 }
 0x231   : > { %4624 = vmatpush1.bf16.msra.mxu0 %v6381_v46  ;;  %4706 = vmatpush1.bf16.msra.mxu1 %v6384_v47  ;;  %v6431_v46 = vld [vmem:[%s7742_s5 + $0x5d4] ss:$80 sps:$4 sm:$0xff]   ;;  %v6434_v47 = vld [vmem:[%s7742_s5 + $0x5dc] ss:$80 sps:$4 sm:$0xff]  }
 0x232   : > { %4625 = vmatprep.subr.bf16.mxu0 %v6389_v48  ;;  %4707 = vmatprep.subr.bf16.mxu1 %v6392_v49  ;;  %v6429_v49 = vld [vmem:[%s7742_s5 + $0x5d0] ss:$80 sps:$4 sm:$0xff]  }
 0x235   : > { %4626 = vmatpush1.bf16.msra.mxu0 %v6387_v51  ;;  %4708 = vmatpush1.bf16.msra.mxu1 %v6390_v52  ;;  %v6432_v51 = vld [vmem:[%s7742_s5 + $0x5d8] ss:$80 sps:$4 sm:$0xff]   ;;  %v6437_v52 = vld [vmem:[%s7742_s5 + $0x674] ss:$80 sps:$4 sm:$0xff]  }
 0x236   : > { %4627 = vmatprep.subr.bf16.mxu0 %v6395_v54  ;;  %4709 = vmatprep.subr.bf16.mxu1 %v6398_v55  ;;  %v6440_v54 = vld [vmem:[%s7742_s5 + $0x67c] ss:$80 sps:$4 sm:$0xff]   ;;  %v6435_v55 = vld [vmem:[%s7742_s5 + $0x670] ss:$80 sps:$4 sm:$0xff]  }
 0x239   : > { %4628 = vmatpush1.bf16.msra.mxu0 %v6393_v44  ;;  %4710 = vmatpush1.bf16.msra.mxu1 %v6396_v59  ;;  %v6438_v44 = vld [vmem:[%s7742_s5 + $0x678] ss:$80 sps:$4 sm:$0xff]   ;;  %v6443_v59 = vld [vmem:[%s7742_s5 + $0x714] ss:$80 sps:$4 sm:$0xff]  }
 0x23a   : > { %4629 = vmatprep.subr.bf16.mxu0 %v6401_v63  ;;  %4711 = vmatprep.subr.bf16.mxu1 %v6404_v0  ;;  %v6446_v63 = vld [vmem:[%s7742_s5 + $0x71c] ss:$80 sps:$4 sm:$0xff]   ;;  %v6441_v0 = vld [vmem:[%s7742_s5 + $0x710] ss:$80 sps:$4 sm:$0xff]  }
 0x23d   : > { %4630 = vmatpush1.bf16.msra.mxu0 %v6399_v3  ;;  %4712 = vmatpush1.bf16.msra.mxu1 %v6402_v4  ;;  %v6452_v3 = vld [vmem:[%s7742_s5 + $0x7bc] ss:$80 sps:$4 sm:$0xff]   ;;  %v6447_v4 = vld [vmem:[%s7742_s5 + $0x7b0] ss:$80 sps:$4 sm:$0xff]  }
 0x23e   : > { %4631 = vmatprep.subr.bf16.mxu0 %v6407_v7  ;;  %4713 = vmatprep.subr.bf16.mxu1 %v6410_v8  ;;  %v6458_v7 = vld [vmem:[%s7742_s5 + $0x85c] ss:$80 sps:$4 sm:$0xff]   ;;  %v6453_v8 = vld [vmem:[%s7742_s5 + $0x850] ss:$80 sps:$4 sm:$0xff]  }
 0x23f   : > { %v4204_v15 = vpop.f32.mrb[0].mxu0  ;;  %v4286_v16 = vpop.f32.mrb[0].mxu1 }
 0x240   : > { %v4206_v17 = vpop.f32.mrb[1].mxu0  ;;  %v4288_v18 = vpop.f32.mrb[1].mxu1 }
 0x241   : > { %v4969_v20 = vcombine.low %v4204_v15, %v4206_v17  ;;  %v4970_v21 = vcombine.low %v4286_v16, %v4288_v18  ;;  %v4208_v23 = vpop.f32.mrb[2].mxu0  ;;  %v4290_v24 = vpop.f32.mrb[2].mxu1  ;;  %4632 = vmatpush1.bf16.msra.mxu0 %v6405_v11  ;;  %4714 = vmatpush1.bf16.msra.mxu1 %v6408_v12  ;;  %v6464_v11 = vld [vmem:[%s7742_s5 + $0x8fc] ss:$80 sps:$4 sm:$0xff]   ;;  %v6459_v12 = vld [vmem:[%s7742_s5 + $0x8f0] ss:$80 sps:$4 sm:$0xff]  }
 0x242   : > { %v4209_v27 = vpop.f32.mrb[3].mxu0  ;;  %v4291_v28 = vpop.f32.mrb[3].mxu1  ;;  %4633 = vmatprep.subr.bf16.mxu0 %v6413_v13  ;;  %4715 = vmatprep.subr.bf16.mxu1 %v6416_v14  ;;  %v6462_v13 = vld [vmem:[%s7742_s5 + $0x8f8] ss:$80 sps:$4 sm:$0xff]   ;;  %v6467_v14 = vld [vmem:[%s7742_s5 + $0x994] ss:$80 sps:$4 sm:$0xff]  }
 0x243   : > { %v4977_v31 = vrot.slane %v4969_v20, %v7747_v40  ;;  %v4984_v32 = vrot.slane %v4970_v21, %v7747_v40  ;;  %v6470_v15 = vld [vmem:[%s7742_s5 + $0x99c] ss:$80 sps:$4 sm:$0xff]   ;;  %v6465_v16 = vld [vmem:[%s7742_s5 + $0x990] ss:$80 sps:$4 sm:$0xff]   ;;  %v6468_v17 = vld [vmem:[%s7742_s5 + $0x998] ss:$80 sps:$4 sm:$0xff]  }
 0x244   : > { %v6473_v18 = vld [vmem:[%s7742_s5 + $0xa34] ss:$80 sps:$4 sm:$0xff]   ;;  %v6471_v20 = vld [vmem:[%s7742_s5 + $0xa30] ss:$80 sps:$4 sm:$0xff]   ;;  %v6474_v21 = vld [vmem:[%s7742_s5 + $0xa38] ss:$80 sps:$4 sm:$0xff]  }
 0x245   : > { %v4985_v33 = vcombine.low %v4977_v31, %v4984_v32  ;;  %4634 = vmatpush1.bf16.msra.mxu0 %v6411_v25  ;;  %4716 = vmatpush1.bf16.msra.mxu1 %v6414_v26  ;;  %v6482_v23 = vld [vmem:[%s7742_s5 + $0xadc] ss:$80 sps:$4 sm:$0xff]   ;;  %v6477_v24 = vld [vmem:[%s7742_s5 + $0xad0] ss:$80 sps:$4 sm:$0xff]   ;;  %v6480_v25 = vld [vmem:[%s7742_s5 + $0xad8] ss:$80 sps:$4 sm:$0xff]  }
 0x246   : > { %4635 = vmatprep.subr.bf16.mxu0 %v6419_v29  ;;  %4717 = vmatprep.subr.bf16.mxu1 %v6422_v30  ;;  %v6485_v26 = vld [vmem:[%s7742_s5 + $0xb74] ss:$80 sps:$4 sm:$0xff]   ;;  %v6488_v27 = vld [vmem:[%s7742_s5 + $0xb7c] ss:$80 sps:$4 sm:$0xff]   ;;  %v6483_v28 = vld [vmem:[%s7742_s5 + $0xb70] ss:$80 sps:$4 sm:$0xff]  }
 0x247   : > { %v5253_v42 = vadd.f32 %v5179_v34, %v4985_v33  ;;  %v6486_v29 = vld [vmem:[%s7742_s5 + $0xb78] ss:$80 sps:$4 sm:$0xff]   ;;  %v6491_v30 = vld [vmem:[%s7742_s5 + $0xc14] ss:$80 sps:$4 sm:$0xff]   ;;  %v6494_v31 = vld [vmem:[%s7742_s5 + $0xc1c] ss:$80 sps:$4 sm:$0xff]  }
 0x248   : > { %v6489_v32 = vld [vmem:[%s7742_s5 + $0xc10] ss:$80 sps:$4 sm:$0xff]   ;;  %v6492_v33 = vld [vmem:[%s7742_s5 + $0xc18] ss:$80 sps:$4 sm:$0xff]   ;;  %v6497_v34 = vld [vmem:[%s7742_s5 + $0xcb4] ss:$80 sps:$4 sm:$0xff]  }
 0x249   : > { %4636 = vmatpush1.bf16.msra.mxu0 %v6417_v37  ;;  %4718 = vmatpush1.bf16.msra.mxu1 %v6420_v38  ;;  %v5258_v48 = vmax.f32 %v5253_v42, 0.0  ;;  %v6500_v37 = vld [vmem:[%s7742_s5 + $0xcbc] ss:$80 sps:$4 sm:$0xff]   ;;  %v6495_v38 = vld [vmem:[%s7742_s5 + $0xcb0] ss:$80 sps:$4 sm:$0xff]  }
 0x24a   : > { %4637 = vmatprep.subr.bf16.mxu0 %v6425_v39  ;;  %4719 = vmatprep.subr.bf16.mxu1 %v6428_v41  ;;  %v6498_v39 = vld [vmem:[%s7742_s5 + $0xcb8] ss:$80 sps:$4 sm:$0xff]   ;;  %v6503_v41 = vld [vmem:[%s7742_s5 + $0xd54] ss:$80 sps:$4 sm:$0xff]   ;;  %v6506_v42 = vld [vmem:[%s7742_s5 + $0xd5c] ss:$80 sps:$4 sm:$0xff]  }
 0x24b   : > { %5263 = vst [vmem:[%s8154_s14] sm:$0xff] %v5258_v48  ;;  %v6507_v48 = vld [vmem:[%s7742_s5 + $0xdf0] ss:$80 sps:$4 sm:$0xff]  }
 0x24d   : > { %4638 = vmatpush1.bf16.msra.mxu0 %v6423_v43  ;;  %4720 = vmatpush1.bf16.msra.mxu1 %v6426_v45  ;;  %v6501_v43 = vld [vmem:[%s7742_s5 + $0xd50] ss:$80 sps:$4 sm:$0xff]   ;;  %v6504_v45 = vld [vmem:[%s7742_s5 + $0xd58] ss:$80 sps:$4 sm:$0xff]  }
 0x24e   : > { %4639 = vmatprep.subr.bf16.mxu0 %v6431_v46  ;;  %4721 = vmatprep.subr.bf16.mxu1 %v6434_v47  ;;  %v6509_v46 = vld [vmem:[%s7742_s5 + $0xdf4] ss:$80 sps:$4 sm:$0xff]   ;;  %v6512_v47 = vld [vmem:[%s7742_s5 + $0xdfc] ss:$80 sps:$4 sm:$0xff]  }
 0x251   : > { %4640 = vmatpush1.bf16.msra.mxu0 %v6429_v49  ;;  %4722 = vmatpush1.bf16.msra.mxu1 %v6432_v51  ;;  %v6510_v49 = vld [vmem:[%s7742_s5 + $0xdf8] ss:$80 sps:$4 sm:$0xff]   ;;  %v6515_v51 = vld [vmem:[%s7742_s5 + $0xe94] ss:$80 sps:$4 sm:$0xff]  }
 0x252   : > { %4641 = vmatprep.subr.bf16.mxu0 %v6437_v52  ;;  %4723 = vmatprep.subr.bf16.mxu1 %v6440_v54  ;;  %v6518_v52 = vld [vmem:[%s7742_s5 + $0xe9c] ss:$80 sps:$4 sm:$0xff]   ;;  %v6513_v54 = vld [vmem:[%s7742_s5 + $0xe90] ss:$80 sps:$4 sm:$0xff]  }
 0x255   : > { %4642 = vmatpush1.bf16.msra.mxu0 %v6435_v55  ;;  %4724 = vmatpush1.bf16.msra.mxu1 %v6438_v44  ;;  %v6516_v55 = vld [vmem:[%s7742_s5 + $0xe98] ss:$80 sps:$4 sm:$0xff]   ;;  %v6521_v44 = vld [vmem:[%s7742_s5 + $0x44] ss:$80 sps:$4 sm:$0xff]  }
 0x256   : > { %4643 = vmatprep.subr.bf16.mxu0 %v6443_v59  ;;  %4725 = vmatprep.subr.bf16.mxu1 %v6446_v63  ;;  %v6524_v59 = vld [vmem:[%s7742_s5 + $0x4c] ss:$80 sps:$4 sm:$0xff]   ;;  %v6519_v63 = vld [vmem:[%s7742_s5 + $0x40] ss:$80 sps:$4 sm:$0xff]  }
 0x259   : > { %4644 = vmatpush1.bf16.msra.mxu0 %v6441_v0  ;;  %4726 = vmatpush1.bf16.msra.mxu1 %v6444_v1  ;;  %v6522_v0 = vld [vmem:[%s7742_s5 + $0x48] ss:$80 sps:$4 sm:$0xff]   ;;  %v6527_v1 = vld [vmem:[%s7742_s5 + $0xe4] ss:$80 sps:$4 sm:$0xff]  }
 0x25a   : > { %4645 = vmatprep.subr.bf16.mxu0 %v6449_v2  ;;  %4727 = vmatprep.subr.bf16.mxu1 %v6452_v3  ;;  %v6530_v2 = vld [vmem:[%s7742_s5 + $0xec] ss:$80 sps:$4 sm:$0xff]   ;;  %v6525_v3 = vld [vmem:[%s7742_s5 + $0xe0] ss:$80 sps:$4 sm:$0xff]  }
 0x25d   : > { %4646 = vmatpush1.bf16.msra.mxu0 %v6447_v4  ;;  %4728 = vmatpush1.bf16.msra.mxu1 %v6450_v5  ;;  %v6528_v4 = vld [vmem:[%s7742_s5 + $0xe8] ss:$80 sps:$4 sm:$0xff]   ;;  %v6533_v5 = vld [vmem:[%s7742_s5 + $0x184] ss:$80 sps:$4 sm:$0xff]  }
 0x25e   : > { %4647 = vmatprep.subr.bf16.mxu0 %v6455_v6  ;;  %4729 = vmatprep.subr.bf16.mxu1 %v6458_v7  ;;  %v6536_v6 = vld [vmem:[%s7742_s5 + $0x18c] ss:$80 sps:$4 sm:$0xff]   ;;  %v6531_v7 = vld [vmem:[%s7742_s5 + $0x180] ss:$80 sps:$4 sm:$0xff]  }
 0x261   : > { %4648 = vmatpush1.bf16.msra.mxu0 %v6453_v8  ;;  %4730 = vmatpush1.bf16.msra.mxu1 %v6456_v9  ;;  %v6534_v8 = vld [vmem:[%s7742_s5 + $0x188] ss:$80 sps:$4 sm:$0xff]   ;;  %v6539_v9 = vld [vmem:[%s7742_s5 + $0x224] ss:$80 sps:$4 sm:$0xff]  }
 0x262   : > { %4649 = vmatprep.subr.bf16.mxu0 %v6461_v10  ;;  %4731 = vmatprep.subr.bf16.mxu1 %v6464_v11  ;;  %v6542_v10 = vld [vmem:[%s7742_s5 + $0x22c] ss:$80 sps:$4 sm:$0xff]   ;;  %v5101_v11 = vsub.s32 4, %v7735_v35 }
 0x265   : > { %4650 = vmatpush1.bf16.msra.mxu0 %v6459_v12  ;;  %4732 = vmatpush1.bf16.msra.mxu1 %v6462_v13  ;;  %v5105_v12 = vsub.s32 5, %v7735_v35  ;;  %v6537_v13 = vld [vmem:[%s7742_s5 + $0x220] ss:$80 sps:$4 sm:$0xff]  }
 0x266   : > { %4651 = vmatprep.subr.bf16.mxu0 %v6467_v14  ;;  %4733 = vmatprep.subr.bf16.mxu1 %v6470_v15  ;;  %v5109_v14 = vsub.s32 6, %v7735_v35  ;;  %v5113_v15 = vsub.s32 7, %v7735_v35 }
 0x269   : > { %4652 = vmatpush1.bf16.msra.mxu0 %v6465_v16  ;;  %4734 = vmatpush1.bf16.msra.mxu1 %v6468_v17  ;;  %v6545_v16 = vld [vmem:[%s7742_s5 + $0x2c4] ss:$80 sps:$4 sm:$0xff]   ;;  %v6548_v17 = vld [vmem:[%s7742_s5 + $0x2cc] ss:$80 sps:$4 sm:$0xff]  }
 0x26a   : > { %4662 = vmatprep.subr.bf16.mxu0 %v6473_v18  ;;  %4744 = vmatprep.subr.bf16.mxu1 %v6476_v36  ;;  %v5102_v18 = vrot.slane %v8110_v60, %v5101_v11  ;;  %v5106_v36 = vrot.slane %v8110_v60, %v5105_v12 }
 0x26c   : > { %4654 = vmatmul.mubr.bf16.vlgmr.msra.gmra.mrb[12].mxu0 %v7827_v50  ;;  %4736 = vmatmul.mubr.bf16.vlgmr.msra.gmra.mrb[12].mxu1 %v7827_v50 }
 0x26d   : > { %4663 = vmatpush1.bf16.msra.mxu0 %v6471_v20  ;;  %4745 = vmatpush1.bf16.msra.mxu1 %v6474_v21  ;;  %v6543_v20 = vld [vmem:[%s7742_s5 + $0x2c0] ss:$80 sps:$4 sm:$0xff]   ;;  %v6546_v21 = vld [vmem:[%s7742_s5 + $0x2c8] ss:$80 sps:$4 sm:$0xff]  }
 0x26e   : > { %4664 = vmatprep.subr.bf16.mxu0 %v6479_v22  ;;  %4746 = vmatprep.subr.bf16.mxu1 %v6482_v23  ;;  %v5110_v22 = vrot.slane %v8110_v60, %v5109_v14  ;;  %v5114_v23 = vrot.slane %v8110_v60, %v5113_v15 }
 0x26f   : > { %4694 = vmatprep.mubr.bf16.mxu0 %v6704_v57  ;;  %4776 = vmatprep.mubr.bf16.mxu1 %v6704_v57 }
 0x271   : > { %4665 = vmatpush1.bf16.msra.mxu0 %v6477_v24  ;;  %4747 = vmatpush1.bf16.msra.mxu1 %v6480_v25  ;;  %v6551_v24 = vld [vmem:[%s7742_s5 + $0x364] ss:$80 sps:$4 sm:$0xff]   ;;  %v6554_v25 = vld [vmem:[%s7742_s5 + $0x36c] ss:$80 sps:$4 sm:$0xff]  }
 0x272   : > { %4666 = vmatprep.subr.bf16.mxu0 %v6485_v26  ;;  %4748 = vmatprep.subr.bf16.mxu1 %v6488_v27  ;;  %v5180_v26 = vcombine.low %v5102_v18, %v5106_v36  ;;  %v5181_v27 = vcombine.low %v5110_v22, %v5114_v23  ;;  %v6590_v18 = vld [vmem:[%s7742_s5 + $0x72c] ss:$80 sps:$4 sm:$0xff]   ;;  %v6585_v36 = vld [vmem:[%s7742_s5 + $0x720] ss:$80 sps:$4 sm:$0xff]  }
 0x273   : > { %v6596_v22 = vld [vmem:[%s7742_s5 + $0x7cc] ss:$80 sps:$4 sm:$0xff]   ;;  %v6591_v23 = vld [vmem:[%s7742_s5 + $0x7c0] ss:$80 sps:$4 sm:$0xff]  }
 0x275   : > { %4667 = vmatpush1.bf16.msra.mxu0 %v6483_v28  ;;  %4749 = vmatpush1.bf16.msra.mxu1 %v6486_v29  ;;  %v6549_v28 = vld [vmem:[%s7742_s5 + $0x360] ss:$80 sps:$4 sm:$0xff]   ;;  %v6552_v29 = vld [vmem:[%s7742_s5 + $0x368] ss:$80 sps:$4 sm:$0xff]  }
 0x276   : > { %4668 = vmatprep.subr.bf16.mxu0 %v6491_v30  ;;  %4750 = vmatprep.subr.bf16.mxu1 %v6494_v31  ;;  %v6557_v30 = vld [vmem:[%s7742_s5 + $0x404] ss:$80 sps:$4 sm:$0xff]   ;;  %v6560_v31 = vld [vmem:[%s7742_s5 + $0x40c] ss:$80 sps:$4 sm:$0xff]  }
 0x279   : > { %4669 = vmatpush1.bf16.msra.mxu0 %v6489_v32  ;;  %4751 = vmatpush1.bf16.msra.mxu1 %v6492_v33 }
 0x27a   : > { %4670 = vmatprep.subr.bf16.mxu0 %v6497_v34  ;;  %4752 = vmatprep.subr.bf16.mxu1 %v6500_v37  ;;  %v5188_v37 = vrot.slane %v5180_v26, %v7747_v40  ;;  %v6602_v26 = vld [vmem:[%s7742_s5 + $0x86c] ss:$80 sps:$4 sm:$0xff]  }
 0x27d   : > { %4671 = vmatpush1.bf16.msra.mxu0 %v6495_v38  ;;  %4753 = vmatpush1.bf16.msra.mxu1 %v6498_v39 }
 0x27e   : > { %4672 = vmatprep.subr.bf16.mxu0 %v6503_v41  ;;  %4754 = vmatprep.subr.bf16.mxu1 %v6506_v42  ;;  %v5195_v41 = vrot.slane %v5181_v27, %v7747_v40  ;;  %v6597_v27 = vld [vmem:[%s7742_s5 + $0x860] ss:$80 sps:$4 sm:$0xff]  }
 0x281   : > { %4673 = vmatpush1.bf16.msra.mxu0 %v6501_v43  ;;  %4755 = vmatpush1.bf16.msra.mxu1 %v6504_v45  ;;  %v6555_v45 = vld [vmem:[%s7742_s5 + $0x400] ss:$80 sps:$4 sm:$0xff]  }
 0x282   : > { %4674 = vmatprep.subr.bf16.mxu0 %v6509_v46  ;;  %4756 = vmatprep.subr.bf16.mxu1 %v6512_v47  ;;  %v6558_v46 = vld [vmem:[%s7742_s5 + $0x408] ss:$80 sps:$4 sm:$0xff]  }
 0x285   : > { %4675 = vmatpush1.bf16.msra.mxu0 %v6507_v48  ;;  %4757 = vmatpush1.bf16.msra.mxu1 %v6510_v49  ;;  %v6563_v49 = vld [vmem:[%s7742_s5 + $0x4a4] ss:$80 sps:$4 sm:$0xff]  }
 0x286   : > { %4676 = vmatprep.subr.bf16.mxu0 %v6515_v51  ;;  %4758 = vmatprep.subr.bf16.mxu1 %v6518_v52  ;;  %v6566_v51 = vld [vmem:[%s7742_s5 + $0x4ac] ss:$80 sps:$4 sm:$0xff]  }
 0x289   : > { %4677 = vmatpush1.bf16.msra.mxu0 %v6513_v54  ;;  %4759 = vmatpush1.bf16.msra.mxu1 %v6516_v55 }
 0x28a   : > { %4785 = vmatprep.subr.bf16.mxu0 %v6521_v44  ;;  %4867 = vmatprep.subr.bf16.mxu1 %v6524_v59  ;;  %v5196_v44 = vcombine.low %v5188_v37, %v5195_v41  ;;  %v6561_v59 = vld [vmem:[%s7742_s5 + $0x4a0] ss:$80 sps:$4 sm:$0xff]   ;;  %v6612_v37 = vld [vmem:[%s7742_s5 + $0x9a8] ss:$80 sps:$4 sm:$0xff]  }
 0x28b   : > { %v6615_v41 = vld [vmem:[%s7742_s5 + $0xa40] ss:$80 sps:$4 sm:$0xff]  }
 0x28c   : > { %4695 = vmatmul.mubr.bf16.vlgmr.msra.gmra.mrb[12].mxu0 %v7866_v19  ;;  %4777 = vmatmul.mubr.bf16.vlgmr.msra.gmra.mrb[12].mxu1 %v7866_v19 }
 0x28d   : > { %4786 = vmatpush1.bf16.msra.mxu0 %v6519_v63  ;;  %4868 = vmatpush1.bf16.msra.mxu1 %v6522_v0  ;;  %v6564_v63 = vld [vmem:[%s7742_s5 + $0x4a8] ss:$80 sps:$4 sm:$0xff]   ;;  %v6569_v0 = vld [vmem:[%s7742_s5 + $0x544] ss:$80 sps:$4 sm:$0xff]  }
 0x28e   : > { %4787 = vmatprep.subr.bf16.mxu0 %v6527_v1  ;;  %4869 = vmatprep.subr.bf16.mxu1 %v6530_v2  ;;  %v6572_v1 = vld [vmem:[%s7742_s5 + $0x54c] ss:$80 sps:$4 sm:$0xff]  }
 0x28f   : > { %4817 = vmatprep.mubr.bf16.mxu0 %v7765_v53  ;;  %4899 = vmatprep.mubr.bf16.mxu1 %v7765_v53  ;;  %v6540_v53 = vld [vmem:[%s7742_s5 + $0x228] ss:$80 sps:$4 sm:$0xff]  }
 0x291   : > { %4788 = vmatpush1.bf16.msra.mxu0 %v6525_v3  ;;  %4870 = vmatpush1.bf16.msra.mxu1 %v6528_v4  ;;  %v6567_v3 = vld [vmem:[%s7742_s5 + $0x540] ss:$80 sps:$4 sm:$0xff]   ;;  %v6570_v4 = vld [vmem:[%s7742_s5 + $0x548] ss:$80 sps:$4 sm:$0xff]  }
 0x292   : > { %4789 = vmatprep.subr.bf16.mxu0 %v6533_v5  ;;  %4871 = vmatprep.subr.bf16.mxu1 %v6536_v6  ;;  %v6575_v5 = vld [vmem:[%s7742_s5 + $0x5e4] ss:$80 sps:$4 sm:$0xff]   ;;  %v6578_v6 = vld [vmem:[%s7742_s5 + $0x5ec] ss:$80 sps:$4 sm:$0xff]  }
 0x295   : > { %4790 = vmatpush1.bf16.msra.mxu0 %v6531_v7  ;;  %4872 = vmatpush1.bf16.msra.mxu1 %v6534_v8  ;;  %v6573_v8 = vld [vmem:[%s7742_s5 + $0x5e0] ss:$80 sps:$4 sm:$0xff]  }
 0x296   : > { %4791 = vmatprep.subr.bf16.mxu0 %v6539_v9  ;;  %4873 = vmatprep.subr.bf16.mxu1 %v6542_v10  ;;  %v6576_v9 = vld [vmem:[%s7742_s5 + $0x5e8] ss:$80 sps:$4 sm:$0xff]   ;;  %v6581_v10 = vld [vmem:[%s7742_s5 + $0x684] ss:$80 sps:$4 sm:$0xff]  }
 0x299   : > { %4792 = vmatpush1.bf16.msra.mxu0 %v6537_v13  ;;  %4874 = vmatpush1.bf16.msra.mxu1 %v6540_v53  ;;  %v6584_v13 = vld [vmem:[%s7742_s5 + $0x68c] ss:$80 sps:$4 sm:$0xff]   ;;  %v6579_v53 = vld [vmem:[%s7742_s5 + $0x680] ss:$80 sps:$4 sm:$0xff]  }
 0x29a   : > { %4793 = vmatprep.subr.bf16.mxu0 %v6545_v16  ;;  %4875 = vmatprep.subr.bf16.mxu1 %v6548_v17  ;;  %v6582_v16 = vld [vmem:[%s7742_s5 + $0x688] ss:$80 sps:$4 sm:$0xff]   ;;  %v6587_v17 = vld [vmem:[%s7742_s5 + $0x724] ss:$80 sps:$4 sm:$0xff]  }
 0x29d   : > { %4794 = vmatpush1.bf16.msra.mxu0 %v6543_v20  ;;  %4876 = vmatpush1.bf16.msra.mxu1 %v6546_v21  ;;  %v6588_v20 = vld [vmem:[%s7742_s5 + $0x728] ss:$80 sps:$4 sm:$0xff]   ;;  %v6593_v21 = vld [vmem:[%s7742_s5 + $0x7c4] ss:$80 sps:$4 sm:$0xff]  }
 0x29e   : > { %4795 = vmatprep.subr.bf16.mxu0 %v6551_v24  ;;  %4877 = vmatprep.subr.bf16.mxu1 %v6554_v25  ;;  %v6594_v24 = vld [vmem:[%s7742_s5 + $0x7c8] ss:$80 sps:$4 sm:$0xff]   ;;  %v6599_v25 = vld [vmem:[%s7742_s5 + $0x864] ss:$80 sps:$4 sm:$0xff]  }
 0x29f   : > { %v4368_v32 = vpop.f32.mrb[4].mxu0  ;;  %v4450_v33 = vpop.f32.mrb[4].mxu1 }
 0x2a0   : > { %v4370_v34 = vpop.f32.mrb[5].mxu0  ;;  %v4452_v60 = vpop.f32.mrb[5].mxu1 }
 0x2a1   : > { %v4986_v38 = vcombine.low %v4368_v32, %v4370_v34  ;;  %v4987_v39 = vcombine.low %v4450_v33, %v4452_v60  ;;  %v4372_v42 = vpop.f32.mrb[6].mxu0  ;;  %v4454_v43 = vpop.f32.mrb[6].mxu1  ;;  %4796 = vmatpush1.bf16.msra.mxu0 %v6549_v28  ;;  %4878 = vmatpush1.bf16.msra.mxu1 %v6552_v29  ;;  %v6600_v28 = vld [vmem:[%s7742_s5 + $0x868] ss:$80 sps:$4 sm:$0xff]   ;;  %v6605_v29 = vld [vmem:[%s7742_s5 + $0x904] ss:$80 sps:$4 sm:$0xff]  }
 0x2a2   : > { %v4373_v47 = vpop.f32.mrb[7].mxu0  ;;  %v4455_v48 = vpop.f32.mrb[7].mxu1  ;;  %4797 = vmatprep.subr.bf16.mxu0 %v6557_v30  ;;  %4879 = vmatprep.subr.bf16.mxu1 %v6560_v31  ;;  %v6608_v30 = vld [vmem:[%s7742_s5 + $0x90c] ss:$80 sps:$4 sm:$0xff]   ;;  %v6603_v31 = vld [vmem:[%s7742_s5 + $0x900] ss:$80 sps:$4 sm:$0xff]  }
 0x2a3   : > { %v4994_v52 = vrot.slane %v4986_v38, %v7747_v40  ;;  %v5001_v54 = vrot.slane %v4987_v39, %v7747_v40  ;;  %v6606_v32 = vld [vmem:[%s7742_s5 + $0x908] ss:$80 sps:$4 sm:$0xff]   ;;  %v6611_v33 = vld [vmem:[%s7742_s5 + $0x9a4] ss:$80 sps:$4 sm:$0xff]   ;;  %v6614_v34 = vld [vmem:[%s7742_s5 + $0x9ac] ss:$80 sps:$4 sm:$0xff]  }
 0x2a4   : > { %v6609_v60 = vld [vmem:[%s7742_s5 + $0x9a0] ss:$80 sps:$4 sm:$0xff]   ;;  %v6617_v38 = vld [vmem:[%s7742_s5 + $0xa44] ss:$80 sps:$4 sm:$0xff]   ;;  %v6620_v39 = vld [vmem:[%s7742_s5 + $0xa4c] ss:$80 sps:$4 sm:$0xff]  }
 0x2a5   : > { %v5002_v55 = vcombine.low %v4994_v52, %v5001_v54  ;;  %4798 = vmatpush1.bf16.msra.mxu0 %v6555_v45  ;;  %4880 = vmatpush1.bf16.msra.mxu1 %v6558_v46  ;;  %v6618_v42 = vld [vmem:[%s7742_s5 + $0xa48] ss:$80 sps:$4 sm:$0xff]   ;;  %v6623_v43 = vld [vmem:[%s7742_s5 + $0xae4] ss:$80 sps:$4 sm:$0xff]   ;;  %v6626_v45 = vld [vmem:[%s7742_s5 + $0xaec] ss:$80 sps:$4 sm:$0xff]  }
 0x2a6   : > { %4799 = vmatprep.subr.bf16.mxu0 %v6563_v49  ;;  %4881 = vmatprep.subr.bf16.mxu1 %v6566_v51  ;;  %v6621_v46 = vld [vmem:[%s7742_s5 + $0xae0] ss:$80 sps:$4 sm:$0xff]   ;;  %v6624_v47 = vld [vmem:[%s7742_s5 + $0xae8] ss:$80 sps:$4 sm:$0xff]   ;;  %v6629_v48 = vld [vmem:[%s7742_s5 + $0xb84] ss:$80 sps:$4 sm:$0xff]  }
 0x2a7   : > { %v5254_v2 = vadd.f32 %v5196_v44, %v5002_v55  ;;  %v6632_v49 = vld [vmem:[%s7742_s5 + $0xb8c] ss:$80 sps:$4 sm:$0xff]   ;;  %v6630_v51 = vld [vmem:[%s7742_s5 + $0xb88] ss:$80 sps:$4 sm:$0xff]   ;;  %v6635_v52 = vld [vmem:[%s7742_s5 + $0xc24] ss:$80 sps:$4 sm:$0xff]  }
 0x2a8   : > { %v6638_v54 = vld [vmem:[%s7742_s5 + $0xc2c] ss:$80 sps:$4 sm:$0xff]   ;;  %v6633_v55 = vld [vmem:[%s7742_s5 + $0xc20] ss:$80 sps:$4 sm:$0xff]   ;;  %v6636_v44 = vld [vmem:[%s7742_s5 + $0xc28] ss:$80 sps:$4 sm:$0xff]  }
 0x2a9   : > { %4800 = vmatpush1.bf16.msra.mxu0 %v6561_v59  ;;  %4882 = vmatpush1.bf16.msra.mxu1 %v6564_v63  ;;  %v5259_v7 = vmax.f32 %v5254_v2, 0.0  ;;  %v6644_v59 = vld [vmem:[%s7742_s5 + $0xccc] ss:$80 sps:$4 sm:$0xff]   ;;  %v6639_v63 = vld [vmem:[%s7742_s5 + $0xcc0] ss:$80 sps:$4 sm:$0xff]  }
 0x2aa   : > { %4801 = vmatprep.subr.bf16.mxu0 %v6569_v0  ;;  %4883 = vmatprep.subr.bf16.mxu1 %v6572_v1  ;;  %v6642_v0 = vld [vmem:[%s7742_s5 + $0xcc8] ss:$80 sps:$4 sm:$0xff]   ;;  %v6647_v1 = vld [vmem:[%s7742_s5 + $0xd64] ss:$80 sps:$4 sm:$0xff]   ;;  %v6650_v2 = vld [vmem:[%s7742_s5 + $0xd6c] ss:$80 sps:$4 sm:$0xff]  }
 0x2ab   : > { %5264 = vst [vmem:[%s8154_s14 + $0x8] sm:$0xff] %v5259_v7  ;;  %v6651_v7 = vld [vmem:[%s7742_s5 + $0xe00] ss:$80 sps:$4 sm:$0xff]  }
 0x2ad   : > { %4802 = vmatpush1.bf16.msra.mxu0 %v6567_v3  ;;  %4884 = vmatpush1.bf16.msra.mxu1 %v6570_v4  ;;  %v6645_v3 = vld [vmem:[%s7742_s5 + $0xd60] ss:$80 sps:$4 sm:$0xff]   ;;  %v6648_v4 = vld [vmem:[%s7742_s5 + $0xd68] ss:$80 sps:$4 sm:$0xff]  }
 0x2ae   : > { %4803 = vmatprep.subr.bf16.mxu0 %v6575_v5  ;;  %4885 = vmatprep.subr.bf16.mxu1 %v6578_v6  ;;  %v6653_v5 = vld [vmem:[%s7742_s5 + $0xe04] ss:$80 sps:$4 sm:$0xff]   ;;  %v6656_v6 = vld [vmem:[%s7742_s5 + $0xe0c] ss:$80 sps:$4 sm:$0xff]  }
 0x2b1   : > { %4804 = vmatpush1.bf16.msra.mxu0 %v6573_v8  ;;  %4886 = vmatpush1.bf16.msra.mxu1 %v6576_v9  ;;  %v6654_v8 = vld [vmem:[%s7742_s5 + $0xe08] ss:$80 sps:$4 sm:$0xff]   ;;  %v6659_v9 = vld [vmem:[%s7742_s5 + $0xea4] ss:$80 sps:$4 sm:$0xff]  }
 0x2b2   : > { %4805 = vmatprep.subr.bf16.mxu0 %v6581_v10  ;;  %4887 = vmatprep.subr.bf16.mxu1 %v6584_v13  ;;  %v6662_v10 = vld [vmem:[%s7742_s5 + $0xeac] ss:$80 sps:$4 sm:$0xff]   ;;  %v6657_v13 = vld [vmem:[%s7742_s5 + $0xea0] ss:$80 sps:$4 sm:$0xff]  }
 0x2b5   : > { %4806 = vmatpush1.bf16.msra.mxu0 %v6579_v53  ;;  %4888 = vmatpush1.bf16.msra.mxu1 %v6582_v16  ;;  %v6660_v53 = vld [vmem:[%s7742_s5 + $0xea8] ss:$80 sps:$4 sm:$0xff]  }
 0x2b6   : > { %4807 = vmatprep.subr.bf16.mxu0 %v6587_v17  ;;  %4889 = vmatprep.subr.bf16.mxu1 %v6590_v18  ;;  %v5078_v16 = vld [vmem:[%s8099_s9 + $0x8] sm:$0xff] }
 0x2b7   : > { %v5118_v17 = vrot.slane %v5078_v16, %v8103_v56  ;;  %v5122_v18 = vrot.slane %v5078_v16, %v8106_v58 }
 0x2b9   : > { %4808 = vmatpush1.bf16.msra.mxu0 %v6585_v36  ;;  %4890 = vmatpush1.bf16.msra.mxu1 %v6588_v20  ;;  %v5126_v36 = vrot.slane %v5078_v16, %v8113_v61  ;;  %v5130_v20 = vrot.slane %v5078_v16, %v8116_v62 }
 0x2ba   : > { %4809 = vmatprep.subr.bf16.mxu0 %v6593_v21  ;;  %4891 = vmatprep.subr.bf16.mxu1 %v6596_v22  ;;  %v5197_v21 = vcombine.low %v5118_v17, %v5122_v18 }
 0x2bb   : > { %v5198_v22 = vcombine.low %v5126_v36, %v5130_v20 }
 0x2bd   : > { %4810 = vmatpush1.bf16.msra.mxu0 %v6591_v23  ;;  %4892 = vmatpush1.bf16.msra.mxu1 %v6594_v24 }
 0x2be   : > { %4811 = vmatprep.subr.bf16.mxu0 %v6599_v25  ;;  %4893 = vmatprep.subr.bf16.mxu1 %v6602_v26 }
 0x2c1   : > { %4812 = vmatpush1.bf16.msra.mxu0 %v6597_v27  ;;  %4894 = vmatpush1.bf16.msra.mxu1 %v6600_v28 }
 0x2c2   : > { %4813 = vmatprep.subr.bf16.mxu0 %v6605_v29  ;;  %4895 = vmatprep.subr.bf16.mxu1 %v6608_v30  ;;  %v5212_v29 = vrot.slane %v5198_v22, %v7747_v40 }
 0x2c5   : > { %4814 = vmatpush1.bf16.msra.mxu0 %v6603_v31  ;;  %4896 = vmatpush1.bf16.msra.mxu1 %v6606_v32 }
 0x2c6   : > { %4815 = vmatprep.subr.bf16.mxu0 %v6611_v33  ;;  %4897 = vmatprep.subr.bf16.mxu1 %v6614_v34 }
 0x2c9   : > { %4816 = vmatpush1.bf16.msra.mxu0 %v6609_v60  ;;  %4898 = vmatpush1.bf16.msra.mxu1 %v6612_v37 }
 0x2ca   : > { %4826 = vmatprep.subr.bf16.mxu0 %v6617_v38  ;;  %4908 = vmatprep.subr.bf16.mxu1 %v6620_v39 }
 0x2cc   : > { %4818 = vmatmul.mubr.bf16.vlgmr.msra.gmra.mrb[16].mxu0 %v7827_v50  ;;  %4900 = vmatmul.mubr.bf16.vlgmr.msra.gmra.mrb[16].mxu1 %v7827_v50  ;;  %v6627_v50 = vld [vmem:[%s7742_s5 + $0xb80] ss:$80 sps:$4 sm:$0xff]  }
 0x2cd   : > { %4827 = vmatpush1.bf16.msra.mxu0 %v6615_v41  ;;  %4909 = vmatpush1.bf16.msra.mxu1 %v6618_v42  ;;  %v5134_v42 = vrot.slane %v5078_v16, %v5101_v11 }
 0x2ce   : > { %4828 = vmatprep.subr.bf16.mxu0 %v6623_v43  ;;  %4910 = vmatprep.subr.bf16.mxu1 %v6626_v45  ;;  %v5138_v43 = vrot.slane %v5078_v16, %v5105_v12  ;;  %v5142_v45 = vrot.slane %v5078_v16, %v5109_v14 }
 0x2cf   : > { %4858 = vmatprep.mubr.bf16.mxu0 %v6704_v57  ;;  %4940 = vmatprep.mubr.bf16.mxu1 %v6704_v57  ;;  %v6641_v57 = vld [vmem:[%s7742_s5 + $0xcc4] ss:$80 sps:$4 sm:$0xff]  }
 0x2d1   : > { %4829 = vmatpush1.bf16.msra.mxu0 %v6621_v46  ;;  %4911 = vmatpush1.bf16.msra.mxu1 %v6624_v47  ;;  %v5146_v46 = vrot.slane %v5078_v16, %v5113_v15  ;;  %v5214_v47 = vcombine.low %v5134_v42, %v5138_v43 }
 0x2d2   : > { %4830 = vmatprep.subr.bf16.mxu0 %v6629_v48  ;;  %4912 = vmatprep.subr.bf16.mxu1 %v6632_v49 }
 0x2d3   : > { %v5215_v48 = vcombine.low %v5142_v45, %v5146_v46  ;;  %v5222_v11 = vrot.slane %v5214_v47, %v7747_v40 }
 0x2d5   : > { %4831 = vmatpush1.bf16.msra.mxu0 %v6627_v50  ;;  %4913 = vmatpush1.bf16.msra.mxu1 %v6630_v51  ;;  %v5229_v12 = vrot.slane %v5215_v48, %v7747_v40 }
 0x2d6   : > { %4832 = vmatprep.subr.bf16.mxu0 %v6635_v52  ;;  %4914 = vmatprep.subr.bf16.mxu1 %v6638_v54 }
 0x2d9   : > { %4833 = vmatpush1.bf16.msra.mxu0 %v6633_v55  ;;  %4915 = vmatpush1.bf16.msra.mxu1 %v6636_v44 }
 0x2da   : > { %4834 = vmatprep.subr.bf16.mxu0 %v6641_v57  ;;  %4916 = vmatprep.subr.bf16.mxu1 %v6644_v59 }
 0x2dd   : > { %4835 = vmatpush1.bf16.msra.mxu0 %v6639_v63  ;;  %4917 = vmatpush1.bf16.msra.mxu1 %v6642_v0  ;;  %v5230_v0 = vcombine.low %v5222_v11, %v5229_v12 }
 0x2de   : > { %4836 = vmatprep.subr.bf16.mxu0 %v6647_v1  ;;  %4918 = vmatprep.subr.bf16.mxu1 %v6650_v2 }
 0x2e1   : > { %4837 = vmatpush1.bf16.msra.mxu0 %v6645_v3  ;;  %4919 = vmatpush1.bf16.msra.mxu1 %v6648_v4  ;;  %v5079_v3 = vld [vmem:[%s8099_s9 + $0x10] sm:$0xf] }
 0x2e2   : > { %4838 = vmatprep.subr.bf16.mxu0 %v6653_v5  ;;  %4920 = vmatprep.subr.bf16.mxu1 %v6656_v6  ;;  %v5150_v4 = vrot.slane %v5079_v3, %v8103_v56  ;;  %v5154_v5 = vrot.slane %v5079_v3, %v8106_v58  ;;  %v5158_v6 = vrot.slane %v5079_v3, %v8113_v61 }
 0x2e5   : > { %4839 = vmatpush1.bf16.msra.mxu0 %v6651_v7  ;;  %4921 = vmatpush1.bf16.msra.mxu1 %v6654_v8  ;;  %v5162_v7 = vrot.slane %v5079_v3, %v8116_v62  ;;  %v5231_v8 = vcombine.low %v5150_v4, %v5154_v5 }
 0x2e6   : > { %4840 = vmatprep.subr.bf16.mxu0 %v6659_v9  ;;  %4922 = vmatprep.subr.bf16.mxu1 %v6662_v10 }
 0x2e7   : > { %v5232_v9 = vcombine.low %v5158_v6, %v5162_v7  ;;  %v5239_v36 = vrot.slane %v5231_v8, %v7747_v40 }
 0x2e9   : > { %4841 = vmatpush1.bf16.msra.mxu0 %v6657_v13  ;;  %4923 = vmatpush1.bf16.msra.mxu1 %v6660_v53  ;;  %v5246_v20 = vrot.slane %v5232_v9, %v7747_v40 }
 0x2ec   : > { %4859 = vmatmul.mubr.bf16.vlgmr.msra.gmra.mrb[16].mxu0 %v7866_v19  ;;  %4941 = vmatmul.mubr.bf16.vlgmr.msra.gmra.mrb[16].mxu1 %v7866_v19  ;;  %v5205_v19 = vrot.slane %v5197_v21, %v7747_v40 }
 0x2ee   : > { %v5213_v38 = vcombine.low %v5205_v19, %v5212_v29 }
 0x2ff   : > { %v4532_v23 = vpop.f32.mrb[8].mxu0  ;;  %v4614_v24 = vpop.f32.mrb[8].mxu1 }
 0x300   : > { %v4534_v25 = vpop.f32.mrb[9].mxu0  ;;  %v4616_v26 = vpop.f32.mrb[9].mxu1 }
 0x301   : > { %v5003_v27 = vcombine.low %v4532_v23, %v4534_v25  ;;  %v5004_v28 = vcombine.low %v4614_v24, %v4616_v26  ;;  %v4536_v30 = vpop.f32.mrb[10].mxu0  ;;  %v4618_v31 = vpop.f32.mrb[10].mxu1  ;;  %v5247_v24 = vcombine.low %v5239_v36, %v5246_v20 }
 0x302   : > { %v4537_v32 = vpop.f32.mrb[11].mxu0  ;;  %v4619_v33 = vpop.f32.mrb[11].mxu1 }
 0x303   : > { %v5011_v34 = vrot.slane %v5003_v27, %v7747_v40  ;;  %v5018_v60 = vrot.slane %v5004_v28, %v7747_v40 }
 0x305   : > { %v5019_v37 = vcombine.low %v5011_v34, %v5018_v60 }
 0x307   : > { %v5255_v39 = vadd.f32 %v5213_v38, %v5019_v37 }
 0x309   : > { %v5260_v41 = vmax.f32 %v5255_v39, 0.0 }
 0x30b   : > { %5265 = vst [vmem:[%s8154_s14 + $0x10] sm:$0xff] %v5260_v41 }
 0x35f   : > { %v4696_v49 = vpop.f32.mrb[12].mxu0  ;;  %v4778_v50 = vpop.f32.mrb[12].mxu1 }
 0x360   : > { %v4698_v51 = vpop.f32.mrb[13].mxu0  ;;  %v4780_v52 = vpop.f32.mrb[13].mxu1 }
 0x361   : > { %v5020_v54 = vcombine.low %v4696_v49, %v4698_v51  ;;  %v5021_v55 = vcombine.low %v4778_v50, %v4780_v52  ;;  %v4700_v44 = vpop.f32.mrb[14].mxu0  ;;  %v4782_v57 = vpop.f32.mrb[14].mxu1 }
 0x362   : > { %v4701_v14 = vpop.f32.mrb[15].mxu0  ;;  %v4783_v59 = vpop.f32.mrb[15].mxu1 }
 0x363   : > { %v5028_v35 = vrot.slane %v5020_v54, %v7747_v40  ;;  %v5035_v15 = vrot.slane %v5021_v55, %v7747_v40 }
 0x365   : > { %v5036_v63 = vcombine.low %v5028_v35, %v5035_v15 }
 0x367   : > { %v5256_v1 = vadd.f32 %v5230_v0, %v5036_v63 }
 0x369   : > { %v5261_v2 = vmax.f32 %v5256_v1, 0.0 }
 0x36b   : > { %5266 = vst [vmem:[%s8154_s14 + $0x18] sm:$0xff] %v5261_v2 }
 0x3bf   : > { %v4860_v10 = vpop.f32.mrb[16].mxu0  ;;  %v4942_v13 = vpop.f32.mrb[16].mxu1 }
 0x3c0   : > { %v4862_v53 = vpop.f32.mrb[17].mxu0  ;;  %v4944_v16 = vpop.f32.mrb[17].mxu1 }
 0x3c1   : > { %v5037_v17 = vcombine.low %v4860_v10, %v4862_v53  ;;  %v5038_v18 = vcombine.low %v4942_v13, %v4944_v16  ;;  %v4864_v56 = vpop.f32.mrb[18].mxu0  ;;  %v4946_v21 = vpop.f32.mrb[18].mxu1 }
 0x3c2   : > { %v4865_v58 = vpop.f32.mrb[19].mxu0  ;;  %v4947_v22 = vpop.f32.mrb[19].mxu1 }
 0x3c3   : > { %v5045_v61 = vrot.slane %v5037_v17, %v7747_v40  ;;  %v5052_v62 = vrot.slane %v5038_v18, %v7747_v40 }
 0x3c5   : > { %v5053_v23 = vcombine.low %v5045_v61, %v5052_v62 }
 0x3c7   : > { %v5257_v25 = vadd.f32 %v5247_v24, %v5053_v23 }
 0x3c9   : > { %v5262_v26 = vmax.f32 %v5257_v25, 0.0 }
 0x3cb   : > { %5267 = vst [vmem:[%s8154_s14 + $0x20] sm:$0xff] %v5262_v26 }
 0x3cc PF: > { %s13_s16 = sadd.s32 1, %s6701_s16   ;;  %s8400_s12 = smov %s6689_s13 }
 0x3cd   : > { %p10_p10 = scmp.ge.s32.totalorder %s13_s16, 4   ;;  %s8401_s13 = smov %s6760_s20 }
 0x3ce   : > { %s8402_s14 = smov %s6697_s15  ;;  %s8403_s15 = smov %s8405_s17 }
 0x3cf   :  { %12 = sbr.rel (!%p10_p10) target bundleno = 3 (0x3), region = 104 }

</bundles_post_ra>
